<compile_context>
chip_gen: v6e
topology: v6e:2x2x1
jax: 0.10.0
libtpu: 0.0.40
codegen_flags: <defaults>
</compile_context>

<pallas_src>
import numpy as np

import jax
import jax.numpy as jnp
from jax.experimental import pallas as pl
from jax.experimental.pallas import tpu as pltpu


# ---------------------------------------------------------------------------
# Fused kernel: 3x (conv4x4/s2/p1 -> InstanceNorm -> ReLU) + folded final conv
# ---------------------------------------------------------------------------
def _fused_disc_kernel(x_ref, g1_ref, w1_ref, g2_ref, w2_ref, g3_ref, w3_ref,
                       w4_ref, out_ref, *, eps=1e-5):
    """One batch sample end to end; everything stays in VMEM / vregs.

    x_ref  : (1, H*W, 3)            channels-last input sample
    gN_ref : (16, HWout_N, HWin_N)  0/1 shift ("im2col") matrices, layer N
    wN_ref : (16, Cin_N, Cout_N)    per-kernel-offset weight matrices
    w4_ref : (HW3, 256)             layer-4 weights folded onto layer-3 grid
    out_ref: (1, 1, 1)              final 1x1 patch score
    """

    def conv_in_relu(act, g_ref, w_ref):
        hw_out = g_ref.shape[1]
        cout = w_ref.shape[2]
        # conv(4x4, s=2, p=1, no bias) as 16 offset terms: all MXU work with
        # an f32 accumulator.  Operands kept f32 for accuracy vs the 1e-3
        # reference check (and v5e has no bf16 VPU/EUP path); on v6e/v7x a
        # bf16 cast of `shifted` / `w_ref[k]` would double MXU rate.
        acc = jnp.zeros((hw_out, cout), jnp.float32)
        for k in range(16):
            shifted = jnp.dot(g_ref[k], act,
                              preferred_element_type=jnp.float32)
            acc = acc + jnp.dot(shifted, w_ref[k],
                                preferred_element_type=jnp.float32)
        # InstanceNorm2d (affine=False, biased variance) over the spatial dim,
        # then ReLU -- all f32 on the VPU.
        mean = jnp.mean(acc, axis=0, keepdims=True)
        var = jnp.mean((acc - mean) * (acc - mean), axis=0, keepdims=True)
        return jnp.maximum((acc - mean) * jax.lax.rsqrt(var + eps), 0.0)

    act = x_ref[0].astype(jnp.float32)            # [256,   3]
    act = conv_in_relu(act, g1_ref, w1_ref)       # [ 64,  64]
    act = conv_in_relu(act, g2_ref, w2_ref)       # [ 16, 128]
    act = conv_in_relu(act, g3_ref, w3_ref)       # [  4, 256]

    # Layer 4 (256 -> 1, 1x1 output) folded into the epilogue: VPU mul+reduce
    # (no 1-lane matmul, no extra kernel launch, no HBM round-trip).
    prod = act * w4_ref[...]
    y = jnp.sum(prod, axis=1, keepdims=True)      # lane reduce    -> [HW3, 1]
    y = jnp.sum(y, axis=0, keepdims=True)         # sublane reduce -> [1, 1]
    out_ref[0] = y.astype(out_ref.dtype)


# ---------------------------------------------------------------------------
# Host-side (one-time) preparation of kernel constants
# ---------------------------------------------------------------------------
def _shift_matrices(h, w):
    """0/1 gather matrices implementing im2col for conv(4x4, s=2, p=1)."""
    ho, wo = h // 2, w // 2
    g = np.zeros((16, ho * wo, h * w), np.float32)
    for kh in range(4):
        for kw in range(4):
            k = 4 * kh + kw
            for oh in range(ho):
                ih = 2 * oh - 1 + kh
                if not 0 <= ih < h:
                    continue                      # zero padding row
                for ow in range(wo):
                    iw = 2 * ow - 1 + kw
                    if 0 <= iw < w:
                        g[k, oh * wo + ow, ih * w + iw] = 1.0
    return g


def _stack_weight(wt):
    """[Cout, Cin, 4, 4] torch layout -> [16, Cin, Cout] per-offset matrices."""
    cout, cin = wt.shape[0], wt.shape[1]
    return jnp.transpose(wt, (2, 3, 1, 0)).reshape(16, cin, cout)


def init_params(key):
    ks = jax.random.split(key, 4)
    scale = 0.05
    return {
        "w1": scale * jax.random.normal(ks[0], (64, 3, 4, 4), jnp.float32),
        "w2": scale * jax.random.normal(ks[1], (128, 64, 4, 4), jnp.float32),
        "w3": scale * jax.random.normal(ks[2], (256, 128, 4, 4), jnp.float32),
        "w4": scale * jax.random.normal(ks[3], (1, 256, 4, 4), jnp.float32),
    }


def prepare_discriminator(params, h, w):
    """Precompute (once) the shift matrices and reshaped weights."""
    if (h, w) != (16, 16):
        # TODO(synk): for larger inputs keep layer 4 as a regular conv and tile
        # the spatial dim with a grid axis instead of dense shift matrices.
        raise NotImplementedError("fused kernel is specialized to 16x16 input")
    g4 = _shift_matrices(2, 2)                                        # [16,1,4]
    w4k = jnp.transpose(params["w4"], (2, 3, 1, 0)).reshape(16, -1)   # [16,256]
    # Fold layer 4 onto layer 3's 2x2 output grid: w4fold[p, c].
    w4fold = jnp.einsum("kp,kc->pc", jnp.asarray(g4[:, 0, :]), w4k)   # [4, 256]
    return {
        "g1": jnp.asarray(_shift_matrices(16, 16)),   # [16,  64, 256]
        "w1": _stack_weight(params["w1"]),            # [16,   3,  64]
        "g2": jnp.asarray(_shift_matrices(8, 8)),     # [16,  16,  64]
        "w2": _stack_weight(params["w2"]),            # [16,  64, 128]
        "g3": jnp.asarray(_shift_matrices(4, 4)),     # [16,   4,  16]
        "w3": _stack_weight(params["w3"]),            # [16, 128, 256]
        "w4": w4fold,                                 # [ 4, 256]
    }


# ---------------------------------------------------------------------------
# Forward pass: one pallas_call for the whole network
# ---------------------------------------------------------------------------
def patch_discriminator(consts, x):
    n, c, h, w = x.shape
    x_cl = x.reshape(n, c, h * w).transpose(0, 2, 1)        # [N, HW, C]

    def const_spec(a):
        nd = a.ndim
        return pl.BlockSpec(a.shape, lambda b: (0,) * nd)   # VMEM-resident

    const_args = [consts["g1"], consts["w1"], consts["g2"], consts["w2"],
                  consts["g3"], consts["w3"], consts["w4"]]

    out = pl.pallas_call(
        _fused_disc_kernel,
        out_shape=jax.ShapeDtypeStruct((n, 1, 1), jnp.float32),
        grid=(n,),
        in_specs=[pl.BlockSpec((1, h * w, c), lambda b: (b, 0, 0))]
                 + [const_spec(a) for a in const_args],
        out_specs=pl.BlockSpec((1, 1, 1), lambda b: (b, 0, 0)),
        compiler_params=pltpu.CompilerParams(
            dimension_semantics=("parallel",)),  # one sample per TC on v7x
    )(x_cl, *const_args)

    return out.reshape(n, 1, 1, 1)               # NCHW [N, 1, 1, 1]


# ---------------------------------------------------------------------------
# Pure-JAX reference (for correctness check)
# ---------------------------------------------------------------------------
def _ref_conv(x, w, stride=2, pad=1):
    return jax.lax.conv_general_dilated(
        x, w, window_strides=(stride, stride),
        padding=((pad, pad), (pad, pad)),
        dimension_numbers=("NCHW", "OIHW", "NCHW"),
        precision=jax.lax.Precision.HIGHEST)


def _ref_instance_norm(x, eps=1e-5):
    mean = jnp.mean(x, axis=(2, 3), keepdims=True)
    var = jnp.mean((x - mean) ** 2, axis=(2, 3), keepdims=True)
    return (x - mean) * jax.lax.rsqrt(var + eps)


def patch_discriminator_ref(params, x):
    x = jnp.maximum(_ref_instance_norm(_ref_conv(x, params["w1"])), 0.0)
    x = jnp.maximum(_ref_instance_norm(_ref_conv(x, params["w2"])), 0.0)
    x = jnp.maximum(_ref_instance_norm(_ref_conv(x, params["w3"])), 0.0)
    return _ref_conv(x, params["w4"])


if __name__ == "__main__":
    key = jax.random.PRNGKey(0)
    pkey, xkey = jax.random.split(key)
    params = init_params(pkey)

    # Input: batch=2, 3 channels (RGB), 16x16 spatial.
    x = jax.random.normal(xkey, (2, 3, 16, 16), jnp.float32)

    consts = prepare_discriminator(params, 16, 16)
    fwd = jax.jit(patch_discriminator)
    out = jax.block_until_ready(fwd(consts, x))
    ref = jax.block_until_ready(patch_discriminator_ref(params, x))

    assert out.shape == (2, 1, 1, 1), out.shape
    err = jnp.max(jnp.abs(out - ref))
    assert jnp.allclose(out, ref, rtol=2e-3, atol=2e-3), f"max abs err {err}"

    print("KERNEL_OK")
</pallas_src>

<mosaic_0001>
module attributes {stable_mosaic.version = 11 : i64} {
  func.func @_fused_disc_kernel(%arg0: i32, %arg1: memref<1x256x3xf32, #tpu.memory_space<vmem>>, %arg2: memref<16x64x256xf32, #tpu.memory_space<vmem>>, %arg3: memref<16x3x64xf32, #tpu.memory_space<vmem>>, %arg4: memref<16x16x64xf32, #tpu.memory_space<vmem>>, %arg5: memref<16x64x128xf32, #tpu.memory_space<vmem>>, %arg6: memref<16x4x16xf32, #tpu.memory_space<vmem>>, %arg7: memref<16x128x256xf32, #tpu.memory_space<vmem>>, %arg8: memref<4x256xf32, #tpu.memory_space<vmem>>, %arg9: memref<1x1x1xf32, #tpu.memory_space<vmem>>) attributes {dimension_semantics = [#tpu.dimension_semantics<parallel>], iteration_bounds = array<i64: 2>, scalar_prefetch = 0 : i64, scratch_operands = 0 : i64, tpu.core_type = #tpu.core_type<tc>, window_params = [{transform_indices = @transform_0, window_bounds = array<i64: 1, 256, 3>}, {pipeline_mode = #tpu.pipeline_mode<synchronous>, transform_indices = @transform_1, window_bounds = array<i64: 16, 64, 256>}, {pipeline_mode = #tpu.pipeline_mode<synchronous>, transform_indices = @transform_2, window_bounds = array<i64: 16, 3, 64>}, {pipeline_mode = #tpu.pipeline_mode<synchronous>, transform_indices = @transform_3, window_bounds = array<i64: 16, 16, 64>}, {pipeline_mode = #tpu.pipeline_mode<synchronous>, transform_indices = @transform_4, window_bounds = array<i64: 16, 64, 128>}, {pipeline_mode = #tpu.pipeline_mode<synchronous>, transform_indices = @transform_5, window_bounds = array<i64: 16, 4, 16>}, {pipeline_mode = #tpu.pipeline_mode<synchronous>, transform_indices = @transform_6, window_bounds = array<i64: 16, 128, 256>}, {pipeline_mode = #tpu.pipeline_mode<synchronous>, transform_indices = @transform_7, window_bounds = array<i64: 4, 256>}, {transform_indices = @transform_8, window_bounds = array<i64: 1, 1, 1>}]} {
    %c0 = arith.constant 0 : index
    %c0_0 = arith.constant 0 : index
    %c0_1 = arith.constant 0 : index
    %0 = vector.load %arg1[%c0, %c0_0, %c0_1] : memref<1x256x3xf32, #tpu.memory_space<vmem>>, vector<1x256x3xf32>
    %1 = vector.shape_cast %0 : vector<1x256x3xf32> to vector<256x3xf32>
    %cst = arith.constant 0.000000e+00 : f32
    %2 = vector.broadcast %cst : f32 to vector<64x64xf32>
    %c0_2 = arith.constant 0 : index
    %c0_3 = arith.constant 0 : index
    %c0_4 = arith.constant 0 : index
    %3 = vector.load %arg2[%c0_2, %c0_3, %c0_4] : memref<16x64x256xf32, #tpu.memory_space<vmem>>, vector<1x64x256xf32>
    %4 = vector.shape_cast %3 : vector<1x64x256xf32> to vector<64x256xf32>
    %cst_5 = arith.constant dense<0.000000e+00> : vector<64x3xf32>
    %5 = tpu.matmul %4, %1, %cst_5 {dimension_numbers = #tpu.dot_dimension_numbers<[1], [0], [0], [1], [0, 0, 1, 1], [], []>} : vector<64x256xf32>, vector<256x3xf32>, vector<64x3xf32> -> vector<64x3xf32>
    %c0_6 = arith.constant 0 : index
    %c0_7 = arith.constant 0 : index
    %c0_8 = arith.constant 0 : index
    %6 = vector.load %arg3[%c0_6, %c0_7, %c0_8] : memref<16x3x64xf32, #tpu.memory_space<vmem>>, vector<1x3x64xf32>
    %7 = vector.shape_cast %6 : vector<1x3x64xf32> to vector<3x64xf32>
    %cst_9 = arith.constant dense<0.000000e+00> : vector<64x64xf32>
    %8 = tpu.matmul %5, %7, %cst_9 {dimension_numbers = #tpu.dot_dimension_numbers<[1], [0], [0], [1], [0, 0, 1, 1], [], []>} : vector<64x3xf32>, vector<3x64xf32>, vector<64x64xf32> -> vector<64x64xf32>
    %9 = arith.addf %2, %8 : vector<64x64xf32>
    %c1 = arith.constant 1 : index
    %c0_10 = arith.constant 0 : index
    %c0_11 = arith.constant 0 : index
    %10 = vector.load %arg2[%c1, %c0_10, %c0_11] : memref<16x64x256xf32, #tpu.memory_space<vmem>>, vector<1x64x256xf32>
    %11 = vector.shape_cast %10 : vector<1x64x256xf32> to vector<64x256xf32>
    %cst_12 = arith.constant dense<0.000000e+00> : vector<64x3xf32>
    %12 = tpu.matmul %11, %1, %cst_12 {dimension_numbers = #tpu.dot_dimension_numbers<[1], [0], [0], [1], [0, 0, 1, 1], [], []>} : vector<64x256xf32>, vector<256x3xf32>, vector<64x3xf32> -> vector<64x3xf32>
    %c1_13 = arith.constant 1 : index
    %c0_14 = arith.constant 0 : index
    %c0_15 = arith.constant 0 : index
    %13 = vector.load %arg3[%c1_13, %c0_14, %c0_15] : memref<16x3x64xf32, #tpu.memory_space<vmem>>, vector<1x3x64xf32>
    %14 = vector.shape_cast %13 : vector<1x3x64xf32> to vector<3x64xf32>
    %cst_16 = arith.constant dense<0.000000e+00> : vector<64x64xf32>
    %15 = tpu.matmul %12, %14, %cst_16 {dimension_numbers = #tpu.dot_dimension_numbers<[1], [0], [0], [1], [0, 0, 1, 1], [], []>} : vector<64x3xf32>, vector<3x64xf32>, vector<64x64xf32> -> vector<64x64xf32>
    %16 = arith.addf %9, %15 : vector<64x64xf32>
    %c2 = arith.constant 2 : index
    %c0_17 = arith.constant 0 : index
    %c0_18 = arith.constant 0 : index
    %17 = vector.load %arg2[%c2, %c0_17, %c0_18] : memref<16x64x256xf32, #tpu.memory_space<vmem>>, vector<1x64x256xf32>
    %18 = vector.shape_cast %17 : vector<1x64x256xf32> to vector<64x256xf32>
    %cst_19 = arith.constant dense<0.000000e+00> : vector<64x3xf32>
    %19 = tpu.matmul %18, %1, %cst_19 {dimension_numbers = #tpu.dot_dimension_numbers<[1], [0], [0], [1], [0, 0, 1, 1], [], []>} : vector<64x256xf32>, vector<256x3xf32>, vector<64x3xf32> -> vector<64x3xf32>
    %c2_20 = arith.constant 2 : index
    %c0_21 = arith.constant 0 : index
    %c0_22 = arith.constant 0 : index
    %20 = vector.load %arg3[%c2_20, %c0_21, %c0_22] : memref<16x3x64xf32, #tpu.memory_space<vmem>>, vector<1x3x64xf32>
    %21 = vector.shape_cast %20 : vector<1x3x64xf32> to vector<3x64xf32>
    %cst_23 = arith.constant dense<0.000000e+00> : vector<64x64xf32>
    %22 = tpu.matmul %19, %21, %cst_23 {dimension_numbers = #tpu.dot_dimension_numbers<[1], [0], [0], [1], [0, 0, 1, 1], [], []>} : vector<64x3xf32>, vector<3x64xf32>, vector<64x64xf32> -> vector<64x64xf32>
    %23 = arith.addf %16, %22 : vector<64x64xf32>
    %c3 = arith.constant 3 : index
    %c0_24 = arith.constant 0 : index
    %c0_25 = arith.constant 0 : index
    %24 = vector.load %arg2[%c3, %c0_24, %c0_25] : memref<16x64x256xf32, #tpu.memory_space<vmem>>, vector<1x64x256xf32>
    %25 = vector.shape_cast %24 : vector<1x64x256xf32> to vector<64x256xf32>
    %cst_26 = arith.constant dense<0.000000e+00> : vector<64x3xf32>
    %26 = tpu.matmul %25, %1, %cst_26 {dimension_numbers = #tpu.dot_dimension_numbers<[1], [0], [0], [1], [0, 0, 1, 1], [], []>} : vector<64x256xf32>, vector<256x3xf32>, vector<64x3xf32> -> vector<64x3xf32>
    %c3_27 = arith.constant 3 : index
    %c0_28 = arith.constant 0 : index
    %c0_29 = arith.constant 0 : index
    %27 = vector.load %arg3[%c3_27, %c0_28, %c0_29] : memref<16x3x64xf32, #tpu.memory_space<vmem>>, vector<1x3x64xf32>
    %28 = vector.shape_cast %27 : vector<1x3x64xf32> to vector<3x64xf32>
    %cst_30 = arith.constant dense<0.000000e+00> : vector<64x64xf32>
    %29 = tpu.matmul %26, %28, %cst_30 {dimension_numbers = #tpu.dot_dimension_numbers<[1], [0], [0], [1], [0, 0, 1, 1], [], []>} : vector<64x3xf32>, vector<3x64xf32>, vector<64x64xf32> -> vector<64x64xf32>
    %30 = arith.addf %23, %29 : vector<64x64xf32>
    %c4 = arith.constant 4 : index
    %c0_31 = arith.constant 0 : index
    %c0_32 = arith.constant 0 : index
    %31 = vector.load %arg2[%c4, %c0_31, %c0_32] : memref<16x64x256xf32, #tpu.memory_space<vmem>>, vector<1x64x256xf32>
    %32 = vector.shape_cast %31 : vector<1x64x256xf32> to vector<64x256xf32>
    %cst_33 = arith.constant dense<0.000000e+00> : vector<64x3xf32>
    %33 = tpu.matmul %32, %1, %cst_33 {dimension_numbers = #tpu.dot_dimension_numbers<[1], [0], [0], [1], [0, 0, 1, 1], [], []>} : vector<64x256xf32>, vector<256x3xf32>, vector<64x3xf32> -> vector<64x3xf32>
    %c4_34 = arith.constant 4 : index
    %c0_35 = arith.constant 0 : index
    %c0_36 = arith.constant 0 : index
    %34 = vector.load %arg3[%c4_34, %c0_35, %c0_36] : memref<16x3x64xf32, #tpu.memory_space<vmem>>, vector<1x3x64xf32>
    %35 = vector.shape_cast %34 : vector<1x3x64xf32> to vector<3x64xf32>
    %cst_37 = arith.constant dense<0.000000e+00> : vector<64x64xf32>
    %36 = tpu.matmul %33, %35, %cst_37 {dimension_numbers = #tpu.dot_dimension_numbers<[1], [0], [0], [1], [0, 0, 1, 1], [], []>} : vector<64x3xf32>, vector<3x64xf32>, vector<64x64xf32> -> vector<64x64xf32>
    %37 = arith.addf %30, %36 : vector<64x64xf32>
    %c5 = arith.constant 5 : index
    %c0_38 = arith.constant 0 : index
    %c0_39 = arith.constant 0 : index
    %38 = vector.load %arg2[%c5, %c0_38, %c0_39] : memref<16x64x256xf32, #tpu.memory_space<vmem>>, vector<1x64x256xf32>
    %39 = vector.shape_cast %38 : vector<1x64x256xf32> to vector<64x256xf32>
    %cst_40 = arith.constant dense<0.000000e+00> : vector<64x3xf32>
    %40 = tpu.matmul %39, %1, %cst_40 {dimension_numbers = #tpu.dot_dimension_numbers<[1], [0], [0], [1], [0, 0, 1, 1], [], []>} : vector<64x256xf32>, vector<256x3xf32>, vector<64x3xf32> -> vector<64x3xf32>
    %c5_41 = arith.constant 5 : index
    %c0_42 = arith.constant 0 : index
    %c0_43 = arith.constant 0 : index
    %41 = vector.load %arg3[%c5_41, %c0_42, %c0_43] : memref<16x3x64xf32, #tpu.memory_space<vmem>>, vector<1x3x64xf32>
    %42 = vector.shape_cast %41 : vector<1x3x64xf32> to vector<3x64xf32>
    %cst_44 = arith.constant dense<0.000000e+00> : vector<64x64xf32>
    %43 = tpu.matmul %40, %42, %cst_44 {dimension_numbers = #tpu.dot_dimension_numbers<[1], [0], [0], [1], [0, 0, 1, 1], [], []>} : vector<64x3xf32>, vector<3x64xf32>, vector<64x64xf32> -> vector<64x64xf32>
    %44 = arith.addf %37, %43 : vector<64x64xf32>
    %c6 = arith.constant 6 : index
    %c0_45 = arith.constant 0 : index
    %c0_46 = arith.constant 0 : index
    %45 = vector.load %arg2[%c6, %c0_45, %c0_46] : memref<16x64x256xf32, #tpu.memory_space<vmem>>, vector<1x64x256xf32>
    %46 = vector.shape_cast %45 : vector<1x64x256xf32> to vector<64x256xf32>
    %cst_47 = arith.constant dense<0.000000e+00> : vector<64x3xf32>
    %47 = tpu.matmul %46, %1, %cst_47 {dimension_numbers = #tpu.dot_dimension_numbers<[1], [0], [0], [1], [0, 0, 1, 1], [], []>} : vector<64x256xf32>, vector<256x3xf32>, vector<64x3xf32> -> vector<64x3xf32>
    %c6_48 = arith.constant 6 : index
    %c0_49 = arith.constant 0 : index
    %c0_50 = arith.constant 0 : index
    %48 = vector.load %arg3[%c6_48, %c0_49, %c0_50] : memref<16x3x64xf32, #tpu.memory_space<vmem>>, vector<1x3x64xf32>
    %49 = vector.shape_cast %48 : vector<1x3x64xf32> to vector<3x64xf32>
    %cst_51 = arith.constant dense<0.000000e+00> : vector<64x64xf32>
    %50 = tpu.matmul %47, %49, %cst_51 {dimension_numbers = #tpu.dot_dimension_numbers<[1], [0], [0], [1], [0, 0, 1, 1], [], []>} : vector<64x3xf32>, vector<3x64xf32>, vector<64x64xf32> -> vector<64x64xf32>
    %51 = arith.addf %44, %50 : vector<64x64xf32>
    %c7 = arith.constant 7 : index
    %c0_52 = arith.constant 0 : index
    %c0_53 = arith.constant 0 : index
    %52 = vector.load %arg2[%c7, %c0_52, %c0_53] : memref<16x64x256xf32, #tpu.memory_space<vmem>>, vector<1x64x256xf32>
    %53 = vector.shape_cast %52 : vector<1x64x256xf32> to vector<64x256xf32>
    %cst_54 = arith.constant dense<0.000000e+00> : vector<64x3xf32>
    %54 = tpu.matmul %53, %1, %cst_54 {dimension_numbers = #tpu.dot_dimension_numbers<[1], [0], [0], [1], [0, 0, 1, 1], [], []>} : vector<64x256xf32>, vector<256x3xf32>, vector<64x3xf32> -> vector<64x3xf32>
    %c7_55 = arith.constant 7 : index
    %c0_56 = arith.constant 0 : index
    %c0_57 = arith.constant 0 : index
    %55 = vector.load %arg3[%c7_55, %c0_56, %c0_57] : memref<16x3x64xf32, #tpu.memory_space<vmem>>, vector<1x3x64xf32>
    %56 = vector.shape_cast %55 : vector<1x3x64xf32> to vector<3x64xf32>
    %cst_58 = arith.constant dense<0.000000e+00> : vector<64x64xf32>
    %57 = tpu.matmul %54, %56, %cst_58 {dimension_numbers = #tpu.dot_dimension_numbers<[1], [0], [0], [1], [0, 0, 1, 1], [], []>} : vector<64x3xf32>, vector<3x64xf32>, vector<64x64xf32> -> vector<64x64xf32>
    %58 = arith.addf %51, %57 : vector<64x64xf32>
    %c8 = arith.constant 8 : index
    %c0_59 = arith.constant 0 : index
    %c0_60 = arith.constant 0 : index
    %59 = vector.load %arg2[%c8, %c0_59, %c0_60] : memref<16x64x256xf32, #tpu.memory_space<vmem>>, vector<1x64x256xf32>
    %60 = vector.shape_cast %59 : vector<1x64x256xf32> to vector<64x256xf32>
    %cst_61 = arith.constant dense<0.000000e+00> : vector<64x3xf32>
    %61 = tpu.matmul %60, %1, %cst_61 {dimension_numbers = #tpu.dot_dimension_numbers<[1], [0], [0], [1], [0, 0, 1, 1], [], []>} : vector<64x256xf32>, vector<256x3xf32>, vector<64x3xf32> -> vector<64x3xf32>
    %c8_62 = arith.constant 8 : index
    %c0_63 = arith.constant 0 : index
    %c0_64 = arith.constant 0 : index
    %62 = vector.load %arg3[%c8_62, %c0_63, %c0_64] : memref<16x3x64xf32, #tpu.memory_space<vmem>>, vector<1x3x64xf32>
    %63 = vector.shape_cast %62 : vector<1x3x64xf32> to vector<3x64xf32>
    %cst_65 = arith.constant dense<0.000000e+00> : vector<64x64xf32>
    %64 = tpu.matmul %61, %63, %cst_65 {dimension_numbers = #tpu.dot_dimension_numbers<[1], [0], [0], [1], [0, 0, 1, 1], [], []>} : vector<64x3xf32>, vector<3x64xf32>, vector<64x64xf32> -> vector<64x64xf32>
    %65 = arith.addf %58, %64 : vector<64x64xf32>
    %c9 = arith.constant 9 : index
    %c0_66 = arith.constant 0 : index
    %c0_67 = arith.constant 0 : index
    %66 = vector.load %arg2[%c9, %c0_66, %c0_67] : memref<16x64x256xf32, #tpu.memory_space<vmem>>, vector<1x64x256xf32>
    %67 = vector.shape_cast %66 : vector<1x64x256xf32> to vector<64x256xf32>
    %cst_68 = arith.constant dense<0.000000e+00> : vector<64x3xf32>
    %68 = tpu.matmul %67, %1, %cst_68 {dimension_numbers = #tpu.dot_dimension_numbers<[1], [0], [0], [1], [0, 0, 1, 1], [], []>} : vector<64x256xf32>, vector<256x3xf32>, vector<64x3xf32> -> vector<64x3xf32>
    %c9_69 = arith.constant 9 : index
    %c0_70 = arith.constant 0 : index
    %c0_71 = arith.constant 0 : index
    %69 = vector.load %arg3[%c9_69, %c0_70, %c0_71] : memref<16x3x64xf32, #tpu.memory_space<vmem>>, vector<1x3x64xf32>
    %70 = vector.shape_cast %69 : vector<1x3x64xf32> to vector<3x64xf32>
    %cst_72 = arith.constant dense<0.000000e+00> : vector<64x64xf32>
    %71 = tpu.matmul %68, %70, %cst_72 {dimension_numbers = #tpu.dot_dimension_numbers<[1], [0], [0], [1], [0, 0, 1, 1], [], []>} : vector<64x3xf32>, vector<3x64xf32>, vector<64x64xf32> -> vector<64x64xf32>
    %72 = arith.addf %65, %71 : vector<64x64xf32>
    %c10 = arith.constant 10 : index
    %c0_73 = arith.constant 0 : index
    %c0_74 = arith.constant 0 : index
    %73 = vector.load %arg2[%c10, %c0_73, %c0_74] : memref<16x64x256xf32, #tpu.memory_space<vmem>>, vector<1x64x256xf32>
    %74 = vector.shape_cast %73 : vector<1x64x256xf32> to vector<64x256xf32>
    %cst_75 = arith.constant dense<0.000000e+00> : vector<64x3xf32>
    %75 = tpu.matmul %74, %1, %cst_75 {dimension_numbers = #tpu.dot_dimension_numbers<[1], [0], [0], [1], [0, 0, 1, 1], [], []>} : vector<64x256xf32>, vector<256x3xf32>, vector<64x3xf32> -> vector<64x3xf32>
    %c10_76 = arith.constant 10 : index
    %c0_77 = arith.constant 0 : index
    %c0_78 = arith.constant 0 : index
    %76 = vector.load %arg3[%c10_76, %c0_77, %c0_78] : memref<16x3x64xf32, #tpu.memory_space<vmem>>, vector<1x3x64xf32>
    %77 = vector.shape_cast %76 : vector<1x3x64xf32> to vector<3x64xf32>
    %cst_79 = arith.constant dense<0.000000e+00> : vector<64x64xf32>
    %78 = tpu.matmul %75, %77, %cst_79 {dimension_numbers = #tpu.dot_dimension_numbers<[1], [0], [0], [1], [0, 0, 1, 1], [], []>} : vector<64x3xf32>, vector<3x64xf32>, vector<64x64xf32> -> vector<64x64xf32>
    %79 = arith.addf %72, %78 : vector<64x64xf32>
    %c11 = arith.constant 11 : index
    %c0_80 = arith.constant 0 : index
    %c0_81 = arith.constant 0 : index
    %80 = vector.load %arg2[%c11, %c0_80, %c0_81] : memref<16x64x256xf32, #tpu.memory_space<vmem>>, vector<1x64x256xf32>
    %81 = vector.shape_cast %80 : vector<1x64x256xf32> to vector<64x256xf32>
    %cst_82 = arith.constant dense<0.000000e+00> : vector<64x3xf32>
    %82 = tpu.matmul %81, %1, %cst_82 {dimension_numbers = #tpu.dot_dimension_numbers<[1], [0], [0], [1], [0, 0, 1, 1], [], []>} : vector<64x256xf32>, vector<256x3xf32>, vector<64x3xf32> -> vector<64x3xf32>
    %c11_83 = arith.constant 11 : index
    %c0_84 = arith.constant 0 : index
    %c0_85 = arith.constant 0 : index
    %83 = vector.load %arg3[%c11_83, %c0_84, %c0_85] : memref<16x3x64xf32, #tpu.memory_space<vmem>>, vector<1x3x64xf32>
    %84 = vector.shape_cast %83 : vector<1x3x64xf32> to vector<3x64xf32>
    %cst_86 = arith.constant dense<0.000000e+00> : vector<64x64xf32>
    %85 = tpu.matmul %82, %84, %cst_86 {dimension_numbers = #tpu.dot_dimension_numbers<[1], [0], [0], [1], [0, 0, 1, 1], [], []>} : vector<64x3xf32>, vector<3x64xf32>, vector<64x64xf32> -> vector<64x64xf32>
    %86 = arith.addf %79, %85 : vector<64x64xf32>
    %c12 = arith.constant 12 : index
    %c0_87 = arith.constant 0 : index
    %c0_88 = arith.constant 0 : index
    %87 = vector.load %arg2[%c12, %c0_87, %c0_88] : memref<16x64x256xf32, #tpu.memory_space<vmem>>, vector<1x64x256xf32>
    %88 = vector.shape_cast %87 : vector<1x64x256xf32> to vector<64x256xf32>
    %cst_89 = arith.constant dense<0.000000e+00> : vector<64x3xf32>
    %89 = tpu.matmul %88, %1, %cst_89 {dimension_numbers = #tpu.dot_dimension_numbers<[1], [0], [0], [1], [0, 0, 1, 1], [], []>} : vector<64x256xf32>, vector<256x3xf32>, vector<64x3xf32> -> vector<64x3xf32>
    %c12_90 = arith.constant 12 : index
    %c0_91 = arith.constant 0 : index
    %c0_92 = arith.constant 0 : index
    %90 = vector.load %arg3[%c12_90, %c0_91, %c0_92] : memref<16x3x64xf32, #tpu.memory_space<vmem>>, vector<1x3x64xf32>
    %91 = vector.shape_cast %90 : vector<1x3x64xf32> to vector<3x64xf32>
    %cst_93 = arith.constant dense<0.000000e+00> : vector<64x64xf32>
    %92 = tpu.matmul %89, %91, %cst_93 {dimension_numbers = #tpu.dot_dimension_numbers<[1], [0], [0], [1], [0, 0, 1, 1], [], []>} : vector<64x3xf32>, vector<3x64xf32>, vector<64x64xf32> -> vector<64x64xf32>
    %93 = arith.addf %86, %92 : vector<64x64xf32>
    %c13 = arith.constant 13 : index
    %c0_94 = arith.constant 0 : index
    %c0_95 = arith.constant 0 : index
    %94 = vector.load %arg2[%c13, %c0_94, %c0_95] : memref<16x64x256xf32, #tpu.memory_space<vmem>>, vector<1x64x256xf32>
    %95 = vector.shape_cast %94 : vector<1x64x256xf32> to vector<64x256xf32>
    %cst_96 = arith.constant dense<0.000000e+00> : vector<64x3xf32>
    %96 = tpu.matmul %95, %1, %cst_96 {dimension_numbers = #tpu.dot_dimension_numbers<[1], [0], [0], [1], [0, 0, 1, 1], [], []>} : vector<64x256xf32>, vector<256x3xf32>, vector<64x3xf32> -> vector<64x3xf32>
    %c13_97 = arith.constant 13 : index
    %c0_98 = arith.constant 0 : index
    %c0_99 = arith.constant 0 : index
    %97 = vector.load %arg3[%c13_97, %c0_98, %c0_99] : memref<16x3x64xf32, #tpu.memory_space<vmem>>, vector<1x3x64xf32>
    %98 = vector.shape_cast %97 : vector<1x3x64xf32> to vector<3x64xf32>
    %cst_100 = arith.constant dense<0.000000e+00> : vector<64x64xf32>
    %99 = tpu.matmul %96, %98, %cst_100 {dimension_numbers = #tpu.dot_dimension_numbers<[1], [0], [0], [1], [0, 0, 1, 1], [], []>} : vector<64x3xf32>, vector<3x64xf32>, vector<64x64xf32> -> vector<64x64xf32>
    %100 = arith.addf %93, %99 : vector<64x64xf32>
    %c14 = arith.constant 14 : index
    %c0_101 = arith.constant 0 : index
    %c0_102 = arith.constant 0 : index
    %101 = vector.load %arg2[%c14, %c0_101, %c0_102] : memref<16x64x256xf32, #tpu.memory_space<vmem>>, vector<1x64x256xf32>
    %102 = vector.shape_cast %101 : vector<1x64x256xf32> to vector<64x256xf32>
    %cst_103 = arith.constant dense<0.000000e+00> : vector<64x3xf32>
    %103 = tpu.matmul %102, %1, %cst_103 {dimension_numbers = #tpu.dot_dimension_numbers<[1], [0], [0], [1], [0, 0, 1, 1], [], []>} : vector<64x256xf32>, vector<256x3xf32>, vector<64x3xf32> -> vector<64x3xf32>
    %c14_104 = arith.constant 14 : index
    %c0_105 = arith.constant 0 : index
    %c0_106 = arith.constant 0 : index
    %104 = vector.load %arg3[%c14_104, %c0_105, %c0_106] : memref<16x3x64xf32, #tpu.memory_space<vmem>>, vector<1x3x64xf32>
    %105 = vector.shape_cast %104 : vector<1x3x64xf32> to vector<3x64xf32>
    %cst_107 = arith.constant dense<0.000000e+00> : vector<64x64xf32>
    %106 = tpu.matmul %103, %105, %cst_107 {dimension_numbers = #tpu.dot_dimension_numbers<[1], [0], [0], [1], [0, 0, 1, 1], [], []>} : vector<64x3xf32>, vector<3x64xf32>, vector<64x64xf32> -> vector<64x64xf32>
    %107 = arith.addf %100, %106 : vector<64x64xf32>
    %c15 = arith.constant 15 : index
    %c0_108 = arith.constant 0 : index
    %c0_109 = arith.constant 0 : index
    %108 = vector.load %arg2[%c15, %c0_108, %c0_109] : memref<16x64x256xf32, #tpu.memory_space<vmem>>, vector<1x64x256xf32>
    %109 = vector.shape_cast %108 : vector<1x64x256xf32> to vector<64x256xf32>
    %cst_110 = arith.constant dense<0.000000e+00> : vector<64x3xf32>
    %110 = tpu.matmul %109, %1, %cst_110 {dimension_numbers = #tpu.dot_dimension_numbers<[1], [0], [0], [1], [0, 0, 1, 1], [], []>} : vector<64x256xf32>, vector<256x3xf32>, vector<64x3xf32> -> vector<64x3xf32>
    %c15_111 = arith.constant 15 : index
    %c0_112 = arith.constant 0 : index
    %c0_113 = arith.constant 0 : index
    %111 = vector.load %arg3[%c15_111, %c0_112, %c0_113] : memref<16x3x64xf32, #tpu.memory_space<vmem>>, vector<1x3x64xf32>
    %112 = vector.shape_cast %111 : vector<1x3x64xf32> to vector<3x64xf32>
    %cst_114 = arith.constant dense<0.000000e+00> : vector<64x64xf32>
    %113 = tpu.matmul %110, %112, %cst_114 {dimension_numbers = #tpu.dot_dimension_numbers<[1], [0], [0], [1], [0, 0, 1, 1], [], []>} : vector<64x3xf32>, vector<3x64xf32>, vector<64x64xf32> -> vector<64x64xf32>
    %114 = arith.addf %107, %113 : vector<64x64xf32>
    %cst_115 = arith.constant dense<0.000000e+00> : vector<64xf32>
    %115 = vector.multi_reduction <add>, %114, %cst_115 [0] : vector<64x64xf32> to vector<64xf32>
    %116 = vector.shape_cast %115 : vector<64xf32> to vector<1x64xf32>
    %cst_116 = arith.constant 6.400000e+01 : f32
    %117 = vector.broadcast %cst_116 : f32 to vector<1x64xf32>
    %118 = arith.divf %116, %117 : vector<1x64xf32>
    %119 = vector.broadcast %118 : vector<1x64xf32> to vector<64x64xf32>
    %120 = arith.subf %114, %119 : vector<64x64xf32>
    %121 = vector.broadcast %118 : vector<1x64xf32> to vector<64x64xf32>
    %122 = arith.subf %114, %121 : vector<64x64xf32>
    %123 = arith.mulf %120, %122 : vector<64x64xf32>
    %cst_117 = arith.constant dense<0.000000e+00> : vector<64xf32>
    %124 = vector.multi_reduction <add>, %123, %cst_117 [0] : vector<64x64xf32> to vector<64xf32>
    %125 = vector.shape_cast %124 : vector<64xf32> to vector<1x64xf32>
    %cst_118 = arith.constant 6.400000e+01 : f32
    %126 = vector.broadcast %cst_118 : f32 to vector<1x64xf32>
    %127 = arith.divf %125, %126 : vector<1x64xf32>
    %128 = vector.broadcast %118 : vector<1x64xf32> to vector<64x64xf32>
    %129 = arith.subf %114, %128 : vector<64x64xf32>
    %cst_119 = arith.constant 9.99999974E-6 : f32
    %130 = vector.broadcast %cst_119 : f32 to vector<1x64xf32>
    %131 = arith.addf %127, %130 : vector<1x64xf32>
    %132 = math.rsqrt %131 : vector<1x64xf32>
    %133 = vector.broadcast %132 : vector<1x64xf32> to vector<64x64xf32>
    %134 = arith.mulf %129, %133 : vector<64x64xf32>
    %cst_120 = arith.constant 0.000000e+00 : f32
    %135 = vector.broadcast %cst_120 : f32 to vector<64x64xf32>
    %136 = arith.maximumf %134, %135 : vector<64x64xf32>
    %cst_121 = arith.constant 0.000000e+00 : f32
    %137 = vector.broadcast %cst_121 : f32 to vector<16x128xf32>
    %c0_122 = arith.constant 0 : index
    %c0_123 = arith.constant 0 : index
    %c0_124 = arith.constant 0 : index
    %138 = vector.load %arg4[%c0_122, %c0_123, %c0_124] : memref<16x16x64xf32, #tpu.memory_space<vmem>>, vector<1x16x64xf32>
    %139 = vector.shape_cast %138 : vector<1x16x64xf32> to vector<16x64xf32>
    %cst_125 = arith.constant dense<0.000000e+00> : vector<16x64xf32>
    %140 = tpu.matmul %139, %136, %cst_125 {dimension_numbers = #tpu.dot_dimension_numbers<[1], [0], [0], [1], [0, 0, 1, 1], [], []>} : vector<16x64xf32>, vector<64x64xf32>, vector<16x64xf32> -> vector<16x64xf32>
    %c0_126 = arith.constant 0 : index
    %c0_127 = arith.constant 0 : index
    %c0_128 = arith.constant 0 : index
    %141 = vector.load %arg5[%c0_126, %c0_127, %c0_128] : memref<16x64x128xf32, #tpu.memory_space<vmem>>, vector<1x64x128xf32>
    %142 = vector.shape_cast %141 : vector<1x64x128xf32> to vector<64x128xf32>
    %cst_129 = arith.constant dense<0.000000e+00> : vector<16x128xf32>
    %143 = tpu.matmul %140, %142, %cst_129 {dimension_numbers = #tpu.dot_dimension_numbers<[1], [0], [0], [1], [0, 0, 1, 1], [], []>} : vector<16x64xf32>, vector<64x128xf32>, vector<16x128xf32> -> vector<16x128xf32>
    %144 = arith.addf %137, %143 : vector<16x128xf32>
    %c1_130 = arith.constant 1 : index
    %c0_131 = arith.constant 0 : index
    %c0_132 = arith.constant 0 : index
    %145 = vector.load %arg4[%c1_130, %c0_131, %c0_132] : memref<16x16x64xf32, #tpu.memory_space<vmem>>, vector<1x16x64xf32>
    %146 = vector.shape_cast %145 : vector<1x16x64xf32> to vector<16x64xf32>
    %cst_133 = arith.constant dense<0.000000e+00> : vector<16x64xf32>
    %147 = tpu.matmul %146, %136, %cst_133 {dimension_numbers = #tpu.dot_dimension_numbers<[1], [0], [0], [1], [0, 0, 1, 1], [], []>} : vector<16x64xf32>, vector<64x64xf32>, vector<16x64xf32> -> vector<16x64xf32>
    %c1_134 = arith.constant 1 : index
    %c0_135 = arith.constant 0 : index
    %c0_136 = arith.constant 0 : index
    %148 = vector.load %arg5[%c1_134, %c0_135, %c0_136] : memref<16x64x128xf32, #tpu.memory_space<vmem>>, vector<1x64x128xf32>
    %149 = vector.shape_cast %148 : vector<1x64x128xf32> to vector<64x128xf32>
    %cst_137 = arith.constant dense<0.000000e+00> : vector<16x128xf32>
    %150 = tpu.matmul %147, %149, %cst_137 {dimension_numbers = #tpu.dot_dimension_numbers<[1], [0], [0], [1], [0, 0, 1, 1], [], []>} : vector<16x64xf32>, vector<64x128xf32>, vector<16x128xf32> -> vector<16x128xf32>
    %151 = arith.addf %144, %150 : vector<16x128xf32>
    %c2_138 = arith.constant 2 : index
    %c0_139 = arith.constant 0 : index
    %c0_140 = arith.constant 0 : index
    %152 = vector.load %arg4[%c2_138, %c0_139, %c0_140] : memref<16x16x64xf32, #tpu.memory_space<vmem>>, vector<1x16x64xf32>
    %153 = vector.shape_cast %152 : vector<1x16x64xf32> to vector<16x64xf32>
    %cst_141 = arith.constant dense<0.000000e+00> : vector<16x64xf32>
    %154 = tpu.matmul %153, %136, %cst_141 {dimension_numbers = #tpu.dot_dimension_numbers<[1], [0], [0], [1], [0, 0, 1, 1], [], []>} : vector<16x64xf32>, vector<64x64xf32>, vector<16x64xf32> -> vector<16x64xf32>
    %c2_142 = arith.constant 2 : index
    %c0_143 = arith.constant 0 : index
    %c0_144 = arith.constant 0 : index
    %155 = vector.load %arg5[%c2_142, %c0_143, %c0_144] : memref<16x64x128xf32, #tpu.memory_space<vmem>>, vector<1x64x128xf32>
    %156 = vector.shape_cast %155 : vector<1x64x128xf32> to vector<64x128xf32>
    %cst_145 = arith.constant dense<0.000000e+00> : vector<16x128xf32>
    %157 = tpu.matmul %154, %156, %cst_145 {dimension_numbers = #tpu.dot_dimension_numbers<[1], [0], [0], [1], [0, 0, 1, 1], [], []>} : vector<16x64xf32>, vector<64x128xf32>, vector<16x128xf32> -> vector<16x128xf32>
    %158 = arith.addf %151, %157 : vector<16x128xf32>
    %c3_146 = arith.constant 3 : index
    %c0_147 = arith.constant 0 : index
    %c0_148 = arith.constant 0 : index
    %159 = vector.load %arg4[%c3_146, %c0_147, %c0_148] : memref<16x16x64xf32, #tpu.memory_space<vmem>>, vector<1x16x64xf32>
    %160 = vector.shape_cast %159 : vector<1x16x64xf32> to vector<16x64xf32>
    %cst_149 = arith.constant dense<0.000000e+00> : vector<16x64xf32>
    %161 = tpu.matmul %160, %136, %cst_149 {dimension_numbers = #tpu.dot_dimension_numbers<[1], [0], [0], [1], [0, 0, 1, 1], [], []>} : vector<16x64xf32>, vector<64x64xf32>, vector<16x64xf32> -> vector<16x64xf32>
    %c3_150 = arith.constant 3 : index
    %c0_151 = arith.constant 0 : index
    %c0_152 = arith.constant 0 : index
    %162 = vector.load %arg5[%c3_150, %c0_151, %c0_152] : memref<16x64x128xf32, #tpu.memory_space<vmem>>, vector<1x64x128xf32>
    %163 = vector.shape_cast %162 : vector<1x64x128xf32> to vector<64x128xf32>
    %cst_153 = arith.constant dense<0.000000e+00> : vector<16x128xf32>
    %164 = tpu.matmul %161, %163, %cst_153 {dimension_numbers = #tpu.dot_dimension_numbers<[1], [0], [0], [1], [0, 0, 1, 1], [], []>} : vector<16x64xf32>, vector<64x128xf32>, vector<16x128xf32> -> vector<16x128xf32>
    %165 = arith.addf %158, %164 : vector<16x128xf32>
    %c4_154 = arith.constant 4 : index
    %c0_155 = arith.constant 0 : index
    %c0_156 = arith.constant 0 : index
    %166 = vector.load %arg4[%c4_154, %c0_155, %c0_156] : memref<16x16x64xf32, #tpu.memory_space<vmem>>, vector<1x16x64xf32>
    %167 = vector.shape_cast %166 : vector<1x16x64xf32> to vector<16x64xf32>
    %cst_157 = arith.constant dense<0.000000e+00> : vector<16x64xf32>
    %168 = tpu.matmul %167, %136, %cst_157 {dimension_numbers = #tpu.dot_dimension_numbers<[1], [0], [0], [1], [0, 0, 1, 1], [], []>} : vector<16x64xf32>, vector<64x64xf32>, vector<16x64xf32> -> vector<16x64xf32>
    %c4_158 = arith.constant 4 : index
    %c0_159 = arith.constant 0 : index
    %c0_160 = arith.constant 0 : index
    %169 = vector.load %arg5[%c4_158, %c0_159, %c0_160] : memref<16x64x128xf32, #tpu.memory_space<vmem>>, vector<1x64x128xf32>
    %170 = vector.shape_cast %169 : vector<1x64x128xf32> to vector<64x128xf32>
    %cst_161 = arith.constant dense<0.000000e+00> : vector<16x128xf32>
    %171 = tpu.matmul %168, %170, %cst_161 {dimension_numbers = #tpu.dot_dimension_numbers<[1], [0], [0], [1], [0, 0, 1, 1], [], []>} : vector<16x64xf32>, vector<64x128xf32>, vector<16x128xf32> -> vector<16x128xf32>
    %172 = arith.addf %165, %171 : vector<16x128xf32>
    %c5_162 = arith.constant 5 : index
    %c0_163 = arith.constant 0 : index
    %c0_164 = arith.constant 0 : index
    %173 = vector.load %arg4[%c5_162, %c0_163, %c0_164] : memref<16x16x64xf32, #tpu.memory_space<vmem>>, vector<1x16x64xf32>
    %174 = vector.shape_cast %173 : vector<1x16x64xf32> to vector<16x64xf32>
    %cst_165 = arith.constant dense<0.000000e+00> : vector<16x64xf32>
    %175 = tpu.matmul %174, %136, %cst_165 {dimension_numbers = #tpu.dot_dimension_numbers<[1], [0], [0], [1], [0, 0, 1, 1], [], []>} : vector<16x64xf32>, vector<64x64xf32>, vector<16x64xf32> -> vector<16x64xf32>
    %c5_166 = arith.constant 5 : index
    %c0_167 = arith.constant 0 : index
    %c0_168 = arith.constant 0 : index
    %176 = vector.load %arg5[%c5_166, %c0_167, %c0_168] : memref<16x64x128xf32, #tpu.memory_space<vmem>>, vector<1x64x128xf32>
    %177 = vector.shape_cast %176 : vector<1x64x128xf32> to vector<64x128xf32>
    %cst_169 = arith.constant dense<0.000000e+00> : vector<16x128xf32>
    %178 = tpu.matmul %175, %177, %cst_169 {dimension_numbers = #tpu.dot_dimension_numbers<[1], [0], [0], [1], [0, 0, 1, 1], [], []>} : vector<16x64xf32>, vector<64x128xf32>, vector<16x128xf32> -> vector<16x128xf32>
    %179 = arith.addf %172, %178 : vector<16x128xf32>
    %c6_170 = arith.constant 6 : index
    %c0_171 = arith.constant 0 : index
    %c0_172 = arith.constant 0 : index
    %180 = vector.load %arg4[%c6_170, %c0_171, %c0_172] : memref<16x16x64xf32, #tpu.memory_space<vmem>>, vector<1x16x64xf32>
    %181 = vector.shape_cast %180 : vector<1x16x64xf32> to vector<16x64xf32>
    %cst_173 = arith.constant dense<0.000000e+00> : vector<16x64xf32>
    %182 = tpu.matmul %181, %136, %cst_173 {dimension_numbers = #tpu.dot_dimension_numbers<[1], [0], [0], [1], [0, 0, 1, 1], [], []>} : vector<16x64xf32>, vector<64x64xf32>, vector<16x64xf32> -> vector<16x64xf32>
    %c6_174 = arith.constant 6 : index
    %c0_175 = arith.constant 0 : index
    %c0_176 = arith.constant 0 : index
    %183 = vector.load %arg5[%c6_174, %c0_175, %c0_176] : memref<16x64x128xf32, #tpu.memory_space<vmem>>, vector<1x64x128xf32>
    %184 = vector.shape_cast %183 : vector<1x64x128xf32> to vector<64x128xf32>
    %cst_177 = arith.constant dense<0.000000e+00> : vector<16x128xf32>
    %185 = tpu.matmul %182, %184, %cst_177 {dimension_numbers = #tpu.dot_dimension_numbers<[1], [0], [0], [1], [0, 0, 1, 1], [], []>} : vector<16x64xf32>, vector<64x128xf32>, vector<16x128xf32> -> vector<16x128xf32>
    %186 = arith.addf %179, %185 : vector<16x128xf32>
    %c7_178 = arith.constant 7 : index
    %c0_179 = arith.constant 0 : index
    %c0_180 = arith.constant 0 : index
    %187 = vector.load %arg4[%c7_178, %c0_179, %c0_180] : memref<16x16x64xf32, #tpu.memory_space<vmem>>, vector<1x16x64xf32>
    %188 = vector.shape_cast %187 : vector<1x16x64xf32> to vector<16x64xf32>
    %cst_181 = arith.constant dense<0.000000e+00> : vector<16x64xf32>
    %189 = tpu.matmul %188, %136, %cst_181 {dimension_numbers = #tpu.dot_dimension_numbers<[1], [0], [0], [1], [0, 0, 1, 1], [], []>} : vector<16x64xf32>, vector<64x64xf32>, vector<16x64xf32> -> vector<16x64xf32>
    %c7_182 = arith.constant 7 : index
    %c0_183 = arith.constant 0 : index
    %c0_184 = arith.constant 0 : index
    %190 = vector.load %arg5[%c7_182, %c0_183, %c0_184] : memref<16x64x128xf32, #tpu.memory_space<vmem>>, vector<1x64x128xf32>
    %191 = vector.shape_cast %190 : vector<1x64x128xf32> to vector<64x128xf32>
    %cst_185 = arith.constant dense<0.000000e+00> : vector<16x128xf32>
    %192 = tpu.matmul %189, %191, %cst_185 {dimension_numbers = #tpu.dot_dimension_numbers<[1], [0], [0], [1], [0, 0, 1, 1], [], []>} : vector<16x64xf32>, vector<64x128xf32>, vector<16x128xf32> -> vector<16x128xf32>
    %193 = arith.addf %186, %192 : vector<16x128xf32>
    %c8_186 = arith.constant 8 : index
    %c0_187 = arith.constant 0 : index
    %c0_188 = arith.constant 0 : index
    %194 = vector.load %arg4[%c8_186, %c0_187, %c0_188] : memref<16x16x64xf32, #tpu.memory_space<vmem>>, vector<1x16x64xf32>
    %195 = vector.shape_cast %194 : vector<1x16x64xf32> to vector<16x64xf32>
    %cst_189 = arith.constant dense<0.000000e+00> : vector<16x64xf32>
    %196 = tpu.matmul %195, %136, %cst_189 {dimension_numbers = #tpu.dot_dimension_numbers<[1], [0], [0], [1], [0, 0, 1, 1], [], []>} : vector<16x64xf32>, vector<64x64xf32>, vector<16x64xf32> -> vector<16x64xf32>
    %c8_190 = arith.constant 8 : index
    %c0_191 = arith.constant 0 : index
    %c0_192 = arith.constant 0 : index
    %197 = vector.load %arg5[%c8_190, %c0_191, %c0_192] : memref<16x64x128xf32, #tpu.memory_space<vmem>>, vector<1x64x128xf32>
    %198 = vector.shape_cast %197 : vector<1x64x128xf32> to vector<64x128xf32>
    %cst_193 = arith.constant dense<0.000000e+00> : vector<16x128xf32>
    %199 = tpu.matmul %196, %198, %cst_193 {dimension_numbers = #tpu.dot_dimension_numbers<[1], [0], [0], [1], [0, 0, 1, 1], [], []>} : vector<16x64xf32>, vector<64x128xf32>, vector<16x128xf32> -> vector<16x128xf32>
    %200 = arith.addf %193, %199 : vector<16x128xf32>
    %c9_194 = arith.constant 9 : index
    %c0_195 = arith.constant 0 : index
    %c0_196 = arith.constant 0 : index
    %201 = vector.load %arg4[%c9_194, %c0_195, %c0_196] : memref<16x16x64xf32, #tpu.memory_space<vmem>>, vector<1x16x64xf32>
    %202 = vector.shape_cast %201 : vector<1x16x64xf32> to vector<16x64xf32>
    %cst_197 = arith.constant dense<0.000000e+00> : vector<16x64xf32>
    %203 = tpu.matmul %202, %136, %cst_197 {dimension_numbers = #tpu.dot_dimension_numbers<[1], [0], [0], [1], [0, 0, 1, 1], [], []>} : vector<16x64xf32>, vector<64x64xf32>, vector<16x64xf32> -> vector<16x64xf32>
    %c9_198 = arith.constant 9 : index
    %c0_199 = arith.constant 0 : index
    %c0_200 = arith.constant 0 : index
    %204 = vector.load %arg5[%c9_198, %c0_199, %c0_200] : memref<16x64x128xf32, #tpu.memory_space<vmem>>, vector<1x64x128xf32>
    %205 = vector.shape_cast %204 : vector<1x64x128xf32> to vector<64x128xf32>
    %cst_201 = arith.constant dense<0.000000e+00> : vector<16x128xf32>
    %206 = tpu.matmul %203, %205, %cst_201 {dimension_numbers = #tpu.dot_dimension_numbers<[1], [0], [0], [1], [0, 0, 1, 1], [], []>} : vector<16x64xf32>, vector<64x128xf32>, vector<16x128xf32> -> vector<16x128xf32>
    %207 = arith.addf %200, %206 : vector<16x128xf32>
    %c10_202 = arith.constant 10 : index
    %c0_203 = arith.constant 0 : index
    %c0_204 = arith.constant 0 : index
    %208 = vector.load %arg4[%c10_202, %c0_203, %c0_204] : memref<16x16x64xf32, #tpu.memory_space<vmem>>, vector<1x16x64xf32>
    %209 = vector.shape_cast %208 : vector<1x16x64xf32> to vector<16x64xf32>
    %cst_205 = arith.constant dense<0.000000e+00> : vector<16x64xf32>
    %210 = tpu.matmul %209, %136, %cst_205 {dimension_numbers = #tpu.dot_dimension_numbers<[1], [0], [0], [1], [0, 0, 1, 1], [], []>} : vector<16x64xf32>, vector<64x64xf32>, vector<16x64xf32> -> vector<16x64xf32>
    %c10_206 = arith.constant 10 : index
    %c0_207 = arith.constant 0 : index
    %c0_208 = arith.constant 0 : index
    %211 = vector.load %arg5[%c10_206, %c0_207, %c0_208] : memref<16x64x128xf32, #tpu.memory_space<vmem>>, vector<1x64x128xf32>
    %212 = vector.shape_cast %211 : vector<1x64x128xf32> to vector<64x128xf32>
    %cst_209 = arith.constant dense<0.000000e+00> : vector<16x128xf32>
    %213 = tpu.matmul %210, %212, %cst_209 {dimension_numbers = #tpu.dot_dimension_numbers<[1], [0], [0], [1], [0, 0, 1, 1], [], []>} : vector<16x64xf32>, vector<64x128xf32>, vector<16x128xf32> -> vector<16x128xf32>
    %214 = arith.addf %207, %213 : vector<16x128xf32>
    %c11_210 = arith.constant 11 : index
    %c0_211 = arith.constant 0 : index
    %c0_212 = arith.constant 0 : index
    %215 = vector.load %arg4[%c11_210, %c0_211, %c0_212] : memref<16x16x64xf32, #tpu.memory_space<vmem>>, vector<1x16x64xf32>
    %216 = vector.shape_cast %215 : vector<1x16x64xf32> to vector<16x64xf32>
    %cst_213 = arith.constant dense<0.000000e+00> : vector<16x64xf32>
    %217 = tpu.matmul %216, %136, %cst_213 {dimension_numbers = #tpu.dot_dimension_numbers<[1], [0], [0], [1], [0, 0, 1, 1], [], []>} : vector<16x64xf32>, vector<64x64xf32>, vector<16x64xf32> -> vector<16x64xf32>
    %c11_214 = arith.constant 11 : index
    %c0_215 = arith.constant 0 : index
    %c0_216 = arith.constant 0 : index
    %218 = vector.load %arg5[%c11_214, %c0_215, %c0_216] : memref<16x64x128xf32, #tpu.memory_space<vmem>>, vector<1x64x128xf32>
    %219 = vector.shape_cast %218 : vector<1x64x128xf32> to vector<64x128xf32>
    %cst_217 = arith.constant dense<0.000000e+00> : vector<16x128xf32>
    %220 = tpu.matmul %217, %219, %cst_217 {dimension_numbers = #tpu.dot_dimension_numbers<[1], [0], [0], [1], [0, 0, 1, 1], [], []>} : vector<16x64xf32>, vector<64x128xf32>, vector<16x128xf32> -> vector<16x128xf32>
    %221 = arith.addf %214, %220 : vector<16x128xf32>
    %c12_218 = arith.constant 12 : index
    %c0_219 = arith.constant 0 : index
    %c0_220 = arith.constant 0 : index
    %222 = vector.load %arg4[%c12_218, %c0_219, %c0_220] : memref<16x16x64xf32, #tpu.memory_space<vmem>>, vector<1x16x64xf32>
    %223 = vector.shape_cast %222 : vector<1x16x64xf32> to vector<16x64xf32>
    %cst_221 = arith.constant dense<0.000000e+00> : vector<16x64xf32>
    %224 = tpu.matmul %223, %136, %cst_221 {dimension_numbers = #tpu.dot_dimension_numbers<[1], [0], [0], [1], [0, 0, 1, 1], [], []>} : vector<16x64xf32>, vector<64x64xf32>, vector<16x64xf32> -> vector<16x64xf32>
    %c12_222 = arith.constant 12 : index
    %c0_223 = arith.constant 0 : index
    %c0_224 = arith.constant 0 : index
    %225 = vector.load %arg5[%c12_222, %c0_223, %c0_224] : memref<16x64x128xf32, #tpu.memory_space<vmem>>, vector<1x64x128xf32>
    %226 = vector.shape_cast %225 : vector<1x64x128xf32> to vector<64x128xf32>
    %cst_225 = arith.constant dense<0.000000e+00> : vector<16x128xf32>
    %227 = tpu.matmul %224, %226, %cst_225 {dimension_numbers = #tpu.dot_dimension_numbers<[1], [0], [0], [1], [0, 0, 1, 1], [], []>} : vector<16x64xf32>, vector<64x128xf32>, vector<16x128xf32> -> vector<16x128xf32>
    %228 = arith.addf %221, %227 : vector<16x128xf32>
    %c13_226 = arith.constant 13 : index
    %c0_227 = arith.constant 0 : index
    %c0_228 = arith.constant 0 : index
    %229 = vector.load %arg4[%c13_226, %c0_227, %c0_228] : memref<16x16x64xf32, #tpu.memory_space<vmem>>, vector<1x16x64xf32>
    %230 = vector.shape_cast %229 : vector<1x16x64xf32> to vector<16x64xf32>
    %cst_229 = arith.constant dense<0.000000e+00> : vector<16x64xf32>
    %231 = tpu.matmul %230, %136, %cst_229 {dimension_numbers = #tpu.dot_dimension_numbers<[1], [0], [0], [1], [0, 0, 1, 1], [], []>} : vector<16x64xf32>, vector<64x64xf32>, vector<16x64xf32> -> vector<16x64xf32>
    %c13_230 = arith.constant 13 : index
    %c0_231 = arith.constant 0 : index
    %c0_232 = arith.constant 0 : index
    %232 = vector.load %arg5[%c13_230, %c0_231, %c0_232] : memref<16x64x128xf32, #tpu.memory_space<vmem>>, vector<1x64x128xf32>
    %233 = vector.shape_cast %232 : vector<1x64x128xf32> to vector<64x128xf32>
    %cst_233 = arith.constant dense<0.000000e+00> : vector<16x128xf32>
    %234 = tpu.matmul %231, %233, %cst_233 {dimension_numbers = #tpu.dot_dimension_numbers<[1], [0], [0], [1], [0, 0, 1, 1], [], []>} : vector<16x64xf32>, vector<64x128xf32>, vector<16x128xf32> -> vector<16x128xf32>
    %235 = arith.addf %228, %234 : vector<16x128xf32>
    %c14_234 = arith.constant 14 : index
    %c0_235 = arith.constant 0 : index
    %c0_236 = arith.constant 0 : index
    %236 = vector.load %arg4[%c14_234, %c0_235, %c0_236] : memref<16x16x64xf32, #tpu.memory_space<vmem>>, vector<1x16x64xf32>
    %237 = vector.shape_cast %236 : vector<1x16x64xf32> to vector<16x64xf32>
    %cst_237 = arith.constant dense<0.000000e+00> : vector<16x64xf32>
    %238 = tpu.matmul %237, %136, %cst_237 {dimension_numbers = #tpu.dot_dimension_numbers<[1], [0], [0], [1], [0, 0, 1, 1], [], []>} : vector<16x64xf32>, vector<64x64xf32>, vector<16x64xf32> -> vector<16x64xf32>
    %c14_238 = arith.constant 14 : index
    %c0_239 = arith.constant 0 : index
    %c0_240 = arith.constant 0 : index
    %239 = vector.load %arg5[%c14_238, %c0_239, %c0_240] : memref<16x64x128xf32, #tpu.memory_space<vmem>>, vector<1x64x128xf32>
    %240 = vector.shape_cast %239 : vector<1x64x128xf32> to vector<64x128xf32>
    %cst_241 = arith.constant dense<0.000000e+00> : vector<16x128xf32>
    %241 = tpu.matmul %238, %240, %cst_241 {dimension_numbers = #tpu.dot_dimension_numbers<[1], [0], [0], [1], [0, 0, 1, 1], [], []>} : vector<16x64xf32>, vector<64x128xf32>, vector<16x128xf32> -> vector<16x128xf32>
    %242 = arith.addf %235, %241 : vector<16x128xf32>
    %c15_242 = arith.constant 15 : index
    %c0_243 = arith.constant 0 : index
    %c0_244 = arith.constant 0 : index
    %243 = vector.load %arg4[%c15_242, %c0_243, %c0_244] : memref<16x16x64xf32, #tpu.memory_space<vmem>>, vector<1x16x64xf32>
    %244 = vector.shape_cast %243 : vector<1x16x64xf32> to vector<16x64xf32>
    %cst_245 = arith.constant dense<0.000000e+00> : vector<16x64xf32>
    %245 = tpu.matmul %244, %136, %cst_245 {dimension_numbers = #tpu.dot_dimension_numbers<[1], [0], [0], [1], [0, 0, 1, 1], [], []>} : vector<16x64xf32>, vector<64x64xf32>, vector<16x64xf32> -> vector<16x64xf32>
    %c15_246 = arith.constant 15 : index
    %c0_247 = arith.constant 0 : index
    %c0_248 = arith.constant 0 : index
    %246 = vector.load %arg5[%c15_246, %c0_247, %c0_248] : memref<16x64x128xf32, #tpu.memory_space<vmem>>, vector<1x64x128xf32>
    %247 = vector.shape_cast %246 : vector<1x64x128xf32> to vector<64x128xf32>
    %cst_249 = arith.constant dense<0.000000e+00> : vector<16x128xf32>
    %248 = tpu.matmul %245, %247, %cst_249 {dimension_numbers = #tpu.dot_dimension_numbers<[1], [0], [0], [1], [0, 0, 1, 1], [], []>} : vector<16x64xf32>, vector<64x128xf32>, vector<16x128xf32> -> vector<16x128xf32>
    %249 = arith.addf %242, %248 : vector<16x128xf32>
    %cst_250 = arith.constant dense<0.000000e+00> : vector<128xf32>
    %250 = vector.multi_reduction <add>, %249, %cst_250 [0] : vector<16x128xf32> to vector<128xf32>
    %251 = vector.shape_cast %250 : vector<128xf32> to vector<1x128xf32>
    %cst_251 = arith.constant 1.600000e+01 : f32
    %252 = vector.broadcast %cst_251 : f32 to vector<1x128xf32>
    %253 = arith.divf %251, %252 : vector<1x128xf32>
    %254 = vector.broadcast %253 : vector<1x128xf32> to vector<16x128xf32>
    %255 = arith.subf %249, %254 : vector<16x128xf32>
    %256 = vector.broadcast %253 : vector<1x128xf32> to vector<16x128xf32>
    %257 = arith.subf %249, %256 : vector<16x128xf32>
    %258 = arith.mulf %255, %257 : vector<16x128xf32>
    %cst_252 = arith.constant dense<0.000000e+00> : vector<128xf32>
    %259 = vector.multi_reduction <add>, %258, %cst_252 [0] : vector<16x128xf32> to vector<128xf32>
    %260 = vector.shape_cast %259 : vector<128xf32> to vector<1x128xf32>
    %cst_253 = arith.constant 1.600000e+01 : f32
    %261 = vector.broadcast %cst_253 : f32 to vector<1x128xf32>
    %262 = arith.divf %260, %261 : vector<1x128xf32>
    %263 = vector.broadcast %253 : vector<1x128xf32> to vector<16x128xf32>
    %264 = arith.subf %249, %263 : vector<16x128xf32>
    %cst_254 = arith.constant 9.99999974E-6 : f32
    %265 = vector.broadcast %cst_254 : f32 to vector<1x128xf32>
    %266 = arith.addf %262, %265 : vector<1x128xf32>
    %267 = math.rsqrt %266 : vector<1x128xf32>
    %268 = vector.broadcast %267 : vector<1x128xf32> to vector<16x128xf32>
    %269 = arith.mulf %264, %268 : vector<16x128xf32>
    %cst_255 = arith.constant 0.000000e+00 : f32
    %270 = vector.broadcast %cst_255 : f32 to vector<16x128xf32>
    %271 = arith.maximumf %269, %270 : vector<16x128xf32>
    %cst_256 = arith.constant 0.000000e+00 : f32
    %272 = vector.broadcast %cst_256 : f32 to vector<4x256xf32>
    %c0_257 = arith.constant 0 : index
    %c0_258 = arith.constant 0 : index
    %c0_259 = arith.constant 0 : index
    %273 = vector.load %arg6[%c0_257, %c0_258, %c0_259] : memref<16x4x16xf32, #tpu.memory_space<vmem>>, vector<1x4x16xf32>
    %274 = vector.shape_cast %273 : vector<1x4x16xf32> to vector<4x16xf32>
    %cst_260 = arith.constant dense<0.000000e+00> : vector<4x128xf32>
    %275 = tpu.matmul %274, %271, %cst_260 {dimension_numbers = #tpu.dot_dimension_numbers<[1], [0], [0], [1], [0, 0, 1, 1], [], []>} : vector<4x16xf32>, vector<16x128xf32>, vector<4x128xf32> -> vector<4x128xf32>
    %c0_261 = arith.constant 0 : index
    %c0_262 = arith.constant 0 : index
    %c0_263 = arith.constant 0 : index
    %276 = vector.load %arg7[%c0_261, %c0_262, %c0_263] : memref<16x128x256xf32, #tpu.memory_space<vmem>>, vector<1x128x256xf32>
    %277 = vector.shape_cast %276 : vector<1x128x256xf32> to vector<128x256xf32>
    %cst_264 = arith.constant dense<0.000000e+00> : vector<4x256xf32>
    %278 = tpu.matmul %275, %277, %cst_264 {dimension_numbers = #tpu.dot_dimension_numbers<[1], [0], [0], [1], [0, 0, 1, 1], [], []>} : vector<4x128xf32>, vector<128x256xf32>, vector<4x256xf32> -> vector<4x256xf32>
    %279 = arith.addf %272, %278 : vector<4x256xf32>
    %c1_265 = arith.constant 1 : index
    %c0_266 = arith.constant 0 : index
    %c0_267 = arith.constant 0 : index
    %280 = vector.load %arg6[%c1_265, %c0_266, %c0_267] : memref<16x4x16xf32, #tpu.memory_space<vmem>>, vector<1x4x16xf32>
    %281 = vector.shape_cast %280 : vector<1x4x16xf32> to vector<4x16xf32>
    %cst_268 = arith.constant dense<0.000000e+00> : vector<4x128xf32>
    %282 = tpu.matmul %281, %271, %cst_268 {dimension_numbers = #tpu.dot_dimension_numbers<[1], [0], [0], [1], [0, 0, 1, 1], [], []>} : vector<4x16xf32>, vector<16x128xf32>, vector<4x128xf32> -> vector<4x128xf32>
    %c1_269 = arith.constant 1 : index
    %c0_270 = arith.constant 0 : index
    %c0_271 = arith.constant 0 : index
    %283 = vector.load %arg7[%c1_269, %c0_270, %c0_271] : memref<16x128x256xf32, #tpu.memory_space<vmem>>, vector<1x128x256xf32>
    %284 = vector.shape_cast %283 : vector<1x128x256xf32> to vector<128x256xf32>
    %cst_272 = arith.constant dense<0.000000e+00> : vector<4x256xf32>
    %285 = tpu.matmul %282, %284, %cst_272 {dimension_numbers = #tpu.dot_dimension_numbers<[1], [0], [0], [1], [0, 0, 1, 1], [], []>} : vector<4x128xf32>, vector<128x256xf32>, vector<4x256xf32> -> vector<4x256xf32>
    %286 = arith.addf %279, %285 : vector<4x256xf32>
    %c2_273 = arith.constant 2 : index
    %c0_274 = arith.constant 0 : index
    %c0_275 = arith.constant 0 : index
    %287 = vector.load %arg6[%c2_273, %c0_274, %c0_275] : memref<16x4x16xf32, #tpu.memory_space<vmem>>, vector<1x4x16xf32>
    %288 = vector.shape_cast %287 : vector<1x4x16xf32> to vector<4x16xf32>
    %cst_276 = arith.constant dense<0.000000e+00> : vector<4x128xf32>
    %289 = tpu.matmul %288, %271, %cst_276 {dimension_numbers = #tpu.dot_dimension_numbers<[1], [0], [0], [1], [0, 0, 1, 1], [], []>} : vector<4x16xf32>, vector<16x128xf32>, vector<4x128xf32> -> vector<4x128xf32>
    %c2_277 = arith.constant 2 : index
    %c0_278 = arith.constant 0 : index
    %c0_279 = arith.constant 0 : index
    %290 = vector.load %arg7[%c2_277, %c0_278, %c0_279] : memref<16x128x256xf32, #tpu.memory_space<vmem>>, vector<1x128x256xf32>
    %291 = vector.shape_cast %290 : vector<1x128x256xf32> to vector<128x256xf32>
    %cst_280 = arith.constant dense<0.000000e+00> : vector<4x256xf32>
    %292 = tpu.matmul %289, %291, %cst_280 {dimension_numbers = #tpu.dot_dimension_numbers<[1], [0], [0], [1], [0, 0, 1, 1], [], []>} : vector<4x128xf32>, vector<128x256xf32>, vector<4x256xf32> -> vector<4x256xf32>
    %293 = arith.addf %286, %292 : vector<4x256xf32>
    %c3_281 = arith.constant 3 : index
    %c0_282 = arith.constant 0 : index
    %c0_283 = arith.constant 0 : index
    %294 = vector.load %arg6[%c3_281, %c0_282, %c0_283] : memref<16x4x16xf32, #tpu.memory_space<vmem>>, vector<1x4x16xf32>
    %295 = vector.shape_cast %294 : vector<1x4x16xf32> to vector<4x16xf32>
    %cst_284 = arith.constant dense<0.000000e+00> : vector<4x128xf32>
    %296 = tpu.matmul %295, %271, %cst_284 {dimension_numbers = #tpu.dot_dimension_numbers<[1], [0], [0], [1], [0, 0, 1, 1], [], []>} : vector<4x16xf32>, vector<16x128xf32>, vector<4x128xf32> -> vector<4x128xf32>
    %c3_285 = arith.constant 3 : index
    %c0_286 = arith.constant 0 : index
    %c0_287 = arith.constant 0 : index
    %297 = vector.load %arg7[%c3_285, %c0_286, %c0_287] : memref<16x128x256xf32, #tpu.memory_space<vmem>>, vector<1x128x256xf32>
    %298 = vector.shape_cast %297 : vector<1x128x256xf32> to vector<128x256xf32>
    %cst_288 = arith.constant dense<0.000000e+00> : vector<4x256xf32>
    %299 = tpu.matmul %296, %298, %cst_288 {dimension_numbers = #tpu.dot_dimension_numbers<[1], [0], [0], [1], [0, 0, 1, 1], [], []>} : vector<4x128xf32>, vector<128x256xf32>, vector<4x256xf32> -> vector<4x256xf32>
    %300 = arith.addf %293, %299 : vector<4x256xf32>
    %c4_289 = arith.constant 4 : index
    %c0_290 = arith.constant 0 : index
    %c0_291 = arith.constant 0 : index
    %301 = vector.load %arg6[%c4_289, %c0_290, %c0_291] : memref<16x4x16xf32, #tpu.memory_space<vmem>>, vector<1x4x16xf32>
    %302 = vector.shape_cast %301 : vector<1x4x16xf32> to vector<4x16xf32>
    %cst_292 = arith.constant dense<0.000000e+00> : vector<4x128xf32>
    %303 = tpu.matmul %302, %271, %cst_292 {dimension_numbers = #tpu.dot_dimension_numbers<[1], [0], [0], [1], [0, 0, 1, 1], [], []>} : vector<4x16xf32>, vector<16x128xf32>, vector<4x128xf32> -> vector<4x128xf32>
    %c4_293 = arith.constant 4 : index
    %c0_294 = arith.constant 0 : index
    %c0_295 = arith.constant 0 : index
    %304 = vector.load %arg7[%c4_293, %c0_294, %c0_295] : memref<16x128x256xf32, #tpu.memory_space<vmem>>, vector<1x128x256xf32>
    %305 = vector.shape_cast %304 : vector<1x128x256xf32> to vector<128x256xf32>
    %cst_296 = arith.constant dense<0.000000e+00> : vector<4x256xf32>
    %306 = tpu.matmul %303, %305, %cst_296 {dimension_numbers = #tpu.dot_dimension_numbers<[1], [0], [0], [1], [0, 0, 1, 1], [], []>} : vector<4x128xf32>, vector<128x256xf32>, vector<4x256xf32> -> vector<4x256xf32>
    %307 = arith.addf %300, %306 : vector<4x256xf32>
    %c5_297 = arith.constant 5 : index
    %c0_298 = arith.constant 0 : index
    %c0_299 = arith.constant 0 : index
    %308 = vector.load %arg6[%c5_297, %c0_298, %c0_299] : memref<16x4x16xf32, #tpu.memory_space<vmem>>, vector<1x4x16xf32>
    %309 = vector.shape_cast %308 : vector<1x4x16xf32> to vector<4x16xf32>
    %cst_300 = arith.constant dense<0.000000e+00> : vector<4x128xf32>
    %310 = tpu.matmul %309, %271, %cst_300 {dimension_numbers = #tpu.dot_dimension_numbers<[1], [0], [0], [1], [0, 0, 1, 1], [], []>} : vector<4x16xf32>, vector<16x128xf32>, vector<4x128xf32> -> vector<4x128xf32>
    %c5_301 = arith.constant 5 : index
    %c0_302 = arith.constant 0 : index
    %c0_303 = arith.constant 0 : index
    %311 = vector.load %arg7[%c5_301, %c0_302, %c0_303] : memref<16x128x256xf32, #tpu.memory_space<vmem>>, vector<1x128x256xf32>
    %312 = vector.shape_cast %311 : vector<1x128x256xf32> to vector<128x256xf32>
    %cst_304 = arith.constant dense<0.000000e+00> : vector<4x256xf32>
    %313 = tpu.matmul %310, %312, %cst_304 {dimension_numbers = #tpu.dot_dimension_numbers<[1], [0], [0], [1], [0, 0, 1, 1], [], []>} : vector<4x128xf32>, vector<128x256xf32>, vector<4x256xf32> -> vector<4x256xf32>
    %314 = arith.addf %307, %313 : vector<4x256xf32>
    %c6_305 = arith.constant 6 : index
    %c0_306 = arith.constant 0 : index
    %c0_307 = arith.constant 0 : index
    %315 = vector.load %arg6[%c6_305, %c0_306, %c0_307] : memref<16x4x16xf32, #tpu.memory_space<vmem>>, vector<1x4x16xf32>
    %316 = vector.shape_cast %315 : vector<1x4x16xf32> to vector<4x16xf32>
    %cst_308 = arith.constant dense<0.000000e+00> : vector<4x128xf32>
    %317 = tpu.matmul %316, %271, %cst_308 {dimension_numbers = #tpu.dot_dimension_numbers<[1], [0], [0], [1], [0, 0, 1, 1], [], []>} : vector<4x16xf32>, vector<16x128xf32>, vector<4x128xf32> -> vector<4x128xf32>
    %c6_309 = arith.constant 6 : index
    %c0_310 = arith.constant 0 : index
    %c0_311 = arith.constant 0 : index
    %318 = vector.load %arg7[%c6_309, %c0_310, %c0_311] : memref<16x128x256xf32, #tpu.memory_space<vmem>>, vector<1x128x256xf32>
    %319 = vector.shape_cast %318 : vector<1x128x256xf32> to vector<128x256xf32>
    %cst_312 = arith.constant dense<0.000000e+00> : vector<4x256xf32>
    %320 = tpu.matmul %317, %319, %cst_312 {dimension_numbers = #tpu.dot_dimension_numbers<[1], [0], [0], [1], [0, 0, 1, 1], [], []>} : vector<4x128xf32>, vector<128x256xf32>, vector<4x256xf32> -> vector<4x256xf32>
    %321 = arith.addf %314, %320 : vector<4x256xf32>
    %c7_313 = arith.constant 7 : index
    %c0_314 = arith.constant 0 : index
    %c0_315 = arith.constant 0 : index
    %322 = vector.load %arg6[%c7_313, %c0_314, %c0_315] : memref<16x4x16xf32, #tpu.memory_space<vmem>>, vector<1x4x16xf32>
    %323 = vector.shape_cast %322 : vector<1x4x16xf32> to vector<4x16xf32>
    %cst_316 = arith.constant dense<0.000000e+00> : vector<4x128xf32>
    %324 = tpu.matmul %323, %271, %cst_316 {dimension_numbers = #tpu.dot_dimension_numbers<[1], [0], [0], [1], [0, 0, 1, 1], [], []>} : vector<4x16xf32>, vector<16x128xf32>, vector<4x128xf32> -> vector<4x128xf32>
    %c7_317 = arith.constant 7 : index
    %c0_318 = arith.constant 0 : index
    %c0_319 = arith.constant 0 : index
    %325 = vector.load %arg7[%c7_317, %c0_318, %c0_319] : memref<16x128x256xf32, #tpu.memory_space<vmem>>, vector<1x128x256xf32>
    %326 = vector.shape_cast %325 : vector<1x128x256xf32> to vector<128x256xf32>
    %cst_320 = arith.constant dense<0.000000e+00> : vector<4x256xf32>
    %327 = tpu.matmul %324, %326, %cst_320 {dimension_numbers = #tpu.dot_dimension_numbers<[1], [0], [0], [1], [0, 0, 1, 1], [], []>} : vector<4x128xf32>, vector<128x256xf32>, vector<4x256xf32> -> vector<4x256xf32>
    %328 = arith.addf %321, %327 : vector<4x256xf32>
    %c8_321 = arith.constant 8 : index
    %c0_322 = arith.constant 0 : index
    %c0_323 = arith.constant 0 : index
    %329 = vector.load %arg6[%c8_321, %c0_322, %c0_323] : memref<16x4x16xf32, #tpu.memory_space<vmem>>, vector<1x4x16xf32>
    %330 = vector.shape_cast %329 : vector<1x4x16xf32> to vector<4x16xf32>
    %cst_324 = arith.constant dense<0.000000e+00> : vector<4x128xf32>
    %331 = tpu.matmul %330, %271, %cst_324 {dimension_numbers = #tpu.dot_dimension_numbers<[1], [0], [0], [1], [0, 0, 1, 1], [], []>} : vector<4x16xf32>, vector<16x128xf32>, vector<4x128xf32> -> vector<4x128xf32>
    %c8_325 = arith.constant 8 : index
    %c0_326 = arith.constant 0 : index
    %c0_327 = arith.constant 0 : index
    %332 = vector.load %arg7[%c8_325, %c0_326, %c0_327] : memref<16x128x256xf32, #tpu.memory_space<vmem>>, vector<1x128x256xf32>
    %333 = vector.shape_cast %332 : vector<1x128x256xf32> to vector<128x256xf32>
    %cst_328 = arith.constant dense<0.000000e+00> : vector<4x256xf32>
    %334 = tpu.matmul %331, %333, %cst_328 {dimension_numbers = #tpu.dot_dimension_numbers<[1], [0], [0], [1], [0, 0, 1, 1], [], []>} : vector<4x128xf32>, vector<128x256xf32>, vector<4x256xf32> -> vector<4x256xf32>
    %335 = arith.addf %328, %334 : vector<4x256xf32>
    %c9_329 = arith.constant 9 : index
    %c0_330 = arith.constant 0 : index
    %c0_331 = arith.constant 0 : index
    %336 = vector.load %arg6[%c9_329, %c0_330, %c0_331] : memref<16x4x16xf32, #tpu.memory_space<vmem>>, vector<1x4x16xf32>
    %337 = vector.shape_cast %336 : vector<1x4x16xf32> to vector<4x16xf32>
    %cst_332 = arith.constant dense<0.000000e+00> : vector<4x128xf32>
    %338 = tpu.matmul %337, %271, %cst_332 {dimension_numbers = #tpu.dot_dimension_numbers<[1], [0], [0], [1], [0, 0, 1, 1], [], []>} : vector<4x16xf32>, vector<16x128xf32>, vector<4x128xf32> -> vector<4x128xf32>
    %c9_333 = arith.constant 9 : index
    %c0_334 = arith.constant 0 : index
    %c0_335 = arith.constant 0 : index
    %339 = vector.load %arg7[%c9_333, %c0_334, %c0_335] : memref<16x128x256xf32, #tpu.memory_space<vmem>>, vector<1x128x256xf32>
    %340 = vector.shape_cast %339 : vector<1x128x256xf32> to vector<128x256xf32>
    %cst_336 = arith.constant dense<0.000000e+00> : vector<4x256xf32>
    %341 = tpu.matmul %338, %340, %cst_336 {dimension_numbers = #tpu.dot_dimension_numbers<[1], [0], [0], [1], [0, 0, 1, 1], [], []>} : vector<4x128xf32>, vector<128x256xf32>, vector<4x256xf32> -> vector<4x256xf32>
    %342 = arith.addf %335, %341 : vector<4x256xf32>
    %c10_337 = arith.constant 10 : index
    %c0_338 = arith.constant 0 : index
    %c0_339 = arith.constant 0 : index
    %343 = vector.load %arg6[%c10_337, %c0_338, %c0_339] : memref<16x4x16xf32, #tpu.memory_space<vmem>>, vector<1x4x16xf32>
    %344 = vector.shape_cast %343 : vector<1x4x16xf32> to vector<4x16xf32>
    %cst_340 = arith.constant dense<0.000000e+00> : vector<4x128xf32>
    %345 = tpu.matmul %344, %271, %cst_340 {dimension_numbers = #tpu.dot_dimension_numbers<[1], [0], [0], [1], [0, 0, 1, 1], [], []>} : vector<4x16xf32>, vector<16x128xf32>, vector<4x128xf32> -> vector<4x128xf32>
    %c10_341 = arith.constant 10 : index
    %c0_342 = arith.constant 0 : index
    %c0_343 = arith.constant 0 : index
    %346 = vector.load %arg7[%c10_341, %c0_342, %c0_343] : memref<16x128x256xf32, #tpu.memory_space<vmem>>, vector<1x128x256xf32>
    %347 = vector.shape_cast %346 : vector<1x128x256xf32> to vector<128x256xf32>
    %cst_344 = arith.constant dense<0.000000e+00> : vector<4x256xf32>
    %348 = tpu.matmul %345, %347, %cst_344 {dimension_numbers = #tpu.dot_dimension_numbers<[1], [0], [0], [1], [0, 0, 1, 1], [], []>} : vector<4x128xf32>, vector<128x256xf32>, vector<4x256xf32> -> vector<4x256xf32>
    %349 = arith.addf %342, %348 : vector<4x256xf32>
    %c11_345 = arith.constant 11 : index
    %c0_346 = arith.constant 0 : index
    %c0_347 = arith.constant 0 : index
    %350 = vector.load %arg6[%c11_345, %c0_346, %c0_347] : memref<16x4x16xf32, #tpu.memory_space<vmem>>, vector<1x4x16xf32>
    %351 = vector.shape_cast %350 : vector<1x4x16xf32> to vector<4x16xf32>
    %cst_348 = arith.constant dense<0.000000e+00> : vector<4x128xf32>
    %352 = tpu.matmul %351, %271, %cst_348 {dimension_numbers = #tpu.dot_dimension_numbers<[1], [0], [0], [1], [0, 0, 1, 1], [], []>} : vector<4x16xf32>, vector<16x128xf32>, vector<4x128xf32> -> vector<4x128xf32>
    %c11_349 = arith.constant 11 : index
    %c0_350 = arith.constant 0 : index
    %c0_351 = arith.constant 0 : index
    %353 = vector.load %arg7[%c11_349, %c0_350, %c0_351] : memref<16x128x256xf32, #tpu.memory_space<vmem>>, vector<1x128x256xf32>
    %354 = vector.shape_cast %353 : vector<1x128x256xf32> to vector<128x256xf32>
    %cst_352 = arith.constant dense<0.000000e+00> : vector<4x256xf32>
    %355 = tpu.matmul %352, %354, %cst_352 {dimension_numbers = #tpu.dot_dimension_numbers<[1], [0], [0], [1], [0, 0, 1, 1], [], []>} : vector<4x128xf32>, vector<128x256xf32>, vector<4x256xf32> -> vector<4x256xf32>
    %356 = arith.addf %349, %355 : vector<4x256xf32>
    %c12_353 = arith.constant 12 : index
    %c0_354 = arith.constant 0 : index
    %c0_355 = arith.constant 0 : index
    %357 = vector.load %arg6[%c12_353, %c0_354, %c0_355] : memref<16x4x16xf32, #tpu.memory_space<vmem>>, vector<1x4x16xf32>
    %358 = vector.shape_cast %357 : vector<1x4x16xf32> to vector<4x16xf32>
    %cst_356 = arith.constant dense<0.000000e+00> : vector<4x128xf32>
    %359 = tpu.matmul %358, %271, %cst_356 {dimension_numbers = #tpu.dot_dimension_numbers<[1], [0], [0], [1], [0, 0, 1, 1], [], []>} : vector<4x16xf32>, vector<16x128xf32>, vector<4x128xf32> -> vector<4x128xf32>
    %c12_357 = arith.constant 12 : index
    %c0_358 = arith.constant 0 : index
    %c0_359 = arith.constant 0 : index
    %360 = vector.load %arg7[%c12_357, %c0_358, %c0_359] : memref<16x128x256xf32, #tpu.memory_space<vmem>>, vector<1x128x256xf32>
    %361 = vector.shape_cast %360 : vector<1x128x256xf32> to vector<128x256xf32>
    %cst_360 = arith.constant dense<0.000000e+00> : vector<4x256xf32>
    %362 = tpu.matmul %359, %361, %cst_360 {dimension_numbers = #tpu.dot_dimension_numbers<[1], [0], [0], [1], [0, 0, 1, 1], [], []>} : vector<4x128xf32>, vector<128x256xf32>, vector<4x256xf32> -> vector<4x256xf32>
    %363 = arith.addf %356, %362 : vector<4x256xf32>
    %c13_361 = arith.constant 13 : index
    %c0_362 = arith.constant 0 : index
    %c0_363 = arith.constant 0 : index
    %364 = vector.load %arg6[%c13_361, %c0_362, %c0_363] : memref<16x4x16xf32, #tpu.memory_space<vmem>>, vector<1x4x16xf32>
    %365 = vector.shape_cast %364 : vector<1x4x16xf32> to vector<4x16xf32>
    %cst_364 = arith.constant dense<0.000000e+00> : vector<4x128xf32>
    %366 = tpu.matmul %365, %271, %cst_364 {dimension_numbers = #tpu.dot_dimension_numbers<[1], [0], [0], [1], [0, 0, 1, 1], [], []>} : vector<4x16xf32>, vector<16x128xf32>, vector<4x128xf32> -> vector<4x128xf32>
    %c13_365 = arith.constant 13 : index
    %c0_366 = arith.constant 0 : index
    %c0_367 = arith.constant 0 : index
    %367 = vector.load %arg7[%c13_365, %c0_366, %c0_367] : memref<16x128x256xf32, #tpu.memory_space<vmem>>, vector<1x128x256xf32>
    %368 = vector.shape_cast %367 : vector<1x128x256xf32> to vector<128x256xf32>
    %cst_368 = arith.constant dense<0.000000e+00> : vector<4x256xf32>
    %369 = tpu.matmul %366, %368, %cst_368 {dimension_numbers = #tpu.dot_dimension_numbers<[1], [0], [0], [1], [0, 0, 1, 1], [], []>} : vector<4x128xf32>, vector<128x256xf32>, vector<4x256xf32> -> vector<4x256xf32>
    %370 = arith.addf %363, %369 : vector<4x256xf32>
    %c14_369 = arith.constant 14 : index
    %c0_370 = arith.constant 0 : index
    %c0_371 = arith.constant 0 : index
    %371 = vector.load %arg6[%c14_369, %c0_370, %c0_371] : memref<16x4x16xf32, #tpu.memory_space<vmem>>, vector<1x4x16xf32>
    %372 = vector.shape_cast %371 : vector<1x4x16xf32> to vector<4x16xf32>
    %cst_372 = arith.constant dense<0.000000e+00> : vector<4x128xf32>
    %373 = tpu.matmul %372, %271, %cst_372 {dimension_numbers = #tpu.dot_dimension_numbers<[1], [0], [0], [1], [0, 0, 1, 1], [], []>} : vector<4x16xf32>, vector<16x128xf32>, vector<4x128xf32> -> vector<4x128xf32>
    %c14_373 = arith.constant 14 : index
    %c0_374 = arith.constant 0 : index
    %c0_375 = arith.constant 0 : index
    %374 = vector.load %arg7[%c14_373, %c0_374, %c0_375] : memref<16x128x256xf32, #tpu.memory_space<vmem>>, vector<1x128x256xf32>
    %375 = vector.shape_cast %374 : vector<1x128x256xf32> to vector<128x256xf32>
    %cst_376 = arith.constant dense<0.000000e+00> : vector<4x256xf32>
    %376 = tpu.matmul %373, %375, %cst_376 {dimension_numbers = #tpu.dot_dimension_numbers<[1], [0], [0], [1], [0, 0, 1, 1], [], []>} : vector<4x128xf32>, vector<128x256xf32>, vector<4x256xf32> -> vector<4x256xf32>
    %377 = arith.addf %370, %376 : vector<4x256xf32>
    %c15_377 = arith.constant 15 : index
    %c0_378 = arith.constant 0 : index
    %c0_379 = arith.constant 0 : index
    %378 = vector.load %arg6[%c15_377, %c0_378, %c0_379] : memref<16x4x16xf32, #tpu.memory_space<vmem>>, vector<1x4x16xf32>
    %379 = vector.shape_cast %378 : vector<1x4x16xf32> to vector<4x16xf32>
    %cst_380 = arith.constant dense<0.000000e+00> : vector<4x128xf32>
    %380 = tpu.matmul %379, %271, %cst_380 {dimension_numbers = #tpu.dot_dimension_numbers<[1], [0], [0], [1], [0, 0, 1, 1], [], []>} : vector<4x16xf32>, vector<16x128xf32>, vector<4x128xf32> -> vector<4x128xf32>
    %c15_381 = arith.constant 15 : index
    %c0_382 = arith.constant 0 : index
    %c0_383 = arith.constant 0 : index
    %381 = vector.load %arg7[%c15_381, %c0_382, %c0_383] : memref<16x128x256xf32, #tpu.memory_space<vmem>>, vector<1x128x256xf32>
    %382 = vector.shape_cast %381 : vector<1x128x256xf32> to vector<128x256xf32>
    %cst_384 = arith.constant dense<0.000000e+00> : vector<4x256xf32>
    %383 = tpu.matmul %380, %382, %cst_384 {dimension_numbers = #tpu.dot_dimension_numbers<[1], [0], [0], [1], [0, 0, 1, 1], [], []>} : vector<4x128xf32>, vector<128x256xf32>, vector<4x256xf32> -> vector<4x256xf32>
    %384 = arith.addf %377, %383 : vector<4x256xf32>
    %cst_385 = arith.constant dense<0.000000e+00> : vector<256xf32>
    %385 = vector.multi_reduction <add>, %384, %cst_385 [0] : vector<4x256xf32> to vector<256xf32>
    %386 = vector.shape_cast %385 : vector<256xf32> to vector<1x256xf32>
    %cst_386 = arith.constant 4.000000e+00 : f32
    %387 = vector.broadcast %cst_386 : f32 to vector<1x256xf32>
    %388 = arith.divf %386, %387 : vector<1x256xf32>
    %389 = vector.broadcast %388 : vector<1x256xf32> to vector<4x256xf32>
    %390 = arith.subf %384, %389 : vector<4x256xf32>
    %391 = vector.broadcast %388 : vector<1x256xf32> to vector<4x256xf32>
    %392 = arith.subf %384, %391 : vector<4x256xf32>
    %393 = arith.mulf %390, %392 : vector<4x256xf32>
    %cst_387 = arith.constant dense<0.000000e+00> : vector<256xf32>
    %394 = vector.multi_reduction <add>, %393, %cst_387 [0] : vector<4x256xf32> to vector<256xf32>
    %395 = vector.shape_cast %394 : vector<256xf32> to vector<1x256xf32>
    %cst_388 = arith.constant 4.000000e+00 : f32
    %396 = vector.broadcast %cst_388 : f32 to vector<1x256xf32>
    %397 = arith.divf %395, %396 : vector<1x256xf32>
    %398 = vector.broadcast %388 : vector<1x256xf32> to vector<4x256xf32>
    %399 = arith.subf %384, %398 : vector<4x256xf32>
    %cst_389 = arith.constant 9.99999974E-6 : f32
    %400 = vector.broadcast %cst_389 : f32 to vector<1x256xf32>
    %401 = arith.addf %397, %400 : vector<1x256xf32>
    %402 = math.rsqrt %401 : vector<1x256xf32>
    %403 = vector.broadcast %402 : vector<1x256xf32> to vector<4x256xf32>
    %404 = arith.mulf %399, %403 : vector<4x256xf32>
    %cst_390 = arith.constant 0.000000e+00 : f32
    %405 = vector.broadcast %cst_390 : f32 to vector<4x256xf32>
    %406 = arith.maximumf %404, %405 : vector<4x256xf32>
    %c0_391 = arith.constant 0 : index
    %c0_392 = arith.constant 0 : index
    %407 = vector.load %arg8[%c0_391, %c0_392] : memref<4x256xf32, #tpu.memory_space<vmem>>, vector<4x256xf32>
    %408 = arith.mulf %406, %407 : vector<4x256xf32>
    %cst_393 = arith.constant dense<0.000000e+00> : vector<4xf32>
    %409 = vector.multi_reduction <add>, %408, %cst_393 [1] : vector<4x256xf32> to vector<4xf32>
    %410 = vector.shape_cast %409 : vector<4xf32> to vector<4x1xf32>
    %cst_394 = arith.constant dense<0.000000e+00> : vector<1xf32>
    %411 = vector.multi_reduction <add>, %410, %cst_394 [0] : vector<4x1xf32> to vector<1xf32>
    %412 = vector.shape_cast %411 : vector<1xf32> to vector<1x1xf32>
    %c0_395 = arith.constant 0 : index
    %c0_396 = arith.constant 0 : index
    %c0_397 = arith.constant 0 : index
    %413 = vector.load %arg9[%c0_395, %c0_396, %c0_397] : memref<1x1x1xf32, #tpu.memory_space<vmem>>, vector<1x1x1xf32>
    %414 = vector.shape_cast %413 : vector<1x1x1xf32> to vector<1x1xf32>
    %415 = vector.shape_cast %412 : vector<1x1xf32> to vector<1x1x1xf32>
    tpu.vector_store %arg9[%c0_395, %c0_396, %c0_397], %415 {strides = array<i32>} : memref<1x1x1xf32, #tpu.memory_space<vmem>>, vector<1x1x1xf32>,
    return
  }
  func.func @transform_0(%arg0: i32) -> (i32, i32, i32) {
    %c0_i32 = arith.constant 0 : i32
    %c0_i32_0 = arith.constant 0 : i32
    %c0_i32_1 = arith.constant 0 : i32
    return %arg0, %c0_i32, %c0_i32_0 : i32, i32, i32
  }
  func.func @transform_1(%arg0: i32) -> (i32, i32, i32) {
    %c0_i32 = arith.constant 0 : i32
    %c0_i32_0 = arith.constant 0 : i32
    %c0_i32_1 = arith.constant 0 : i32
    %c0_i32_2 = arith.constant 0 : i32
    return %c0_i32, %c0_i32_0, %c0_i32_1 : i32, i32, i32
  }
  func.func @transform_2(%arg0: i32) -> (i32, i32, i32) {
    %c0_i32 = arith.constant 0 : i32
    %c0_i32_0 = arith.constant 0 : i32
    %c0_i32_1 = arith.constant 0 : i32
    %c0_i32_2 = arith.constant 0 : i32
    return %c0_i32, %c0_i32_0, %c0_i32_1 : i32, i32, i32
  }
  func.func @transform_3(%arg0: i32) -> (i32, i32, i32) {
    %c0_i32 = arith.constant 0 : i32
    %c0_i32_0 = arith.constant 0 : i32
    %c0_i32_1 = arith.constant 0 : i32
    %c0_i32_2 = arith.constant 0 : i32
    return %c0_i32, %c0_i32_0, %c0_i32_1 : i32, i32, i32
  }
  func.func @transform_4(%arg0: i32) -> (i32, i32, i32) {
    %c0_i32 = arith.constant 0 : i32
    %c0_i32_0 = arith.constant 0 : i32
    %c0_i32_1 = arith.constant 0 : i32
    %c0_i32_2 = arith.constant 0 : i32
    return %c0_i32, %c0_i32_0, %c0_i32_1 : i32, i32, i32
  }
  func.func @transform_5(%arg0: i32) -> (i32, i32, i32) {
    %c0_i32 = arith.constant 0 : i32
    %c0_i32_0 = arith.constant 0 : i32
    %c0_i32_1 = arith.constant 0 : i32
    %c0_i32_2 = arith.constant 0 : i32
    return %c0_i32, %c0_i32_0, %c0_i32_1 : i32, i32, i32
  }
  func.func @transform_6(%arg0: i32) -> (i32, i32, i32) {
    %c0_i32 = arith.constant 0 : i32
    %c0_i32_0 = arith.constant 0 : i32
    %c0_i32_1 = arith.constant 0 : i32
    %c0_i32_2 = arith.constant 0 : i32
    return %c0_i32, %c0_i32_0, %c0_i32_1 : i32, i32, i32
  }
  func.func @transform_7(%arg0: i32) -> (i32, i32) {
    %c0_i32 = arith.constant 0 : i32
    %c0_i32_0 = arith.constant 0 : i32
    %c0_i32_1 = arith.constant 0 : i32
    return %c0_i32, %c0_i32_0 : i32, i32
  }
  func.func @transform_8(%arg0: i32) -> (i32, i32, i32) {
    %c0_i32 = arith.constant 0 : i32
    %c0_i32_0 = arith.constant 0 : i32
    %c0_i32_1 = arith.constant 0 : i32
    return %arg0, %c0_i32, %c0_i32_0 : i32, i32, i32
  }
}

</mosaic_0001>

<bundles_post_ra>
// kernel: patch_discriminator.1
= control target key start
LH: loop header
LB: loop body
LE: loop exit
PB: predicated region body
PF: predicated region fallthrough
CT: control target
= control target key end

     0   :  { %13 = vsyncpa [#allocation3], 0  ;;  %s15563_s0 = inlined_call_operand.vmem [shape: f32[2,256,3], index: 0, kind: input, shape index: {}]   ;;  %s15564_s1 = inlined_call_operand.hbm [shape: f32[16,64,256], index: 1, kind: input, shape index: {}]   ;;  %s15565_s2 = inlined_call_operand.vmem [shape: f32[16,3,64], index: 2, kind: input, shape index: {}]   ;;  %s15566_s3 = inlined_call_operand.hbm [shape: f32[16,16,64], index: 3, kind: input, shape index: {}]   ;;  %s15567_s4 = inlined_call_operand.hbm [shape: f32[16,64,128], index: 4, kind: input, shape index: {}]   ;;  %s15568_s5 = inlined_call_operand.hbm [shape: f32[16,4,16], index: 5, kind: input, shape index: {}]   ;;  %s15569_s6 = inlined_call_operand.hbm [shape: f32[16,128,256], index: 6, kind: input, shape index: {}]   ;;  %s15570_s7 = inlined_call_operand.hbm [shape: f32[4,256], index: 7, kind: input, shape index: {}]   ;;  %s15571_s8 = inlined_call_operand.vmem [shape: f32[2,1,1], index: 8, kind: output, shape index: {}]  }
   0x1   :  { %14 = vsyncpa [#allocation5], 0 }
   0x2   :  { %15 = vsyncpa [#allocation8], 0 }
   0x3   :  { %16 = vsyncpa [#allocation11], 0  ;;  %s13611_s27 = smov 0  }
   0x4 LB: > { %s13552_s28 = smov [#allocation4]   ;;  %s13617_s30 = sadd.s32 4294967295, %s13550_s27   ;;  %s13550_s27 = sphi %s13611_s27, %s22_s27  }
   0x5   : > { %s254_s29 = sshll.u32 %s13552_s28, 4  ;;  %p10611_p0 = scmp.ge.s32.totalorder %s13550_s27, 1  ;;  %s255_s29 = int_to_ptr.vmem [resolvable:$true] %s254_s29 }
   0x6   : > { %p226_p1 = scmp.lt.s32.totalorder %s13550_s27, 3  ;;  %p13265_p2 = scmp.eq.s32.totalorder %s13617_s30, 0 }
   0x7   : > { %s13553_s10 = smov [#allocation7]   ;;  %s13554_s13 = smov [#allocation2]  }
   0x8   : > { %p13622_p3 = pnand %p10611_p0, %p226_p1  ;;  %s280_s11 = sshll.u32 %s13553_s10, 4  ;;  %s13628_s11 = int_to_ptr.vmem [resolvable:$true] %s280_s11 }
   0x9   : > { %s13636_s14 = sshll.u32 %s13554_s13, 4  ;;  %s13383_s16 = scalar_lea.vmem %s255_s29, 4096  ;;  %s239_s14 = int_to_ptr.vmem [resolvable:$true] %s13636_s14 }
   0xa   : > { %p13246_p4 = pneg %p13622_p3  ;;  %p13384_p7 = scmp.ne.s32.totalorder %s255_s29, %s13383_s16 }
   0xb   : > { %p13391_p10 = scmp.lt.s32.totalorder %s255_s29, %s255_s29  ;;  %p13392_p11 = scmp.lt.s32.totalorder %s13383_s16, %s13383_s16 }
   0xc   : > { %p13632_p5 = pnand %p13265_p2, %p13246_p4 }
   0xd   : > { %p13393_p12 = por %p13392_p11, %p13391_p10 }
   0xe   : > { %p13640_p6 = pneg %p13632_p5 }
  0x10   : > { %p13386_p8 = pnand %p13384_p7, %p13640_p6 }
  0x12   : > { %p13387_p9 = pneg %p13386_p8 }
  0x14   : > { %p13394_p13 = pnand %p13393_p12, %p13387_p9 }
  0x16   : > { %13397 = shalt.err (!%p13394_p13)
}
  0x17   : > { %s13555_s17 = smov 128   ;;  %s13556_s18 = smov 8  }
  0x18   : > { %13252 = dma.hbm_to_vmem [thread:$0]  (!%p13632_p5), %s15566_s3, 4096, %s255_s29, [#allocation5], %s13555_s17, %s13555_s17, %s13556_s18  }
  0x19   : > { %s13409_s21 = scalar_lea.vmem %s13628_s11, 1024  ;;  %p13417_p7 = scmp.lt.s32.totalorder %s13628_s11, %s13628_s11 }
  0x1a   : > { %p13410_p0 = scmp.ne.s32.totalorder %s13628_s11, %s13409_s21  ;;  %p13418_p8 = scmp.lt.s32.totalorder %s13409_s21, %s13409_s21 }
  0x1c   : > { %p13412_p1 = pnand %p13410_p0, %p13640_p6  ;;  %p13419_p9 = por %p13418_p8, %p13417_p7 }
  0x1e   : > { %p13413_p4 = pneg %p13412_p1 }
  0x20   : > { %p13420_p10 = pnand %p13419_p9, %p13413_p4 }
  0x22   : > { %13423 = shalt.err (!%p13420_p10)
}
  0x23   : > { %s13557_s22 = smov 64   ;;  %s13558_s23 = smov 4  }
  0x24   : > { %13258 = dma.hbm_to_vmem [thread:$0]  (!%p13632_p5), %s15568_s5, 1024, %s13628_s11, [#allocation8], %s13557_s22, %s13557_s22, %s13558_s23  }
  0x25   : > { %s13435_s26 = scalar_lea.vmem %s239_s14, 32768  ;;  %p13443_p0 = scmp.lt.s32.totalorder %s239_s14, %s239_s14 }
  0x26   : > { %p13436_p11 = scmp.ne.s32.totalorder %s239_s14, %s13435_s26  ;;  %p13444_p1 = scmp.lt.s32.totalorder %s13435_s26, %s13435_s26 }
  0x28   : > { %p13438_p12 = pnand %p13436_p11, %p13640_p6  ;;  %p13445_p4 = por %p13444_p1, %p13443_p0 }
  0x2a   : > { %p13439_p13 = pneg %p13438_p12 }
  0x2c   : > { %p13446_p7 = pnand %p13445_p4, %p13439_p13 }
  0x2e   : > { %13449 = shalt.err (!%p13446_p7)
}
  0x2f   : > { %s13559_s28 = smov 256   ;;  %s13560_s29 = smov 16  }
  0x30   : > { %13249 = dma.hbm_to_vmem [thread:$0]  (!%p13632_p5), %s15564_s1, 32768, %s239_s14, [#allocation3], %s13559_s28, %s13559_s28, %s13560_s29  }
  0x31   : > { %s13561_s13 = smov [#allocation6]   ;;  %s13562_s19 = smov [#allocation9]  }
  0x32   : > { %s267_s16 = sshll.u32 %s13561_s13, 4  ;;  %s293_s20 = sshll.u32 %s13562_s19, 4  ;;  %s268_s16 = int_to_ptr.vmem [resolvable:$true] %s267_s16  ;;  %s294_s20 = int_to_ptr.vmem [resolvable:$true] %s293_s20 }
  0x33   : > { %s13461_s21 = scalar_lea.vmem %s268_s16, 16384  ;;  %p13469_p11 = scmp.lt.s32.totalorder %s268_s16, %s268_s16 }
  0x34   : > { %p13462_p8 = scmp.ne.s32.totalorder %s268_s16, %s13461_s21  ;;  %p13470_p12 = scmp.lt.s32.totalorder %s13461_s21, %s13461_s21 }
  0x36   : > { %p13464_p9 = pnand %p13462_p8, %p13640_p6  ;;  %p13471_p13 = por %p13470_p12, %p13469_p11 }
  0x38   : > { %p13465_p10 = pneg %p13464_p9 }
  0x3a   : > { %p13472_p0 = pnand %p13471_p13, %p13465_p10 }
  0x3c   : > { %13475 = shalt.err (!%p13472_p0)
}
  0x3d   : > { %13255 = dma.hbm_to_vmem [thread:$0]  (!%p13632_p5), %s15567_s4, 16384, %s268_s16, [#allocation5], %s13555_s17, %s13555_s17, %s13556_s18  }
  0x3e   : > { %s13487_s23 = scalar_lea.vmem %s294_s20, 65536  ;;  %p13495_p8 = scmp.lt.s32.totalorder %s294_s20, %s294_s20 }
  0x3f   : > { %p13488_p1 = scmp.ne.s32.totalorder %s294_s20, %s13487_s23  ;;  %p13496_p9 = scmp.lt.s32.totalorder %s13487_s23, %s13487_s23 }
  0x41   : > { %p13490_p4 = pnand %p13488_p1, %p13640_p6  ;;  %p13497_p11 = por %p13496_p9, %p13495_p8 }
  0x43   : > { %p13491_p7 = pneg %p13490_p4 }
  0x45   : > { %p13498_p10 = pnand %p13497_p11, %p13491_p7 }
  0x47   : > { %13501 = shalt.err (!%p13498_p10)
}
  0x48   : > { %13261 = dma.hbm_to_vmem [thread:$0]  (!%p13632_p5), %s15569_s6, 65536, %s294_s20, [#allocation8], %s13559_s28, %s13559_s28, %s13560_s29  }
  0x49   : > { %s13563_s17 = smov [#allocation10]  }
  0x4a   : > { %s307_s18 = sshll.u32 %s13563_s17, 4  ;;  %s308_s18 = int_to_ptr.vmem [resolvable:$true] %s307_s18 }
  0x4b   : > { %s13513_s26 = scalar_lea.vmem %s308_s18, 128  ;;  %p13521_p1 = scmp.lt.s32.totalorder %s308_s18, %s308_s18 }
  0x4c   : > { %p13514_p12 = scmp.ne.s32.totalorder %s308_s18, %s13513_s26  ;;  %p13522_p4 = scmp.lt.s32.totalorder %s13513_s26, %s13513_s26 }
  0x4e   : > { %p13516_p13 = pnand %p13514_p12, %p13640_p6  ;;  %p13523_p7 = por %p13522_p4, %p13521_p1 }
  0x50   : > { %p13517_p0 = pneg %p13516_p13 }
  0x52   : > { %p13524_p8 = pnand %p13523_p7, %p13517_p0 }
  0x54   : > { %13527 = shalt.err (!%p13524_p8)
}
  0x55   : > { %13264 = dma.hbm_to_vmem [thread:$0]  (!%p13632_p5), %s15570_s7, 128, %s308_s18, [#allocation11]  }
  0x56   : > { %328 = sbr.rel (%p13622_p3) target bundleno = 5563 (0x15bb), region = 52 }
  0x5b   : > { %13533 = dma.done.wait (%p13265_p2), [#allocation3], 32768  }
  0x5c   : > { %13535 = vsyncadd (%p13265_p2), [#allocation3], 4294934528 }
  0x5d   : > { %13537 = dma.done.wait (%p13265_p2), [#allocation5], 20480  }
  0x5e   : > { %13539 = vsyncadd (%p13265_p2), [#allocation5], 4294946816 }
  0x5f   : > { %13541 = dma.done.wait (%p13265_p2), [#allocation8], 66560  }
  0x60   : > { %13543 = vsyncadd (%p13265_p2), [#allocation8], 4294900736 }
  0x61   : > { %13545 = dma.done.wait (%p13265_p2), [#allocation11], 128  }
  0x62   : > { %13547 = vsyncadd (%p13265_p2), [#allocation11], 4294967168  ;;  %p380_p3 = scmp.lt.s32.totalorder %s13617_s30, 1  ;;  %v421_v32 = vld [vmem:[#allocation2 + $0x8] sm:$0xff]  ;;  %v420_v34 = vld [vmem:[#allocation2] sm:$0xff]  ;;  %vm691_vm0 = vcmask 1042432  }
  0x63   : > { %v544_v33 = vld [vmem:[#allocation2 + $0x88] sm:$0xff]  ;;  %v543_v35 = vld [vmem:[#allocation2 + $0x80] sm:$0xff]  ;;  %500 = vmatprep.mubr.f32.mxu0 %v421_v32  ;;  %v423_v36 = vld [vmem:[#allocation2 + $0x18] sm:$0xff]  ;;  %vm666_vm1 = vcmask 23552   ;;  %vm4628_vm2 = vcmask 523264   ;;  %vm13565_vm3 = vmmov 0  }
  0x64   : > { %s15652_s30 = smov (!%p380_p3, %s13617_s30), 1  ;;  %v546_v37 = vld [vmem:[#allocation2 + $0x98] sm:$0xff]  ;;  %623 = vmatprep.mubr.f32.mxu1 %v544_v33  ;;  %v10628_v38 = vld [vmem:[%s15565_s2 + $0x4] sm:$0x7]  ;;  %v422_v39 = vld [vmem:[#allocation2 + $0x10] sm:$0xff]  ;;  %vm7546_vm4 = vcmask 130048  }
  0x65   : > { %s10869_s9 = sshll.u32 %s15652_s30, 8  ;;  %v545_v40 = vld [vmem:[#allocation2 + $0x90] sm:$0xff]  ;;  %v425_v41 = vld [vmem:[#allocation2 + $0x28] sm:$0xff]  ;;  %v424_v43 = vld [vmem:[#allocation2 + $0x20] sm:$0xff]  ;;  %vm10436_vm5 = vcmask 1043456   ;;  %s387_s10 = scalar_lea.vmem %s15571_s8, %s15652_s30  ;;  %vm10500_vm6 = vcmask 0  }
  0x66   : > { %s13730_s28 = scalar_lea.vmem %s15563_s0, %s10869_s9  ;;  %v548_v42 = vld [vmem:[#allocation2 + $0xa8] sm:$0xff]  ;;  %v547_v44 = vld [vmem:[#allocation2 + $0xa0] sm:$0xff]  ;;  %v427_v45 = vld [vmem:[#allocation2 + $0x38] sm:$0xff] }
  0x67   : > { %v13733_v0 = vld [vmem:[%s13730_s28 + $0xf8] sm:$0xff]  ;;  %v13739_v2 = vld [vmem:[%s13730_s28 + $0xf0] sm:$0xff]  ;;  %v13749_v4 = vld [vmem:[%s13730_s28 + $0xe8] sm:$0xff] }
  0x68   : > { %v13736_v1 = vld [vmem:[%s13730_s28 + $0x78] sm:$0xff]  ;;  %10870 = vmatprep.subr.mxu0 %v13733_v0  ;;  %10926 = vmatprep.subr.mxu1 %v13733_v0  ;;  %v13744_v3 = vld [vmem:[%s13730_s28 + $0x70] sm:$0xff]  ;;  %v13754_v5 = vld [vmem:[%s13730_s28 + $0x68] sm:$0xff] }
  0x69   : > { %10871 = vmatpush3.msra.mxu0 %v13736_v1  ;;  %10927 = vmatpush3.msra.mxu1 %v13736_v1  ;;  %v13759_v6 = vld [vmem:[%s13730_s28 + $0xe0] sm:$0xff]  ;;  %v13769_v8 = vld [vmem:[%s13730_s28 + $0xd8] sm:$0xff]  ;;  %v13779_v10 = vld [vmem:[%s13730_s28 + $0xd0] sm:$0xff] }
  0x6a   : > { %10872 = vmatprep.subr.mxu0 %v13739_v2  ;;  %10928 = vmatprep.subr.mxu1 %v13739_v2  ;;  %v13764_v7 = vld [vmem:[%s13730_s28 + $0x60] sm:$0xff]  ;;  %v13774_v9 = vld [vmem:[%s13730_s28 + $0x58] sm:$0xff]  ;;  %v13784_v11 = vld [vmem:[%s13730_s28 + $0x50] sm:$0xff] }
  0x6b   : > { %10873 = vmatpush3.msra.mxu0 %v13744_v3  ;;  %10929 = vmatpush3.msra.mxu1 %v13744_v3  ;;  %v13789_v12 = vld [vmem:[%s13730_s28 + $0xc8] sm:$0xff]  ;;  %v13799_v14 = vld [vmem:[%s13730_s28 + $0xc0] sm:$0xff]  ;;  %v13809_v16 = vld [vmem:[%s13730_s28 + $0xb8] sm:$0xff] }
  0x6c   : > { %10874 = vmatprep.subr.mxu0 %v13749_v4  ;;  %10930 = vmatprep.subr.mxu1 %v13749_v4  ;;  %v13794_v13 = vld [vmem:[%s13730_s28 + $0x48] sm:$0xff]  ;;  %v13804_v15 = vld [vmem:[%s13730_s28 + $0x40] sm:$0xff]  ;;  %v13814_v17 = vld [vmem:[%s13730_s28 + $0x38] sm:$0xff] }
  0x6d   : > { %10875 = vmatpush3.msra.mxu0 %v13754_v5  ;;  %10931 = vmatpush3.msra.mxu1 %v13754_v5  ;;  %v13819_v18 = vld [vmem:[%s13730_s28 + $0xb0] sm:$0xff]  ;;  %v13829_v20 = vld [vmem:[%s13730_s28 + $0xa8] sm:$0xff]  ;;  %v13839_v22 = vld [vmem:[%s13730_s28 + $0xa0] sm:$0xff] }
  0x6e   : > { %10876 = vmatprep.subr.mxu0 %v13759_v6  ;;  %10932 = vmatprep.subr.mxu1 %v13759_v6  ;;  %v13824_v19 = vld [vmem:[%s13730_s28 + $0x30] sm:$0xff]  ;;  %v13834_v21 = vld [vmem:[%s13730_s28 + $0x28] sm:$0xff]  ;;  %v13844_v23 = vld [vmem:[%s13730_s28 + $0x20] sm:$0xff] }
  0x6f   : > { %10877 = vmatpush3.msra.mxu0 %v13764_v7  ;;  %10933 = vmatpush3.msra.mxu1 %v13764_v7  ;;  %v13849_v24 = vld [vmem:[%s13730_s28 + $0x98] sm:$0xff]  ;;  %v13859_v26 = vld [vmem:[%s13730_s28 + $0x90] sm:$0xff]  ;;  %v13869_v28 = vld [vmem:[%s13730_s28 + $0x88] sm:$0xff] }
  0x70   : > { %10878 = vmatprep.subr.mxu0 %v13769_v8  ;;  %10934 = vmatprep.subr.mxu1 %v13769_v8  ;;  %v13854_v25 = vld [vmem:[%s13730_s28 + $0x18] sm:$0xff]  ;;  %v13864_v27 = vld [vmem:[%s13730_s28 + $0x10] sm:$0xff]  ;;  %v13874_v29 = vld [vmem:[%s13730_s28 + $0x8] sm:$0xff] }
  0x71   : > { %10879 = vmatpush3.msra.mxu0 %v13774_v9  ;;  %10935 = vmatpush3.msra.mxu1 %v13774_v9  ;;  %v13879_v30 = vld [vmem:[%s13730_s28 + $0x80] sm:$0xff]  ;;  %v550_v46 = vld [vmem:[#allocation2 + $0xb8] sm:$0xff]  ;;  %v426_v47 = vld [vmem:[#allocation2 + $0x30] sm:$0xff] }
  0x72   : > { %10880 = vmatprep.subr.mxu0 %v13779_v10  ;;  %10936 = vmatprep.subr.mxu1 %v13779_v10  ;;  %v13884_v31 = vld [vmem:[%s13730_s28] sm:$0xff]  ;;  %v549_v48 = vld [vmem:[#allocation2 + $0xb0] sm:$0xff]  ;;  %v429_v49 = vld [vmem:[#allocation2 + $0x48] sm:$0xff] }
  0x73   : > { %10881 = vmatpush3.msra.mxu0 %v13784_v11  ;;  %10937 = vmatpush3.msra.mxu1 %v13784_v11  ;;  %v552_v50 = vld [vmem:[#allocation2 + $0xc8] sm:$0xff]  ;;  %v428_v51 = vld [vmem:[#allocation2 + $0x40] sm:$0xff]  ;;  %v431_v53 = vld [vmem:[#allocation2 + $0x58] sm:$0xff] }
  0x74   : > { %10882 = vmatprep.subr.mxu0 %v13789_v12  ;;  %10938 = vmatprep.subr.mxu1 %v13789_v12  ;;  %v551_v52 = vld [vmem:[#allocation2 + $0xc0] sm:$0xff]  ;;  %v554_v54 = vld [vmem:[#allocation2 + $0xd8] sm:$0xff]  ;;  %v430_v55 = vld [vmem:[#allocation2 + $0x50] sm:$0xff] }
  0x75   : > { %10883 = vmatpush3.msra.mxu0 %v13794_v13  ;;  %10939 = vmatpush3.msra.mxu1 %v13794_v13  ;;  %v553_v56 = vld [vmem:[#allocation2 + $0xd0] sm:$0xff]  ;;  %v433_v57 = vld [vmem:[#allocation2 + $0x68] sm:$0xff]  ;;  %v432_v59 = vld [vmem:[#allocation2 + $0x60] sm:$0xff] }
  0x76   : > { %10884 = vmatprep.subr.mxu0 %v13799_v14  ;;  %10940 = vmatprep.subr.mxu1 %v13799_v14  ;;  %v556_v58 = vld [vmem:[#allocation2 + $0xe8] sm:$0xff]  ;;  %v555_v60 = vld [vmem:[#allocation2 + $0xe0] sm:$0xff]  ;;  %v435_v61 = vld [vmem:[#allocation2 + $0x78] sm:$0xff] }
  0x77   : > { %10885 = vmatpush3.msra.mxu0 %v13804_v15  ;;  %10941 = vmatpush3.msra.mxu1 %v13804_v15  ;;  %v558_v62 = vld [vmem:[#allocation2 + $0xf8] sm:$0xff]  ;;  %v434_v63 = vld [vmem:[#allocation2 + $0x70] sm:$0xff]  ;;  %v541_v33 = vld [vmem:[%s15565_s2] sm:$0x7] }
  0x78   : > { %10886 = vmatprep.subr.mxu0 %v13809_v16  ;;  %10942 = vmatprep.subr.mxu1 %v13809_v16  ;;  %v557_v32 = vld [vmem:[#allocation2 + $0xf0] sm:$0xff] }
  0x79   : > { %10887 = vmatpush3.msra.mxu0 %v13814_v17  ;;  %10943 = vmatpush3.msra.mxu1 %v13814_v17 }
  0x7a   : > { %10888 = vmatprep.subr.mxu0 %v13819_v18  ;;  %10944 = vmatprep.subr.mxu1 %v13819_v18 }
  0x7b   : > { %10889 = vmatpush3.msra.mxu0 %v13824_v19  ;;  %10945 = vmatpush3.msra.mxu1 %v13824_v19 }
  0x7c   : > { %10890 = vmatprep.subr.mxu0 %v13829_v20  ;;  %10946 = vmatprep.subr.mxu1 %v13829_v20 }
  0x7d   : > { %10891 = vmatpush3.msra.mxu0 %v13834_v21  ;;  %10947 = vmatpush3.msra.mxu1 %v13834_v21 }
  0x7e   : > { %10892 = vmatprep.subr.mxu0 %v13839_v22  ;;  %10948 = vmatprep.subr.mxu1 %v13839_v22 }
  0x7f   : > { %10893 = vmatpush3.msra.mxu0 %v13844_v23  ;;  %10949 = vmatpush3.msra.mxu1 %v13844_v23 }
  0x80   : > { %10894 = vmatprep.subr.mxu0 %v13849_v24  ;;  %10950 = vmatprep.subr.mxu1 %v13849_v24 }
  0x81   : > { %10895 = vmatpush3.msra.mxu0 %v13854_v25  ;;  %10951 = vmatpush3.msra.mxu1 %v13854_v25 }
  0x82   : > { %10896 = vmatprep.subr.mxu0 %v13859_v26  ;;  %10952 = vmatprep.subr.mxu1 %v13859_v26 }
  0x83   : > { %10897 = vmatpush3.msra.mxu0 %v13864_v27  ;;  %10953 = vmatpush3.msra.mxu1 %v13864_v27 }
  0x84   : > { %10898 = vmatprep.subr.mxu0 %v13869_v28  ;;  %10954 = vmatprep.subr.mxu1 %v13869_v28 }
  0x85   : > { %10899 = vmatpush3.msra.mxu0 %v13874_v29  ;;  %10955 = vmatpush3.msra.mxu1 %v13874_v29 }
  0x86   : > { %10900 = vmatprep.subr.mxu0 %v13879_v30  ;;  %10956 = vmatprep.subr.mxu1 %v13879_v30 }
  0x87   : > { %10901 = vmatpush3.msra.mxu0 %v13884_v31  ;;  %10957 = vmatpush3.msra.mxu1 %v13884_v31 }
  0x88   : > { %501 = vmatmul.mubr.f32.vlgmr.msra.gmra.mxu0 %v420_v34  ;;  %624 = vmatmul.mubr.f32.vlgmr.msra.gmra.mxu1 %v543_v35 }
  0x89   : > { %505 = vmatprep.mubr.f32.mxu0 %v423_v36  ;;  %628 = vmatprep.mubr.f32.mxu1 %v546_v37 }
  0x8a   : > { %12278 = vmatprep.subr.msk.mxu0 %vm691_vm0, %v10628_v38  ;;  %12292 = vmatprep.subr.msk.mxu1 %vm691_vm0, %v541_v33 }
  0x8b   : > { %12279 = vmatpush3.msk.msra.mxu0 %vm691_vm0, %v10628_v38  ;;  %12293 = vmatpush3.msk.msra.mxu1 %vm691_vm0, %v541_v33 }
  0x8c   : > { %506 = vmatmul.mubr.f32.gmra.mxu0 %v422_v39  ;;  %629 = vmatmul.mubr.f32.gmra.mxu1 %v545_v40 }
  0x8d   : > { %510 = vmatprep.mubr.f32.mxu0 %v425_v41  ;;  %633 = vmatprep.mubr.f32.mxu1 %v548_v42 }
  0x8e   : > { %11000 = vmatprep.subr.mxu0 %v13733_v0 }
  0x90   : > { %511 = vmatmul.mubr.f32.gmra.mxu0 %v424_v43  ;;  %634 = vmatmul.mubr.f32.gmra.mxu1 %v547_v44 }
  0x91   : > { %515 = vmatprep.mubr.f32.mxu0 %v427_v45  ;;  %638 = vmatprep.mubr.f32.mxu1 %v550_v46 }
  0x94   : > { %516 = vmatmul.mubr.f32.gmra.mxu0 %v426_v47  ;;  %639 = vmatmul.mubr.f32.gmra.mxu1 %v549_v48 }
  0x95   : > { %520 = vmatprep.mubr.f32.mxu0 %v429_v49  ;;  %643 = vmatprep.mubr.f32.mxu1 %v552_v50 }
  0x98   : > { %521 = vmatmul.mubr.f32.gmra.mxu0 %v428_v51  ;;  %644 = vmatmul.mubr.f32.gmra.mxu1 %v551_v52 }
  0x99   : > { %525 = vmatprep.mubr.f32.mxu0 %v431_v53  ;;  %648 = vmatprep.mubr.f32.mxu1 %v554_v54 }
  0x9c   : > { %526 = vmatmul.mubr.f32.gmra.mxu0 %v430_v55  ;;  %649 = vmatmul.mubr.f32.gmra.mxu1 %v553_v56 }
  0x9d   : > { %530 = vmatprep.mubr.f32.mxu0 %v433_v57  ;;  %653 = vmatprep.mubr.f32.mxu1 %v556_v58 }
  0xa0   : > { %531 = vmatmul.mubr.f32.gmra.mxu0 %v432_v59  ;;  %654 = vmatmul.mubr.f32.gmra.mxu1 %v555_v60 }
  0xa1   : > { %535 = vmatprep.mubr.f32.mxu0 %v435_v61  ;;  %658 = vmatprep.mubr.f32.mxu1 %v558_v62 }
  0xa4   : > { %536 = vmatmul.mubr.f32.gmra.mxu0 %v434_v63  ;;  %659 = vmatmul.mubr.f32.gmra.mxu1 %v557_v32 }
 0x148   : > { %v10902_v34 = vpop.f32.mrf.mxu0  ;;  %v10958_v35 = vpop.f32.mrf.mxu1 }
 0x14a   : > { %v10903_v36 = vpop.f32.mrf.mxu0  ;;  %v10959_v37 = vpop.f32.mrf.mxu1 }
 0x14b   : > { %v10904_v38 = vadd.f32 %v10903_v36, %v10902_v34  ;;  %v10960_v39 = vadd.f32 %v10959_v37, %v10958_v35 }
 0x14c   : > { %v10905_v40 = vpop.f32.mrf.mxu0  ;;  %v10961_v41 = vpop.f32.mrf.mxu1 }
 0x14d   : > { %12280 = vmatprep.mubr.msk.f32.mxu0 %vm666_vm1, %v10960_v39  ;;  %12294 = vmatprep.mubr.msk.f32.mxu1 %vm666_vm1, %v10904_v38 }
 0x14e   : > { %v10906_v42 = vpop.f32.mrf.mxu0  ;;  %v10962_v43 = vpop.f32.mrf.mxu1 }
 0x14f   : > { %v10907_v44 = vadd.f32 %v10906_v42, %v10905_v40  ;;  %v10963_v45 = vadd.f32 %v10962_v43, %v10961_v41 }
 0x150   : > { %v10908_v46 = vpop.f32.mrf.mxu0  ;;  %v10964_v47 = vpop.f32.mrf.mxu1 }
 0x151   : > { %12281 = vmatmul.mubr.msk.f32.vlgmr.msra.gmra.mxu0 %vm666_vm1, %v10963_v45  ;;  %12295 = vmatmul.mubr.msk.f32.vlgmr.msra.gmra.mxu1 %vm666_vm1, %v10907_v44 }
 0x152   : > { %11001 = vmatpush3.msra.mxu0 %v13736_v1  ;;  %v10909_v48 = vpop.f32.mrf.mxu0  ;;  %v10965_v49 = vpop.f32.mrf.mxu1 }
 0x153   : > { %v10910_v50 = vadd.f32 %v10909_v48, %v10908_v46  ;;  %v10966_v51 = vadd.f32 %v10965_v49, %v10964_v47  ;;  %11002 = vmatprep.subr.mxu0 %v13739_v2 }
 0x154   : > { %11003 = vmatpush3.msra.mxu0 %v13744_v3  ;;  %v10911_v52 = vpop.f32.mrf.mxu0  ;;  %v10967_v53 = vpop.f32.mrf.mxu1 }
 0x155   : > { %11004 = vmatprep.subr.mxu0 %v13749_v4  ;;  %12283 = vmatprep.mubr.msk.f32.mxu0 %vm666_vm1, %v10966_v51  ;;  %v933_v51 = vld [vmem:[#allocation2 + $0x100] sm:$0xff] }
 0x156   : > { %11005 = vmatpush3.msra.mxu0 %v13754_v5  ;;  %v10912_v54 = vpop.f32.mrf.mxu0  ;;  %v10968_v55 = vpop.f32.mrf.mxu1  ;;  %12297 = vmatprep.mubr.msk.f32.mxu1 %vm666_vm1, %v10910_v50  ;;  %v934_v50 = vld [vmem:[#allocation2 + $0x108] sm:$0xff] }
 0x157   : > { %v10913_v56 = vadd.f32 %v10912_v54, %v10911_v52  ;;  %v10969_v57 = vadd.f32 %v10968_v55, %v10967_v53  ;;  %11006 = vmatprep.subr.mxu0 %v13759_v6  ;;  %v936_v52 = vld [vmem:[#allocation2 + $0x118] sm:$0xff]  ;;  %v935_v53 = vld [vmem:[#allocation2 + $0x110] sm:$0xff]  ;;  %v938_v54 = vld [vmem:[#allocation2 + $0x128] sm:$0xff] }
 0x158   : > { %11007 = vmatpush3.msra.mxu0 %v13764_v7  ;;  %v10914_v58 = vpop.f32.mrf.mxu0  ;;  %v10970_v59 = vpop.f32.mrf.mxu1  ;;  %v937_v55 = vld [vmem:[#allocation2 + $0x120] sm:$0xff] }
 0x159   : > { %11008 = vmatprep.subr.mxu0 %v13769_v8  ;;  %12284 = vmatmul.mubr.msk.f32.gmra.mxu0 %vm666_vm1, %v10969_v57  ;;  %v939_v57 = vld [vmem:[#allocation2 + $0x130] sm:$0xff] }
 0x15a   : > { %12298 = vmatmul.mubr.msk.f32.gmra.mxu1 %vm666_vm1, %v10913_v56  ;;  %11009 = vmatpush3.msra.mxu0 %v13774_v9  ;;  %v10915_v60 = vpop.f32.mrf.mxu0  ;;  %v10971_v61 = vpop.f32.mrf.mxu1  ;;  %v940_v56 = vld [vmem:[#allocation2 + $0x138] sm:$0xff] }
 0x15b   : > { %v10916_v62 = vadd.f32 %v10915_v60, %v10914_v58  ;;  %v10972_v63 = vadd.f32 %v10971_v61, %v10970_v59  ;;  %11010 = vmatprep.subr.mxu0 %v13779_v10  ;;  %v942_v58 = vld [vmem:[#allocation2 + $0x148] sm:$0xff]  ;;  %v941_v59 = vld [vmem:[#allocation2 + $0x140] sm:$0xff]  ;;  %v944_v60 = vld [vmem:[#allocation2 + $0x158] sm:$0xff] }
 0x15c   : > { %11011 = vmatpush3.msra.mxu0 %v13784_v11  ;;  %v10917_v32 = vpop.f32.mrf.mxu0  ;;  %v10973_v33 = vpop.f32.mrf.mxu1  ;;  %v943_v61 = vld [vmem:[#allocation2 + $0x150] sm:$0xff] }
 0x15d   : > { %11012 = vmatprep.subr.mxu0 %v13789_v12  ;;  %12286 = vmatprep.mubr.msk.f32.mxu0 %vm666_vm1, %v10972_v63  ;;  %v945_v63 = vld [vmem:[#allocation2 + $0x160] sm:$0xff] }
 0x15e   : > { %11013 = vmatpush3.msra.mxu0 %v13794_v13  ;;  %v10918_v34 = vpop.f32.mrf.mxu0  ;;  %v10974_v35 = vpop.f32.mrf.mxu1  ;;  %12300 = vmatprep.mubr.msk.f32.mxu1 %vm666_vm1, %v10916_v62  ;;  %v946_v62 = vld [vmem:[#allocation2 + $0x168] sm:$0xff] }
 0x15f   : > { %v10919_v36 = vadd.f32 %v10918_v34, %v10917_v32  ;;  %v10975_v37 = vadd.f32 %v10974_v35, %v10973_v33  ;;  %11014 = vmatprep.subr.mxu0 %v13799_v14  ;;  %v948_v32 = vld [vmem:[#allocation2 + $0x178] sm:$0xff]  ;;  %v947_v33 = vld [vmem:[#allocation2 + $0x170] sm:$0xff]  ;;  %v10647_v34 = vld [vmem:[%s15565_s2 + $0x8] sm:$0x7] }
 0x160   : > { %11015 = vmatpush3.msra.mxu0 %v13804_v15  ;;  %v10920_v38 = vpop.f32.mrf.mxu0  ;;  %v10976_v39 = vpop.f32.mrf.mxu1  ;;  %12306 = vmatprep.subr.msk.mxu1 %vm691_vm0, %v10647_v34 }
 0x161   : > { %11016 = vmatprep.subr.mxu0 %v13809_v16  ;;  %12287 = vmatmul.mubr.msk.f32.gmra.mxu0 %vm666_vm1, %v10975_v37 }
 0x162   : > { %12301 = vmatmul.mubr.msk.f32.gmra.mxu1 %vm666_vm1, %v10919_v36  ;;  %11017 = vmatpush3.msra.mxu0 %v13814_v17  ;;  %v10921_v40 = vpop.f32.mrf.mxu0  ;;  %v10977_v41 = vpop.f32.mrf.mxu1 }
 0x163   : > { %v10922_v42 = vadd.f32 %v10921_v40, %v10920_v38  ;;  %v10978_v43 = vadd.f32 %v10977_v41, %v10976_v39  ;;  %11018 = vmatprep.subr.mxu0 %v13819_v18  ;;  %12307 = vmatpush3.msk.msra.mxu1 %vm691_vm0, %v10647_v34 }
 0x164   : > { %11019 = vmatpush3.msra.mxu0 %v13824_v19  ;;  %v10923_v44 = vpop.f32.mrf.mxu0  ;;  %v10979_v45 = vpop.f32.mrf.mxu1  ;;  %11065 = vmatprep.subr.mxu1 %v13733_v0 }
 0x165   : > { %11020 = vmatprep.subr.mxu0 %v13829_v20  ;;  %12289 = vmatprep.mubr.msk.f32.mxu0 %vm666_vm1, %v10978_v43 }
 0x166   : > { %11021 = vmatpush3.msra.mxu0 %v13834_v21  ;;  %v10924_v46 = vpop.f32.mrf.mxu0  ;;  %v10980_v47 = vpop.f32.mrf.mxu1  ;;  %12303 = vmatprep.mubr.msk.f32.mxu1 %vm666_vm1, %v10922_v42 }
 0x167   : > { %v10925_v48 = vadd.f32 %v10924_v46, %v10923_v44  ;;  %v10981_v49 = vadd.f32 %v10980_v47, %v10979_v45  ;;  %11022 = vmatprep.subr.mxu0 %v13839_v22 }
 0x168   : > { %11023 = vmatpush3.msra.mxu0 %v13844_v23 }
 0x169   : > { %11024 = vmatprep.subr.mxu0 %v13849_v24  ;;  %12290 = vmatmul.mubr.msk.f32.gmra.mxu0 %vm666_vm1, %v10981_v49 }
 0x16a   : > { %12304 = vmatmul.mubr.msk.f32.gmra.mxu1 %vm666_vm1, %v10925_v48  ;;  %11025 = vmatpush3.msra.mxu0 %v13854_v25 }
 0x16b   : > { %11026 = vmatprep.subr.mxu0 %v13859_v26  ;;  %1013 = vmatprep.mubr.f32.mxu0 %v934_v50 }
 0x16c   : > { %11027 = vmatpush3.msra.mxu0 %v13864_v27 }
 0x16d   : > { %11028 = vmatprep.subr.mxu0 %v13869_v28 }
 0x16e   : > { %11029 = vmatpush3.msra.mxu0 %v13874_v29 }
 0x16f   : > { %11030 = vmatprep.subr.mxu0 %v13879_v30 }
 0x170   : > { %11031 = vmatpush3.msra.mxu0 %v13884_v31 }
 0x171   : > { %1014 = vmatmul.mubr.f32.vlgmr.msra.gmra.mxu0 %v933_v51 }
 0x172   : > { %1018 = vmatprep.mubr.f32.mxu0 %v936_v52 }
 0x175   : > { %1019 = vmatmul.mubr.f32.gmra.mxu0 %v935_v53 }
 0x176   : > { %1023 = vmatprep.mubr.f32.mxu0 %v938_v54 }
 0x179   : > { %1024 = vmatmul.mubr.f32.gmra.mxu0 %v937_v55 }
 0x17a   : > { %1028 = vmatprep.mubr.f32.mxu0 %v940_v56 }
 0x17d   : > { %1029 = vmatmul.mubr.f32.gmra.mxu0 %v939_v57 }
 0x17e   : > { %1033 = vmatprep.mubr.f32.mxu0 %v942_v58 }
 0x181   : > { %1034 = vmatmul.mubr.f32.gmra.mxu0 %v941_v59 }
 0x182   : > { %1038 = vmatprep.mubr.f32.mxu0 %v944_v60 }
 0x185   : > { %1039 = vmatmul.mubr.f32.gmra.mxu0 %v943_v61 }
 0x186   : > { %1043 = vmatprep.mubr.f32.mxu0 %v946_v62 }
 0x189   : > { %1044 = vmatmul.mubr.f32.gmra.mxu0 %v945_v63 }
 0x18a   : > { %1048 = vmatprep.mubr.f32.mxu0 %v948_v32 }
 0x18d   : > { %1049 = vmatmul.mubr.f32.gmra.mxu0 %v947_v33 }
 0x211   : > { %v12282_v35 = vpop.f32.mrf.mxu0  ;;  %v12296_v36 = vpop.f32.mrf.mxu1 }
 0x212   : > { %v13956_v37 = vadd.f32 %v12296_v36, %v12282_v35 }
 0x213   : > { %v13958_v38 = vpop.f32.mrf.mxu0  ;;  %v13960_v39 = vpop.f32.mrf.mxu1 }
 0x219   : > { %v12285_v40 = vpop.f32.mrf.mxu0 }
 0x21a   : > { %v12299_v41 = vpop.f32.mrf.mxu1 }
 0x21b   : > { %v13962_v42 = vadd.f32 %v12299_v41, %v12285_v40  ;;  %v13964_v43 = vpop.f32.mrf.mxu0 }
 0x21c   : > { %v13966_v44 = vpop.f32.mrf.mxu1 }
 0x221   : > { %v12288_v45 = vpop.f32.mrf.mxu0 }
 0x222   : > { %v12302_v46 = vpop.f32.mrf.mxu1 }
 0x223   : > { %v13968_v47 = vadd.f32 %v12302_v46, %v12288_v45  ;;  %v13970_v48 = vpop.f32.mrf.mxu0 }
 0x224   : > { %15575 = vst [vmem:[#allocation16_spill] sm:$0xff] %v13970_v48  ;;  %v13972_v49 = vpop.f32.mrf.mxu1 }
 0x225   : > { %15576 = vst [vmem:[#allocation17_spill] sm:$0xff] %v13972_v49 }
 0x229   : > { %v12291_v50 = vpop.f32.mrf.mxu0 }
 0x22a   : > { %v12305_v51 = vpop.f32.mrf.mxu1 }
 0x22b   : > { %v13974_v52 = vadd.f32 %v12305_v51, %v12291_v50  ;;  %v13976_v53 = vpop.f32.mrf.mxu0 }
 0x22c   : > { %15577 = vst [vmem:[#allocation18_spill] sm:$0xff] %v13976_v53 }
 0x231   : > { %v11032_v54 = vpop.f32.mrf.mxu0 }
 0x233   : > { %v11033_v55 = vpop.f32.mrf.mxu0 }
 0x234   : > { %v11034_v56 = vadd.f32 %v11033_v55, %v11032_v54 }
 0x235   : > { %v11035_v57 = vpop.f32.mrf.mxu0 }
 0x236   : > { %12308 = vmatprep.mubr.msk.f32.mxu1 %vm666_vm1, %v11034_v56 }
 0x237   : > { %v11036_v58 = vpop.f32.mrf.mxu0 }
 0x238   : > { %v11037_v59 = vadd.f32 %v11036_v58, %v11035_v57  ;;  %v1198_v57 = vld [vmem:[#allocation2 + $0x188] sm:$0xff]  ;;  %v1197_v58 = vld [vmem:[#allocation2 + $0x180] sm:$0xff] }
 0x239   : > { %v11038_v60 = vpop.f32.mrf.mxu0 }
 0x23a   : > { %12309 = vmatmul.mubr.msk.f32.vlgmr.msra.gmra.mxu1 %vm666_vm1, %v11037_v59  ;;  %v1200_v59 = vld [vmem:[#allocation2 + $0x198] sm:$0xff] }
 0x23b   : > { %11066 = vmatpush3.msra.mxu1 %v13736_v1  ;;  %v11039_v61 = vpop.f32.mrf.mxu0 }
 0x23c   : > { %v11040_v62 = vadd.f32 %v11039_v61, %v11038_v60  ;;  %11067 = vmatprep.subr.mxu1 %v13739_v2  ;;  %v1199_v60 = vld [vmem:[#allocation2 + $0x190] sm:$0xff]  ;;  %v1202_v61 = vld [vmem:[#allocation2 + $0x1a8] sm:$0xff] }
 0x23d   : > { %11068 = vmatpush3.msra.mxu1 %v13744_v3  ;;  %v11041_v63 = vpop.f32.mrf.mxu0 }
 0x23e   : > { %11069 = vmatprep.subr.mxu1 %v13749_v4  ;;  %12311 = vmatprep.mubr.msk.f32.mxu1 %vm666_vm1, %v11040_v62  ;;  %v1201_v62 = vld [vmem:[#allocation2 + $0x1a0] sm:$0xff] }
 0x23f   : > { %11070 = vmatpush3.msra.mxu1 %v13754_v5  ;;  %v11042_v32 = vpop.f32.mrf.mxu0 }
 0x240   : > { %v11043_v33 = vadd.f32 %v11042_v32, %v11041_v63  ;;  %11071 = vmatprep.subr.mxu1 %v13759_v6  ;;  %v1204_v63 = vld [vmem:[#allocation2 + $0x1b8] sm:$0xff]  ;;  %v14058_v32 = vpop.f32.mrf.mxu1 }
 0x241   : > { %11072 = vmatpush3.msra.mxu1 %v13764_v7  ;;  %v11044_v34 = vpop.f32.mrf.mxu0  ;;  %15578 = vst [vmem:[#allocation19_spill] sm:$0xff] %v14058_v32 }
 0x242   : > { %11073 = vmatprep.subr.mxu1 %v13769_v8  ;;  %12312 = vmatmul.mubr.msk.f32.gmra.mxu1 %vm666_vm1, %v11043_v33 }
 0x243   : > { %11074 = vmatpush3.msra.mxu1 %v13774_v9  ;;  %v11045_v35 = vpop.f32.mrf.mxu0 }
 0x244   : > { %v11046_v36 = vadd.f32 %v11045_v35, %v11044_v34  ;;  %11075 = vmatprep.subr.mxu1 %v13779_v10 }
 0x245   : > { %11076 = vmatpush3.msra.mxu1 %v13784_v11  ;;  %v11047_v40 = vpop.f32.mrf.mxu0 }
 0x246   : > { %11077 = vmatprep.subr.mxu1 %v13789_v12  ;;  %12314 = vmatprep.mubr.msk.f32.mxu1 %vm666_vm1, %v11046_v36 }
 0x247   : > { %11078 = vmatpush3.msra.mxu1 %v13794_v13  ;;  %v11048_v41 = vpop.f32.mrf.mxu0 }
 0x248   : > { %v11049_v45 = vadd.f32 %v11048_v41, %v11047_v40  ;;  %11079 = vmatprep.subr.mxu1 %v13799_v14 }
 0x249   : > { %11080 = vmatpush3.msra.mxu1 %v13804_v15  ;;  %v11050_v46 = vpop.f32.mrf.mxu0 }
 0x24a   : > { %11081 = vmatprep.subr.mxu1 %v13809_v16  ;;  %12315 = vmatmul.mubr.msk.f32.gmra.mxu1 %vm666_vm1, %v11049_v45 }
 0x24b   : > { %11082 = vmatpush3.msra.mxu1 %v13814_v17  ;;  %v11051_v50 = vpop.f32.mrf.mxu0 }
 0x24c   : > { %v11052_v51 = vadd.f32 %v11051_v50, %v11050_v46  ;;  %11083 = vmatprep.subr.mxu1 %v13819_v18 }
 0x24d   : > { %11084 = vmatpush3.msra.mxu1 %v13824_v19  ;;  %v11053_v54 = vpop.f32.mrf.mxu0 }
 0x24e   : > { %11085 = vmatprep.subr.mxu1 %v13829_v20  ;;  %12317 = vmatprep.mubr.msk.f32.mxu1 %vm666_vm1, %v11052_v51 }
 0x24f   : > { %11086 = vmatpush3.msra.mxu1 %v13834_v21  ;;  %v11054_v55 = vpop.f32.mrf.mxu0 }
 0x250   : > { %v11055_v56 = vadd.f32 %v11054_v55, %v11053_v54  ;;  %11087 = vmatprep.subr.mxu1 %v13839_v22 }
 0x251   : > { %11088 = vmatpush3.msra.mxu1 %v13844_v23 }
 0x252   : > { %11089 = vmatprep.subr.mxu1 %v13849_v24  ;;  %12318 = vmatmul.mubr.msk.f32.gmra.mxu1 %vm666_vm1, %v11055_v56 }
 0x253   : > { %11090 = vmatpush3.msra.mxu1 %v13854_v25  ;;  %1277 = vmatprep.mubr.f32.mxu1 %v1198_v57 }
 0x254   : > { %11091 = vmatprep.subr.mxu1 %v13859_v26 }
 0x255   : > { %11092 = vmatpush3.msra.mxu1 %v13864_v27 }
 0x256   : > { %11093 = vmatprep.subr.mxu1 %v13869_v28 }
 0x257   : > { %11094 = vmatpush3.msra.mxu1 %v13874_v29 }
 0x258   : > { %11095 = vmatprep.subr.mxu1 %v13879_v30 }
 0x259   : > { %11096 = vmatpush3.msra.mxu1 %v13884_v31 }
 0x25a   : > { %1278 = vmatmul.mubr.f32.vlgmr.msra.gmra.mxu1 %v1197_v58  ;;  %11130 = vmatprep.subr.mxu1 %v13733_v0 }
 0x25b   : > { %11131 = vmatpush3.msra.mxu1 %v13736_v1  ;;  %1282 = vmatprep.mubr.f32.mxu1 %v1200_v59  ;;  %v1203_v1 = vld [vmem:[#allocation2 + $0x1b0] sm:$0xff] }
 0x25c   : > { %11132 = vmatprep.subr.mxu1 %v13739_v2  ;;  %v1206_v2 = vld [vmem:[#allocation2 + $0x1c8] sm:$0xff] }
 0x25d   : > { %11133 = vmatpush3.msra.mxu1 %v13744_v3  ;;  %v1205_v3 = vld [vmem:[#allocation2 + $0x1c0] sm:$0xff] }
 0x25e   : > { %1283 = vmatmul.mubr.f32.gmra.mxu1 %v1199_v60  ;;  %11134 = vmatprep.subr.mxu1 %v13749_v4  ;;  %v1208_v4 = vld [vmem:[#allocation2 + $0x1d8] sm:$0xff] }
 0x25f   : > { %11135 = vmatpush3.msra.mxu1 %v13754_v5  ;;  %1287 = vmatprep.mubr.f32.mxu1 %v1202_v61  ;;  %v1207_v5 = vld [vmem:[#allocation2 + $0x1d0] sm:$0xff] }
 0x260   : > { %11136 = vmatprep.subr.mxu1 %v13759_v6  ;;  %v1210_v6 = vld [vmem:[#allocation2 + $0x1e8] sm:$0xff] }
 0x261   : > { %11137 = vmatpush3.msra.mxu1 %v13764_v7  ;;  %v1209_v7 = vld [vmem:[#allocation2 + $0x1e0] sm:$0xff] }
 0x262   : > { %1288 = vmatmul.mubr.f32.gmra.mxu1 %v1201_v62  ;;  %11138 = vmatprep.subr.mxu1 %v13769_v8  ;;  %v1212_v8 = vld [vmem:[#allocation2 + $0x1f8] sm:$0xff] }
 0x263   : > { %11139 = vmatpush3.msra.mxu1 %v13774_v9  ;;  %1292 = vmatprep.mubr.f32.mxu1 %v1204_v63  ;;  %v1211_v9 = vld [vmem:[#allocation2 + $0x1f0] sm:$0xff] }
 0x264   : > { %11140 = vmatprep.subr.mxu1 %v13779_v10  ;;  %v1462_v10 = vld [vmem:[#allocation2 + $0x208] sm:$0xff] }
 0x265   : > { %11141 = vmatpush3.msra.mxu1 %v13784_v11  ;;  %v1461_v11 = vld [vmem:[#allocation2 + $0x200] sm:$0xff] }
 0x266   : > { %1293 = vmatmul.mubr.f32.gmra.mxu1 %v1203_v1  ;;  %11142 = vmatprep.subr.mxu1 %v13789_v12  ;;  %v1464_v12 = vld [vmem:[#allocation2 + $0x218] sm:$0xff] }
 0x267   : > { %11143 = vmatpush3.msra.mxu1 %v13794_v13  ;;  %1297 = vmatprep.mubr.f32.mxu1 %v1206_v2  ;;  %v1463_v13 = vld [vmem:[#allocation2 + $0x210] sm:$0xff] }
 0x268   : > { %11144 = vmatprep.subr.mxu1 %v13799_v14  ;;  %v1466_v14 = vld [vmem:[#allocation2 + $0x228] sm:$0xff] }
 0x269   : > { %11145 = vmatpush3.msra.mxu1 %v13804_v15  ;;  %v1465_v15 = vld [vmem:[#allocation2 + $0x220] sm:$0xff] }
 0x26a   : > { %1298 = vmatmul.mubr.f32.gmra.mxu1 %v1205_v3  ;;  %11146 = vmatprep.subr.mxu1 %v13809_v16  ;;  %v1468_v16 = vld [vmem:[#allocation2 + $0x238] sm:$0xff] }
 0x26b   : > { %11147 = vmatpush3.msra.mxu1 %v13814_v17  ;;  %1302 = vmatprep.mubr.f32.mxu1 %v1208_v4  ;;  %v1467_v17 = vld [vmem:[#allocation2 + $0x230] sm:$0xff] }
 0x26c   : > { %11148 = vmatprep.subr.mxu1 %v13819_v18  ;;  %v1470_v18 = vld [vmem:[#allocation2 + $0x248] sm:$0xff] }
 0x26d   : > { %11149 = vmatpush3.msra.mxu1 %v13824_v19  ;;  %v1469_v19 = vld [vmem:[#allocation2 + $0x240] sm:$0xff] }
 0x26e   : > { %1303 = vmatmul.mubr.f32.gmra.mxu1 %v1207_v5  ;;  %11150 = vmatprep.subr.mxu1 %v13829_v20  ;;  %v1472_v20 = vld [vmem:[#allocation2 + $0x258] sm:$0xff] }
 0x26f   : > { %11151 = vmatpush3.msra.mxu1 %v13834_v21  ;;  %1307 = vmatprep.mubr.f32.mxu1 %v1210_v6  ;;  %v1471_v21 = vld [vmem:[#allocation2 + $0x250] sm:$0xff] }
 0x270   : > { %11152 = vmatprep.subr.mxu1 %v13839_v22  ;;  %v1474_v22 = vld [vmem:[#allocation2 + $0x268] sm:$0xff] }
 0x271   : > { %11153 = vmatpush3.msra.mxu1 %v13844_v23  ;;  %v1473_v23 = vld [vmem:[#allocation2 + $0x260] sm:$0xff] }
 0x272   : > { %1308 = vmatmul.mubr.f32.gmra.mxu1 %v1209_v7  ;;  %11154 = vmatprep.subr.mxu1 %v13849_v24  ;;  %v1476_v24 = vld [vmem:[#allocation2 + $0x278] sm:$0xff] }
 0x273   : > { %11155 = vmatpush3.msra.mxu1 %v13854_v25  ;;  %1312 = vmatprep.mubr.f32.mxu1 %v1212_v8  ;;  %v1475_v25 = vld [vmem:[#allocation2 + $0x270] sm:$0xff] }
 0x274   : > { %11156 = vmatprep.subr.mxu1 %v13859_v26  ;;  %v10657_v26 = vld [vmem:[%s15565_s2 + $0xc] sm:$0x7] }
 0x275   : > { %11157 = vmatpush3.msra.mxu1 %v13864_v27  ;;  %12320 = vmatprep.subr.msk.mxu0 %vm691_vm0, %v10657_v26  ;;  %v10667_v27 = vld [vmem:[%s15565_s2 + $0x10] sm:$0x7] }
 0x276   : > { %1313 = vmatmul.mubr.f32.gmra.mxu1 %v1211_v9  ;;  %11158 = vmatprep.subr.mxu1 %v13869_v28 }
 0x277   : > { %11159 = vmatpush3.msra.mxu1 %v13874_v29  ;;  %1541 = vmatprep.mubr.f32.mxu1 %v1462_v10 }
 0x278   : > { %11160 = vmatprep.subr.mxu1 %v13879_v30  ;;  %12321 = vmatpush3.msk.msra.mxu0 %vm691_vm0, %v10657_v26  ;;  %v14110_v26 = vld [vmem:[%s13730_s28 + $0x68] sm:$0xff] }
 0x279   : > { %11161 = vmatpush3.msra.mxu1 %v13884_v31  ;;  %12334 = vmatprep.subr.msk.mxu0 %vm691_vm0, %v10667_v27 }
 0x27a   : > { %1542 = vmatmul.mubr.f32.vlgmr.msra.gmra.mxu1 %v1461_v11 }
 0x27b   : > { %1546 = vmatprep.mubr.f32.mxu1 %v1464_v12 }
 0x27e   : > { %1547 = vmatmul.mubr.f32.gmra.mxu1 %v1463_v13 }
 0x27f   : > { %1551 = vmatprep.mubr.f32.mxu1 %v1466_v14 }
 0x282   : > { %1552 = vmatmul.mubr.f32.gmra.mxu1 %v1465_v15 }
 0x283   : > { %1556 = vmatprep.mubr.f32.mxu1 %v1468_v16 }
 0x286   : > { %1557 = vmatmul.mubr.f32.gmra.mxu1 %v1467_v17 }
 0x287   : > { %1561 = vmatprep.mubr.f32.mxu1 %v1470_v18 }
 0x28a   : > { %1562 = vmatmul.mubr.f32.gmra.mxu1 %v1469_v19  ;;  %v14093_v19 = vld [vmem:[%s13730_s28 + $0x78] sm:$0xff] }
 0x28b   : > { %1566 = vmatprep.mubr.f32.mxu1 %v1472_v20 }
 0x28e   : > { %1567 = vmatmul.mubr.f32.gmra.mxu1 %v1471_v21 }
 0x28f   : > { %1571 = vmatprep.mubr.f32.mxu1 %v1474_v22  ;;  %v14097_v22 = vld [vmem:[%s13730_s28 + $0xf0] sm:$0xff] }
 0x292   : > { %1572 = vmatmul.mubr.f32.gmra.mxu1 %v1473_v23  ;;  %v14101_v23 = vld [vmem:[%s13730_s28 + $0x70] sm:$0xff] }
 0x293   : > { %1576 = vmatprep.mubr.f32.mxu1 %v1476_v24 }
 0x296   : > { %1577 = vmatmul.mubr.f32.gmra.mxu1 %v1475_v25  ;;  %v14105_v25 = vld [vmem:[%s13730_s28 + $0xe8] sm:$0xff] }
 0x2fa   : > { %v12310_v33 = vpop.f32.mrf.mxu1 }
 0x2fb   : > { %v14061_v34 = vadd.f32 %v12310_v33, %v13956_v37 }
 0x2fc   : > { %v14063_v35 = vpop.f32.mrf.mxu1 }
 0x302   : > { %v12313_v36 = vpop.f32.mrf.mxu1 }
 0x303   : > { %v14066_v40 = vadd.f32 %v12313_v36, %v13962_v42  ;;  %v14114_v36 = vld [vmem:[%s13730_s28 + $0xe0] sm:$0xff] }
 0x304   : > { %v14068_v41 = vpop.f32.mrf.mxu1 }
 0x30a   : > { %v12316_v45 = vpop.f32.mrf.mxu1 }
 0x30b   : > { %v14071_v46 = vadd.f32 %v12316_v45, %v13968_v47  ;;  %v14118_v45 = vld [vmem:[%s13730_s28 + $0x60] sm:$0xff] }
 0x30c   : > { %v14073_v50 = vpop.f32.mrf.mxu1 }
 0x30d   : > { %15579 = vst [vmem:[#allocation20_spill] sm:$0xff] %v14073_v50 }
 0x312   : > { %v12319_v51 = vpop.f32.mrf.mxu1 }
 0x313   : > { %v14076_v54 = vadd.f32 %v12319_v51, %v13974_v52 }
 0x314   : > { %v14078_v37 = vpop.f32.mrf.mxu1 }
 0x315   : > { %15580 = vst [vmem:[#allocation21_spill] sm:$0xff] %v14078_v37 }
 0x31a   : > { %v11097_v55 = vpop.f32.mrf.mxu1 }
 0x31c   : > { %v11098_v56 = vpop.f32.mrf.mxu1 }
 0x31d   : > { %v11099_v57 = vadd.f32 %v11098_v56, %v11097_v55  ;;  %v14122_v55 = vld [vmem:[%s13730_s28 + $0xd8] sm:$0xff] }
 0x31e   : > { %v11100_v58 = vpop.f32.mrf.mxu1  ;;  %v14127_v56 = vld [vmem:[%s13730_s28 + $0x58] sm:$0xff] }
 0x31f   : > { %12322 = vmatprep.mubr.msk.f32.mxu0 %vm666_vm1, %v11099_v57 }
 0x320   : > { %v11101_v42 = vpop.f32.mrf.mxu1 }
 0x321   : > { %v11102_v59 = vadd.f32 %v11101_v42, %v11100_v58  ;;  %v14131_v42 = vld [vmem:[%s13730_s28 + $0xd0] sm:$0xff] }
 0x322   : > { %v11103_v60 = vpop.f32.mrf.mxu1 }
 0x323   : > { %12323 = vmatmul.mubr.msk.f32.vlgmr.msra.gmra.mxu0 %vm666_vm1, %v11102_v59  ;;  %v14135_v59 = vld [vmem:[%s13730_s28 + $0x50] sm:$0xff] }
 0x324   : > { %v11104_v47 = vpop.f32.mrf.mxu1  ;;  %12335 = vmatpush3.msk.msra.mxu0 %vm691_vm0, %v10667_v27 }
 0x325   : > { %v11105_v61 = vadd.f32 %v11104_v47, %v11103_v60  ;;  %11195 = vmatprep.subr.mxu0 %v13733_v0  ;;  %v14139_v47 = vld [vmem:[%s13730_s28 + $0xc8] sm:$0xff] }
 0x326   : > { %v11106_v52 = vpop.f32.mrf.mxu1 }
 0x327   : > { %12325 = vmatprep.mubr.msk.f32.mxu0 %vm666_vm1, %v11105_v61  ;;  %v14144_v61 = vld [vmem:[%s13730_s28 + $0x48] sm:$0xff] }
 0x328   : > { %v11107_v62 = vpop.f32.mrf.mxu1 }
 0x329   : > { %v11108_v63 = vadd.f32 %v11107_v62, %v11106_v52 }
 0x32a   : > { %v11109_v1 = vpop.f32.mrf.mxu1 }
 0x32b   : > { %12326 = vmatmul.mubr.msk.f32.gmra.mxu0 %vm666_vm1, %v11108_v63  ;;  %v14148_v63 = vld [vmem:[%s13730_s28 + $0xc0] sm:$0xff] }
 0x32c   : > { %v11110_v2 = vpop.f32.mrf.mxu1 }
 0x32d   : > { %v11111_v3 = vadd.f32 %v11110_v2, %v11109_v1  ;;  %v14152_v1 = vld [vmem:[%s13730_s28 + $0x40] sm:$0xff] }
 0x32e   : > { %v11112_v4 = vpop.f32.mrf.mxu1 }
 0x32f   : > { %12328 = vmatprep.mubr.msk.f32.mxu0 %vm666_vm1, %v11111_v3  ;;  %v14156_v3 = vld [vmem:[%s13730_s28 + $0xb8] sm:$0xff] }
 0x330   : > { %v11113_v5 = vpop.f32.mrf.mxu1 }
 0x331   : > { %v11114_v6 = vadd.f32 %v11113_v5, %v11112_v4  ;;  %v14161_v4 = vld [vmem:[%s13730_s28 + $0x38] sm:$0xff] }
 0x332   : > { %v11115_v7 = vpop.f32.mrf.mxu1 }
 0x333   : > { %12329 = vmatmul.mubr.msk.f32.gmra.mxu0 %vm666_vm1, %v11114_v6 }
 0x334   : > { %v11116_v8 = vpop.f32.mrf.mxu1 }
 0x335   : > { %v11117_v0 = vadd.f32 %v11116_v8, %v11115_v7  ;;  %v14165_v7 = vld [vmem:[%s13730_s28 + $0xb0] sm:$0xff] }
 0x336   : > { %v11118_v9 = vpop.f32.mrf.mxu1  ;;  %v14169_v8 = vld [vmem:[%s13730_s28 + $0x30] sm:$0xff] }
 0x337   : > { %12331 = vmatprep.mubr.msk.f32.mxu0 %vm666_vm1, %v11117_v0 }
 0x338   : > { %v11119_v10 = vpop.f32.mrf.mxu1 }
 0x339   : > { %v11120_v11 = vadd.f32 %v11119_v10, %v11118_v9  ;;  %v14173_v9 = vld [vmem:[%s13730_s28 + $0xa8] sm:$0xff] }
 0x33a   : > { %v11162_v12 = vpop.f32.mrf.mxu1  ;;  %v14178_v10 = vld [vmem:[%s13730_s28 + $0x28] sm:$0xff] }
 0x33b   : > { %12332 = vmatmul.mubr.msk.f32.gmra.mxu0 %vm666_vm1, %v11120_v11 }
 0x33c   : > { %v11163_v13 = vpop.f32.mrf.mxu1 }
 0x33d   : > { %v11164_v14 = vadd.f32 %v11163_v13, %v11162_v12  ;;  %v14182_v13 = vld [vmem:[%s13730_s28 + $0xa0] sm:$0xff] }
 0x33e   : > { %v11165_v15 = vpop.f32.mrf.mxu1 }
 0x33f   : > { %12336 = vmatprep.mubr.msk.f32.mxu0 %vm666_vm1, %v11164_v14  ;;  %v1726_v14 = vld [vmem:[#allocation2 + $0x288] sm:$0xff] }
 0x340   : > { %v11166_v16 = vpop.f32.mrf.mxu1 }
 0x341   : > { %v11167_v17 = vadd.f32 %v11166_v16, %v11165_v15  ;;  %v14186_v15 = vld [vmem:[%s13730_s28 + $0x20] sm:$0xff]  ;;  %v14190_v16 = vld [vmem:[%s13730_s28 + $0x98] sm:$0xff] }
 0x342   : > { %v11168_v18 = vpop.f32.mrf.mxu1 }
 0x343   : > { %12337 = vmatmul.mubr.msk.f32.vlgmr.msra.gmra.mxu0 %vm666_vm1, %v11167_v17  ;;  %v14195_v17 = vld [vmem:[%s13730_s28 + $0x18] sm:$0xff] }
 0x344   : > { %11196 = vmatpush3.msra.mxu0 %v14093_v19  ;;  %v11169_v20 = vpop.f32.mrf.mxu1 }
 0x345   : > { %v11170_v21 = vadd.f32 %v11169_v20, %v11168_v18  ;;  %11197 = vmatprep.subr.mxu0 %v14097_v22  ;;  %v14199_v18 = vld [vmem:[%s13730_s28 + $0x90] sm:$0xff] }
 0x346   : > { %11198 = vmatpush3.msra.mxu0 %v14101_v23  ;;  %v11171_v24 = vpop.f32.mrf.mxu1  ;;  %v14203_v20 = vld [vmem:[%s13730_s28 + $0x10] sm:$0xff] }
 0x347   : > { %11199 = vmatprep.subr.mxu0 %v14105_v25  ;;  %12339 = vmatprep.mubr.msk.f32.mxu0 %vm666_vm1, %v11170_v21  ;;  %v1725_v21 = vld [vmem:[#allocation2 + $0x280] sm:$0xff] }
 0x348   : > { %11200 = vmatpush3.msra.mxu0 %v14110_v26  ;;  %v11172_v27 = vpop.f32.mrf.mxu1 }
 0x349   : > { %v11173_v33 = vadd.f32 %v11172_v27, %v11171_v24  ;;  %11201 = vmatprep.subr.mxu0 %v14114_v36  ;;  %v1728_v24 = vld [vmem:[#allocation2 + $0x298] sm:$0xff] }
 0x34a   : > { %11202 = vmatpush3.msra.mxu0 %v14118_v45  ;;  %v11174_v51 = vpop.f32.mrf.mxu1  ;;  %v14211_v27 = vld [vmem:[%s13730_s28 + $0xf8] sm:$0xff] }
 0x34b   : > { %11203 = vmatprep.subr.mxu0 %v14122_v55  ;;  %12340 = vmatmul.mubr.msk.f32.gmra.mxu0 %vm666_vm1, %v11173_v33  ;;  %v1727_v33 = vld [vmem:[#allocation2 + $0x290] sm:$0xff] }
 0x34c   : > { %11204 = vmatpush3.msra.mxu0 %v14127_v56  ;;  %v11175_v57 = vpop.f32.mrf.mxu1 }
 0x34d   : > { %v11176_v58 = vadd.f32 %v11175_v57, %v11174_v51  ;;  %11205 = vmatprep.subr.mxu0 %v14131_v42  ;;  %v1734_v51 = vld [vmem:[#allocation2 + $0x2c8] sm:$0xff]  ;;  %v1733_v57 = vld [vmem:[#allocation2 + $0x2c0] sm:$0xff] }
 0x34e   : > { %11206 = vmatpush3.msra.mxu0 %v14135_v59  ;;  %v11177_v60 = vpop.f32.mrf.mxu1 }
 0x34f   : > { %11207 = vmatprep.subr.mxu0 %v14139_v47  ;;  %12342 = vmatprep.mubr.msk.f32.mxu0 %vm666_vm1, %v11176_v58  ;;  %v1736_v58 = vld [vmem:[#allocation2 + $0x2d8] sm:$0xff] }
 0x350   : > { %11208 = vmatpush3.msra.mxu0 %v14144_v61  ;;  %v11178_v52 = vpop.f32.mrf.mxu1 }
 0x351   : > { %v11179_v62 = vadd.f32 %v11178_v52, %v11177_v60  ;;  %11209 = vmatprep.subr.mxu0 %v14148_v63  ;;  %v1735_v60 = vld [vmem:[#allocation2 + $0x2d0] sm:$0xff]  ;;  %v1738_v52 = vld [vmem:[#allocation2 + $0x2e8] sm:$0xff] }
 0x352   : > { %11210 = vmatpush3.msra.mxu0 %v14152_v1  ;;  %v11180_v2 = vpop.f32.mrf.mxu1 }
 0x353   : > { %11211 = vmatprep.subr.mxu0 %v14156_v3  ;;  %12343 = vmatmul.mubr.msk.f32.gmra.mxu0 %vm666_vm1, %v11179_v62  ;;  %v1737_v62 = vld [vmem:[#allocation2 + $0x2e0] sm:$0xff] }
 0x354   : > { %11212 = vmatpush3.msra.mxu0 %v14161_v4  ;;  %v11181_v5 = vpop.f32.mrf.mxu1 }
 0x355   : > { %v11182_v6 = vadd.f32 %v11181_v5, %v11180_v2  ;;  %11213 = vmatprep.subr.mxu0 %v14165_v7  ;;  %v1740_v2 = vld [vmem:[#allocation2 + $0x2f8] sm:$0xff]  ;;  %v1739_v5 = vld [vmem:[#allocation2 + $0x2f0] sm:$0xff] }
 0x356   : > { %11214 = vmatpush3.msra.mxu0 %v14169_v8  ;;  %v11183_v0 = vpop.f32.mrf.mxu1 }
 0x357   : > { %11215 = vmatprep.subr.mxu0 %v14173_v9  ;;  %12345 = vmatprep.mubr.msk.f32.mxu0 %vm666_vm1, %v11182_v6  ;;  %v1990_v6 = vld [vmem:[#allocation2 + $0x308] sm:$0xff] }
 0x358   : > { %11216 = vmatpush3.msra.mxu0 %v14178_v10  ;;  %v11184_v11 = vpop.f32.mrf.mxu1 }
 0x359   : > { %v11185_v12 = vadd.f32 %v11184_v11, %v11183_v0  ;;  %11217 = vmatprep.subr.mxu0 %v14182_v13  ;;  %v14242_v0 = vld [vmem:[%s13730_s28 + $0x88] sm:$0xff] }
 0x35a   : > { %11218 = vmatpush3.msra.mxu0 %v14186_v15  ;;  %v14246_v11 = vld [vmem:[%s13730_s28 + $0x8] sm:$0xff] }
 0x35b   : > { %11219 = vmatprep.subr.mxu0 %v14190_v16  ;;  %12346 = vmatmul.mubr.msk.f32.gmra.mxu0 %vm666_vm1, %v11185_v12  ;;  %v1989_v12 = vld [vmem:[#allocation2 + $0x300] sm:$0xff] }
 0x35c   : > { %11220 = vmatpush3.msra.mxu0 %v14195_v17  ;;  %1805 = vmatprep.mubr.f32.mxu0 %v1726_v14  ;;  %v14250_v14 = vld [vmem:[%s13730_s28 + $0x80] sm:$0xff] }
 0x35d   : > { %11221 = vmatprep.subr.mxu0 %v14199_v18 }
 0x35e   : > { %11222 = vmatpush3.msra.mxu0 %v14203_v20 }
 0x35f   : > { %11223 = vmatprep.subr.mxu0 %v13869_v28  ;;  %v1730_v28 = vld [vmem:[#allocation2 + $0x2a8] sm:$0xff] }
 0x360   : > { %11224 = vmatpush3.msra.mxu0 %v13874_v29  ;;  %v1729_v29 = vld [vmem:[#allocation2 + $0x2a0] sm:$0xff] }
 0x361   : > { %11225 = vmatprep.subr.mxu0 %v13879_v30  ;;  %v1732_v30 = vld [vmem:[#allocation2 + $0x2b8] sm:$0xff] }
 0x362   : > { %11226 = vmatpush3.msra.mxu0 %v13884_v31  ;;  %v1731_v31 = vld [vmem:[#allocation2 + $0x2b0] sm:$0xff] }
 0x363   : > { %1806 = vmatmul.mubr.f32.vlgmr.msra.gmra.mxu0 %v1725_v21  ;;  %11260 = vmatprep.subr.mxu0 %v14211_v27  ;;  %v1992_v21 = vld [vmem:[#allocation2 + $0x318] sm:$0xff] }
 0x364   : > { %11261 = vmatpush3.msra.mxu0 %v14093_v19  ;;  %1810 = vmatprep.mubr.f32.mxu0 %v1728_v24  ;;  %v14254_v24 = vld [vmem:[%s13730_s28] sm:$0xff] }
 0x365   : > { %11262 = vmatprep.subr.mxu0 %v14097_v22 }
 0x366   : > { %11263 = vmatpush3.msra.mxu0 %v14101_v23 }
 0x367   : > { %1811 = vmatmul.mubr.f32.gmra.mxu0 %v1727_v33  ;;  %11264 = vmatprep.subr.mxu0 %v14105_v25  ;;  %v1991_v33 = vld [vmem:[#allocation2 + $0x310] sm:$0xff] }
 0x368   : > { %11265 = vmatpush3.msra.mxu0 %v14110_v26  ;;  %1815 = vmatprep.mubr.f32.mxu0 %v1730_v28  ;;  %v1994_v28 = vld [vmem:[#allocation2 + $0x328] sm:$0xff] }
 0x369   : > { %11266 = vmatprep.subr.mxu0 %v14114_v36 }
 0x36a   : > { %11267 = vmatpush3.msra.mxu0 %v14118_v45 }
 0x36b   : > { %1816 = vmatmul.mubr.f32.gmra.mxu0 %v1729_v29  ;;  %11268 = vmatprep.subr.mxu0 %v14122_v55  ;;  %v1993_v29 = vld [vmem:[#allocation2 + $0x320] sm:$0xff] }
 0x36c   : > { %11269 = vmatpush3.msra.mxu0 %v14127_v56  ;;  %1820 = vmatprep.mubr.f32.mxu0 %v1732_v30  ;;  %v1996_v30 = vld [vmem:[#allocation2 + $0x338] sm:$0xff] }
 0x36d   : > { %11270 = vmatprep.subr.mxu0 %v14131_v42 }
 0x36e   : > { %11271 = vmatpush3.msra.mxu0 %v14135_v59 }
 0x36f   : > { %1821 = vmatmul.mubr.f32.gmra.mxu0 %v1731_v31  ;;  %11272 = vmatprep.subr.mxu0 %v14139_v47  ;;  %v1995_v31 = vld [vmem:[#allocation2 + $0x330] sm:$0xff] }
 0x370   : > { %11273 = vmatpush3.msra.mxu0 %v14144_v61  ;;  %1825 = vmatprep.mubr.f32.mxu0 %v1734_v51  ;;  %v1998_v51 = vld [vmem:[#allocation2 + $0x348] sm:$0xff] }
 0x371   : > { %11274 = vmatprep.subr.mxu0 %v14148_v63 }
 0x372   : > { %11275 = vmatpush3.msra.mxu0 %v14152_v1 }
 0x373   : > { %1826 = vmatmul.mubr.f32.gmra.mxu0 %v1733_v57  ;;  %11276 = vmatprep.subr.mxu0 %v14156_v3  ;;  %v1997_v57 = vld [vmem:[#allocation2 + $0x340] sm:$0xff] }
 0x374   : > { %11277 = vmatpush3.msra.mxu0 %v14161_v4  ;;  %1830 = vmatprep.mubr.f32.mxu0 %v1736_v58  ;;  %v2000_v58 = vld [vmem:[#allocation2 + $0x358] sm:$0xff] }
 0x375   : > { %11278 = vmatprep.subr.mxu0 %v14165_v7 }
 0x376   : > { %11279 = vmatpush3.msra.mxu0 %v14169_v8 }
 0x377   : > { %1831 = vmatmul.mubr.f32.gmra.mxu0 %v1735_v60  ;;  %11280 = vmatprep.subr.mxu0 %v14173_v9  ;;  %v1999_v60 = vld [vmem:[#allocation2 + $0x350] sm:$0xff] }
 0x378   : > { %11281 = vmatpush3.msra.mxu0 %v14178_v10  ;;  %1835 = vmatprep.mubr.f32.mxu0 %v1738_v52  ;;  %v2002_v52 = vld [vmem:[#allocation2 + $0x368] sm:$0xff] }
 0x379   : > { %11282 = vmatprep.subr.mxu0 %v14182_v13 }
 0x37a   : > { %11283 = vmatpush3.msra.mxu0 %v14186_v15 }
 0x37b   : > { %1836 = vmatmul.mubr.f32.gmra.mxu0 %v1737_v62  ;;  %11284 = vmatprep.subr.mxu0 %v14190_v16  ;;  %v2001_v62 = vld [vmem:[#allocation2 + $0x360] sm:$0xff] }
 0x37c   : > { %11285 = vmatpush3.msra.mxu0 %v14195_v17  ;;  %1840 = vmatprep.mubr.f32.mxu0 %v1740_v2  ;;  %v2004_v2 = vld [vmem:[#allocation2 + $0x378] sm:$0xff] }
 0x37d   : > { %11286 = vmatprep.subr.mxu0 %v14199_v18 }
 0x37e   : > { %11287 = vmatpush3.msra.mxu0 %v14203_v20 }
 0x37f   : > { %1841 = vmatmul.mubr.f32.gmra.mxu0 %v1739_v5  ;;  %11288 = vmatprep.subr.mxu0 %v14242_v0  ;;  %v2003_v5 = vld [vmem:[#allocation2 + $0x370] sm:$0xff] }
 0x380   : > { %11289 = vmatpush3.msra.mxu0 %v14246_v11  ;;  %2069 = vmatprep.mubr.f32.mxu0 %v1990_v6  ;;  %v10677_v6 = vld [vmem:[%s15565_s2 + $0x14] sm:$0x7] }
 0x381   : > { %11290 = vmatprep.subr.mxu0 %v14250_v14  ;;  %12348 = vmatprep.subr.msk.mxu1 %vm691_vm0, %v10677_v6 }
 0x382   : > { %11291 = vmatpush3.msra.mxu0 %v14254_v24  ;;  %12349 = vmatpush3.msk.msra.mxu1 %vm691_vm0, %v10677_v6 }
 0x383   : > { %2070 = vmatmul.mubr.f32.vlgmr.msra.gmra.mxu0 %v1989_v12  ;;  %v10687_v12 = vld [vmem:[%s15565_s2 + $0x18] sm:$0x7] }
 0x384   : > { %2074 = vmatprep.mubr.f32.mxu0 %v1992_v21  ;;  %12362 = vmatprep.subr.msk.mxu1 %vm691_vm0, %v10687_v12 }
 0x387   : > { %2075 = vmatmul.mubr.f32.gmra.mxu0 %v1991_v33 }
 0x388   : > { %2079 = vmatprep.mubr.f32.mxu0 %v1994_v28 }
 0x38b   : > { %2080 = vmatmul.mubr.f32.gmra.mxu0 %v1993_v29 }
 0x38c   : > { %2084 = vmatprep.mubr.f32.mxu0 %v1996_v30 }
 0x38f   : > { %2085 = vmatmul.mubr.f32.gmra.mxu0 %v1995_v31 }
 0x390   : > { %2089 = vmatprep.mubr.f32.mxu0 %v1998_v51 }
 0x393   : > { %2090 = vmatmul.mubr.f32.gmra.mxu0 %v1997_v57 }
 0x394   : > { %2094 = vmatprep.mubr.f32.mxu0 %v2000_v58 }
 0x397   : > { %2095 = vmatmul.mubr.f32.gmra.mxu0 %v1999_v60 }
 0x398   : > { %2099 = vmatprep.mubr.f32.mxu0 %v2002_v52 }
 0x39b   : > { %2100 = vmatmul.mubr.f32.gmra.mxu0 %v2001_v62 }
 0x39c   : > { %2104 = vmatprep.mubr.f32.mxu0 %v2004_v2 }
 0x39f   : > { %2105 = vmatmul.mubr.f32.gmra.mxu0 %v2003_v5 }
 0x3e3   : > { %v12324_v21 = vpop.f32.mrf.mxu0 }
 0x3e4   : > { %v1453_v33 = vadd.f32 %v12324_v21, %v14061_v34 }
 0x3e5   : > { %v14267_v28 = vpop.f32.mrf.mxu0 }
 0x3eb   : > { %v12327_v29 = vpop.f32.mrf.mxu0 }
 0x3ec   : > { %v1455_v30 = vadd.f32 %v12327_v29, %v14066_v40 }
 0x3ed   : > { %v14270_v31 = vpop.f32.mrf.mxu0 }
 0x3f3   : > { %v12330_v51 = vpop.f32.mrf.mxu0 }
 0x3f4   : > { %v1457_v57 = vadd.f32 %v12330_v51, %v14071_v46 }
 0x3f5   : > { %v14273_v58 = vpop.f32.mrf.mxu0 }
 0x3f6   : > { %15581 = vst [vmem:[#allocation22_spill] sm:$0xff] %v14273_v58 }
 0x3fb   : > { %v12333_v60 = vpop.f32.mrf.mxu0 }
 0x3fc   : > { %v1459_v52 = vadd.f32 %v12333_v60, %v14076_v54 }
 0x3fd   : > { %v14276_v62 = vpop.f32.mrf.mxu0 }
 0x3fe   : > { %15582 = vst [vmem:[#allocation23_spill] sm:$0xff] %v14276_v62 }
 0x403   : > { %v12338_v2 = vpop.f32.mrf.mxu0 }
 0x404   : > { %v14278_v5 = vadd.f32 %v12338_v2, %v1453_v33 }
 0x405   : > { %v14280_v34 = vpop.f32.mrf.mxu0 }
 0x40b   : > { %v12341_v6 = vpop.f32.mrf.mxu0 }
 0x40c   : > { %v14282_v21 = vadd.f32 %v12341_v6, %v1455_v30 }
 0x40d   : > { %v14284_v40 = vpop.f32.mrf.mxu0 }
 0x413   : > { %v12344_v29 = vpop.f32.mrf.mxu0 }
 0x414   : > { %v14286_v37 = vadd.f32 %v12344_v29, %v1457_v57 }
 0x415   : > { %v14288_v46 = vpop.f32.mrf.mxu0 }
 0x416   : > { %15583 = vst [vmem:[#allocation24_spill] sm:$0xff] %v14288_v46 }
 0x41b   : > { %v12347_v51 = vpop.f32.mrf.mxu0 }
 0x41c   : > { %v14290_v32 = vadd.f32 %v12347_v51, %v1459_v52 }
 0x41d   : > { %v14292_v54 = vpop.f32.mrf.mxu0 }
 0x41e   : > { %15584 = vst [vmem:[#allocation25_spill] sm:$0xff] %v14292_v54 }
 0x423   : > { %v11227_v60 = vpop.f32.mrf.mxu0 }
 0x425   : > { %v11228_v33 = vpop.f32.mrf.mxu0 }
 0x426   : > { %v11229_v2 = vadd.f32 %v11228_v33, %v11227_v60 }
 0x427   : > { %v11230_v62 = vpop.f32.mrf.mxu0 }
 0x428   : > { %12350 = vmatprep.mubr.msk.f32.mxu1 %vm666_vm1, %v11229_v2 }
 0x429   : > { %v11231_v30 = vpop.f32.mrf.mxu0 }
 0x42a   : > { %v11232_v6 = vadd.f32 %v11231_v30, %v11230_v62 }
 0x42b   : > { %v11233_v53 = vpop.f32.mrf.mxu0 }
 0x42c   : > { %12351 = vmatmul.mubr.msk.f32.vlgmr.msra.gmra.mxu1 %vm666_vm1, %v11232_v6 }
 0x42d   : > { %v11234_v57 = vpop.f32.mrf.mxu0  ;;  %12363 = vmatpush3.msk.msra.mxu1 %vm691_vm0, %v10687_v12 }
 0x42e   : > { %v11235_v29 = vadd.f32 %v11234_v57, %v11233_v53  ;;  %11325 = vmatprep.subr.mxu1 %v14211_v27 }
 0x42f   : > { %v11236_v52 = vpop.f32.mrf.mxu0 }
 0x430   : > { %12353 = vmatprep.mubr.msk.f32.mxu1 %vm666_vm1, %v11235_v29 }
 0x431   : > { %v11237_v51 = vpop.f32.mrf.mxu0 }
 0x432   : > { %v11238_v54 = vadd.f32 %v11237_v51, %v11236_v52 }
 0x433   : > { %v11239_v60 = vpop.f32.mrf.mxu0 }
 0x434   : > { %12354 = vmatmul.mubr.msk.f32.gmra.mxu1 %vm666_vm1, %v11238_v54 }
 0x435   : > { %v11240_v33 = vpop.f32.mrf.mxu0 }
 0x436   : > { %v11241_v2 = vadd.f32 %v11240_v33, %v11239_v60 }
 0x437   : > { %v11242_v62 = vpop.f32.mrf.mxu0 }
 0x438   : > { %12356 = vmatprep.mubr.msk.f32.mxu1 %vm666_vm1, %v11241_v2 }
 0x439   : > { %v11243_v30 = vpop.f32.mrf.mxu0 }
 0x43a   : > { %v11244_v6 = vadd.f32 %v11243_v30, %v11242_v62 }
 0x43b   : > { %v11245_v46 = vpop.f32.mrf.mxu0 }
 0x43c   : > { %12357 = vmatmul.mubr.msk.f32.gmra.mxu1 %vm666_vm1, %v11244_v6 }
 0x43d   : > { %v11246_v53 = vpop.f32.mrf.mxu0 }
 0x43e   : > { %v11247_v12 = vadd.f32 %v11246_v53, %v11245_v46 }
 0x43f   : > { %v11248_v57 = vpop.f32.mrf.mxu0 }
 0x440   : > { %12359 = vmatprep.mubr.msk.f32.mxu1 %vm666_vm1, %v11247_v12 }
 0x441   : > { %v11249_v29 = vpop.f32.mrf.mxu0 }
 0x442   : > { %v11250_v52 = vadd.f32 %v11249_v29, %v11248_v57 }
 0x443   : > { %v11292_v51 = vpop.f32.mrf.mxu0 }
 0x444   : > { %12360 = vmatmul.mubr.msk.f32.gmra.mxu1 %vm666_vm1, %v11250_v52 }
 0x445   : > { %v11293_v54 = vpop.f32.mrf.mxu0 }
 0x446   : > { %v11294_v60 = vadd.f32 %v11293_v54, %v11292_v51 }
 0x447   : > { %v11295_v33 = vpop.f32.mrf.mxu0 }
 0x448   : > { %12364 = vmatprep.mubr.msk.f32.mxu1 %vm666_vm1, %v11294_v60 }
 0x449   : > { %v11296_v2 = vpop.f32.mrf.mxu0 }
 0x44a   : > { %v11297_v62 = vadd.f32 %v11296_v2, %v11295_v33 }
 0x44b   : > { %v11298_v30 = vpop.f32.mrf.mxu0 }
 0x44c   : > { %12365 = vmatmul.mubr.msk.f32.vlgmr.msra.gmra.mxu1 %vm666_vm1, %v11297_v62 }
 0x44d   : > { %11326 = vmatpush3.msra.mxu1 %v14093_v19  ;;  %v11299_v46 = vpop.f32.mrf.mxu0 }
 0x44e   : > { %v11300_v6 = vadd.f32 %v11299_v46, %v11298_v30  ;;  %11327 = vmatprep.subr.mxu1 %v14097_v22 }
 0x44f   : > { %11328 = vmatpush3.msra.mxu1 %v14101_v23  ;;  %v11301_v53 = vpop.f32.mrf.mxu0 }
 0x450   : > { %11329 = vmatprep.subr.mxu1 %v14105_v25  ;;  %12367 = vmatprep.mubr.msk.f32.mxu1 %vm666_vm1, %v11300_v6 }
 0x451   : > { %11330 = vmatpush3.msra.mxu1 %v14110_v26  ;;  %v11302_v12 = vpop.f32.mrf.mxu0 }
 0x452   : > { %v11303_v57 = vadd.f32 %v11302_v12, %v11301_v53  ;;  %11331 = vmatprep.subr.mxu1 %v14114_v36  ;;  %v2254_v12 = vld [vmem:[#allocation2 + $0x388] sm:$0xff] }
 0x453   : > { %11332 = vmatpush3.msra.mxu1 %v14118_v45  ;;  %v11304_v29 = vpop.f32.mrf.mxu0 }
 0x454   : > { %11333 = vmatprep.subr.mxu1 %v14122_v55  ;;  %12368 = vmatmul.mubr.msk.f32.gmra.mxu1 %vm666_vm1, %v11303_v57  ;;  %v2253_v57 = vld [vmem:[#allocation2 + $0x380] sm:$0xff] }
 0x455   : > { %11334 = vmatpush3.msra.mxu1 %v14127_v56  ;;  %v11305_v52 = vpop.f32.mrf.mxu0 }
 0x456   : > { %v11306_v51 = vadd.f32 %v11305_v52, %v11304_v29  ;;  %11335 = vmatprep.subr.mxu1 %v14131_v42  ;;  %v2256_v29 = vld [vmem:[#allocation2 + $0x398] sm:$0xff]  ;;  %v2255_v52 = vld [vmem:[#allocation2 + $0x390] sm:$0xff] }
 0x457   : > { %11336 = vmatpush3.msra.mxu1 %v14135_v59  ;;  %v11307_v54 = vpop.f32.mrf.mxu0 }
 0x458   : > { %11337 = vmatprep.subr.mxu1 %v14139_v47  ;;  %12370 = vmatprep.mubr.msk.f32.mxu1 %vm666_vm1, %v11306_v51  ;;  %v2258_v51 = vld [vmem:[#allocation2 + $0x3a8] sm:$0xff] }
 0x459   : > { %11338 = vmatpush3.msra.mxu1 %v14144_v61  ;;  %v11308_v60 = vpop.f32.mrf.mxu0 }
 0x45a   : > { %v11309_v33 = vadd.f32 %v11308_v60, %v11307_v54  ;;  %11339 = vmatprep.subr.mxu1 %v14148_v63  ;;  %v2257_v54 = vld [vmem:[#allocation2 + $0x3a0] sm:$0xff]  ;;  %v2260_v60 = vld [vmem:[#allocation2 + $0x3b8] sm:$0xff] }
 0x45b   : > { %11340 = vmatpush3.msra.mxu1 %v14152_v1  ;;  %v11310_v2 = vpop.f32.mrf.mxu0 }
 0x45c   : > { %11341 = vmatprep.subr.mxu1 %v14156_v3  ;;  %12371 = vmatmul.mubr.msk.f32.gmra.mxu1 %vm666_vm1, %v11309_v33  ;;  %v2259_v33 = vld [vmem:[#allocation2 + $0x3b0] sm:$0xff] }
 0x45d   : > { %11342 = vmatpush3.msra.mxu1 %v14161_v4  ;;  %v11311_v62 = vpop.f32.mrf.mxu0 }
 0x45e   : > { %v11312_v30 = vadd.f32 %v11311_v62, %v11310_v2  ;;  %11343 = vmatprep.subr.mxu1 %v14165_v7  ;;  %v2262_v2 = vld [vmem:[#allocation2 + $0x3c8] sm:$0xff]  ;;  %v2261_v62 = vld [vmem:[#allocation2 + $0x3c0] sm:$0xff] }
 0x45f   : > { %11344 = vmatpush3.msra.mxu1 %v14169_v8  ;;  %v11313_v46 = vpop.f32.mrf.mxu0 }
 0x460   : > { %11345 = vmatprep.subr.mxu1 %v14173_v9  ;;  %12373 = vmatprep.mubr.msk.f32.mxu1 %vm666_vm1, %v11312_v30  ;;  %v2264_v30 = vld [vmem:[#allocation2 + $0x3d8] sm:$0xff] }
 0x461   : > { %11346 = vmatpush3.msra.mxu1 %v14178_v10  ;;  %v11314_v6 = vpop.f32.mrf.mxu0 }
 0x462   : > { %v11315_v53 = vadd.f32 %v11314_v6, %v11313_v46  ;;  %11347 = vmatprep.subr.mxu1 %v14182_v13  ;;  %v2263_v46 = vld [vmem:[#allocation2 + $0x3d0] sm:$0xff]  ;;  %v2266_v6 = vld [vmem:[#allocation2 + $0x3e8] sm:$0xff] }
 0x463   : > { %11348 = vmatpush3.msra.mxu1 %v14186_v15 }
 0x464   : > { %11349 = vmatprep.subr.mxu1 %v14190_v16  ;;  %12374 = vmatmul.mubr.msk.f32.gmra.mxu1 %vm666_vm1, %v11315_v53  ;;  %v2265_v53 = vld [vmem:[#allocation2 + $0x3e0] sm:$0xff] }
 0x465   : > { %11350 = vmatpush3.msra.mxu1 %v14195_v17  ;;  %2333 = vmatprep.mubr.f32.mxu1 %v2254_v12  ;;  %v2268_v12 = vld [vmem:[#allocation2 + $0x3f8] sm:$0xff] }
 0x466   : > { %11351 = vmatprep.subr.mxu1 %v14199_v18 }
 0x467   : > { %11352 = vmatpush3.msra.mxu1 %v14203_v20 }
 0x468   : > { %11353 = vmatprep.subr.mxu1 %v14242_v0 }
 0x469   : > { %11354 = vmatpush3.msra.mxu1 %v14246_v11 }
 0x46a   : > { %11355 = vmatprep.subr.mxu1 %v14250_v14 }
 0x46b   : > { %11356 = vmatpush3.msra.mxu1 %v14254_v24 }
 0x46c   : > { %2334 = vmatmul.mubr.f32.vlgmr.msra.gmra.mxu1 %v2253_v57  ;;  %11390 = vmatprep.subr.mxu1 %v14211_v27  ;;  %v2267_v57 = vld [vmem:[#allocation2 + $0x3f0] sm:$0xff] }
 0x46d   : > { %11391 = vmatpush3.msra.mxu1 %v14093_v19  ;;  %2338 = vmatprep.mubr.f32.mxu1 %v2256_v29  ;;  %v2518_v29 = vld [vmem:[#allocation2 + $0x408] sm:$0xff] }
 0x46e   : > { %11392 = vmatprep.subr.mxu1 %v14097_v22 }
 0x46f   : > { %11393 = vmatpush3.msra.mxu1 %v14101_v23 }
 0x470   : > { %2339 = vmatmul.mubr.f32.gmra.mxu1 %v2255_v52  ;;  %11394 = vmatprep.subr.mxu1 %v14105_v25  ;;  %v2517_v52 = vld [vmem:[#allocation2 + $0x400] sm:$0xff] }
 0x471   : > { %11395 = vmatpush3.msra.mxu1 %v14110_v26  ;;  %2343 = vmatprep.mubr.f32.mxu1 %v2258_v51  ;;  %v2520_v51 = vld [vmem:[#allocation2 + $0x418] sm:$0xff] }
 0x472   : > { %11396 = vmatprep.subr.mxu1 %v14114_v36 }
 0x473   : > { %11397 = vmatpush3.msra.mxu1 %v14118_v45 }
 0x474   : > { %2344 = vmatmul.mubr.f32.gmra.mxu1 %v2257_v54  ;;  %11398 = vmatprep.subr.mxu1 %v14122_v55  ;;  %v2519_v54 = vld [vmem:[#allocation2 + $0x410] sm:$0xff] }
 0x475   : > { %11399 = vmatpush3.msra.mxu1 %v14127_v56  ;;  %2348 = vmatprep.mubr.f32.mxu1 %v2260_v60  ;;  %v2522_v60 = vld [vmem:[#allocation2 + $0x428] sm:$0xff] }
 0x476   : > { %11400 = vmatprep.subr.mxu1 %v14131_v42 }
 0x477   : > { %11401 = vmatpush3.msra.mxu1 %v14135_v59 }
 0x478   : > { %2349 = vmatmul.mubr.f32.gmra.mxu1 %v2259_v33  ;;  %11402 = vmatprep.subr.mxu1 %v14139_v47  ;;  %v2521_v33 = vld [vmem:[#allocation2 + $0x420] sm:$0xff] }
 0x479   : > { %11403 = vmatpush3.msra.mxu1 %v14144_v61  ;;  %2353 = vmatprep.mubr.f32.mxu1 %v2262_v2  ;;  %v2524_v2 = vld [vmem:[#allocation2 + $0x438] sm:$0xff] }
 0x47a   : > { %11404 = vmatprep.subr.mxu1 %v14148_v63 }
 0x47b   : > { %11405 = vmatpush3.msra.mxu1 %v14152_v1 }
 0x47c   : > { %2354 = vmatmul.mubr.f32.gmra.mxu1 %v2261_v62  ;;  %11406 = vmatprep.subr.mxu1 %v14156_v3  ;;  %v2523_v62 = vld [vmem:[#allocation2 + $0x430] sm:$0xff] }
 0x47d   : > { %11407 = vmatpush3.msra.mxu1 %v14161_v4  ;;  %2358 = vmatprep.mubr.f32.mxu1 %v2264_v30  ;;  %v2526_v30 = vld [vmem:[#allocation2 + $0x448] sm:$0xff] }
 0x47e   : > { %11408 = vmatprep.subr.mxu1 %v14165_v7 }
 0x47f   : > { %11409 = vmatpush3.msra.mxu1 %v14169_v8 }
 0x480   : > { %2359 = vmatmul.mubr.f32.gmra.mxu1 %v2263_v46  ;;  %11410 = vmatprep.subr.mxu1 %v14173_v9  ;;  %v2525_v46 = vld [vmem:[#allocation2 + $0x440] sm:$0xff] }
 0x481   : > { %11411 = vmatpush3.msra.mxu1 %v14178_v10  ;;  %2363 = vmatprep.mubr.f32.mxu1 %v2266_v6  ;;  %v2528_v6 = vld [vmem:[#allocation2 + $0x458] sm:$0xff] }
 0x482   : > { %11412 = vmatprep.subr.mxu1 %v14182_v13 }
 0x483   : > { %11413 = vmatpush3.msra.mxu1 %v14186_v15 }
 0x484   : > { %2364 = vmatmul.mubr.f32.gmra.mxu1 %v2265_v53  ;;  %11414 = vmatprep.subr.mxu1 %v14190_v16  ;;  %v2527_v53 = vld [vmem:[#allocation2 + $0x450] sm:$0xff] }
 0x485   : > { %11415 = vmatpush3.msra.mxu1 %v14195_v17  ;;  %2368 = vmatprep.mubr.f32.mxu1 %v2268_v12  ;;  %v2530_v12 = vld [vmem:[#allocation2 + $0x468] sm:$0xff] }
 0x486   : > { %11416 = vmatprep.subr.mxu1 %v14199_v18 }
 0x487   : > { %11417 = vmatpush3.msra.mxu1 %v14203_v20 }
 0x488   : > { %2369 = vmatmul.mubr.f32.gmra.mxu1 %v2267_v57  ;;  %11418 = vmatprep.subr.mxu1 %v14242_v0  ;;  %v2529_v57 = vld [vmem:[#allocation2 + $0x460] sm:$0xff] }
 0x489   : > { %11419 = vmatpush3.msra.mxu1 %v14246_v11  ;;  %2597 = vmatprep.mubr.f32.mxu1 %v2518_v29  ;;  %v2532_v29 = vld [vmem:[#allocation2 + $0x478] sm:$0xff] }
 0x48a   : > { %11420 = vmatprep.subr.mxu1 %v14250_v14 }
 0x48b   : > { %11421 = vmatpush3.msra.mxu1 %v14254_v24 }
 0x48c   : > { %2598 = vmatmul.mubr.f32.vlgmr.msra.gmra.mxu1 %v2517_v52  ;;  %v2531_v52 = vld [vmem:[#allocation2 + $0x470] sm:$0xff] }
 0x48d   : > { %2602 = vmatprep.mubr.f32.mxu1 %v2520_v51  ;;  %v10697_v51 = vld [vmem:[%s15565_s2 + $0x1c] sm:$0x7] }
 0x48e   : > { %12376 = vmatprep.subr.msk.mxu0 %vm691_vm0, %v10697_v51 }
 0x48f   : > { %12377 = vmatpush3.msk.msra.mxu0 %vm691_vm0, %v10697_v51 }
 0x490   : > { %2603 = vmatmul.mubr.f32.gmra.mxu1 %v2519_v54  ;;  %v10707_v54 = vld [vmem:[%s15565_s2 + $0x20] sm:$0x7] }
 0x491   : > { %2607 = vmatprep.mubr.f32.mxu1 %v2522_v60  ;;  %12390 = vmatprep.subr.msk.mxu0 %vm691_vm0, %v10707_v54 }
 0x494   : > { %2608 = vmatmul.mubr.f32.gmra.mxu1 %v2521_v33 }
 0x495   : > { %2612 = vmatprep.mubr.f32.mxu1 %v2524_v2 }
 0x498   : > { %2613 = vmatmul.mubr.f32.gmra.mxu1 %v2523_v62 }
 0x499   : > { %2617 = vmatprep.mubr.f32.mxu1 %v2526_v30 }
 0x49c   : > { %2618 = vmatmul.mubr.f32.gmra.mxu1 %v2525_v46 }
 0x49d   : > { %2622 = vmatprep.mubr.f32.mxu1 %v2528_v6 }
 0x4a0   : > { %2623 = vmatmul.mubr.f32.gmra.mxu1 %v2527_v53 }
 0x4a1   : > { %2627 = vmatprep.mubr.f32.mxu1 %v2530_v12 }
 0x4a4   : > { %2628 = vmatmul.mubr.f32.gmra.mxu1 %v2529_v57 }
 0x4a5   : > { %2632 = vmatprep.mubr.f32.mxu1 %v2532_v29 }
 0x4a8   : > { %2633 = vmatmul.mubr.f32.gmra.mxu1 %v2531_v52 }
 0x4ec   : > { %v12352_v60 = vpop.f32.mrf.mxu1 }
 0x4ed   : > { %v1981_v33 = vadd.f32 %v12352_v60, %v14278_v5 }
 0x4ee   : > { %v14385_v2 = vpop.f32.mrf.mxu1 }
 0x4f4   : > { %v12355_v62 = vpop.f32.mrf.mxu1 }
 0x4f5   : > { %v1983_v30 = vadd.f32 %v12355_v62, %v14282_v21 }
 0x4f6   : > { %v14388_v46 = vpop.f32.mrf.mxu1 }
 0x4f7   : > { %15585 = vst [vmem:[#allocation26_spill] sm:$0xff] %v14388_v46 }
 0x4fc   : > { %v12358_v6 = vpop.f32.mrf.mxu1 }
 0x4fd   : > { %v1985_v53 = vadd.f32 %v12358_v6, %v14286_v37 }
 0x4fe   : > { %v14391_v12 = vpop.f32.mrf.mxu1 }
 0x4ff   : > { %15586 = vst [vmem:[#allocation27_spill] sm:$0xff] %v14391_v12 }
 0x504   : > { %v12361_v57 = vpop.f32.mrf.mxu1 }
 0x505   : > { %v1987_v29 = vadd.f32 %v12361_v57, %v14290_v32 }
 0x506   : > { %v14394_v52 = vpop.f32.mrf.mxu1 }
 0x507   : > { %15587 = vst [vmem:[#allocation28_spill] sm:$0xff] %v14394_v52 }
 0x50c   : > { %v12366_v51 = vpop.f32.mrf.mxu1 }
 0x50d   : > { %v14396_v58 = vadd.f32 %v12366_v51, %v1981_v33 }
 0x50e   : > { %v14398_v5 = vpop.f32.mrf.mxu1 }
 0x514   : > { %v12369_v60 = vpop.f32.mrf.mxu1 }
 0x515   : > { %v14400_v50 = vadd.f32 %v12369_v60, %v1983_v30 }
 0x516   : > { %v14402_v21 = vpop.f32.mrf.mxu1 }
 0x517   : > { %15588 = vst [vmem:[#allocation29_spill] sm:$0xff] %v14402_v21 }
 0x51c   : > { %v12372_v62 = vpop.f32.mrf.mxu1 }
 0x51d   : > { %v14404_v46 = vadd.f32 %v12372_v62, %v1985_v53 }
 0x51e   : > { %v14406_v37 = vpop.f32.mrf.mxu1 }
 0x51f   : > { %15589 = vst [vmem:[#allocation30_spill] sm:$0xff] %v14406_v37 }
 0x524   : > { %v12375_v6 = vpop.f32.mrf.mxu1 }
 0x525   : > { %v14408_v12 = vadd.f32 %v12375_v6, %v1987_v29 }
 0x526   : > { %v14410_v32 = vpop.f32.mrf.mxu1 }
 0x527   : > { %15590 = vst [vmem:[#allocation31_spill] sm:$0xff] %v14410_v32 }
 0x52c   : > { %v11357_v57 = vpop.f32.mrf.mxu1 }
 0x52e   : > { %v11358_v33 = vpop.f32.mrf.mxu1 }
 0x52f   : > { %v11359_v51 = vadd.f32 %v11358_v33, %v11357_v57 }
 0x530   : > { %v11360_v52 = vpop.f32.mrf.mxu1 }
 0x531   : > { %12378 = vmatprep.mubr.msk.f32.mxu0 %vm666_vm1, %v11359_v51 }
 0x532   : > { %v11361_v30 = vpop.f32.mrf.mxu1 }
 0x533   : > { %v11362_v60 = vadd.f32 %v11361_v30, %v11360_v52 }
 0x534   : > { %v11363_v49 = vpop.f32.mrf.mxu1 }
 0x535   : > { %12379 = vmatmul.mubr.msk.f32.vlgmr.msra.gmra.mxu0 %vm666_vm1, %v11362_v60 }
 0x536   : > { %v11364_v53 = vpop.f32.mrf.mxu1  ;;  %12391 = vmatpush3.msk.msra.mxu0 %vm691_vm0, %v10707_v54 }
 0x537   : > { %v11365_v62 = vadd.f32 %v11364_v53, %v11363_v49  ;;  %11455 = vmatprep.subr.mxu0 %v14211_v27 }
 0x538   : > { %v11366_v29 = vpop.f32.mrf.mxu1 }
 0x539   : > { %12381 = vmatprep.mubr.msk.f32.mxu0 %vm666_vm1, %v11365_v62 }
 0x53a   : > { %v11367_v6 = vpop.f32.mrf.mxu1 }
 0x53b   : > { %v11368_v32 = vadd.f32 %v11367_v6, %v11366_v29 }
 0x53c   : > { %v11369_v57 = vpop.f32.mrf.mxu1 }
 0x53d   : > { %12382 = vmatmul.mubr.msk.f32.gmra.mxu0 %vm666_vm1, %v11368_v32 }
 0x53e   : > { %v11370_v33 = vpop.f32.mrf.mxu1 }
 0x53f   : > { %v11371_v51 = vadd.f32 %v11370_v33, %v11369_v57 }
 0x540   : > { %v11372_v52 = vpop.f32.mrf.mxu1 }
 0x541   : > { %12384 = vmatprep.mubr.msk.f32.mxu0 %vm666_vm1, %v11371_v51 }
 0x542   : > { %v11373_v30 = vpop.f32.mrf.mxu1 }
 0x543   : > { %v11374_v60 = vadd.f32 %v11373_v30, %v11372_v52 }
 0x544   : > { %v11375_v37 = vpop.f32.mrf.mxu1 }
 0x545   : > { %12385 = vmatmul.mubr.msk.f32.gmra.mxu0 %vm666_vm1, %v11374_v60 }
 0x546   : > { %v11376_v49 = vpop.f32.mrf.mxu1 }
 0x547   : > { %v11377_v54 = vadd.f32 %v11376_v49, %v11375_v37 }
 0x548   : > { %v11378_v53 = vpop.f32.mrf.mxu1 }
 0x549   : > { %12387 = vmatprep.mubr.msk.f32.mxu0 %vm666_vm1, %v11377_v54 }
 0x54a   : > { %v11379_v62 = vpop.f32.mrf.mxu1 }
 0x54b   : > { %v11380_v29 = vadd.f32 %v11379_v62, %v11378_v53 }
 0x54c   : > { %v11422_v6 = vpop.f32.mrf.mxu1 }
 0x54d   : > { %12388 = vmatmul.mubr.msk.f32.gmra.mxu0 %vm666_vm1, %v11380_v29 }
 0x54e   : > { %v11423_v32 = vpop.f32.mrf.mxu1 }
 0x54f   : > { %v11424_v57 = vadd.f32 %v11423_v32, %v11422_v6 }
 0x550   : > { %v11425_v33 = vpop.f32.mrf.mxu1 }
 0x551   : > { %12392 = vmatprep.mubr.msk.f32.mxu0 %vm666_vm1, %v11424_v57 }
 0x552   : > { %v11426_v51 = vpop.f32.mrf.mxu1 }
 0x553   : > { %v11427_v52 = vadd.f32 %v11426_v51, %v11425_v33 }
 0x554   : > { %v11428_v30 = vpop.f32.mrf.mxu1 }
 0x555   : > { %12393 = vmatmul.mubr.msk.f32.vlgmr.msra.gmra.mxu0 %vm666_vm1, %v11427_v52 }
 0x556   : > { %11456 = vmatpush3.msra.mxu0 %v14093_v19  ;;  %v11429_v37 = vpop.f32.mrf.mxu1 }
 0x557   : > { %v11430_v60 = vadd.f32 %v11429_v37, %v11428_v30  ;;  %11457 = vmatprep.subr.mxu0 %v14097_v22 }
 0x558   : > { %11458 = vmatpush3.msra.mxu0 %v14101_v23  ;;  %v11431_v49 = vpop.f32.mrf.mxu1 }
 0x559   : > { %11459 = vmatprep.subr.mxu0 %v14105_v25  ;;  %12395 = vmatprep.mubr.msk.f32.mxu0 %vm666_vm1, %v11430_v60 }
 0x55a   : > { %11460 = vmatpush3.msra.mxu0 %v14110_v26  ;;  %v11432_v54 = vpop.f32.mrf.mxu1 }
 0x55b   : > { %v11433_v53 = vadd.f32 %v11432_v54, %v11431_v49  ;;  %11461 = vmatprep.subr.mxu0 %v14114_v36  ;;  %v2782_v54 = vld [vmem:[#allocation2 + $0x488] sm:$0xff] }
 0x55c   : > { %11462 = vmatpush3.msra.mxu0 %v14118_v45  ;;  %v11434_v62 = vpop.f32.mrf.mxu1 }
 0x55d   : > { %11463 = vmatprep.subr.mxu0 %v14122_v55  ;;  %12396 = vmatmul.mubr.msk.f32.gmra.mxu0 %vm666_vm1, %v11433_v53  ;;  %v2781_v53 = vld [vmem:[#allocation2 + $0x480] sm:$0xff] }
 0x55e   : > { %11464 = vmatpush3.msra.mxu0 %v14127_v56  ;;  %v11435_v29 = vpop.f32.mrf.mxu1 }
 0x55f   : > { %v11436_v6 = vadd.f32 %v11435_v29, %v11434_v62  ;;  %11465 = vmatprep.subr.mxu0 %v14131_v42  ;;  %v2784_v62 = vld [vmem:[#allocation2 + $0x498] sm:$0xff]  ;;  %v2783_v29 = vld [vmem:[#allocation2 + $0x490] sm:$0xff] }
 0x560   : > { %11466 = vmatpush3.msra.mxu0 %v14135_v59  ;;  %v11437_v32 = vpop.f32.mrf.mxu1 }
 0x561   : > { %11467 = vmatprep.subr.mxu0 %v14139_v47  ;;  %12398 = vmatprep.mubr.msk.f32.mxu0 %vm666_vm1, %v11436_v6  ;;  %v2786_v6 = vld [vmem:[#allocation2 + $0x4a8] sm:$0xff] }
 0x562   : > { %11468 = vmatpush3.msra.mxu0 %v14144_v61  ;;  %v11438_v57 = vpop.f32.mrf.mxu1 }
 0x563   : > { %v11439_v33 = vadd.f32 %v11438_v57, %v11437_v32  ;;  %11469 = vmatprep.subr.mxu0 %v14148_v63  ;;  %v2785_v32 = vld [vmem:[#allocation2 + $0x4a0] sm:$0xff]  ;;  %v2788_v57 = vld [vmem:[#allocation2 + $0x4b8] sm:$0xff] }
 0x564   : > { %11470 = vmatpush3.msra.mxu0 %v14152_v1  ;;  %v11440_v51 = vpop.f32.mrf.mxu1 }
 0x565   : > { %11471 = vmatprep.subr.mxu0 %v14156_v3  ;;  %12399 = vmatmul.mubr.msk.f32.gmra.mxu0 %vm666_vm1, %v11439_v33 }
 0x566   : > { %11472 = vmatpush3.msra.mxu0 %v14161_v4  ;;  %v11441_v52 = vpop.f32.mrf.mxu1 }
 0x567   : > { %v11442_v30 = vadd.f32 %v11441_v52, %v11440_v51  ;;  %11473 = vmatprep.subr.mxu0 %v14165_v7 }
 0x568   : > { %11474 = vmatpush3.msra.mxu0 %v14169_v8  ;;  %v11443_v37 = vpop.f32.mrf.mxu1 }
 0x569   : > { %11475 = vmatprep.subr.mxu0 %v14173_v9  ;;  %12401 = vmatprep.mubr.msk.f32.mxu0 %vm666_vm1, %v11442_v30 }
 0x56a   : > { %11476 = vmatpush3.msra.mxu0 %v14178_v10  ;;  %v11444_v60 = vpop.f32.mrf.mxu1 }
 0x56b   : > { %v11445_v49 = vadd.f32 %v11444_v60, %v11443_v37  ;;  %11477 = vmatprep.subr.mxu0 %v14182_v13 }
 0x56c   : > { %11478 = vmatpush3.msra.mxu0 %v14186_v15 }
 0x56d   : > { %11479 = vmatprep.subr.mxu0 %v14190_v16  ;;  %12402 = vmatmul.mubr.msk.f32.gmra.mxu0 %vm666_vm1, %v11445_v49 }
 0x56e   : > { %11480 = vmatpush3.msra.mxu0 %v14195_v17  ;;  %2861 = vmatprep.mubr.f32.mxu0 %v2782_v54 }
 0x56f   : > { %11481 = vmatprep.subr.mxu0 %v14199_v18 }
 0x570   : > { %11482 = vmatpush3.msra.mxu0 %v14203_v20 }
 0x571   : > { %11483 = vmatprep.subr.mxu0 %v14242_v0 }
 0x572   : > { %11484 = vmatpush3.msra.mxu0 %v14246_v11 }
 0x573   : > { %11485 = vmatprep.subr.mxu0 %v14250_v14 }
 0x574   : > { %11486 = vmatpush3.msra.mxu0 %v14254_v24 }
 0x575   : > { %2862 = vmatmul.mubr.f32.vlgmr.msra.gmra.mxu0 %v2781_v53  ;;  %11520 = vmatprep.subr.mxu0 %v14211_v27 }
 0x576   : > { %11521 = vmatpush3.msra.mxu0 %v14093_v19  ;;  %2866 = vmatprep.mubr.f32.mxu0 %v2784_v62  ;;  %v2787_v19 = vld [vmem:[#allocation2 + $0x4b0] sm:$0xff] }
 0x577   : > { %11522 = vmatprep.subr.mxu0 %v14097_v22  ;;  %v2790_v22 = vld [vmem:[#allocation2 + $0x4c8] sm:$0xff] }
 0x578   : > { %11523 = vmatpush3.msra.mxu0 %v14101_v23  ;;  %v2789_v23 = vld [vmem:[#allocation2 + $0x4c0] sm:$0xff] }
 0x579   : > { %2867 = vmatmul.mubr.f32.gmra.mxu0 %v2783_v29  ;;  %11524 = vmatprep.subr.mxu0 %v14105_v25  ;;  %v2792_v25 = vld [vmem:[#allocation2 + $0x4d8] sm:$0xff] }
 0x57a   : > { %11525 = vmatpush3.msra.mxu0 %v14110_v26  ;;  %2871 = vmatprep.mubr.f32.mxu0 %v2786_v6  ;;  %v2791_v26 = vld [vmem:[#allocation2 + $0x4d0] sm:$0xff] }
 0x57b   : > { %11526 = vmatprep.subr.mxu0 %v14114_v36  ;;  %v2794_v36 = vld [vmem:[#allocation2 + $0x4e8] sm:$0xff] }
 0x57c   : > { %11527 = vmatpush3.msra.mxu0 %v14118_v45  ;;  %v2793_v45 = vld [vmem:[#allocation2 + $0x4e0] sm:$0xff] }
 0x57d   : > { %2872 = vmatmul.mubr.f32.gmra.mxu0 %v2785_v32  ;;  %11528 = vmatprep.subr.mxu0 %v14122_v55  ;;  %v2796_v55 = vld [vmem:[#allocation2 + $0x4f8] sm:$0xff] }
 0x57e   : > { %11529 = vmatpush3.msra.mxu0 %v14127_v56  ;;  %2876 = vmatprep.mubr.f32.mxu0 %v2788_v57  ;;  %v2795_v56 = vld [vmem:[#allocation2 + $0x4f0] sm:$0xff] }
 0x57f   : > { %11530 = vmatprep.subr.mxu0 %v14131_v42  ;;  %v3046_v42 = vld [vmem:[#allocation2 + $0x508] sm:$0xff] }
 0x580   : > { %11531 = vmatpush3.msra.mxu0 %v14135_v59  ;;  %v3045_v59 = vld [vmem:[#allocation2 + $0x500] sm:$0xff] }
 0x581   : > { %2877 = vmatmul.mubr.f32.gmra.mxu0 %v2787_v19  ;;  %11532 = vmatprep.subr.mxu0 %v14139_v47  ;;  %v3048_v47 = vld [vmem:[#allocation2 + $0x518] sm:$0xff] }
 0x582   : > { %11533 = vmatpush3.msra.mxu0 %v14144_v61  ;;  %2881 = vmatprep.mubr.f32.mxu0 %v2790_v22  ;;  %v3047_v61 = vld [vmem:[#allocation2 + $0x510] sm:$0xff] }
 0x583   : > { %11534 = vmatprep.subr.mxu0 %v14148_v63  ;;  %v3050_v63 = vld [vmem:[#allocation2 + $0x528] sm:$0xff] }
 0x584   : > { %11535 = vmatpush3.msra.mxu0 %v14152_v1  ;;  %v3049_v1 = vld [vmem:[#allocation2 + $0x520] sm:$0xff] }
 0x585   : > { %2882 = vmatmul.mubr.f32.gmra.mxu0 %v2789_v23  ;;  %11536 = vmatprep.subr.mxu0 %v14156_v3  ;;  %v3052_v3 = vld [vmem:[#allocation2 + $0x538] sm:$0xff] }
 0x586   : > { %11537 = vmatpush3.msra.mxu0 %v14161_v4  ;;  %2886 = vmatprep.mubr.f32.mxu0 %v2792_v25  ;;  %v3051_v4 = vld [vmem:[#allocation2 + $0x530] sm:$0xff] }
 0x587   : > { %11538 = vmatprep.subr.mxu0 %v14165_v7  ;;  %v3054_v7 = vld [vmem:[#allocation2 + $0x548] sm:$0xff] }
 0x588   : > { %11539 = vmatpush3.msra.mxu0 %v14169_v8  ;;  %v3053_v8 = vld [vmem:[#allocation2 + $0x540] sm:$0xff] }
 0x589   : > { %2887 = vmatmul.mubr.f32.gmra.mxu0 %v2791_v26  ;;  %11540 = vmatprep.subr.mxu0 %v14173_v9  ;;  %v3056_v9 = vld [vmem:[#allocation2 + $0x558] sm:$0xff] }
 0x58a   : > { %11541 = vmatpush3.msra.mxu0 %v14178_v10  ;;  %2891 = vmatprep.mubr.f32.mxu0 %v2794_v36  ;;  %v3055_v10 = vld [vmem:[#allocation2 + $0x550] sm:$0xff] }
 0x58b   : > { %11542 = vmatprep.subr.mxu0 %v14182_v13  ;;  %v3058_v13 = vld [vmem:[#allocation2 + $0x568] sm:$0xff] }
 0x58c   : > { %11543 = vmatpush3.msra.mxu0 %v14186_v15  ;;  %v3057_v15 = vld [vmem:[#allocation2 + $0x560] sm:$0xff] }
 0x58d   : > { %2892 = vmatmul.mubr.f32.gmra.mxu0 %v2793_v45  ;;  %11544 = vmatprep.subr.mxu0 %v14190_v16  ;;  %v3060_v16 = vld [vmem:[#allocation2 + $0x578] sm:$0xff] }
 0x58e   : > { %11545 = vmatpush3.msra.mxu0 %v14195_v17  ;;  %2896 = vmatprep.mubr.f32.mxu0 %v2796_v55  ;;  %v3059_v17 = vld [vmem:[#allocation2 + $0x570] sm:$0xff] }
 0x58f   : > { %11546 = vmatprep.subr.mxu0 %v14199_v18  ;;  %v10717_v18 = vld [vmem:[%s15565_s2 + $0x24] sm:$0x7] }
 0x590   : > { %11547 = vmatpush3.msra.mxu0 %v14203_v20  ;;  %12404 = vmatprep.subr.msk.mxu1 %vm691_vm0, %v10717_v18  ;;  %v10727_v20 = vld [vmem:[%s15565_s2 + $0x28] sm:$0x7] }
 0x591   : > { %2897 = vmatmul.mubr.f32.gmra.mxu0 %v2795_v56  ;;  %11548 = vmatprep.subr.mxu0 %v14242_v0 }
 0x592   : > { %11549 = vmatpush3.msra.mxu0 %v14246_v11  ;;  %3125 = vmatprep.mubr.f32.mxu0 %v3046_v42 }
 0x593   : > { %11550 = vmatprep.subr.mxu0 %v14250_v14  ;;  %12405 = vmatpush3.msk.msra.mxu1 %vm691_vm0, %v10717_v18 }
 0x594   : > { %11551 = vmatpush3.msra.mxu0 %v14254_v24  ;;  %12418 = vmatprep.subr.msk.mxu1 %vm691_vm0, %v10727_v20 }
 0x595   : > { %3126 = vmatmul.mubr.f32.vlgmr.msra.gmra.mxu0 %v3045_v59  ;;  %v14534_v59 = vld [vmem:[%s13730_s28 + $0xf8] sm:$0xff] }
 0x596   : > { %3130 = vmatprep.mubr.f32.mxu0 %v3048_v47 }
 0x599   : > { %3131 = vmatmul.mubr.f32.gmra.mxu0 %v3047_v61 }
 0x59a   : > { %3135 = vmatprep.mubr.f32.mxu0 %v3050_v63 }
 0x59d   : > { %3136 = vmatmul.mubr.f32.gmra.mxu0 %v3049_v1 }
 0x59e   : > { %3140 = vmatprep.mubr.f32.mxu0 %v3052_v3 }
 0x5a1   : > { %3141 = vmatmul.mubr.f32.gmra.mxu0 %v3051_v4 }
 0x5a2   : > { %3145 = vmatprep.mubr.f32.mxu0 %v3054_v7 }
 0x5a5   : > { %3146 = vmatmul.mubr.f32.gmra.mxu0 %v3053_v8 }
 0x5a6   : > { %3150 = vmatprep.mubr.f32.mxu0 %v3056_v9 }
 0x5a9   : > { %3151 = vmatmul.mubr.f32.gmra.mxu0 %v3055_v10 }
 0x5aa   : > { %3155 = vmatprep.mubr.f32.mxu0 %v3058_v13 }
 0x5ad   : > { %3156 = vmatmul.mubr.f32.gmra.mxu0 %v3057_v15 }
 0x5ae   : > { %3160 = vmatprep.mubr.f32.mxu0 %v3060_v16 }
 0x5b1   : > { %3161 = vmatmul.mubr.f32.gmra.mxu0 %v3059_v17 }
 0x5f5   : > { %v12380_v27 = vpop.f32.mrf.mxu0 }
 0x5f6   : > { %v2509_v0 = vadd.f32 %v12380_v27, %v14396_v58 }
 0x5f7   : > { %v14503_v11 = vpop.f32.mrf.mxu0 }
 0x5fd   : > { %v12383_v14 = vpop.f32.mrf.mxu0 }
 0x5fe   : > { %v2511_v24 = vadd.f32 %v12383_v14, %v14400_v50 }
 0x5ff   : > { %v14506_v33 = vpop.f32.mrf.mxu0 }
 0x600   : > { %15591 = vst [vmem:[#allocation32_spill] sm:$0xff] %v14506_v33  ;;  %v3586_v33 = vld [vmem:[#allocation2 + $0x668] sm:$0xff] }
 0x605   : > { %v12386_v51 = vpop.f32.mrf.mxu0 }
 0x606   : > { %v2513_v52 = vadd.f32 %v12386_v51, %v14404_v46 }
 0x607   : > { %v14509_v30 = vpop.f32.mrf.mxu0 }
 0x608   : > { %15592 = vst [vmem:[#allocation33_spill] sm:$0xff] %v14509_v30  ;;  %v3584_v30 = vld [vmem:[#allocation2 + $0x658] sm:$0xff] }
 0x60d   : > { %v12389_v37 = vpop.f32.mrf.mxu0 }
 0x60e   : > { %v2515_v60 = vadd.f32 %v12389_v37, %v14408_v12  ;;  %v14546_v37 = vld [vmem:[%s13730_s28 + $0x78] sm:$0xff] }
 0x60f   : > { %v14512_v49 = vpop.f32.mrf.mxu0 }
 0x610   : > { %15593 = vst [vmem:[#allocation34_spill] sm:$0xff] %v14512_v49  ;;  %v3580_v49 = vld [vmem:[#allocation2 + $0x638] sm:$0xff] }
 0x615   : > { %v12394_v54 = vpop.f32.mrf.mxu0 }
 0x616   : > { %v14514_v53 = vadd.f32 %v12394_v54, %v2509_v0 }
 0x617   : > { %v14516_v58 = vpop.f32.mrf.mxu0 }
 0x618   : > { %15594 = vst [vmem:[#allocation35_spill] sm:$0xff] %v14516_v58 }
 0x61d   : > { %v12397_v62 = vpop.f32.mrf.mxu0 }
 0x61e   : > { %v14518_v29 = vadd.f32 %v12397_v62, %v2511_v24  ;;  %v14550_v62 = vld [vmem:[%s13730_s28 + $0xf0] sm:$0xff] }
 0x61f   : > { %v14520_v50 = vpop.f32.mrf.mxu0 }
 0x620   : > { %15595 = vst [vmem:[#allocation36_spill] sm:$0xff] %v14520_v50  ;;  %v3583_v50 = vld [vmem:[#allocation2 + $0x650] sm:$0xff] }
 0x625   : > { %v12400_v6 = vpop.f32.mrf.mxu0 }
 0x626   : > { %v14522_v32 = vadd.f32 %v12400_v6, %v2513_v52  ;;  %v14554_v6 = vld [vmem:[%s13730_s28 + $0x70] sm:$0xff] }
 0x627   : > { %v14524_v46 = vpop.f32.mrf.mxu0 }
 0x628   : > { %15596 = vst [vmem:[#allocation37_spill] sm:$0xff] %v14524_v46  ;;  %v3582_v46 = vld [vmem:[#allocation2 + $0x648] sm:$0xff] }
 0x62d   : > { %v12403_v57 = vpop.f32.mrf.mxu0 }
 0x62e   : > { %v14526_v12 = vadd.f32 %v12403_v57, %v2515_v60 }
 0x62f   : > { %v14528_v19 = vpop.f32.mrf.mxu0 }
 0x630   : > { %15597 = vst [vmem:[#allocation38_spill] sm:$0xff] %v14528_v19  ;;  %v3577_v19 = vld [vmem:[#allocation2 + $0x620] sm:$0xff] }
 0x635   : > { %v11487_v22 = vpop.f32.mrf.mxu0 }
 0x637   : > { %v11488_v23 = vpop.f32.mrf.mxu0 }
 0x638   : > { %v11489_v25 = vadd.f32 %v11488_v23, %v11487_v22  ;;  %v14558_v22 = vld [vmem:[%s13730_s28 + $0xe8] sm:$0xff] }
 0x639   : > { %v11490_v26 = vpop.f32.mrf.mxu0  ;;  %v14563_v23 = vld [vmem:[%s13730_s28 + $0x68] sm:$0xff] }
 0x63a   : > { %12406 = vmatprep.mubr.msk.f32.mxu1 %vm666_vm1, %v11489_v25 }
 0x63b   : > { %v11491_v36 = vpop.f32.mrf.mxu0 }
 0x63c   : > { %v11492_v45 = vadd.f32 %v11491_v36, %v11490_v26  ;;  %v14567_v36 = vld [vmem:[%s13730_s28 + $0xe0] sm:$0xff] }
 0x63d   : > { %v11493_v55 = vpop.f32.mrf.mxu0 }
 0x63e   : > { %12407 = vmatmul.mubr.msk.f32.vlgmr.msra.gmra.mxu1 %vm666_vm1, %v11492_v45  ;;  %v14571_v45 = vld [vmem:[%s13730_s28 + $0x60] sm:$0xff] }
 0x63f   : > { %v11494_v56 = vpop.f32.mrf.mxu0  ;;  %12419 = vmatpush3.msk.msra.mxu1 %vm691_vm0, %v10727_v20 }
 0x640   : > { %v11495_v42 = vadd.f32 %v11494_v56, %v11493_v55  ;;  %11585 = vmatprep.subr.mxu1 %v14534_v59  ;;  %v14575_v56 = vld [vmem:[%s13730_s28 + $0xd8] sm:$0xff] }
 0x641   : > { %v11496_v47 = vpop.f32.mrf.mxu0 }
 0x642   : > { %12409 = vmatprep.mubr.msk.f32.mxu1 %vm666_vm1, %v11495_v42  ;;  %v14580_v42 = vld [vmem:[%s13730_s28 + $0x58] sm:$0xff] }
 0x643   : > { %v11497_v61 = vpop.f32.mrf.mxu0 }
 0x644   : > { %v11498_v63 = vadd.f32 %v11497_v61, %v11496_v47 }
 0x645   : > { %v11499_v1 = vpop.f32.mrf.mxu0 }
 0x646   : > { %12410 = vmatmul.mubr.msk.f32.gmra.mxu1 %vm666_vm1, %v11498_v63  ;;  %v14584_v63 = vld [vmem:[%s13730_s28 + $0xd0] sm:$0xff] }
 0x647   : > { %v11500_v3 = vpop.f32.mrf.mxu0 }
 0x648   : > { %v11501_v4 = vadd.f32 %v11500_v3, %v11499_v1  ;;  %v14588_v1 = vld [vmem:[%s13730_s28 + $0x50] sm:$0xff] }
 0x649   : > { %v11502_v7 = vpop.f32.mrf.mxu0 }
 0x64a   : > { %12412 = vmatprep.mubr.msk.f32.mxu1 %vm666_vm1, %v11501_v4  ;;  %v14592_v4 = vld [vmem:[%s13730_s28 + $0xc8] sm:$0xff] }
 0x64b   : > { %v11503_v8 = vpop.f32.mrf.mxu0 }
 0x64c   : > { %v11504_v9 = vadd.f32 %v11503_v8, %v11502_v7  ;;  %v14597_v7 = vld [vmem:[%s13730_s28 + $0x48] sm:$0xff] }
 0x64d   : > { %v11505_v10 = vpop.f32.mrf.mxu0 }
 0x64e   : > { %12413 = vmatmul.mubr.msk.f32.gmra.mxu1 %vm666_vm1, %v11504_v9 }
 0x64f   : > { %v11506_v13 = vpop.f32.mrf.mxu0 }
 0x650   : > { %v11507_v15 = vadd.f32 %v11506_v13, %v11505_v10  ;;  %v14601_v10 = vld [vmem:[%s13730_s28 + $0xc0] sm:$0xff] }
 0x651   : > { %v11508_v16 = vpop.f32.mrf.mxu0  ;;  %v14605_v13 = vld [vmem:[%s13730_s28 + $0x40] sm:$0xff] }
 0x652   : > { %12415 = vmatprep.mubr.msk.f32.mxu1 %vm666_vm1, %v11507_v15 }
 0x653   : > { %v11509_v17 = vpop.f32.mrf.mxu0 }
 0x654   : > { %v11510_v18 = vadd.f32 %v11509_v17, %v11508_v16  ;;  %v14609_v16 = vld [vmem:[%s13730_s28 + $0xb8] sm:$0xff] }
 0x655   : > { %v11552_v20 = vpop.f32.mrf.mxu0  ;;  %v14614_v17 = vld [vmem:[%s13730_s28 + $0x38] sm:$0xff] }
 0x656   : > { %12416 = vmatmul.mubr.msk.f32.gmra.mxu1 %vm666_vm1, %v11510_v18 }
 0x657   : > { %v11553_v27 = vpop.f32.mrf.mxu0 }
 0x658   : > { %v11554_v0 = vadd.f32 %v11553_v27, %v11552_v20  ;;  %v14618_v27 = vld [vmem:[%s13730_s28 + $0xb0] sm:$0xff] }
 0x659   : > { %v11555_v14 = vpop.f32.mrf.mxu0 }
 0x65a   : > { %12420 = vmatprep.mubr.msk.f32.mxu1 %vm666_vm1, %v11554_v0  ;;  %v14622_v0 = vld [vmem:[%s13730_s28 + $0x30] sm:$0xff] }
 0x65b   : > { %v11556_v24 = vpop.f32.mrf.mxu0 }
 0x65c   : > { %v11557_v51 = vadd.f32 %v11556_v24, %v11555_v14  ;;  %v14626_v24 = vld [vmem:[%s13730_s28 + $0xa8] sm:$0xff] }
 0x65d   : > { %v11558_v52 = vpop.f32.mrf.mxu0 }
 0x65e   : > { %12421 = vmatmul.mubr.msk.f32.vlgmr.msra.gmra.mxu1 %vm666_vm1, %v11557_v51  ;;  %v14631_v51 = vld [vmem:[%s13730_s28 + $0x28] sm:$0xff] }
 0x65f   : > { %11586 = vmatpush3.msra.mxu1 %v14546_v37  ;;  %v11559_v60 = vpop.f32.mrf.mxu0 }
 0x660   : > { %v11560_v54 = vadd.f32 %v11559_v60, %v11558_v52  ;;  %11587 = vmatprep.subr.mxu1 %v14550_v62 }
 0x661   : > { %11588 = vmatpush3.msra.mxu1 %v14554_v6  ;;  %v11561_v57 = vpop.f32.mrf.mxu0 }
 0x662   : > { %11589 = vmatprep.subr.mxu1 %v14558_v22  ;;  %12423 = vmatprep.mubr.msk.f32.mxu1 %vm666_vm1, %v11560_v54  ;;  %v14635_v54 = vld [vmem:[%s13730_s28 + $0xa0] sm:$0xff] }
 0x663   : > { %11590 = vmatpush3.msra.mxu1 %v14563_v23  ;;  %v11562_v25 = vpop.f32.mrf.mxu0 }
 0x664   : > { %v11563_v26 = vadd.f32 %v11562_v25, %v11561_v57  ;;  %11591 = vmatprep.subr.mxu1 %v14567_v36  ;;  %v3310_v57 = vld [vmem:[#allocation2 + $0x588] sm:$0xff]  ;;  %v14639_v25 = vld [vmem:[%s13730_s28 + $0x20] sm:$0xff] }
 0x665   : > { %11592 = vmatpush3.msra.mxu1 %v14571_v45  ;;  %v11564_v55 = vpop.f32.mrf.mxu0 }
 0x666   : > { %11593 = vmatprep.subr.mxu1 %v14575_v56  ;;  %12424 = vmatmul.mubr.msk.f32.gmra.mxu1 %vm666_vm1, %v11563_v26  ;;  %v14643_v26 = vld [vmem:[%s13730_s28 + $0x98] sm:$0xff] }
 0x667   : > { %11594 = vmatpush3.msra.mxu1 %v14580_v42  ;;  %v11565_v47 = vpop.f32.mrf.mxu0 }
 0x668   : > { %v11566_v61 = vadd.f32 %v11565_v47, %v11564_v55  ;;  %11595 = vmatprep.subr.mxu1 %v14584_v63  ;;  %v14648_v55 = vld [vmem:[%s13730_s28 + $0x18] sm:$0xff]  ;;  %v14652_v47 = vld [vmem:[%s13730_s28 + $0x90] sm:$0xff] }
 0x669   : > { %11596 = vmatpush3.msra.mxu1 %v14588_v1  ;;  %v11567_v3 = vpop.f32.mrf.mxu0 }
 0x66a   : > { %11597 = vmatprep.subr.mxu1 %v14592_v4  ;;  %12426 = vmatprep.mubr.msk.f32.mxu1 %vm666_vm1, %v11566_v61  ;;  %v14656_v61 = vld [vmem:[%s13730_s28 + $0x10] sm:$0xff] }
 0x66b   : > { %11598 = vmatpush3.msra.mxu1 %v14597_v7  ;;  %v11568_v8 = vpop.f32.mrf.mxu0 }
 0x66c   : > { %v11569_v9 = vadd.f32 %v11568_v8, %v11567_v3  ;;  %11599 = vmatprep.subr.mxu1 %v14601_v10  ;;  %v14660_v3 = vld [vmem:[%s13730_s28 + $0x88] sm:$0xff] }
 0x66d   : > { %11600 = vmatpush3.msra.mxu1 %v14605_v13  ;;  %v11570_v15 = vpop.f32.mrf.mxu0  ;;  %v14664_v8 = vld [vmem:[%s13730_s28 + $0x8] sm:$0xff] }
 0x66e   : > { %11601 = vmatprep.subr.mxu1 %v14609_v16  ;;  %12427 = vmatmul.mubr.msk.f32.gmra.mxu1 %vm666_vm1, %v11569_v9  ;;  %v3309_v9 = vld [vmem:[#allocation2 + $0x580] sm:$0xff] }
 0x66f   : > { %11602 = vmatpush3.msra.mxu1 %v14614_v17  ;;  %v11571_v18 = vpop.f32.mrf.mxu0 }
 0x670   : > { %v11572_v20 = vadd.f32 %v11571_v18, %v11570_v15  ;;  %11603 = vmatprep.subr.mxu1 %v14618_v27  ;;  %v14668_v15 = vld [vmem:[%s13730_s28 + $0x80] sm:$0xff]  ;;  %v3312_v18 = vld [vmem:[#allocation2 + $0x598] sm:$0xff] }
 0x671   : > { %11604 = vmatpush3.msra.mxu1 %v14622_v0  ;;  %v11573_v14 = vpop.f32.mrf.mxu0 }
 0x672   : > { %11605 = vmatprep.subr.mxu1 %v14626_v24  ;;  %12429 = vmatprep.mubr.msk.f32.mxu1 %vm666_vm1, %v11572_v20  ;;  %v14672_v20 = vld [vmem:[%s13730_s28] sm:$0xff] }
 0x673   : > { %11606 = vmatpush3.msra.mxu1 %v14631_v51  ;;  %v11574_v52 = vpop.f32.mrf.mxu0 }
 0x674   : > { %v11575_v60 = vadd.f32 %v11574_v52, %v11573_v14  ;;  %11607 = vmatprep.subr.mxu1 %v14635_v54  ;;  %v3311_v14 = vld [vmem:[#allocation2 + $0x590] sm:$0xff]  ;;  %v3314_v52 = vld [vmem:[#allocation2 + $0x5a8] sm:$0xff] }
 0x675   : > { %11608 = vmatpush3.msra.mxu1 %v14639_v25 }
 0x676   : > { %11609 = vmatprep.subr.mxu1 %v14643_v26  ;;  %12430 = vmatmul.mubr.msk.f32.gmra.mxu1 %vm666_vm1, %v11575_v60  ;;  %v3313_v60 = vld [vmem:[#allocation2 + $0x5a0] sm:$0xff] }
 0x677   : > { %11610 = vmatpush3.msra.mxu1 %v14648_v55  ;;  %3389 = vmatprep.mubr.f32.mxu1 %v3310_v57  ;;  %v3316_v57 = vld [vmem:[#allocation2 + $0x5b8] sm:$0xff] }
 0x678   : > { %11611 = vmatprep.subr.mxu1 %v14652_v47 }
 0x679   : > { %11612 = vmatpush3.msra.mxu1 %v14656_v61 }
 0x67a   : > { %11613 = vmatprep.subr.mxu1 %v14660_v3 }
 0x67b   : > { %11614 = vmatpush3.msra.mxu1 %v14664_v8 }
 0x67c   : > { %11615 = vmatprep.subr.mxu1 %v14668_v15 }
 0x67d   : > { %11616 = vmatpush3.msra.mxu1 %v14672_v20 }
 0x67e   : > { %3390 = vmatmul.mubr.f32.vlgmr.msra.gmra.mxu1 %v3309_v9  ;;  %11650 = vmatprep.subr.mxu1 %v14534_v59  ;;  %v3315_v9 = vld [vmem:[#allocation2 + $0x5b0] sm:$0xff] }
 0x67f   : > { %11651 = vmatpush3.msra.mxu1 %v14546_v37  ;;  %3394 = vmatprep.mubr.f32.mxu1 %v3312_v18  ;;  %v3318_v18 = vld [vmem:[#allocation2 + $0x5c8] sm:$0xff] }
 0x680   : > { %11652 = vmatprep.subr.mxu1 %v14550_v62 }
 0x681   : > { %11653 = vmatpush3.msra.mxu1 %v14554_v6 }
 0x682   : > { %3395 = vmatmul.mubr.f32.gmra.mxu1 %v3311_v14  ;;  %11654 = vmatprep.subr.mxu1 %v14558_v22  ;;  %v3317_v14 = vld [vmem:[#allocation2 + $0x5c0] sm:$0xff] }
 0x683   : > { %11655 = vmatpush3.msra.mxu1 %v14563_v23  ;;  %3399 = vmatprep.mubr.f32.mxu1 %v3314_v52  ;;  %v3320_v52 = vld [vmem:[#allocation2 + $0x5d8] sm:$0xff] }
 0x684   : > { %11656 = vmatprep.subr.mxu1 %v14567_v36 }
 0x685   : > { %11657 = vmatpush3.msra.mxu1 %v14571_v45 }
 0x686   : > { %3400 = vmatmul.mubr.f32.gmra.mxu1 %v3313_v60  ;;  %11658 = vmatprep.subr.mxu1 %v14575_v56  ;;  %v3319_v60 = vld [vmem:[#allocation2 + $0x5d0] sm:$0xff] }
 0x687   : > { %11659 = vmatpush3.msra.mxu1 %v14580_v42  ;;  %3404 = vmatprep.mubr.f32.mxu1 %v3316_v57  ;;  %v3322_v57 = vld [vmem:[#allocation2 + $0x5e8] sm:$0xff] }
 0x688   : > { %11660 = vmatprep.subr.mxu1 %v14584_v63 }
 0x689   : > { %11661 = vmatpush3.msra.mxu1 %v14588_v1 }
 0x68a   : > { %3405 = vmatmul.mubr.f32.gmra.mxu1 %v3315_v9  ;;  %11662 = vmatprep.subr.mxu1 %v14592_v4  ;;  %v3321_v9 = vld [vmem:[#allocation2 + $0x5e0] sm:$0xff] }
 0x68b   : > { %11663 = vmatpush3.msra.mxu1 %v14597_v7  ;;  %3409 = vmatprep.mubr.f32.mxu1 %v3318_v18  ;;  %v3324_v18 = vld [vmem:[#allocation2 + $0x5f8] sm:$0xff] }
 0x68c   : > { %11664 = vmatprep.subr.mxu1 %v14601_v10 }
 0x68d   : > { %11665 = vmatpush3.msra.mxu1 %v14605_v13 }
 0x68e   : > { %3410 = vmatmul.mubr.f32.gmra.mxu1 %v3317_v14  ;;  %11666 = vmatprep.subr.mxu1 %v14609_v16  ;;  %v3323_v14 = vld [vmem:[#allocation2 + $0x5f0] sm:$0xff] }
 0x68f   : > { %11667 = vmatpush3.msra.mxu1 %v14614_v17  ;;  %3414 = vmatprep.mubr.f32.mxu1 %v3320_v52  ;;  %v3574_v52 = vld [vmem:[#allocation2 + $0x608] sm:$0xff] }
 0x690   : > { %11668 = vmatprep.subr.mxu1 %v14618_v27 }
 0x691   : > { %11669 = vmatpush3.msra.mxu1 %v14622_v0 }
 0x692   : > { %3415 = vmatmul.mubr.f32.gmra.mxu1 %v3319_v60  ;;  %11670 = vmatprep.subr.mxu1 %v14626_v24  ;;  %v3573_v60 = vld [vmem:[#allocation2 + $0x600] sm:$0xff] }
 0x693   : > { %11671 = vmatpush3.msra.mxu1 %v14631_v51  ;;  %3419 = vmatprep.mubr.f32.mxu1 %v3322_v57  ;;  %v3576_v57 = vld [vmem:[#allocation2 + $0x618] sm:$0xff] }
 0x694   : > { %11672 = vmatprep.subr.mxu1 %v14635_v54 }
 0x695   : > { %11673 = vmatpush3.msra.mxu1 %v14639_v25 }
 0x696   : > { %3420 = vmatmul.mubr.f32.gmra.mxu1 %v3321_v9  ;;  %11674 = vmatprep.subr.mxu1 %v14643_v26  ;;  %v3575_v9 = vld [vmem:[#allocation2 + $0x610] sm:$0xff] }
 0x697   : > { %11675 = vmatpush3.msra.mxu1 %v14648_v55  ;;  %3424 = vmatprep.mubr.f32.mxu1 %v3324_v18  ;;  %v3578_v18 = vld [vmem:[#allocation2 + $0x628] sm:$0xff] }
 0x698   : > { %11676 = vmatprep.subr.mxu1 %v14652_v47 }
 0x699   : > { %11677 = vmatpush3.msra.mxu1 %v14656_v61 }
 0x69a   : > { %3425 = vmatmul.mubr.f32.gmra.mxu1 %v3323_v14  ;;  %11678 = vmatprep.subr.mxu1 %v14660_v3  ;;  %v3579_v14 = vld [vmem:[#allocation2 + $0x630] sm:$0xff] }
 0x69b   : > { %11679 = vmatpush3.msra.mxu1 %v14664_v8  ;;  %3653 = vmatprep.mubr.f32.mxu1 %v3574_v52  ;;  %v3581_v52 = vld [vmem:[#allocation2 + $0x640] sm:$0xff] }
 0x69c   : > { %11680 = vmatprep.subr.mxu1 %v14668_v15 }
 0x69d   : > { %11681 = vmatpush3.msra.mxu1 %v14672_v20 }
 0x69e   : > { %3654 = vmatmul.mubr.f32.vlgmr.msra.gmra.mxu1 %v3573_v60  ;;  %v3585_v60 = vld [vmem:[#allocation2 + $0x660] sm:$0xff] }
 0x69f   : > { %3658 = vmatprep.mubr.f32.mxu1 %v3576_v57  ;;  %v3588_v57 = vld [vmem:[#allocation2 + $0x678] sm:$0xff] }
 0x6a2   : > { %3659 = vmatmul.mubr.f32.gmra.mxu1 %v3575_v9  ;;  %v3587_v9 = vld [vmem:[#allocation2 + $0x670] sm:$0xff] }
 0x6a3   : > { %3663 = vmatprep.mubr.f32.mxu1 %v3578_v18 }
 0x6a6   : > { %3664 = vmatmul.mubr.f32.gmra.mxu1 %v3577_v19 }
 0x6a7   : > { %3668 = vmatprep.mubr.f32.mxu1 %v3580_v49  ;;  %v10737_v49 = vld [vmem:[%s15565_s2 + $0x2c] sm:$0x7] }
 0x6a8   : > { %12432 = vmatprep.subr.msk.mxu0 %vm691_vm0, %v10737_v49 }
 0x6a9   : > { %12433 = vmatpush3.msk.msra.mxu0 %vm691_vm0, %v10737_v49 }
 0x6aa   : > { %3669 = vmatmul.mubr.f32.gmra.mxu1 %v3579_v14 }
 0x6ab   : > { %3673 = vmatprep.mubr.f32.mxu1 %v3582_v46 }
 0x6ae   : > { %3674 = vmatmul.mubr.f32.gmra.mxu1 %v3581_v52 }
 0x6af   : > { %3678 = vmatprep.mubr.f32.mxu1 %v3584_v30  ;;  %v10747_v30 = vld [vmem:[%s15565_s2 + $0x30] sm:$0x7] }
 0x6b0   : > { %12446 = vmatprep.subr.msk.mxu0 %vm691_vm0, %v10747_v30 }
 0x6b2   : > { %3679 = vmatmul.mubr.f32.gmra.mxu1 %v3583_v50 }
 0x6b3   : > { %3683 = vmatprep.mubr.f32.mxu1 %v3586_v33 }
 0x6b6   : > { %3684 = vmatmul.mubr.f32.gmra.mxu1 %v3585_v60 }
 0x6b7   : > { %3688 = vmatprep.mubr.f32.mxu1 %v3588_v57 }
 0x6ba   : > { %3689 = vmatmul.mubr.f32.gmra.mxu1 %v3587_v9 }
 0x6fe   : > { %v12408_v33 = vpop.f32.mrf.mxu1 }
 0x6ff   : > { %v3037_v50 = vadd.f32 %v12408_v33, %v14514_v53 }
 0x700   : > { %v14717_v46 = vpop.f32.mrf.mxu1 }
 0x701   : > { %15598 = vst [vmem:[#allocation39_spill] sm:$0xff] %v14717_v46 }
 0x706   : > { %v12411_v19 = vpop.f32.mrf.mxu1 }
 0x707   : > { %v3039_v18 = vadd.f32 %v12411_v19, %v14518_v29 }
 0x708   : > { %v14720_v14 = vpop.f32.mrf.mxu1 }
 0x709   : > { %15599 = vst [vmem:[#allocation40_spill] sm:$0xff] %v14720_v14 }
 0x70e   : > { %v12414_v52 = vpop.f32.mrf.mxu1 }
 0x70f   : > { %v3041_v60 = vadd.f32 %v12414_v52, %v14522_v32 }
 0x710   : > { %v14723_v57 = vpop.f32.mrf.mxu1 }
 0x711   : > { %15600 = vst [vmem:[#allocation41_spill] sm:$0xff] %v14723_v57 }
 0x716   : > { %v12417_v9 = vpop.f32.mrf.mxu1 }
 0x717   : > { %v3043_v49 = vadd.f32 %v12417_v9, %v14526_v12 }
 0x718   : > { %v14726_v21 = vpop.f32.mrf.mxu1 }
 0x719   : > { %15601 = vst [vmem:[#allocation42_spill] sm:$0xff] %v14726_v21 }
 0x71e   : > { %v12422_v48 = vpop.f32.mrf.mxu1 }
 0x71f   : > { %v14728_v58 = vadd.f32 %v12422_v48, %v3037_v50 }
 0x720   : > { %v14730_v53 = vpop.f32.mrf.mxu1 }
 0x721   : > { %15602 = vst [vmem:[#allocation43_spill] sm:$0xff] %v14730_v53 }
 0x726   : > { %v12425_v33 = vpop.f32.mrf.mxu1 }
 0x727   : > { %v14732_v46 = vadd.f32 %v12425_v33, %v3039_v18 }
 0x728   : > { %v14734_v29 = vpop.f32.mrf.mxu1 }
 0x729   : > { %15603 = vst [vmem:[#allocation44_spill] sm:$0xff] %v14734_v29 }
 0x72e   : > { %v12428_v19 = vpop.f32.mrf.mxu1 }
 0x72f   : > { %v14736_v14 = vadd.f32 %v12428_v19, %v3041_v60 }
 0x730   : > { %v14738_v32 = vpop.f32.mrf.mxu1 }
 0x731   : > { %15604 = vst [vmem:[#allocation45_spill] sm:$0xff] %v14738_v32 }
 0x736   : > { %v12431_v52 = vpop.f32.mrf.mxu1 }
 0x737   : > { %v14740_v57 = vadd.f32 %v12431_v52, %v3043_v49 }
 0x738   : > { %v14742_v12 = vpop.f32.mrf.mxu1 }
 0x739   : > { %15605 = vst [vmem:[#allocation46_spill] sm:$0xff] %v14742_v12 }
 0x73e   : > { %v11617_v9 = vpop.f32.mrf.mxu1 }
 0x740   : > { %v11618_v48 = vpop.f32.mrf.mxu1 }
 0x741   : > { %v11619_v50 = vadd.f32 %v11618_v48, %v11617_v9 }
 0x742   : > { %v11620_v21 = vpop.f32.mrf.mxu1 }
 0x743   : > { %12434 = vmatprep.mubr.msk.f32.mxu0 %vm666_vm1, %v11619_v50 }
 0x744   : > { %v11621_v18 = vpop.f32.mrf.mxu1 }
 0x745   : > { %v11622_v33 = vadd.f32 %v11621_v18, %v11620_v21 }
 0x746   : > { %v11623_v53 = vpop.f32.mrf.mxu1 }
 0x747   : > { %12435 = vmatmul.mubr.msk.f32.vlgmr.msra.gmra.mxu0 %vm666_vm1, %v11622_v33 }
 0x748   : > { %v11624_v60 = vpop.f32.mrf.mxu1  ;;  %12447 = vmatpush3.msk.msra.mxu0 %vm691_vm0, %v10747_v30 }
 0x749   : > { %v11625_v19 = vadd.f32 %v11624_v60, %v11623_v53  ;;  %11715 = vmatprep.subr.mxu0 %v14534_v59 }
 0x74a   : > { %v11626_v49 = vpop.f32.mrf.mxu1 }
 0x74b   : > { %12437 = vmatprep.mubr.msk.f32.mxu0 %vm666_vm1, %v11625_v19 }
 0x74c   : > { %v11627_v52 = vpop.f32.mrf.mxu1 }
 0x74d   : > { %v11628_v12 = vadd.f32 %v11627_v52, %v11626_v49 }
 0x74e   : > { %v11629_v9 = vpop.f32.mrf.mxu1 }
 0x74f   : > { %12438 = vmatmul.mubr.msk.f32.gmra.mxu0 %vm666_vm1, %v11628_v12 }
 0x750   : > { %v11630_v48 = vpop.f32.mrf.mxu1 }
 0x751   : > { %v11631_v50 = vadd.f32 %v11630_v48, %v11629_v9 }
 0x752   : > { %v11632_v21 = vpop.f32.mrf.mxu1 }
 0x753   : > { %12440 = vmatprep.mubr.msk.f32.mxu0 %vm666_vm1, %v11631_v50 }
 0x754   : > { %v11633_v18 = vpop.f32.mrf.mxu1 }
 0x755   : > { %v11634_v33 = vadd.f32 %v11633_v18, %v11632_v21 }
 0x756   : > { %v11635_v32 = vpop.f32.mrf.mxu1 }
 0x757   : > { %12441 = vmatmul.mubr.msk.f32.gmra.mxu0 %vm666_vm1, %v11634_v33 }
 0x758   : > { %v11636_v30 = vpop.f32.mrf.mxu1 }
 0x759   : > { %v11637_v53 = vadd.f32 %v11636_v30, %v11635_v32 }
 0x75a   : > { %v11638_v60 = vpop.f32.mrf.mxu1 }
 0x75b   : > { %12443 = vmatprep.mubr.msk.f32.mxu0 %vm666_vm1, %v11637_v53 }
 0x75c   : > { %v11639_v19 = vpop.f32.mrf.mxu1 }
 0x75d   : > { %v11640_v49 = vadd.f32 %v11639_v19, %v11638_v60 }
 0x75e   : > { %v11682_v52 = vpop.f32.mrf.mxu1 }
 0x75f   : > { %12444 = vmatmul.mubr.msk.f32.gmra.mxu0 %vm666_vm1, %v11640_v49 }
 0x760   : > { %v11683_v12 = vpop.f32.mrf.mxu1 }
 0x761   : > { %v11684_v9 = vadd.f32 %v11683_v12, %v11682_v52 }
 0x762   : > { %v11685_v48 = vpop.f32.mrf.mxu1 }
 0x763   : > { %12448 = vmatprep.mubr.msk.f32.mxu0 %vm666_vm1, %v11684_v9 }
 0x764   : > { %v11686_v50 = vpop.f32.mrf.mxu1 }
 0x765   : > { %v11687_v21 = vadd.f32 %v11686_v50, %v11685_v48 }
 0x766   : > { %v11688_v18 = vpop.f32.mrf.mxu1 }
 0x767   : > { %12449 = vmatmul.mubr.msk.f32.vlgmr.msra.gmra.mxu0 %vm666_vm1, %v11687_v21 }
 0x768   : > { %11716 = vmatpush3.msra.mxu0 %v14546_v37  ;;  %v11689_v32 = vpop.f32.mrf.mxu1 }
 0x769   : > { %v11690_v33 = vadd.f32 %v11689_v32, %v11688_v18  ;;  %11717 = vmatprep.subr.mxu0 %v14550_v62 }
 0x76a   : > { %11718 = vmatpush3.msra.mxu0 %v14554_v6  ;;  %v11691_v30 = vpop.f32.mrf.mxu1 }
 0x76b   : > { %11719 = vmatprep.subr.mxu0 %v14558_v22  ;;  %12451 = vmatprep.mubr.msk.f32.mxu0 %vm666_vm1, %v11690_v33 }
 0x76c   : > { %11720 = vmatpush3.msra.mxu0 %v14563_v23  ;;  %v11692_v53 = vpop.f32.mrf.mxu1 }
 0x76d   : > { %v11693_v60 = vadd.f32 %v11692_v53, %v11691_v30  ;;  %11721 = vmatprep.subr.mxu0 %v14567_v36  ;;  %v3838_v53 = vld [vmem:[#allocation2 + $0x688] sm:$0xff] }
 0x76e   : > { %11722 = vmatpush3.msra.mxu0 %v14571_v45  ;;  %v11694_v19 = vpop.f32.mrf.mxu1 }
 0x76f   : > { %11723 = vmatprep.subr.mxu0 %v14575_v56  ;;  %12452 = vmatmul.mubr.msk.f32.gmra.mxu0 %vm666_vm1, %v11693_v60  ;;  %v3837_v60 = vld [vmem:[#allocation2 + $0x680] sm:$0xff] }
 0x770   : > { %11724 = vmatpush3.msra.mxu0 %v14580_v42  ;;  %v11695_v49 = vpop.f32.mrf.mxu1 }
 0x771   : > { %v11696_v52 = vadd.f32 %v11695_v49, %v11694_v19  ;;  %11725 = vmatprep.subr.mxu0 %v14584_v63  ;;  %v3840_v19 = vld [vmem:[#allocation2 + $0x698] sm:$0xff]  ;;  %v3839_v49 = vld [vmem:[#allocation2 + $0x690] sm:$0xff] }
 0x772   : > { %11726 = vmatpush3.msra.mxu0 %v14588_v1  ;;  %v11697_v12 = vpop.f32.mrf.mxu1 }
 0x773   : > { %11727 = vmatprep.subr.mxu0 %v14592_v4  ;;  %12454 = vmatprep.mubr.msk.f32.mxu0 %vm666_vm1, %v11696_v52  ;;  %v3842_v52 = vld [vmem:[#allocation2 + $0x6a8] sm:$0xff] }
 0x774   : > { %11728 = vmatpush3.msra.mxu0 %v14597_v7  ;;  %v11698_v9 = vpop.f32.mrf.mxu1 }
 0x775   : > { %v11699_v48 = vadd.f32 %v11698_v9, %v11697_v12  ;;  %11729 = vmatprep.subr.mxu0 %v14601_v10  ;;  %v3841_v12 = vld [vmem:[#allocation2 + $0x6a0] sm:$0xff]  ;;  %v3844_v9 = vld [vmem:[#allocation2 + $0x6b8] sm:$0xff] }
 0x776   : > { %11730 = vmatpush3.msra.mxu0 %v14605_v13  ;;  %v11700_v50 = vpop.f32.mrf.mxu1 }
 0x777   : > { %11731 = vmatprep.subr.mxu0 %v14609_v16  ;;  %12455 = vmatmul.mubr.msk.f32.gmra.mxu0 %vm666_vm1, %v11699_v48  ;;  %v3843_v48 = vld [vmem:[#allocation2 + $0x6b0] sm:$0xff] }
 0x778   : > { %11732 = vmatpush3.msra.mxu0 %v14614_v17  ;;  %v11701_v21 = vpop.f32.mrf.mxu1 }
 0x779   : > { %v11702_v18 = vadd.f32 %v11701_v21, %v11700_v50  ;;  %11733 = vmatprep.subr.mxu0 %v14618_v27  ;;  %v3846_v50 = vld [vmem:[#allocation2 + $0x6c8] sm:$0xff]  ;;  %v3845_v21 = vld [vmem:[#allocation2 + $0x6c0] sm:$0xff] }
 0x77a   : > { %11734 = vmatpush3.msra.mxu0 %v14622_v0  ;;  %v11703_v32 = vpop.f32.mrf.mxu1 }
 0x77b   : > { %11735 = vmatprep.subr.mxu0 %v14626_v24  ;;  %12457 = vmatprep.mubr.msk.f32.mxu0 %vm666_vm1, %v11702_v18  ;;  %v3848_v18 = vld [vmem:[#allocation2 + $0x6d8] sm:$0xff] }
 0x77c   : > { %11736 = vmatpush3.msra.mxu0 %v14631_v51  ;;  %v11704_v33 = vpop.f32.mrf.mxu1 }
 0x77d   : > { %v11705_v30 = vadd.f32 %v11704_v33, %v11703_v32  ;;  %11737 = vmatprep.subr.mxu0 %v14635_v54  ;;  %v3847_v32 = vld [vmem:[#allocation2 + $0x6d0] sm:$0xff]  ;;  %v3850_v33 = vld [vmem:[#allocation2 + $0x6e8] sm:$0xff] }
 0x77e   : > { %11738 = vmatpush3.msra.mxu0 %v14639_v25 }
 0x77f   : > { %11739 = vmatprep.subr.mxu0 %v14643_v26  ;;  %12458 = vmatmul.mubr.msk.f32.gmra.mxu0 %vm666_vm1, %v11705_v30  ;;  %v3849_v30 = vld [vmem:[#allocation2 + $0x6e0] sm:$0xff] }
 0x780   : > { %11740 = vmatpush3.msra.mxu0 %v14648_v55  ;;  %3917 = vmatprep.mubr.f32.mxu0 %v3838_v53  ;;  %v3852_v53 = vld [vmem:[#allocation2 + $0x6f8] sm:$0xff] }
 0x781   : > { %11741 = vmatprep.subr.mxu0 %v14652_v47 }
 0x782   : > { %11742 = vmatpush3.msra.mxu0 %v14656_v61 }
 0x783   : > { %11743 = vmatprep.subr.mxu0 %v14660_v3 }
 0x784   : > { %11744 = vmatpush3.msra.mxu0 %v14664_v8 }
 0x785   : > { %11745 = vmatprep.subr.mxu0 %v14668_v15 }
 0x786   : > { %11746 = vmatpush3.msra.mxu0 %v14672_v20 }
 0x787   : > { %3918 = vmatmul.mubr.f32.vlgmr.msra.gmra.mxu0 %v3837_v60  ;;  %11780 = vmatprep.subr.mxu0 %v14534_v59  ;;  %v3851_v60 = vld [vmem:[#allocation2 + $0x6f0] sm:$0xff] }
 0x788   : > { %11781 = vmatpush3.msra.mxu0 %v14546_v37  ;;  %3922 = vmatprep.mubr.f32.mxu0 %v3840_v19  ;;  %v4102_v19 = vld [vmem:[#allocation2 + $0x708] sm:$0xff] }
 0x789   : > { %11782 = vmatprep.subr.mxu0 %v14550_v62 }
 0x78a   : > { %11783 = vmatpush3.msra.mxu0 %v14554_v6 }
 0x78b   : > { %3923 = vmatmul.mubr.f32.gmra.mxu0 %v3839_v49  ;;  %11784 = vmatprep.subr.mxu0 %v14558_v22  ;;  %v4101_v49 = vld [vmem:[#allocation2 + $0x700] sm:$0xff] }
 0x78c   : > { %11785 = vmatpush3.msra.mxu0 %v14563_v23  ;;  %3927 = vmatprep.mubr.f32.mxu0 %v3842_v52  ;;  %v4104_v52 = vld [vmem:[#allocation2 + $0x718] sm:$0xff] }
 0x78d   : > { %11786 = vmatprep.subr.mxu0 %v14567_v36 }
 0x78e   : > { %11787 = vmatpush3.msra.mxu0 %v14571_v45 }
 0x78f   : > { %3928 = vmatmul.mubr.f32.gmra.mxu0 %v3841_v12  ;;  %11788 = vmatprep.subr.mxu0 %v14575_v56  ;;  %v4103_v12 = vld [vmem:[#allocation2 + $0x710] sm:$0xff] }
 0x790   : > { %11789 = vmatpush3.msra.mxu0 %v14580_v42  ;;  %3932 = vmatprep.mubr.f32.mxu0 %v3844_v9  ;;  %v4106_v9 = vld [vmem:[#allocation2 + $0x728] sm:$0xff] }
 0x791   : > { %11790 = vmatprep.subr.mxu0 %v14584_v63 }
 0x792   : > { %11791 = vmatpush3.msra.mxu0 %v14588_v1 }
 0x793   : > { %3933 = vmatmul.mubr.f32.gmra.mxu0 %v3843_v48  ;;  %11792 = vmatprep.subr.mxu0 %v14592_v4  ;;  %v4105_v48 = vld [vmem:[#allocation2 + $0x720] sm:$0xff] }
 0x794   : > { %11793 = vmatpush3.msra.mxu0 %v14597_v7  ;;  %3937 = vmatprep.mubr.f32.mxu0 %v3846_v50  ;;  %v4108_v50 = vld [vmem:[#allocation2 + $0x738] sm:$0xff] }
 0x795   : > { %11794 = vmatprep.subr.mxu0 %v14601_v10 }
 0x796   : > { %11795 = vmatpush3.msra.mxu0 %v14605_v13 }
 0x797   : > { %3938 = vmatmul.mubr.f32.gmra.mxu0 %v3845_v21  ;;  %11796 = vmatprep.subr.mxu0 %v14609_v16  ;;  %v4107_v21 = vld [vmem:[#allocation2 + $0x730] sm:$0xff] }
 0x798   : > { %11797 = vmatpush3.msra.mxu0 %v14614_v17  ;;  %3942 = vmatprep.mubr.f32.mxu0 %v3848_v18  ;;  %v4110_v18 = vld [vmem:[#allocation2 + $0x748] sm:$0xff] }
 0x799   : > { %11798 = vmatprep.subr.mxu0 %v14618_v27 }
 0x79a   : > { %11799 = vmatpush3.msra.mxu0 %v14622_v0 }
 0x79b   : > { %3943 = vmatmul.mubr.f32.gmra.mxu0 %v3847_v32  ;;  %11800 = vmatprep.subr.mxu0 %v14626_v24  ;;  %v4109_v32 = vld [vmem:[#allocation2 + $0x740] sm:$0xff] }
 0x79c   : > { %11801 = vmatpush3.msra.mxu0 %v14631_v51  ;;  %3947 = vmatprep.mubr.f32.mxu0 %v3850_v33  ;;  %v4112_v33 = vld [vmem:[#allocation2 + $0x758] sm:$0xff] }
 0x79d   : > { %11802 = vmatprep.subr.mxu0 %v14635_v54 }
 0x79e   : > { %11803 = vmatpush3.msra.mxu0 %v14639_v25 }
 0x79f   : > { %3948 = vmatmul.mubr.f32.gmra.mxu0 %v3849_v30  ;;  %11804 = vmatprep.subr.mxu0 %v14643_v26  ;;  %v4111_v30 = vld [vmem:[#allocation2 + $0x750] sm:$0xff] }
 0x7a0   : > { %11805 = vmatpush3.msra.mxu0 %v14648_v55  ;;  %3952 = vmatprep.mubr.f32.mxu0 %v3852_v53  ;;  %v4114_v53 = vld [vmem:[#allocation2 + $0x768] sm:$0xff] }
 0x7a1   : > { %11806 = vmatprep.subr.mxu0 %v14652_v47 }
 0x7a2   : > { %11807 = vmatpush3.msra.mxu0 %v14656_v61 }
 0x7a3   : > { %3953 = vmatmul.mubr.f32.gmra.mxu0 %v3851_v60  ;;  %11808 = vmatprep.subr.mxu0 %v14660_v3  ;;  %v4113_v60 = vld [vmem:[#allocation2 + $0x760] sm:$0xff] }
 0x7a4   : > { %11809 = vmatpush3.msra.mxu0 %v14664_v8  ;;  %4181 = vmatprep.mubr.f32.mxu0 %v4102_v19  ;;  %v4116_v19 = vld [vmem:[#allocation2 + $0x778] sm:$0xff] }
 0x7a5   : > { %11810 = vmatprep.subr.mxu0 %v14668_v15 }
 0x7a6   : > { %11811 = vmatpush3.msra.mxu0 %v14672_v20 }
 0x7a7   : > { %4182 = vmatmul.mubr.f32.vlgmr.msra.gmra.mxu0 %v4101_v49  ;;  %v4115_v49 = vld [vmem:[#allocation2 + $0x770] sm:$0xff] }
 0x7a8   : > { %4186 = vmatprep.mubr.f32.mxu0 %v4104_v52  ;;  %v10757_v52 = vld [vmem:[%s15565_s2 + $0x34] sm:$0x7] }
 0x7a9   : > { %12460 = vmatprep.subr.msk.mxu1 %vm691_vm0, %v10757_v52 }
 0x7aa   : > { %12461 = vmatpush3.msk.msra.mxu1 %vm691_vm0, %v10757_v52 }
 0x7ab   : > { %4187 = vmatmul.mubr.f32.gmra.mxu0 %v4103_v12  ;;  %v10767_v12 = vld [vmem:[%s15565_s2 + $0x38] sm:$0x7] }
 0x7ac   : > { %4191 = vmatprep.mubr.f32.mxu0 %v4106_v9  ;;  %12474 = vmatprep.subr.msk.mxu1 %vm691_vm0, %v10767_v12 }
 0x7af   : > { %4192 = vmatmul.mubr.f32.gmra.mxu0 %v4105_v48 }
 0x7b0   : > { %4196 = vmatprep.mubr.f32.mxu0 %v4108_v50 }
 0x7b3   : > { %4197 = vmatmul.mubr.f32.gmra.mxu0 %v4107_v21 }
 0x7b4   : > { %4201 = vmatprep.mubr.f32.mxu0 %v4110_v18 }
 0x7b7   : > { %4202 = vmatmul.mubr.f32.gmra.mxu0 %v4109_v32 }
 0x7b8   : > { %4206 = vmatprep.mubr.f32.mxu0 %v4112_v33 }
 0x7bb   : > { %4207 = vmatmul.mubr.f32.gmra.mxu0 %v4111_v30 }
 0x7bc   : > { %4211 = vmatprep.mubr.f32.mxu0 %v4114_v53 }
 0x7bf   : > { %4212 = vmatmul.mubr.f32.gmra.mxu0 %v4113_v60 }
 0x7c0   : > { %4216 = vmatprep.mubr.f32.mxu0 %v4116_v19 }
 0x7c3   : > { %4217 = vmatmul.mubr.f32.gmra.mxu0 %v4115_v49 }
 0x807   : > { %v12436_v9 = vpop.f32.mrf.mxu0 }
 0x808   : > { %v3565_v48 = vadd.f32 %v12436_v9, %v14728_v58 }
 0x809   : > { %v14835_v50 = vpop.f32.mrf.mxu0 }
 0x80a   : > { %15606 = vst [vmem:[#allocation47_spill] sm:$0xff] %v14835_v50 }
 0x80f   : > { %v12439_v21 = vpop.f32.mrf.mxu0 }
 0x810   : > { %v3567_v18 = vadd.f32 %v12439_v21, %v14732_v46 }
 0x811   : > { %v14838_v32 = vpop.f32.mrf.mxu0 }
 0x812   : > { %15607 = vst [vmem:[#allocation48_spill] sm:$0xff] %v14838_v32 }
 0x817   : > { %v12442_v33 = vpop.f32.mrf.mxu0 }
 0x818   : > { %v3569_v30 = vadd.f32 %v12442_v33, %v14736_v14 }
 0x819   : > { %v14841_v53 = vpop.f32.mrf.mxu0 }
 0x81a   : > { %15608 = vst [vmem:[#allocation49_spill] sm:$0xff] %v14841_v53 }
 0x81f   : > { %v12445_v60 = vpop.f32.mrf.mxu0 }
 0x820   : > { %v3571_v19 = vadd.f32 %v12445_v60, %v14740_v57 }
 0x821   : > { %v14844_v49 = vpop.f32.mrf.mxu0 }
 0x822   : > { %15609 = vst [vmem:[#allocation50_spill] sm:$0xff] %v14844_v49 }
 0x827   : > { %v12450_v52 = vpop.f32.mrf.mxu0 }
 0x828   : > { %v14846_v29 = vadd.f32 %v12450_v52, %v3565_v48 }
 0x829   : > { %v14848_v58 = vpop.f32.mrf.mxu0 }
 0x82f   : > { %v12453_v9 = vpop.f32.mrf.mxu0 }
 0x830   : > { %v14850_v50 = vadd.f32 %v12453_v9, %v3567_v18 }
 0x831   : > { %v14852_v46 = vpop.f32.mrf.mxu0 }
 0x832   : > { %15610 = vst [vmem:[#allocation51_spill] sm:$0xff] %v14850_v50 }
 0x837   : > { %v12456_v21 = vpop.f32.mrf.mxu0 }
 0x838   : > { %v14854_v32 = vadd.f32 %v12456_v21, %v3569_v30 }
 0x839   : > { %v14856_v14 = vpop.f32.mrf.mxu0 }
 0x83f   : > { %v12459_v33 = vpop.f32.mrf.mxu0 }
 0x840   : > { %v14858_v53 = vadd.f32 %v12459_v33, %v3571_v19 }
 0x841   : > { %v14860_v57 = vpop.f32.mrf.mxu0 }
 0x842   : > { %15611 = vst [vmem:[#allocation52_spill] sm:$0xff] %v14858_v53  ;;  %15612 = vst [vmem:[#allocation53_spill] sm:$0xff] %v14860_v57 }
 0x847   : > { %v11747_v60 = vpop.f32.mrf.mxu0 }
 0x849   : > { %v11748_v48 = vpop.f32.mrf.mxu0 }
 0x84a   : > { %v11749_v52 = vadd.f32 %v11748_v48, %v11747_v60 }
 0x84b   : > { %v11750_v49 = vpop.f32.mrf.mxu0 }
 0x84c   : > { %12462 = vmatprep.mubr.msk.f32.mxu1 %vm666_vm1, %v11749_v52 }
 0x84d   : > { %v11751_v18 = vpop.f32.mrf.mxu0 }
 0x84e   : > { %v11752_v9 = vadd.f32 %v11751_v18, %v11750_v49 }
 0x84f   : > { %v11753_v50 = vpop.f32.mrf.mxu0 }
 0x850   : > { %12463 = vmatmul.mubr.msk.f32.vlgmr.msra.gmra.mxu1 %vm666_vm1, %v11752_v9 }
 0x851   : > { %v11754_v30 = vpop.f32.mrf.mxu0  ;;  %12475 = vmatpush3.msk.msra.mxu1 %vm691_vm0, %v10767_v12 }
 0x852   : > { %v11755_v21 = vadd.f32 %v11754_v30, %v11753_v50  ;;  %11845 = vmatprep.subr.mxu1 %v14534_v59 }
 0x853   : > { %v11756_v19 = vpop.f32.mrf.mxu0 }
 0x854   : > { %12465 = vmatprep.mubr.msk.f32.mxu1 %vm666_vm1, %v11755_v21 }
 0x855   : > { %v11757_v33 = vpop.f32.mrf.mxu0 }
 0x856   : > { %v11758_v53 = vadd.f32 %v11757_v33, %v11756_v19 }
 0x857   : > { %v11759_v60 = vpop.f32.mrf.mxu0 }
 0x858   : > { %12466 = vmatmul.mubr.msk.f32.gmra.mxu1 %vm666_vm1, %v11758_v53 }
 0x859   : > { %v11760_v48 = vpop.f32.mrf.mxu0 }
 0x85a   : > { %v11761_v52 = vadd.f32 %v11760_v48, %v11759_v60 }
 0x85b   : > { %v11762_v49 = vpop.f32.mrf.mxu0 }
 0x85c   : > { %12468 = vmatprep.mubr.msk.f32.mxu1 %vm666_vm1, %v11761_v52 }
 0x85d   : > { %v11763_v18 = vpop.f32.mrf.mxu0 }
 0x85e   : > { %v11764_v9 = vadd.f32 %v11763_v18, %v11762_v49 }
 0x85f   : > { %v11765_v57 = vpop.f32.mrf.mxu0 }
 0x860   : > { %12469 = vmatmul.mubr.msk.f32.gmra.mxu1 %vm666_vm1, %v11764_v9 }
 0x861   : > { %v11766_v12 = vpop.f32.mrf.mxu0 }
 0x862   : > { %v11767_v59 = vadd.f32 %v11766_v12, %v11765_v57 }
 0x863   : > { %v11768_v50 = vpop.f32.mrf.mxu0 }
 0x864   : > { %12471 = vmatprep.mubr.msk.f32.mxu1 %vm666_vm1, %v11767_v59 }
 0x865   : > { %v11769_v30 = vpop.f32.mrf.mxu0 }
 0x866   : > { %v11770_v21 = vadd.f32 %v11769_v30, %v11768_v50 }
 0x867   : > { %v11812_v19 = vpop.f32.mrf.mxu0 }
 0x868   : > { %12472 = vmatmul.mubr.msk.f32.gmra.mxu1 %vm666_vm1, %v11770_v21  ;;  %v904_v21 = vadd.f32 %v13966_v44, %v13964_v43  ;;  %v15617_v43 = vld [vmem:[#allocation39_spill] sm:$0xff] }
 0x869   : > { %v11813_v53 = vpop.f32.mrf.mxu0 }
 0x86a   : > { %v11814_v33 = vadd.f32 %v11813_v53, %v11812_v19  ;;  %v1190_v53 = vadd.f32 %v14068_v41, %v904_v21  ;;  %v15619_v41 = vld [vmem:[#allocation29_spill] sm:$0xff] }
 0x86b   : > { %v11815_v60 = vpop.f32.mrf.mxu0 }
 0x86c   : > { %12476 = vmatprep.mubr.msk.f32.mxu1 %vm666_vm1, %v11814_v33 }
 0x86d   : > { %v11816_v48 = vpop.f32.mrf.mxu0 }
 0x86e   : > { %v11817_v52 = vadd.f32 %v11816_v48, %v11815_v60  ;;  %v1454_v60 = vadd.f32 %v14270_v31, %v1190_v53  ;;  %v15621_v31 = vld [vmem:[#allocation22_spill] sm:$0xff] }
 0x86f   : > { %v11818_v49 = vpop.f32.mrf.mxu0 }
 0x870   : > { %12477 = vmatmul.mubr.msk.f32.vlgmr.msra.gmra.mxu1 %vm666_vm1, %v11817_v52  ;;  %v15615_v52 = vld [vmem:[#allocation17_spill] sm:$0xff] }
 0x871   : > { %11846 = vmatpush3.msra.mxu1 %v14546_v37  ;;  %v11819_v57 = vpop.f32.mrf.mxu0 }
 0x872   : > { %v11820_v18 = vadd.f32 %v11819_v57, %v11818_v49  ;;  %11847 = vmatprep.subr.mxu1 %v14550_v62  ;;  %v15616_v49 = vld [vmem:[#allocation26_spill] sm:$0xff] }
 0x873   : > { %11848 = vmatpush3.msra.mxu1 %v14554_v6  ;;  %v11821_v9 = vpop.f32.mrf.mxu0 }
 0x874   : > { %11849 = vmatprep.subr.mxu1 %v14558_v22  ;;  %12479 = vmatprep.mubr.msk.f32.mxu1 %vm666_vm1, %v11820_v18 }
 0x875   : > { %11850 = vmatpush3.msra.mxu1 %v14563_v23  ;;  %v11822_v12 = vpop.f32.mrf.mxu0 }
 0x876   : > { %v11823_v59 = vadd.f32 %v11822_v12, %v11821_v9  ;;  %11851 = vmatprep.subr.mxu1 %v14567_v36 }
 0x877   : > { %11852 = vmatpush3.msra.mxu1 %v14571_v45  ;;  %v11824_v37 = vpop.f32.mrf.mxu0 }
 0x878   : > { %11853 = vmatprep.subr.mxu1 %v14575_v56  ;;  %12480 = vmatmul.mubr.msk.f32.gmra.mxu1 %vm666_vm1, %v11823_v59 }
 0x879   : > { %11854 = vmatpush3.msra.mxu1 %v14580_v42  ;;  %v11825_v62 = vpop.f32.mrf.mxu0 }
 0x87a   : > { %v11826_v6 = vadd.f32 %v11825_v62, %v11824_v37  ;;  %11855 = vmatprep.subr.mxu1 %v14584_v63 }
 0x87b   : > { %11856 = vmatpush3.msra.mxu1 %v14588_v1  ;;  %v11827_v22 = vpop.f32.mrf.mxu0 }
 0x87c   : > { %11857 = vmatprep.subr.mxu1 %v14592_v4  ;;  %12482 = vmatprep.mubr.msk.f32.mxu1 %vm666_vm1, %v11826_v6 }
 0x87d   : > { %11858 = vmatpush3.msra.mxu1 %v14597_v7  ;;  %v11828_v23 = vpop.f32.mrf.mxu0  ;;  %v4366_v7 = vld [vmem:[#allocation2 + $0x788] sm:$0xff] }
 0x87e   : > { %v11829_v36 = vadd.f32 %v11828_v23, %v11827_v22  ;;  %11859 = vmatprep.subr.mxu1 %v14601_v10  ;;  %v4365_v10 = vld [vmem:[#allocation2 + $0x780] sm:$0xff]  ;;  %v15624_v22 = vld [vmem:[#allocation24_spill] sm:$0xff] }
 0x87f   : > { %11860 = vmatpush3.msra.mxu1 %v14605_v13  ;;  %v11830_v45 = vpop.f32.mrf.mxu0  ;;  %v4368_v13 = vld [vmem:[#allocation2 + $0x798] sm:$0xff] }
 0x880   : > { %11861 = vmatprep.subr.mxu1 %v14609_v16  ;;  %12483 = vmatmul.mubr.msk.f32.gmra.mxu1 %vm666_vm1, %v11829_v36  ;;  %v4367_v16 = vld [vmem:[#allocation2 + $0x790] sm:$0xff]  ;;  %v15625_v36 = vld [vmem:[#allocation36_spill] sm:$0xff] }
 0x881   : > { %11862 = vmatpush3.msra.mxu1 %v14614_v17  ;;  %v11831_v56 = vpop.f32.mrf.mxu0  ;;  %v4370_v17 = vld [vmem:[#allocation2 + $0x7a8] sm:$0xff] }
 0x882   : > { %v11832_v42 = vadd.f32 %v11831_v56, %v11830_v45  ;;  %11863 = vmatprep.subr.mxu1 %v14618_v27  ;;  %v4369_v27 = vld [vmem:[#allocation2 + $0x7a0] sm:$0xff] }
 0x883   : > { %11864 = vmatpush3.msra.mxu1 %v14622_v0  ;;  %v11833_v63 = vpop.f32.mrf.mxu0  ;;  %v4372_v0 = vld [vmem:[#allocation2 + $0x7b8] sm:$0xff] }
 0x884   : > { %11865 = vmatprep.subr.mxu1 %v14626_v24  ;;  %12485 = vmatprep.mubr.msk.f32.mxu1 %vm666_vm1, %v11832_v42  ;;  %v4371_v24 = vld [vmem:[#allocation2 + $0x7b0] sm:$0xff] }
 0x885   : > { %11866 = vmatpush3.msra.mxu1 %v14631_v51  ;;  %v11834_v1 = vpop.f32.mrf.mxu0  ;;  %v4374_v51 = vld [vmem:[#allocation2 + $0x7c8] sm:$0xff] }
 0x886   : > { %v11835_v4 = vadd.f32 %v11834_v1, %v11833_v63  ;;  %11867 = vmatprep.subr.mxu1 %v14635_v54  ;;  %v4373_v54 = vld [vmem:[#allocation2 + $0x7c0] sm:$0xff]  ;;  %v15626_v1 = vld [vmem:[#allocation18_spill] sm:$0xff] }
 0x887   : > { %11868 = vmatpush3.msra.mxu1 %v14639_v25  ;;  %v4376_v25 = vld [vmem:[#allocation2 + $0x7d8] sm:$0xff] }
 0x888   : > { %11869 = vmatprep.subr.mxu1 %v14643_v26  ;;  %12486 = vmatmul.mubr.msk.f32.gmra.mxu1 %vm666_vm1, %v11835_v4  ;;  %v4375_v26 = vld [vmem:[#allocation2 + $0x7d0] sm:$0xff]  ;;  %v15627_v4 = vld [vmem:[#allocation19_spill] sm:$0xff] }
 0x889   : > { %11870 = vmatpush3.msra.mxu1 %v14648_v55  ;;  %4445 = vmatprep.mubr.f32.mxu1 %v4366_v7  ;;  %v4378_v55 = vld [vmem:[#allocation2 + $0x7e8] sm:$0xff]  ;;  %v924_v7 = vadd.f32 %v15627_v4, %v15626_v1 }
 0x88a   : > { %11871 = vmatprep.subr.mxu1 %v14652_v47  ;;  %v4377_v47 = vld [vmem:[#allocation2 + $0x7e0] sm:$0xff] }
 0x88b   : > { %11872 = vmatpush3.msra.mxu1 %v14656_v61  ;;  %v4380_v61 = vld [vmem:[#allocation2 + $0x7f8] sm:$0xff] }
 0x88c   : > { %11873 = vmatprep.subr.mxu1 %v14660_v3  ;;  %v4379_v3 = vld [vmem:[#allocation2 + $0x7f0] sm:$0xff] }
 0x88d   : > { %11874 = vmatpush3.msra.mxu1 %v14664_v8  ;;  %v10777_v8 = vld [vmem:[%s15565_s2 + $0x3c] sm:$0x7] }
 0x88e   : > { %11875 = vmatprep.subr.mxu1 %v14668_v15  ;;  %12488 = vmatprep.subr.msk.mxu0 %vm691_vm0, %v10777_v8  ;;  %v894_v15 = vadd.f32 %v13960_v39, %v13958_v38  ;;  %v1718_v38 = vadd.f32 %v14284_v40, %v1454_v60  ;;  %v15613_v39 = vld [vmem:[#allocation35_spill] sm:$0xff]  ;;  %v15639_v60 = vld [vmem:[#allocation28_spill] sm:$0xff] }
 0x88f   : > { %11876 = vmatpush3.msra.mxu1 %v14672_v20  ;;  %12489 = vmatpush3.msk.msra.mxu0 %vm691_vm0, %v10777_v8  ;;  %v15623_v40 = vld [vmem:[#allocation47_spill] sm:$0xff] }
 0x890   : > { %4446 = vmatmul.mubr.f32.vlgmr.msra.gmra.mxu1 %v4365_v10  ;;  %v1188_v20 = vadd.f32 %v14063_v35, %v894_v15  ;;  %v1982_v57 = vadd.f32 %v15616_v49, %v1718_v38  ;;  %v15628_v10 = vld [vmem:[#allocation27_spill] sm:$0xff]  ;;  %v15636_v15 = vld [vmem:[#allocation25_spill] sm:$0xff] }
 0x891   : > { %4450 = vmatprep.mubr.f32.mxu1 %v4368_v13  ;;  %v15640_v38 = vld [vmem:[#allocation41_spill] sm:$0xff] }
 0x892   : > { %v1452_v50 = vadd.f32 %v14267_v28, %v1188_v20  ;;  %v15614_v28 = vld [vmem:[#allocation16_spill] sm:$0xff]  ;;  %v2246_v9 = vadd.f32 %v15619_v41, %v1982_v57  ;;  %v15643_v57 = vld [vmem:[#allocation34_spill] sm:$0xff] }
 0x893   : > { %v15645_v41 = vld [vmem:[#allocation38_spill] sm:$0xff] }
 0x894   : > { %4451 = vmatmul.mubr.f32.gmra.mxu1 %v4367_v16  ;;  %v1716_v30 = vadd.f32 %v14280_v34, %v1452_v50  ;;  %v914_v34 = vadd.f32 %v15615_v52, %v15614_v28  ;;  %v15629_v16 = vld [vmem:[#allocation40_spill] sm:$0xff]  ;;  %v15637_v50 = vld [vmem:[#allocation37_spill] sm:$0xff]  ;;  %v15641_v28 = vld [vmem:[#allocation31_spill] sm:$0xff] }
 0x895   : > { %4455 = vmatprep.mubr.f32.mxu1 %v4370_v17 }
 0x896   : > { %v1980_v19 = vadd.f32 %v14385_v2, %v1716_v30  ;;  %v15618_v2 = vld [vmem:[#allocation20_spill] sm:$0xff] }
 0x897   : > { %v1192_v18 = vadd.f32 %v15618_v2, %v914_v34  ;;  %v15642_v34 = vld [vmem:[#allocation45_spill] sm:$0xff] }
 0x898   : > { %4456 = vmatmul.mubr.f32.gmra.mxu1 %v4369_v27  ;;  %v2244_v33 = vadd.f32 %v14398_v5, %v1980_v19  ;;  %v15620_v5 = vld [vmem:[#allocation43_spill] sm:$0xff] }
 0x899   : > { %4460 = vmatprep.mubr.f32.mxu1 %v4372_v0  ;;  %v1456_v59 = vadd.f32 %v15621_v31, %v1192_v18  ;;  %v15630_v0 = vld [vmem:[#allocation21_spill] sm:$0xff]  ;;  %v15638_v19 = vld [vmem:[#allocation51_spill] sm:$0xff]  ;;  %v15646_v31 = vld [vmem:[#allocation42_spill] sm:$0xff] }
 0x89a   : > { %v2508_v48 = vadd.f32 %v14503_v11, %v2244_v33  ;;  %v15622_v11 = vld [vmem:[#allocation32_spill] sm:$0xff] }
 0x89b   : > { %v2510_v37 = vadd.f32 %v15622_v11, %v2246_v9  ;;  %v1720_v23 = vadd.f32 %v15624_v22, %v1456_v59 }
 0x89c   : > { %4461 = vmatmul.mubr.f32.gmra.mxu1 %v4371_v24  ;;  %v2772_v35 = vadd.f32 %v15613_v39, %v2508_v48  ;;  %v1194_v24 = vadd.f32 %v15630_v0, %v924_v7 }
 0x89d   : > { %4465 = vmatprep.mubr.f32.mxu1 %v4374_v51  ;;  %v2774_v45 = vadd.f32 %v15625_v36, %v2510_v37  ;;  %v1984_v13 = vadd.f32 %v15628_v10, %v1720_v23  ;;  %v15631_v51 = vld [vmem:[#allocation30_spill] sm:$0xff]  ;;  %v15649_v23 = vld [vmem:[#allocation53_spill] sm:$0xff] }
 0x89e   : > { %v3036_v44 = vadd.f32 %v15617_v43, %v2772_v35  ;;  %v15647_v37 = vld [vmem:[#allocation46_spill] sm:$0xff] }
 0x89f   : > { %v3038_v17 = vadd.f32 %v15629_v16, %v2774_v45  ;;  %v15650_v45 = vld [vmem:[#allocation52_spill] sm:$0xff] }
 0x8a0   : > { %4466 = vmatmul.mubr.f32.gmra.mxu1 %v4373_v54  ;;  %v3300_v12 = vadd.f32 %v15620_v5, %v3036_v44  ;;  %v2248_v54 = vadd.f32 %v15631_v51, %v1984_v13  ;;  %v15644_v44 = vld [vmem:[#allocation49_spill] sm:$0xff] }
 0x8a1   : > { %4470 = vmatprep.mubr.f32.mxu1 %v4376_v25  ;;  %v15632_v25 = vld [vmem:[#allocation44_spill] sm:$0xff] }
 0x8a2   : > { %v3564_v62 = vadd.f32 %v15623_v40, %v3300_v12 }
 0x8a4   : > { %4471 = vmatmul.mubr.f32.gmra.mxu1 %v4375_v26  ;;  %v3828_v56 = vadd.f32 %v14848_v58, %v3564_v62  ;;  %v3302_v26 = vadd.f32 %v15632_v25, %v3038_v17  ;;  %v15634_v58 = vld [vmem:[#allocation33_spill] sm:$0xff]  ;;  %v15648_v62 = vld [vmem:[#allocation50_spill] sm:$0xff] }
 0x8a5   : > { %4475 = vmatprep.mubr.f32.mxu1 %v4378_v55  ;;  %v15633_v55 = vld [vmem:[#allocation23_spill] sm:$0xff] }
 0x8a8   : > { %4476 = vmatmul.mubr.f32.gmra.mxu1 %v4377_v47  ;;  %v1458_v47 = vadd.f32 %v15633_v55, %v1194_v24 }
 0x8a9   : > { %4480 = vmatprep.mubr.f32.mxu1 %v4380_v61  ;;  %v2512_v61 = vadd.f32 %v15634_v58, %v2248_v54 }
 0x8aa   : > { %v1722_v20 = vadd.f32 %v15636_v15, %v1458_v47 }
 0x8ab   : > { %v2776_v30 = vadd.f32 %v15637_v50, %v2512_v61 }
 0x8ac   : > { %4481 = vmatmul.mubr.f32.gmra.mxu1 %v4379_v3  ;;  %v1986_v48 = vadd.f32 %v15639_v60, %v1722_v20 }
 0x8ad   : > { %v3040_v39 = vadd.f32 %v15640_v38, %v2776_v30 }
 0x8ae   : > { %v2250_v52 = vadd.f32 %v15641_v28, %v1986_v48 }
 0x8af   : > { %v3304_v49 = vadd.f32 %v15642_v34, %v3040_v39 }
 0x8b0   : > { %v2514_v43 = vadd.f32 %v15643_v57, %v2250_v52  ;;  %v4800_v57 = vld [vmem:[#allocation4 + $0x10] sm:$0xff] }
 0x8b1   : > { %v3568_v2 = vadd.f32 %v15644_v44, %v3304_v49  ;;  %12537 = vmatprep.mubr.msk.f32.mxu1 %vm4628_vm2, %v4800_v57 }
 0x8b2   : > { %v2778_v9 = vadd.f32 %v15645_v41, %v2514_v43  ;;  %v4708_v43 = vld [vmem:[#allocation4] sm:$0xff] }
 0x8b4   : > { %v3042_v59 = vadd.f32 %v15646_v31, %v2778_v9 }
 0x8b6   : > { %v3306_v40 = vadd.f32 %v15647_v37, %v3042_v59 }
 0x910   : > { %v12464_v6 = vpop.f32.mrf.mxu1 }
 0x911   : > { %v4093_v42 = vadd.f32 %v12464_v6, %v14846_v29  ;;  %v15635_v29 = vld [vmem:[#allocation48_spill] sm:$0xff]  ;;  %v3570_v6 = vadd.f32 %v15648_v62, %v3306_v40 }
 0x912   : > { %v4053_v63 = vpop.f32.mrf.mxu1  ;;  %v3566_v3 = vadd.f32 %v15635_v29, %v3302_v26 }
 0x913   : > { %v4092_v27 = vadd.f32 %v4053_v63, %v3828_v56  ;;  %v3834_v36 = vadd.f32 %v15649_v23, %v3570_v6 }
 0x914   : > { %v3830_v21 = vadd.f32 %v14852_v46, %v3566_v3  ;;  %v3832_v46 = vadd.f32 %v14856_v14, %v3568_v2 }
 0x918   : > { %v12467_v8 = vpop.f32.mrf.mxu1 }
 0x919   : > { %v4095_v53 = vadd.f32 %v12467_v8, %v15638_v19 }
 0x91a   : > { %v4063_v33 = vpop.f32.mrf.mxu1 }
 0x91b   : > { %v4094_v35 = vadd.f32 %v4063_v33, %v3830_v21 }
 0x920   : > { %v12470_v18 = vpop.f32.mrf.mxu1 }
 0x921   : > { %v4097_v5 = vadd.f32 %v12470_v18, %v14854_v32 }
 0x922   : > { %v4073_v12 = vpop.f32.mrf.mxu1 }
 0x923   : > { %v4096_v11 = vadd.f32 %v4073_v12, %v3832_v46 }
 0x928   : > { %v12473_v22 = vpop.f32.mrf.mxu1 }
 0x929   : > { %v4099_v56 = vadd.f32 %v12473_v22, %v15650_v45 }
 0x92a   : > { %v4083_v63 = vpop.f32.mrf.mxu1 }
 0x92b   : > { %v4098_v1 = vadd.f32 %v4083_v63, %v3834_v36 }
 0x930   : > { %v12478_v4 = vpop.f32.mrf.mxu1 }
 0x931   : > { %v4357_v7 = vadd.f32 %v12478_v4, %v4093_v42 }
 0x932   : > { %v4317_v14 = vpop.f32.mrf.mxu1 }
 0x933   : > { %v4356_v10 = vadd.f32 %v4317_v14, %v4092_v27 }
 0x938   : > { %v12481_v32 = vpop.f32.mrf.mxu1 }
 0x939   : > { %v4359_v13 = vadd.f32 %v12481_v32, %v4095_v53 }
 0x93a   : > { %v4327_v16 = vpop.f32.mrf.mxu1 }
 0x93b   : > { %v4358_v17 = vadd.f32 %v4327_v16, %v4094_v35 }
 0x940   : > { %v12484_v0 = vpop.f32.mrf.mxu1 }
 0x941   : > { %v4361_v24 = vadd.f32 %v12484_v0, %v4097_v5 }
 0x942   : > { %v4337_v51 = vpop.f32.mrf.mxu1 }
 0x943   : > { %v4360_v54 = vadd.f32 %v4337_v51, %v4096_v11 }
 0x948   : > { %v12487_v25 = vpop.f32.mrf.mxu1 }
 0x949   : > { %v14972_v26 = vadd.f32 %v12487_v25, %v4099_v56 }
 0x94a   : > { %v4347_v55 = vpop.f32.mrf.mxu1 }
 0x94b   : > { %v14974_v47 = vadd.f32 %v4347_v55, %v4098_v1 }
 0x950   : > { %v11877_v58 = vpop.f32.mrf.mxu1 }
 0x952   : > { %v11878_v61 = vpop.f32.mrf.mxu1 }
 0x953   : > { %v11879_v29 = vadd.f32 %v11878_v61, %v11877_v58 }
 0x954   : > { %v11880_v42 = vpop.f32.mrf.mxu1 }
 0x955   : > { %12490 = vmatprep.mubr.msk.f32.mxu0 %vm666_vm1, %v11879_v29 }
 0x956   : > { %v11881_v27 = vpop.f32.mrf.mxu1 }
 0x957   : > { %v11882_v3 = vadd.f32 %v11881_v27, %v11880_v42 }
 0x958   : > { %v11883_v8 = vpop.f32.mrf.mxu1 }
 0x959   : > { %12491 = vmatmul.mubr.msk.f32.vlgmr.msra.gmra.mxu0 %vm666_vm1, %v11882_v3 }
 0x95a   : > { %v11884_v15 = vpop.f32.mrf.mxu1 }
 0x95b   : > { %v11885_v20 = vadd.f32 %v11884_v15, %v11883_v8 }
 0x95c   : > { %v11886_v50 = vpop.f32.mrf.mxu1 }
 0x95d   : > { %12493 = vmatprep.mubr.msk.f32.mxu0 %vm666_vm1, %v11885_v20 }
 0x95e   : > { %v11887_v30 = vpop.f32.mrf.mxu1 }
 0x95f   : > { %v11888_v21 = vadd.f32 %v11887_v30, %v11886_v50 }
 0x960   : > { %v11889_v19 = vpop.f32.mrf.mxu1 }
 0x961   : > { %12494 = vmatmul.mubr.msk.f32.gmra.mxu0 %vm666_vm1, %v11888_v21 }
 0x962   : > { %v11890_v53 = vpop.f32.mrf.mxu1 }
 0x963   : > { %v11891_v33 = vadd.f32 %v11890_v53, %v11889_v19 }
 0x964   : > { %v11892_v60 = vpop.f32.mrf.mxu1 }
 0x965   : > { %12496 = vmatprep.mubr.msk.f32.mxu0 %vm666_vm1, %v11891_v33 }
 0x966   : > { %v11893_v48 = vpop.f32.mrf.mxu1 }
 0x967   : > { %v11894_v38 = vadd.f32 %v11893_v48, %v11892_v60 }
 0x968   : > { %v11895_v39 = vpop.f32.mrf.mxu1 }
 0x969   : > { %12497 = vmatmul.mubr.msk.f32.gmra.mxu0 %vm666_vm1, %v11894_v38 }
 0x96a   : > { %v11896_v35 = vpop.f32.mrf.mxu1 }
 0x96b   : > { %v11897_v28 = vadd.f32 %v11896_v35, %v11895_v39 }
 0x96c   : > { %v11898_v52 = vpop.f32.mrf.mxu1 }
 0x96d   : > { %12499 = vmatprep.mubr.msk.f32.mxu0 %vm666_vm1, %v11897_v28 }
 0x96e   : > { %v11899_v34 = vpop.f32.mrf.mxu1 }
 0x96f   : > { %v11900_v49 = vadd.f32 %v11899_v34, %v11898_v52 }
 0x971   : > { %12500 = vmatmul.mubr.msk.f32.gmra.mxu0 %vm666_vm1, %v11900_v49 }
 0x972   : > { %12518 = vmatprep.mubr.msk.f32.mxu0 %vm4628_vm2, %v4708_v43 }
 0xa19   : > { %v12492_v44 = vpop.f32.mrf.mxu0 }
 0xa1a   : > { %v4621_v2 = vadd.f32 %v12492_v44, %v4357_v7 }
 0xa1b   : > { %v4581_v18 = vpop.f32.mrf.mxu0 }
 0xa1c   : > { %v4620_v41 = vadd.f32 %v4581_v18, %v4356_v10  ;;  %v4630_v9 = vsel %vm4628_vm2, %v4621_v2, 0.0 }
 0xa1e   : > { %v4629_v46 = vsel %vm4628_vm2, %v4620_v41, 0.0 }
 0xa1f   : > { %v4631_v5 = vadd.f32 %v4630_v9, %v4629_v46 }
 0xa21   : > { %v12495_v12 = vpop.f32.mrf.mxu0 }
 0xa22   : > { %v4623_v59 = vadd.f32 %v12495_v12, %v4359_v13 }
 0xa23   : > { %v4591_v31 = vpop.f32.mrf.mxu0 }
 0xa24   : > { %v4622_v11 = vadd.f32 %v4591_v31, %v4358_v17  ;;  %v4634_v62 = vsel %vm4628_vm2, %v4623_v59, 0.0 }
 0xa26   : > { %v4632_v37 = vsel %vm4628_vm2, %v4622_v11, 0.0 }
 0xa27   : > { %v4633_v40 = vadd.f32 %v4632_v37, %v4631_v5 }
 0xa29   : > { %v12498_v6 = vpop.f32.mrf.mxu0  ;;  %v4635_v22 = vadd.f32 %v4634_v62, %v4633_v40 }
 0xa2a   : > { %v4625_v36 = vadd.f32 %v12498_v6, %v4361_v24 }
 0xa2b   : > { %v4601_v23 = vpop.f32.mrf.mxu0 }
 0xa2c   : > { %v4624_v45 = vadd.f32 %v4601_v23, %v4360_v54  ;;  %v4638_v1 = vsel %vm4628_vm2, %v4625_v36, 0.0 }
 0xa2e   : > { %v4636_v56 = vsel %vm4628_vm2, %v4624_v45, 0.0 }
 0xa2f   : > { %v4637_v63 = vadd.f32 %v4636_v56, %v4635_v22 }
 0xa31   : > { %v12501_v4 = vpop.f32.mrf.mxu0  ;;  %v4639_v7 = vadd.f32 %v4638_v1, %v4637_v63 }
 0xa32   : > { %v4627_v10 = vadd.f32 %v12501_v4, %v14972_v26 }
 0xa33   : > { %v4611_v14 = vpop.f32.mrf.mxu0 }
 0xa34   : > { %v4626_v32 = vadd.f32 %v4611_v14, %v14974_v47  ;;  %v4642_v17 = vsel %vm4628_vm2, %v4627_v10, 0.0 }
 0xa36   : > { %v4640_v13 = vsel %vm4628_vm2, %v4626_v32, 0.0 }
 0xa37   : > { %v4641_v16 = vadd.f32 %v4640_v13, %v4639_v7 }
 0xa39   : > { %v4643_v0 = vadd.f32 %v4642_v17, %v4641_v16 }
 0xa3b   : > { %v4644_v24 = vrot.slane %v4643_v0, 4 }
 0xa3d   : > { %v4645_v51 = vadd.f32 %v4644_v24, %v4643_v0  ;;  %v4801_v0 = vld [vmem:[#allocation4 + $0x18] sm:$0xff] }
 0xa3e   : > { %v4891_v24 = vld [vmem:[#allocation6 + $0x78] sm:$0xff] }
 0xa3f   : > { %v4646_v54 = vrot.slane %v4645_v51, 2 }
 0xa41   : > { %v4647_v25 = vadd.f32 %v4646_v54, %v4645_v51  ;;  %v4709_v51 = vld [vmem:[#allocation4 + $0x8] sm:$0xff]  ;;  %v4798_v54 = vld [vmem:[#allocation6 + $0x38] sm:$0xff] }
 0xa43   : > { %v4648_v55 = vrot.slane %v4647_v25, 1 }
 0xa45   : > { %v4649_v58 = vadd.f32 %v4648_v55, %v4647_v25  ;;  %v4890_v25 = vld [vmem:[#allocation6 + $0x70] sm:$0xff]  ;;  %v4889_v55 = vld [vmem:[#allocation6 + $0x68] sm:$0xff] }
 0xa47   : > { %v4651_v61 = vmul.f32 0.015625, %v4649_v58  ;;  %v4888_v58 = vld [vmem:[#allocation6 + $0x60] sm:$0xff] }
 0xa49   : > { %v4652_v29 = vsub.f32 %v4620_v41, %v4651_v61  ;;  %v4653_v42 = vsub.f32 %v4621_v2, %v4651_v61  ;;  %v4654_v27 = vsub.f32 %v4622_v11, %v4651_v61  ;;  %v4655_v3 = vsub.f32 %v4623_v59, %v4651_v61 }
 0xa4a   : > { %v4656_v26 = vsub.f32 %v4624_v45, %v4651_v61  ;;  %v4657_v8 = vsub.f32 %v4625_v36, %v4651_v61  ;;  %v4658_v47 = vsub.f32 %v4626_v32, %v4651_v61  ;;  %v4659_v15 = vsub.f32 %v4627_v10, %v4651_v61  ;;  %v4887_v61 = vld [vmem:[#allocation6 + $0x58] sm:$0xff] }
 0xa4b   : > { %v4660_v20 = vmul.f32 %v4652_v29, %v4652_v29  ;;  %v4661_v50 = vmul.f32 %v4653_v42, %v4653_v42  ;;  %v4662_v30 = vmul.f32 %v4654_v27, %v4654_v27  ;;  %v4663_v21 = vmul.f32 %v4655_v3, %v4655_v3 }
 0xa4c   : > { %v4664_v60 = vmul.f32 %v4656_v26, %v4656_v26  ;;  %v4665_v39 = vmul.f32 %v4657_v8, %v4657_v8  ;;  %v4666_v52 = vmul.f32 %v4658_v47, %v4658_v47  ;;  %v4667_v57 = vmul.f32 %v4659_v15, %v4659_v15 }
 0xa4d   : > { %v4668_v19 = vsel %vm4628_vm2, %v4660_v20, 0.0  ;;  %v4669_v53 = vsel %vm4628_vm2, %v4661_v50, 0.0  ;;  %v4671_v48 = vsel %vm4628_vm2, %v4662_v30, 0.0  ;;  %v4673_v35 = vsel %vm4628_vm2, %v4663_v21, 0.0  ;;  %v4792_v20 = vld [vmem:[#allocation6 + $0x8] sm:$0xff]  ;;  %v4791_v50 = vld [vmem:[#allocation6] sm:$0xff] }
 0xa4e   : > { %v4670_v33 = vadd.f32 %v4669_v53, %v4668_v19  ;;  %v4675_v34 = vsel %vm4628_vm2, %v4664_v60, 0.0  ;;  %v4677_v43 = vsel %vm4628_vm2, %v4665_v39, 0.0  ;;  %v4679_v2 = vsel %vm4628_vm2, %v4666_v52, 0.0  ;;  %v5056_v60 = vld [vmem:[#allocation4 + $0x28] sm:$0xff]  ;;  %v5407_v39 = vld [vmem:[#allocation4 + $0x40] sm:$0xff]  ;;  %v5584_v52 = vld [vmem:[#allocation4 + $0x58] sm:$0xff] }
 0xa4f   : > { %v4681_v41 = vsel %vm4628_vm2, %v4667_v57, 0.0  ;;  %v5145_v57 = vld [vmem:[#allocation6 + $0xb0] sm:$0xff] }
 0xa50   : > { %v4672_v38 = vadd.f32 %v4671_v48, %v4670_v33  ;;  %v5055_v33 = vld [vmem:[#allocation4 + $0x20] sm:$0xff]  ;;  %v5231_v48 = vld [vmem:[#allocation4 + $0x30] sm:$0xff] }
 0xa52   : > { %v4674_v28 = vadd.f32 %v4673_v35, %v4672_v38  ;;  %v5232_v38 = vld [vmem:[#allocation4 + $0x38] sm:$0xff]  ;;  %v5408_v35 = vld [vmem:[#allocation4 + $0x48] sm:$0xff] }
 0xa54   : > { %v4676_v49 = vadd.f32 %v4675_v34, %v4674_v28  ;;  %v5583_v28 = vld [vmem:[#allocation4 + $0x50] sm:$0xff]  ;;  %v5759_v34 = vld [vmem:[#allocation4 + $0x60] sm:$0xff] }
 0xa56   : > { %v4678_v44 = vadd.f32 %v4677_v43, %v4676_v49  ;;  %v5146_v49 = vld [vmem:[#allocation6 + $0xb8] sm:$0xff]  ;;  %v5144_v43 = vld [vmem:[#allocation6 + $0xa8] sm:$0xff] }
 0xa58   : > { %v4680_v18 = vadd.f32 %v4679_v2, %v4678_v44  ;;  %v5143_v44 = vld [vmem:[#allocation6 + $0xa0] sm:$0xff]  ;;  %v5142_v2 = vld [vmem:[#allocation6 + $0x98] sm:$0xff] }
 0xa5a   : > { %v4682_v9 = vadd.f32 %v4681_v41, %v4680_v18  ;;  %v5760_v18 = vld [vmem:[#allocation4 + $0x68] sm:$0xff]  ;;  %v5141_v41 = vld [vmem:[#allocation6 + $0x90] sm:$0xff] }
 0xa5c   : > { %v4683_v46 = vrot.slane %v4682_v9, 4 }
 0xa5e   : > { %v4684_v5 = vadd.f32 %v4683_v46, %v4682_v9  ;;  %v5935_v9 = vld [vmem:[#allocation4 + $0x70] sm:$0xff]  ;;  %v5140_v46 = vld [vmem:[#allocation6 + $0x88] sm:$0xff] }
 0xa60   : > { %v4685_v12 = vrot.slane %v4684_v5, 2 }
 0xa62   : > { %v4686_v31 = vadd.f32 %v4685_v12, %v4684_v5  ;;  %v5139_v5 = vld [vmem:[#allocation6 + $0x80] sm:$0xff]  ;;  %v15153_v12 = vld [vmem:[#allocation6 + $0xf8] sm:$0xff] }
 0xa64   : > { %v4687_v59 = vrot.slane %v4686_v31, 1 }
 0xa66   : > { %v4688_v11 = vadd.f32 %v4687_v59, %v4686_v31  ;;  %v5936_v31 = vld [vmem:[#allocation4 + $0x78] sm:$0xff]  ;;  %v6111_v59 = vld [vmem:[#allocation4 + $0x80] sm:$0xff] }
 0xa68   : > { %v4689_v37 = vmul.f32 0.015625, %v4688_v11  ;;  %v6112_v11 = vld [vmem:[#allocation4 + $0x88] sm:$0xff] }
 0xa6a   : > { %v4690_v40 = vadd.f32 1e-05, %v4689_v37  ;;  %v6287_v37 = vld [vmem:[#allocation4 + $0x90] sm:$0xff] }
 0xa6c   : > { %13300 = vrsqrt.f32 %v4690_v40  ;;  %v6288_v40 = vld [vmem:[#allocation4 + $0x98] sm:$0xff] }
 0xa79   : > { %v13301_v62 = vpop.eup %13300 }
 0xa7a   : > { %v4692_v6 = vmul.f32 %v13301_v62, %v4652_v29  ;;  %v4693_v22 = vmul.f32 %v13301_v62, %v4653_v42  ;;  %v4694_v23 = vmul.f32 %v13301_v62, %v4654_v27  ;;  %v4695_v36 = vmul.f32 %v13301_v62, %v4655_v3  ;;  %v4886_v29 = vld [vmem:[#allocation6 + $0x50] sm:$0xff]  ;;  %v4885_v42 = vld [vmem:[#allocation6 + $0x48] sm:$0xff]  ;;  %v4884_v27 = vld [vmem:[#allocation6 + $0x40] sm:$0xff] }
 0xa7b   : > { %v4696_v45 = vmul.f32 %v13301_v62, %v4656_v26  ;;  %v4697_v56 = vmul.f32 %v13301_v62, %v4657_v8  ;;  %v4698_v63 = vmul.f32 %v13301_v62, %v4658_v47  ;;  %v4699_v1 = vmul.f32 %v13301_v62, %v4659_v15  ;;  %v4797_v3 = vld [vmem:[#allocation6 + $0x30] sm:$0xff]  ;;  %v4796_v26 = vld [vmem:[#allocation6 + $0x28] sm:$0xff]  ;;  %v4795_v8 = vld [vmem:[#allocation6 + $0x20] sm:$0xff] }
 0xa7c   : > { %v15024_v32 = vmax.f32 %v4695_v36, 0.0  ;;  %v15030_v13 = vmax.f32 %v4694_v23, 0.0  ;;  %v15036_v16 = vmax.f32 %v4693_v22, 0.0  ;;  %v15042_v17 = vmax.f32 %v4692_v6, 0.0  ;;  %v4794_v47 = vld [vmem:[#allocation6 + $0x18] sm:$0xff]  ;;  %v4793_v15 = vld [vmem:[#allocation6 + $0x10] sm:$0xff] }
 0xa7d   : > { %v15004_v4 = vmax.f32 %v4699_v1, 0.0  ;;  %v15006_v7 = vmax.f32 %v4698_v63, 0.0  ;;  %v15012_v14 = vmax.f32 %v4697_v56, 0.0  ;;  %v15018_v10 = vmax.f32 %v4696_v45, 0.0  ;;  %v6463_v62 = vld [vmem:[#allocation4 + $0xa0] sm:$0xff]  ;;  %v6464_v6 = vld [vmem:[#allocation4 + $0xa8] sm:$0xff] }
 0xa7e   : > { %v6639_v22 = vld [vmem:[#allocation4 + $0xb0] sm:$0xff]  ;;  %v6640_v23 = vld [vmem:[#allocation4 + $0xb8] sm:$0xff]  ;;  %v6815_v36 = vld [vmem:[#allocation4 + $0xc0] sm:$0xff] }
 0xa7f   : > { %12502 = vmatprep.subr.mxu0 %v15004_v4  ;;  %12521 = vmatprep.subr.mxu1 %v15004_v4  ;;  %v6816_v45 = vld [vmem:[#allocation4 + $0xc8] sm:$0xff]  ;;  %v6991_v56 = vld [vmem:[#allocation4 + $0xd0] sm:$0xff]  ;;  %v6992_v63 = vld [vmem:[#allocation4 + $0xd8] sm:$0xff] }
 0xa80   : > { %12503 = vmatpush3.msra.mxu0 %v15004_v4  ;;  %12522 = vmatpush3.msra.mxu1 %v15004_v4  ;;  %v7167_v1 = vld [vmem:[#allocation4 + $0xe0] sm:$0xff] }
 0xa81   : > { %12504 = vmatprep.subr.mxu0 %v15006_v7  ;;  %12523 = vmatprep.subr.mxu1 %v15006_v7 }
 0xa82   : > { %12505 = vmatpush3.msra.mxu0 %v15006_v7  ;;  %12524 = vmatpush3.msra.mxu1 %v15006_v7 }
 0xa83   : > { %12506 = vmatprep.subr.mxu0 %v15012_v14  ;;  %12525 = vmatprep.subr.mxu1 %v15012_v14 }
 0xa84   : > { %12507 = vmatpush3.msra.mxu0 %v15012_v14  ;;  %12526 = vmatpush3.msra.mxu1 %v15012_v14 }
 0xa85   : > { %12508 = vmatprep.subr.mxu0 %v15018_v10  ;;  %12527 = vmatprep.subr.mxu1 %v15018_v10 }
 0xa86   : > { %12509 = vmatpush3.msra.mxu0 %v15018_v10  ;;  %12528 = vmatpush3.msra.mxu1 %v15018_v10 }
 0xa87   : > { %12510 = vmatprep.subr.mxu0 %v15024_v32  ;;  %12529 = vmatprep.subr.mxu1 %v15024_v32 }
 0xa88   : > { %12511 = vmatpush3.msra.mxu0 %v15024_v32  ;;  %12530 = vmatpush3.msra.mxu1 %v15024_v32 }
 0xa89   : > { %12512 = vmatprep.subr.mxu0 %v15030_v13  ;;  %12531 = vmatprep.subr.mxu1 %v15030_v13 }
 0xa8a   : > { %12513 = vmatpush3.msra.mxu0 %v15030_v13  ;;  %12532 = vmatpush3.msra.mxu1 %v15030_v13 }
 0xa8b   : > { %12514 = vmatprep.subr.mxu0 %v15036_v16  ;;  %12533 = vmatprep.subr.mxu1 %v15036_v16 }
 0xa8c   : > { %12515 = vmatpush3.msra.mxu0 %v15036_v16  ;;  %12534 = vmatpush3.msra.mxu1 %v15036_v16 }
 0xa8d   : > { %12516 = vmatprep.subr.mxu0 %v15042_v17  ;;  %12535 = vmatprep.subr.mxu1 %v15042_v17 }
 0xa8e   : > { %12517 = vmatpush3.msra.mxu0 %v15042_v17  ;;  %12536 = vmatpush3.msra.mxu1 %v15042_v17 }
 0xa8f   : > { %12538 = vmatmul.mubr.msk.f32.vlgmr.msra.gmra.mxu1 %vm4628_vm2, %v4801_v0  ;;  %12540 = vmatprep.subr.mxu0 %v4891_v24 }
 0xa90   : > { %12519 = vmatmul.mubr.msk.f32.vlgmr.msra.gmra.mxu0 %vm4628_vm2, %v4709_v51  ;;  %12559 = vmatprep.subr.mxu1 %v4798_v54 }
 0xa91   : > { %12541 = vmatpush3.msra.mxu0 %v4891_v24  ;;  %12560 = vmatpush3.msra.mxu1 %v4798_v54  ;;  %v7168_v24 = vld [vmem:[#allocation4 + $0xe8] sm:$0xff]  ;;  %v7343_v54 = vld [vmem:[#allocation4 + $0xf0] sm:$0xff] }
 0xa92   : > { %12542 = vmatprep.subr.mxu0 %v4890_v25  ;;  %12561 = vmatprep.subr.mxu1 %v4797_v3 }
 0xa93   : > { %12543 = vmatpush3.msra.mxu0 %v4890_v25  ;;  %12562 = vmatpush3.msra.mxu1 %v4797_v3  ;;  %v5496_v3 = vld [vmem:[#allocation6 + $0x128] sm:$0xff] }
 0xa94   : > { %12544 = vmatprep.subr.mxu0 %v4889_v55  ;;  %12563 = vmatprep.subr.mxu1 %v4796_v26 }
 0xa95   : > { %12545 = vmatpush3.msra.mxu0 %v4889_v55  ;;  %12564 = vmatpush3.msra.mxu1 %v4796_v26  ;;  %v5494_v26 = vld [vmem:[#allocation6 + $0x118] sm:$0xff] }
 0xa96   : > { %12546 = vmatprep.subr.mxu0 %v4888_v58  ;;  %12565 = vmatprep.subr.mxu1 %v4795_v8 }
 0xa97   : > { %12547 = vmatpush3.msra.mxu0 %v4888_v58  ;;  %12566 = vmatpush3.msra.mxu1 %v4795_v8  ;;  %v5321_v58 = vld [vmem:[#allocation6 + $0xf0] sm:$0xff] }
 0xa98   : > { %12548 = vmatprep.subr.mxu0 %v4887_v61  ;;  %12567 = vmatprep.subr.mxu1 %v4794_v47  ;;  %v5493_v8 = vld [vmem:[#allocation6 + $0x110] sm:$0xff] }
 0xa99   : > { %12549 = vmatpush3.msra.mxu0 %v4887_v61  ;;  %12568 = vmatpush3.msra.mxu1 %v4794_v47  ;;  %v5320_v61 = vld [vmem:[#allocation6 + $0xe8] sm:$0xff] }
 0xa9a   : > { %12550 = vmatprep.subr.mxu0 %v4886_v29  ;;  %12569 = vmatprep.subr.mxu1 %v4793_v15  ;;  %v5492_v47 = vld [vmem:[#allocation6 + $0x108] sm:$0xff] }
 0xa9b   : > { %12551 = vmatpush3.msra.mxu0 %v4886_v29  ;;  %12570 = vmatpush3.msra.mxu1 %v4793_v15  ;;  %v7344_v29 = vld [vmem:[#allocation4 + $0xf8] sm:$0xff]  ;;  %v5491_v15 = vld [vmem:[#allocation6 + $0x100] sm:$0xff] }
 0xa9c   : > { %12552 = vmatprep.subr.mxu0 %v4885_v42  ;;  %12571 = vmatprep.subr.mxu1 %v4792_v20 }
 0xa9d   : > { %12553 = vmatpush3.msra.mxu0 %v4885_v42  ;;  %12572 = vmatpush3.msra.mxu1 %v4792_v20 }
 0xa9e   : > { %12554 = vmatprep.subr.mxu0 %v4884_v27  ;;  %12573 = vmatprep.subr.mxu1 %v4791_v50 }
 0xa9f   : > { %12555 = vmatpush3.msra.mxu0 %v4884_v27  ;;  %12574 = vmatpush3.msra.mxu1 %v4791_v50  ;;  %v5674_v50 = vld [vmem:[#allocation6 + $0x178] sm:$0xff] }
 0xaa0   : > { %12578 = vmatprep.subr.mxu0 %v15004_v4  ;;  %12597 = vmatprep.subr.mxu1 %v5146_v49 }
 0xb4f   : > { %v12539_v30 = vpop.f32.mrf.mxu1 }
 0xb50   : > { %v12520_v21 = vpop.f32.mrf.mxu0 }
 0xb51   : > { %v4874_v19 = vpop.f32.mrf.mxu1 }
 0xb52   : > { %12556 = vmatprep.mubr.msk.f32.mxu0 %vm4628_vm2, %v4874_v19  ;;  %v4782_v53 = vpop.f32.mrf.mxu0  ;;  %v5672_v19 = vld [vmem:[#allocation6 + $0x168] sm:$0xff] }
 0xb53   : > { %12557 = vmatmul.mubr.msk.f32.vlgmr.msra.gmra.mxu0 %vm4628_vm2, %v12539_v30  ;;  %12575 = vmatprep.mubr.msk.f32.mxu1 %vm4628_vm2, %v4782_v53  ;;  %v5671_v53 = vld [vmem:[#allocation6 + $0x160] sm:$0xff] }
 0xb54   : > { %12579 = vmatpush3.msra.mxu0 %v15004_v4  ;;  %12576 = vmatmul.mubr.msk.f32.vlgmr.msra.gmra.mxu1 %vm4628_vm2, %v12520_v21  ;;  %v5673_v21 = vld [vmem:[#allocation6 + $0x170] sm:$0xff] }
 0xb55   : > { %12580 = vmatprep.subr.mxu0 %v15006_v7  ;;  %12594 = vmatprep.mubr.msk.f32.mxu0 %vm4628_vm2, %v5055_v33  ;;  %v5670_v33 = vld [vmem:[#allocation6 + $0x158] sm:$0xff] }
 0xb56   : > { %12581 = vmatpush3.msra.mxu0 %v15006_v7  ;;  %12598 = vmatpush3.msra.mxu1 %v5146_v49  ;;  %v5847_v49 = vld [vmem:[#allocation6 + $0x1a0] sm:$0xff] }
 0xb57   : > { %12582 = vmatprep.subr.mxu0 %v15012_v14  ;;  %12599 = vmatprep.subr.mxu1 %v5145_v57 }
 0xb58   : > { %12583 = vmatpush3.msra.mxu0 %v15012_v14  ;;  %12600 = vmatpush3.msra.mxu1 %v5145_v57  ;;  %v5846_v57 = vld [vmem:[#allocation6 + $0x198] sm:$0xff] }
 0xb59   : > { %12584 = vmatprep.subr.mxu0 %v15018_v10  ;;  %12601 = vmatprep.subr.mxu1 %v5144_v43 }
 0xb5a   : > { %12585 = vmatpush3.msra.mxu0 %v15018_v10  ;;  %12602 = vmatpush3.msra.mxu1 %v5144_v43  ;;  %v5845_v43 = vld [vmem:[#allocation6 + $0x190] sm:$0xff] }
 0xb5b   : > { %12586 = vmatprep.subr.mxu0 %v15024_v32  ;;  %12603 = vmatprep.subr.mxu1 %v5143_v44 }
 0xb5c   : > { %12587 = vmatpush3.msra.mxu0 %v15024_v32  ;;  %12604 = vmatpush3.msra.mxu1 %v5143_v44  ;;  %v5844_v44 = vld [vmem:[#allocation6 + $0x188] sm:$0xff] }
 0xb5d   : > { %12588 = vmatprep.subr.mxu0 %v15030_v13  ;;  %12605 = vmatprep.subr.mxu1 %v5142_v2 }
 0xb5e   : > { %12589 = vmatpush3.msra.mxu0 %v15030_v13  ;;  %12606 = vmatpush3.msra.mxu1 %v5142_v2  ;;  %v5843_v2 = vld [vmem:[#allocation6 + $0x180] sm:$0xff] }
 0xb5f   : > { %12590 = vmatprep.subr.mxu0 %v15036_v16  ;;  %12607 = vmatprep.subr.mxu1 %v5141_v41 }
 0xb60   : > { %12591 = vmatpush3.msra.mxu0 %v15036_v16  ;;  %12608 = vmatpush3.msra.mxu1 %v5141_v41  ;;  %v6026_v41 = vld [vmem:[#allocation6 + $0x1f8] sm:$0xff] }
 0xb61   : > { %12592 = vmatprep.subr.mxu0 %v15042_v17  ;;  %12609 = vmatprep.subr.mxu1 %v5140_v46 }
 0xb62   : > { %12593 = vmatpush3.msra.mxu0 %v15042_v17  ;;  %12610 = vmatpush3.msra.mxu1 %v5140_v46  ;;  %v6025_v46 = vld [vmem:[#allocation6 + $0x1f0] sm:$0xff] }
 0xb63   : > { %12595 = vmatmul.mubr.msk.f32.vlgmr.msra.gmra.mxu0 %vm4628_vm2, %v5056_v60  ;;  %12616 = vmatprep.subr.mxu0 %v15004_v4  ;;  %v5669_v60 = vld [vmem:[#allocation6 + $0x150] sm:$0xff] }
 0xb64   : > { %12617 = vmatpush3.msra.mxu0 %v15004_v4  ;;  %12632 = vmatprep.mubr.msk.f32.mxu0 %vm4628_vm2, %v5231_v48  ;;  %v5668_v48 = vld [vmem:[#allocation6 + $0x148] sm:$0xff] }
 0xb65   : > { %12618 = vmatprep.subr.mxu0 %v15006_v7  ;;  %12611 = vmatprep.subr.mxu1 %v5139_v5 }
 0xb66   : > { %12619 = vmatpush3.msra.mxu0 %v15006_v7  ;;  %12612 = vmatpush3.msra.mxu1 %v5139_v5  ;;  %v6024_v5 = vld [vmem:[#allocation6 + $0x1e8] sm:$0xff] }
 0xb67   : > { %12620 = vmatprep.subr.mxu0 %v15012_v14  ;;  %12635 = vmatprep.subr.mxu1 %v15153_v12 }
 0xb68   : > { %12621 = vmatpush3.msra.mxu0 %v15012_v14 }
 0xb69   : > { %12622 = vmatprep.subr.mxu0 %v15018_v10 }
 0xb6a   : > { %12623 = vmatpush3.msra.mxu0 %v15018_v10 }
 0xb6b   : > { %12624 = vmatprep.subr.mxu0 %v15024_v32 }
 0xb6c   : > { %12625 = vmatpush3.msra.mxu0 %v15024_v32 }
 0xb6d   : > { %12626 = vmatprep.subr.mxu0 %v15030_v13 }
 0xb6e   : > { %12627 = vmatpush3.msra.mxu0 %v15030_v13 }
 0xb6f   : > { %12628 = vmatprep.subr.mxu0 %v15036_v16 }
 0xb70   : > { %12629 = vmatpush3.msra.mxu0 %v15036_v16 }
 0xb71   : > { %12630 = vmatprep.subr.mxu0 %v15042_v17 }
 0xb72   : > { %12631 = vmatpush3.msra.mxu0 %v15042_v17 }
 0xb73   : > { %12633 = vmatmul.mubr.msk.f32.vlgmr.msra.gmra.mxu0 %vm4628_vm2, %v5232_v38  ;;  %12654 = vmatprep.subr.mxu0 %v15004_v4  ;;  %v5667_v38 = vld [vmem:[#allocation6 + $0x140] sm:$0xff] }
 0xb74   : > { %12655 = vmatpush3.msra.mxu0 %v15004_v4  ;;  %12670 = vmatprep.mubr.msk.f32.mxu0 %vm4628_vm2, %v5407_v39 }
 0xb75   : > { %12656 = vmatprep.subr.mxu0 %v15006_v7 }
 0xb76   : > { %12657 = vmatpush3.msra.mxu0 %v15006_v7 }
 0xb77   : > { %12658 = vmatprep.subr.mxu0 %v15012_v14 }
 0xb78   : > { %12659 = vmatpush3.msra.mxu0 %v15012_v14 }
 0xb79   : > { %12660 = vmatprep.subr.mxu0 %v15018_v10 }
 0xb7a   : > { %12661 = vmatpush3.msra.mxu0 %v15018_v10 }
 0xb7b   : > { %12662 = vmatprep.subr.mxu0 %v15024_v32 }
 0xb7c   : > { %12663 = vmatpush3.msra.mxu0 %v15024_v32 }
 0xb7d   : > { %12664 = vmatprep.subr.mxu0 %v15030_v13 }
 0xb7e   : > { %12665 = vmatpush3.msra.mxu0 %v15030_v13 }
 0xb7f   : > { %12666 = vmatprep.subr.mxu0 %v15036_v16 }
 0xb80   : > { %12667 = vmatpush3.msra.mxu0 %v15036_v16 }
 0xb81   : > { %12668 = vmatprep.subr.mxu0 %v15042_v17 }
 0xb82   : > { %12669 = vmatpush3.msra.mxu0 %v15042_v17 }
 0xb83   : > { %12671 = vmatmul.mubr.msk.f32.vlgmr.msra.gmra.mxu0 %vm4628_vm2, %v5408_v35  ;;  %12692 = vmatprep.subr.mxu0 %v15004_v4  ;;  %v5850_v35 = vld [vmem:[#allocation6 + $0x1b8] sm:$0xff] }
 0xb84   : > { %12693 = vmatpush3.msra.mxu0 %v15004_v4  ;;  %12708 = vmatprep.mubr.msk.f32.mxu0 %vm4628_vm2, %v5583_v28 }
 0xb85   : > { %12694 = vmatprep.subr.mxu0 %v15006_v7 }
 0xb86   : > { %12695 = vmatpush3.msra.mxu0 %v15006_v7 }
 0xb87   : > { %12696 = vmatprep.subr.mxu0 %v15012_v14 }
 0xb88   : > { %12697 = vmatpush3.msra.mxu0 %v15012_v14 }
 0xb89   : > { %12698 = vmatprep.subr.mxu0 %v15018_v10 }
 0xb8a   : > { %12699 = vmatpush3.msra.mxu0 %v15018_v10 }
 0xb8b   : > { %12700 = vmatprep.subr.mxu0 %v15024_v32 }
 0xb8c   : > { %12701 = vmatpush3.msra.mxu0 %v15024_v32 }
 0xb8d   : > { %12702 = vmatprep.subr.mxu0 %v15030_v13 }
 0xb8e   : > { %12703 = vmatpush3.msra.mxu0 %v15030_v13 }
 0xb8f   : > { %12704 = vmatprep.subr.mxu0 %v15036_v16 }
 0xb90   : > { %12705 = vmatpush3.msra.mxu0 %v15036_v16 }
 0xb91   : > { %12706 = vmatprep.subr.mxu0 %v15042_v17 }
 0xb92   : > { %12707 = vmatpush3.msra.mxu0 %v15042_v17 }
 0xb93   : > { %12709 = vmatmul.mubr.msk.f32.vlgmr.msra.gmra.mxu0 %vm4628_vm2, %v5584_v52  ;;  %12730 = vmatprep.subr.mxu0 %v15004_v4  ;;  %v5849_v52 = vld [vmem:[#allocation6 + $0x1b0] sm:$0xff] }
 0xb94   : > { %12731 = vmatpush3.msra.mxu0 %v15004_v4  ;;  %12746 = vmatprep.mubr.msk.f32.mxu0 %vm4628_vm2, %v5759_v34  ;;  %v5848_v34 = vld [vmem:[#allocation6 + $0x1a8] sm:$0xff] }
 0xb95   : > { %12732 = vmatprep.subr.mxu0 %v15006_v7 }
 0xb96   : > { %12733 = vmatpush3.msra.mxu0 %v15006_v7 }
 0xb97   : > { %12734 = vmatprep.subr.mxu0 %v15012_v14 }
 0xb98   : > { %12735 = vmatpush3.msra.mxu0 %v15012_v14 }
 0xb99   : > { %12736 = vmatprep.subr.mxu0 %v15018_v10 }
 0xb9a   : > { %12737 = vmatpush3.msra.mxu0 %v15018_v10 }
 0xb9b   : > { %12738 = vmatprep.subr.mxu0 %v15024_v32 }
 0xb9c   : > { %12739 = vmatpush3.msra.mxu0 %v15024_v32 }
 0xb9d   : > { %12740 = vmatprep.subr.mxu0 %v15030_v13 }
 0xb9e   : > { %12741 = vmatpush3.msra.mxu0 %v15030_v13 }
 0xb9f   : > { %12742 = vmatprep.subr.mxu0 %v15036_v16 }
 0xba0   : > { %12743 = vmatpush3.msra.mxu0 %v15036_v16 }
 0xba1   : > { %12744 = vmatprep.subr.mxu0 %v15042_v17 }
 0xba2   : > { %12745 = vmatpush3.msra.mxu0 %v15042_v17 }
 0xba3   : > { %12747 = vmatmul.mubr.msk.f32.vlgmr.msra.gmra.mxu0 %vm4628_vm2, %v5760_v18  ;;  %12768 = vmatprep.subr.mxu0 %v15004_v4 }
 0xba4   : > { %12769 = vmatpush3.msra.mxu0 %v15004_v4  ;;  %12784 = vmatprep.mubr.msk.f32.mxu0 %vm4628_vm2, %v5935_v9 }
 0xba5   : > { %12770 = vmatprep.subr.mxu0 %v15006_v7 }
 0xba6   : > { %12771 = vmatpush3.msra.mxu0 %v15006_v7 }
 0xba7   : > { %12772 = vmatprep.subr.mxu0 %v15012_v14 }
 0xba8   : > { %12773 = vmatpush3.msra.mxu0 %v15012_v14 }
 0xba9   : > { %12774 = vmatprep.subr.mxu0 %v15018_v10 }
 0xbaa   : > { %12775 = vmatpush3.msra.mxu0 %v15018_v10 }
 0xbab   : > { %12776 = vmatprep.subr.mxu0 %v15024_v32 }
 0xbac   : > { %12777 = vmatpush3.msra.mxu0 %v15024_v32 }
 0xbad   : > { %12778 = vmatprep.subr.mxu0 %v15030_v13 }
 0xbae   : > { %12779 = vmatpush3.msra.mxu0 %v15030_v13 }
 0xbaf   : > { %12780 = vmatprep.subr.mxu0 %v15036_v16 }
 0xbb0   : > { %12781 = vmatpush3.msra.mxu0 %v15036_v16 }
 0xbb1   : > { %12782 = vmatprep.subr.mxu0 %v15042_v17 }
 0xbb2   : > { %12783 = vmatpush3.msra.mxu0 %v15042_v17 }
 0xbb3   : > { %12785 = vmatmul.mubr.msk.f32.vlgmr.msra.gmra.mxu0 %vm4628_vm2, %v5936_v31  ;;  %12806 = vmatprep.subr.mxu0 %v15004_v4  ;;  %v6022_v31 = vld [vmem:[#allocation6 + $0x1d8] sm:$0xff] }
 0xbb4   : > { %12807 = vmatpush3.msra.mxu0 %v15004_v4  ;;  %12822 = vmatprep.mubr.msk.f32.mxu0 %vm4628_vm2, %v6111_v59  ;;  %v6021_v59 = vld [vmem:[#allocation6 + $0x1d0] sm:$0xff] }
 0xbb5   : > { %12808 = vmatprep.subr.mxu0 %v15006_v7 }
 0xbb6   : > { %12809 = vmatpush3.msra.mxu0 %v15006_v7 }
 0xbb7   : > { %12810 = vmatprep.subr.mxu0 %v15012_v14 }
 0xbb8   : > { %12811 = vmatpush3.msra.mxu0 %v15012_v14 }
 0xbb9   : > { %12812 = vmatprep.subr.mxu0 %v15018_v10 }
 0xbba   : > { %12813 = vmatpush3.msra.mxu0 %v15018_v10 }
 0xbbb   : > { %12814 = vmatprep.subr.mxu0 %v15024_v32 }
 0xbbc   : > { %12815 = vmatpush3.msra.mxu0 %v15024_v32 }
 0xbbd   : > { %12816 = vmatprep.subr.mxu0 %v15030_v13 }
 0xbbe   : > { %12817 = vmatpush3.msra.mxu0 %v15030_v13 }
 0xbbf   : > { %12818 = vmatprep.subr.mxu0 %v15036_v16 }
 0xbc0   : > { %12819 = vmatpush3.msra.mxu0 %v15036_v16 }
 0xbc1   : > { %12820 = vmatprep.subr.mxu0 %v15042_v17 }
 0xbc2   : > { %12821 = vmatpush3.msra.mxu0 %v15042_v17 }
 0xbc3   : > { %12823 = vmatmul.mubr.msk.f32.vlgmr.msra.gmra.mxu0 %vm4628_vm2, %v6112_v11  ;;  %12844 = vmatprep.subr.mxu0 %v15004_v4  ;;  %v6020_v11 = vld [vmem:[#allocation6 + $0x1c8] sm:$0xff] }
 0xbc4   : > { %12845 = vmatpush3.msra.mxu0 %v15004_v4  ;;  %12860 = vmatprep.mubr.msk.f32.mxu0 %vm4628_vm2, %v6287_v37  ;;  %v6019_v37 = vld [vmem:[#allocation6 + $0x1c0] sm:$0xff] }
 0xbc5   : > { %12846 = vmatprep.subr.mxu0 %v15006_v7 }
 0xbc6   : > { %12847 = vmatpush3.msra.mxu0 %v15006_v7 }
 0xbc7   : > { %12848 = vmatprep.subr.mxu0 %v15012_v14 }
 0xbc8   : > { %12849 = vmatpush3.msra.mxu0 %v15012_v14 }
 0xbc9   : > { %12850 = vmatprep.subr.mxu0 %v15018_v10 }
 0xbca   : > { %12851 = vmatpush3.msra.mxu0 %v15018_v10 }
 0xbcb   : > { %12852 = vmatprep.subr.mxu0 %v15024_v32 }
 0xbcc   : > { %12853 = vmatpush3.msra.mxu0 %v15024_v32 }
 0xbcd   : > { %12854 = vmatprep.subr.mxu0 %v15030_v13 }
 0xbce   : > { %12855 = vmatpush3.msra.mxu0 %v15030_v13 }
 0xbcf   : > { %12856 = vmatprep.subr.mxu0 %v15036_v16 }
 0xbd0   : > { %12857 = vmatpush3.msra.mxu0 %v15036_v16 }
 0xbd1   : > { %12858 = vmatprep.subr.mxu0 %v15042_v17 }
 0xbd2   : > { %12859 = vmatpush3.msra.mxu0 %v15042_v17 }
 0xbd3   : > { %12861 = vmatmul.mubr.msk.f32.vlgmr.msra.gmra.mxu0 %vm4628_vm2, %v6288_v40  ;;  %12882 = vmatprep.subr.mxu0 %v15004_v4 }
 0xbd4   : > { %12883 = vmatpush3.msra.mxu0 %v15004_v4  ;;  %12898 = vmatprep.mubr.msk.f32.mxu0 %vm4628_vm2, %v6463_v62  ;;  %v6202_v62 = vld [vmem:[#allocation6 + $0x238] sm:$0xff] }
 0xbd5   : > { %12884 = vmatprep.subr.mxu0 %v15006_v7 }
 0xbd6   : > { %12885 = vmatpush3.msra.mxu0 %v15006_v7 }
 0xbd7   : > { %12886 = vmatprep.subr.mxu0 %v15012_v14 }
 0xbd8   : > { %12887 = vmatpush3.msra.mxu0 %v15012_v14 }
 0xbd9   : > { %12888 = vmatprep.subr.mxu0 %v15018_v10 }
 0xbda   : > { %12889 = vmatpush3.msra.mxu0 %v15018_v10 }
 0xbdb   : > { %12890 = vmatprep.subr.mxu0 %v15024_v32 }
 0xbdc   : > { %12891 = vmatpush3.msra.mxu0 %v15024_v32 }
 0xbdd   : > { %12892 = vmatprep.subr.mxu0 %v15030_v13 }
 0xbde   : > { %12893 = vmatpush3.msra.mxu0 %v15030_v13 }
 0xbdf   : > { %12894 = vmatprep.subr.mxu0 %v15036_v16 }
 0xbe0   : > { %12895 = vmatpush3.msra.mxu0 %v15036_v16 }
 0xbe1   : > { %12896 = vmatprep.subr.mxu0 %v15042_v17 }
 0xbe2   : > { %12897 = vmatpush3.msra.mxu0 %v15042_v17 }
 0xbe3   : > { %12899 = vmatmul.mubr.msk.f32.vlgmr.msra.gmra.mxu0 %vm4628_vm2, %v6464_v6  ;;  %12920 = vmatprep.subr.mxu0 %v15004_v4 }
 0xbe4   : > { %12921 = vmatpush3.msra.mxu0 %v15004_v4  ;;  %12936 = vmatprep.mubr.msk.f32.mxu0 %vm4628_vm2, %v6639_v22  ;;  %v6201_v22 = vld [vmem:[#allocation6 + $0x230] sm:$0xff] }
 0xbe5   : > { %12922 = vmatprep.subr.mxu0 %v15006_v7 }
 0xbe6   : > { %12923 = vmatpush3.msra.mxu0 %v15006_v7 }
 0xbe7   : > { %12924 = vmatprep.subr.mxu0 %v15012_v14 }
 0xbe8   : > { %12925 = vmatpush3.msra.mxu0 %v15012_v14 }
 0xbe9   : > { %12926 = vmatprep.subr.mxu0 %v15018_v10 }
 0xbea   : > { %12927 = vmatpush3.msra.mxu0 %v15018_v10 }
 0xbeb   : > { %12928 = vmatprep.subr.mxu0 %v15024_v32 }
 0xbec   : > { %12929 = vmatpush3.msra.mxu0 %v15024_v32 }
 0xbed   : > { %12930 = vmatprep.subr.mxu0 %v15030_v13 }
 0xbee   : > { %12931 = vmatpush3.msra.mxu0 %v15030_v13 }
 0xbef   : > { %12932 = vmatprep.subr.mxu0 %v15036_v16 }
 0xbf0   : > { %12933 = vmatpush3.msra.mxu0 %v15036_v16 }
 0xbf1   : > { %12934 = vmatprep.subr.mxu0 %v15042_v17 }
 0xbf2   : > { %12935 = vmatpush3.msra.mxu0 %v15042_v17 }
 0xbf3   : > { %12937 = vmatmul.mubr.msk.f32.vlgmr.msra.gmra.mxu0 %vm4628_vm2, %v6640_v23  ;;  %12958 = vmatprep.subr.mxu0 %v15004_v4  ;;  %v6200_v23 = vld [vmem:[#allocation6 + $0x228] sm:$0xff] }
 0xbf4   : > { %12959 = vmatpush3.msra.mxu0 %v15004_v4  ;;  %12974 = vmatprep.mubr.msk.f32.mxu0 %vm4628_vm2, %v6815_v36  ;;  %v6199_v36 = vld [vmem:[#allocation6 + $0x220] sm:$0xff] }
 0xbf5   : > { %12960 = vmatprep.subr.mxu0 %v15006_v7 }
 0xbf6   : > { %12961 = vmatpush3.msra.mxu0 %v15006_v7 }
 0xbf7   : > { %12962 = vmatprep.subr.mxu0 %v15012_v14 }
 0xbf8   : > { %12963 = vmatpush3.msra.mxu0 %v15012_v14 }
 0xbf9   : > { %12964 = vmatprep.subr.mxu0 %v15018_v10 }
 0xbfa   : > { %12965 = vmatpush3.msra.mxu0 %v15018_v10 }
 0xbfb   : > { %12966 = vmatprep.subr.mxu0 %v15024_v32 }
 0xbfc   : > { %12967 = vmatpush3.msra.mxu0 %v15024_v32 }
 0xbfd   : > { %12968 = vmatprep.subr.mxu0 %v15030_v13 }
 0xbfe   : > { %12969 = vmatpush3.msra.mxu0 %v15030_v13 }
 0xbff   : > { %12970 = vmatprep.subr.mxu0 %v15036_v16 }
 0xc00   : > { %12971 = vmatpush3.msra.mxu0 %v15036_v16 }
 0xc01   : > { %12972 = vmatprep.subr.mxu0 %v15042_v17 }
 0xc02   : > { %12973 = vmatpush3.msra.mxu0 %v15042_v17 }
 0xc03   : > { %12975 = vmatmul.mubr.msk.f32.vlgmr.msra.gmra.mxu0 %vm4628_vm2, %v6816_v45  ;;  %12996 = vmatprep.subr.mxu0 %v15004_v4  ;;  %v6198_v45 = vld [vmem:[#allocation6 + $0x218] sm:$0xff] }
 0xc04   : > { %12997 = vmatpush3.msra.mxu0 %v15004_v4  ;;  %13012 = vmatprep.mubr.msk.f32.mxu0 %vm4628_vm2, %v6991_v56  ;;  %v6197_v56 = vld [vmem:[#allocation6 + $0x210] sm:$0xff] }
 0xc05   : > { %12998 = vmatprep.subr.mxu0 %v15006_v7 }
 0xc06   : > { %12999 = vmatpush3.msra.mxu0 %v15006_v7 }
 0xc07   : > { %13000 = vmatprep.subr.mxu0 %v15012_v14 }
 0xc08   : > { %13001 = vmatpush3.msra.mxu0 %v15012_v14 }
 0xc09   : > { %13002 = vmatprep.subr.mxu0 %v15018_v10 }
 0xc0a   : > { %13003 = vmatpush3.msra.mxu0 %v15018_v10 }
 0xc0b   : > { %13004 = vmatprep.subr.mxu0 %v15024_v32 }
 0xc0c   : > { %13005 = vmatpush3.msra.mxu0 %v15024_v32 }
 0xc0d   : > { %13006 = vmatprep.subr.mxu0 %v15030_v13 }
 0xc0e   : > { %13007 = vmatpush3.msra.mxu0 %v15030_v13 }
 0xc0f   : > { %13008 = vmatprep.subr.mxu0 %v15036_v16 }
 0xc10   : > { %13009 = vmatpush3.msra.mxu0 %v15036_v16 }
 0xc11   : > { %13010 = vmatprep.subr.mxu0 %v15042_v17 }
 0xc12   : > { %13011 = vmatpush3.msra.mxu0 %v15042_v17 }
 0xc13   : > { %13013 = vmatmul.mubr.msk.f32.vlgmr.msra.gmra.mxu0 %vm4628_vm2, %v6992_v63  ;;  %13034 = vmatprep.subr.mxu0 %v15004_v4  ;;  %v15289_v0 = vpop.f32.mrf.mxu0  ;;  %v6196_v63 = vld [vmem:[#allocation6 + $0x208] sm:$0xff] }
 0xc14   : > { %13035 = vmatpush3.msra.mxu0 %v15004_v4  ;;  %13050 = vmatprep.mubr.msk.f32.mxu0 %vm4628_vm2, %v7167_v1  ;;  %v6195_v1 = vld [vmem:[#allocation6 + $0x200] sm:$0xff] }
 0xc15   : > { %13036 = vmatprep.subr.mxu0 %v15006_v7  ;;  %v15294_v51 = vpop.f32.mrf.mxu0 }
 0xc16   : > { %13037 = vmatpush3.msra.mxu0 %v15006_v7 }
 0xc17   : > { %13038 = vmatprep.subr.mxu0 %v15012_v14 }
 0xc18   : > { %13039 = vmatpush3.msra.mxu0 %v15012_v14 }
 0xc19   : > { %13040 = vmatprep.subr.mxu0 %v15018_v10 }
 0xc1a   : > { %13041 = vmatpush3.msra.mxu0 %v15018_v10 }
 0xc1b   : > { %13042 = vmatprep.subr.mxu0 %v15024_v32 }
 0xc1c   : > { %13043 = vmatpush3.msra.mxu0 %v15024_v32 }
 0xc1d   : > { %13044 = vmatprep.subr.mxu0 %v15030_v13 }
 0xc1e   : > { %13045 = vmatpush3.msra.mxu0 %v15030_v13 }
 0xc1f   : > { %13046 = vmatprep.subr.mxu0 %v15036_v16 }
 0xc20   : > { %13047 = vmatpush3.msra.mxu0 %v15036_v16 }
 0xc21   : > { %13048 = vmatprep.subr.mxu0 %v15042_v17 }
 0xc22   : > { %13049 = vmatpush3.msra.mxu0 %v15042_v17 }
 0xc23   : > { %v12596_v25 = vpop.f32.mrf.mxu0  ;;  %13051 = vmatmul.mubr.msk.f32.vlgmr.msra.gmra.mxu0 %vm4628_vm2, %v7168_v24  ;;  %13072 = vmatprep.subr.mxu0 %v15004_v4 }
 0xc24   : > { %13073 = vmatpush3.msra.mxu0 %v15004_v4  ;;  %13088 = vmatprep.mubr.msk.f32.mxu0 %vm4628_vm2, %v7343_v54  ;;  %v5319_v4 = vld [vmem:[#allocation6 + $0xe0] sm:$0xff]  ;;  %v6378_v54 = vld [vmem:[#allocation6 + $0x278] sm:$0xff] }
 0xc25   : > { %v5129_v55 = vpop.f32.mrf.mxu0  ;;  %13074 = vmatprep.subr.mxu0 %v15006_v7 }
 0xc26   : > { %12613 = vmatprep.mubr.msk.f32.mxu1 %vm4628_vm2, %v5129_v55  ;;  %13075 = vmatpush3.msra.mxu0 %v15006_v7  ;;  %v5318_v7 = vld [vmem:[#allocation6 + $0xd8] sm:$0xff]  ;;  %v6377_v55 = vld [vmem:[#allocation6 + $0x270] sm:$0xff] }
 0xc27   : > { %12614 = vmatmul.mubr.msk.f32.vlgmr.msra.gmra.mxu1 %vm4628_vm2, %v12596_v25  ;;  %13076 = vmatprep.subr.mxu0 %v15012_v14 }
 0xc28   : > { %12636 = vmatpush3.msra.mxu1 %v15153_v12  ;;  %13077 = vmatpush3.msra.mxu0 %v15012_v14  ;;  %v5317_v14 = vld [vmem:[#allocation6 + $0xd0] sm:$0xff]  ;;  %v6023_v12 = vld [vmem:[#allocation6 + $0x1e0] sm:$0xff] }
 0xc29   : > { %12637 = vmatprep.subr.mxu1 %v5321_v58  ;;  %13078 = vmatprep.subr.mxu0 %v15018_v10 }
 0xc2a   : > { %12638 = vmatpush3.msra.mxu1 %v5321_v58  ;;  %13079 = vmatpush3.msra.mxu0 %v15018_v10  ;;  %v5316_v10 = vld [vmem:[#allocation6 + $0xc8] sm:$0xff] }
 0xc2b   : > { %12639 = vmatprep.subr.mxu1 %v5320_v61  ;;  %13080 = vmatprep.subr.mxu0 %v15024_v32  ;;  %v6376_v58 = vld [vmem:[#allocation6 + $0x268] sm:$0xff] }
 0xc2c   : > { %12640 = vmatpush3.msra.mxu1 %v5320_v61  ;;  %13081 = vmatpush3.msra.mxu0 %v15024_v32  ;;  %v5315_v32 = vld [vmem:[#allocation6 + $0xc0] sm:$0xff] }
 0xc2d   : > { %12641 = vmatprep.subr.mxu1 %v5319_v4  ;;  %13082 = vmatprep.subr.mxu0 %v15030_v13  ;;  %v6375_v61 = vld [vmem:[#allocation6 + $0x260] sm:$0xff] }
 0xc2e   : > { %12642 = vmatpush3.msra.mxu1 %v5319_v4  ;;  %13083 = vmatpush3.msra.mxu0 %v15030_v13  ;;  %v5498_v13 = vld [vmem:[#allocation6 + $0x138] sm:$0xff] }
 0xc2f   : > { %12643 = vmatprep.subr.mxu1 %v5318_v7  ;;  %13084 = vmatprep.subr.mxu0 %v15036_v16  ;;  %v6374_v4 = vld [vmem:[#allocation6 + $0x258] sm:$0xff] }
 0xc30   : > { %12644 = vmatpush3.msra.mxu1 %v5318_v7  ;;  %13085 = vmatpush3.msra.mxu0 %v15036_v16  ;;  %v5497_v16 = vld [vmem:[#allocation6 + $0x130] sm:$0xff] }
 0xc31   : > { %12645 = vmatprep.subr.mxu1 %v5317_v14  ;;  %13086 = vmatprep.subr.mxu0 %v15042_v17  ;;  %v6373_v7 = vld [vmem:[#allocation6 + $0x250] sm:$0xff] }
 0xc32   : > { %12646 = vmatpush3.msra.mxu1 %v5317_v14  ;;  %13087 = vmatpush3.msra.mxu0 %v15042_v17  ;;  %v5495_v17 = vld [vmem:[#allocation6 + $0x120] sm:$0xff]  ;;  %v6372_v14 = vld [vmem:[#allocation6 + $0x248] sm:$0xff] }
 0xc33   : > { %v12634_v42 = vpop.f32.mrf.mxu0  ;;  %12647 = vmatprep.subr.mxu1 %v5316_v10  ;;  %13089 = vmatmul.mubr.msk.f32.vlgmr.msra.gmra.mxu0 %vm4628_vm2, %v7344_v29 }
 0xc34   : > { %12648 = vmatpush3.msra.mxu1 %v5316_v10  ;;  %v6371_v10 = vld [vmem:[#allocation6 + $0x240] sm:$0xff] }
 0xc35   : > { %v5305_v27 = vpop.f32.mrf.mxu0  ;;  %12649 = vmatprep.subr.mxu1 %v5315_v32 }
 0xc36   : > { %12650 = vmatpush3.msra.mxu1 %v5315_v32  ;;  %12651 = vmatprep.mubr.msk.f32.mxu1 %vm4628_vm2, %v5305_v27  ;;  %v6554_v32 = vld [vmem:[#allocation6 + $0x2b8] sm:$0xff]  ;;  %v6552_v27 = vld [vmem:[#allocation6 + $0x2a8] sm:$0xff] }
 0xc37   : > { %12652 = vmatmul.mubr.msk.f32.vlgmr.msra.gmra.mxu1 %vm4628_vm2, %v12634_v42  ;;  %12673 = vmatprep.subr.mxu1 %v5498_v13 }
 0xc38   : > { %12674 = vmatpush3.msra.mxu1 %v5498_v13  ;;  %v6553_v13 = vld [vmem:[#allocation6 + $0x2b0] sm:$0xff] }
 0xc39   : > { %12675 = vmatprep.subr.mxu1 %v5497_v16 }
 0xc3a   : > { %12676 = vmatpush3.msra.mxu1 %v5497_v16  ;;  %v6551_v16 = vld [vmem:[#allocation6 + $0x2a0] sm:$0xff] }
 0xc3b   : > { %12677 = vmatprep.subr.mxu1 %v5496_v3 }
 0xc3c   : > { %12678 = vmatpush3.msra.mxu1 %v5496_v3  ;;  %v6550_v3 = vld [vmem:[#allocation6 + $0x298] sm:$0xff] }
 0xc3d   : > { %12679 = vmatprep.subr.mxu1 %v5495_v17 }
 0xc3e   : > { %12680 = vmatpush3.msra.mxu1 %v5495_v17  ;;  %v6549_v17 = vld [vmem:[#allocation6 + $0x290] sm:$0xff] }
 0xc3f   : > { %12681 = vmatprep.subr.mxu1 %v5494_v26 }
 0xc40   : > { %12682 = vmatpush3.msra.mxu1 %v5494_v26  ;;  %v6548_v26 = vld [vmem:[#allocation6 + $0x288] sm:$0xff] }
 0xc41   : > { %12683 = vmatprep.subr.mxu1 %v5493_v8 }
 0xc42   : > { %12684 = vmatpush3.msra.mxu1 %v5493_v8  ;;  %v6547_v8 = vld [vmem:[#allocation6 + $0x280] sm:$0xff] }
 0xc43   : > { %v12672_v20 = vpop.f32.mrf.mxu0  ;;  %12685 = vmatprep.subr.mxu1 %v5492_v47 }
 0xc44   : > { %12686 = vmatpush3.msra.mxu1 %v5492_v47 }
 0xc45   : > { %v5481_v30 = vpop.f32.mrf.mxu0  ;;  %12687 = vmatprep.subr.mxu1 %v5491_v15 }
 0xc46   : > { %12688 = vmatpush3.msra.mxu1 %v5491_v15  ;;  %12689 = vmatprep.mubr.msk.f32.mxu1 %vm4628_vm2, %v5481_v30  ;;  %v6730_v15 = vld [vmem:[#allocation6 + $0x2f8] sm:$0xff]  ;;  %v6728_v30 = vld [vmem:[#allocation6 + $0x2e8] sm:$0xff] }
 0xc47   : > { %12690 = vmatmul.mubr.msk.f32.vlgmr.msra.gmra.mxu1 %vm4628_vm2, %v12672_v20  ;;  %12711 = vmatprep.subr.mxu1 %v5674_v50 }
 0xc48   : > { %12712 = vmatpush3.msra.mxu1 %v5674_v50  ;;  %v6729_v50 = vld [vmem:[#allocation6 + $0x2f0] sm:$0xff] }
 0xc49   : > { %12713 = vmatprep.subr.mxu1 %v5673_v21 }
 0xc4a   : > { %12714 = vmatpush3.msra.mxu1 %v5673_v21  ;;  %v6727_v21 = vld [vmem:[#allocation6 + $0x2e0] sm:$0xff] }
 0xc4b   : > { %12715 = vmatprep.subr.mxu1 %v5672_v19 }
 0xc4c   : > { %12716 = vmatpush3.msra.mxu1 %v5672_v19  ;;  %v6726_v19 = vld [vmem:[#allocation6 + $0x2d8] sm:$0xff] }
 0xc4d   : > { %12717 = vmatprep.subr.mxu1 %v5671_v53 }
 0xc4e   : > { %12718 = vmatpush3.msra.mxu1 %v5671_v53  ;;  %v6725_v53 = vld [vmem:[#allocation6 + $0x2d0] sm:$0xff] }
 0xc4f   : > { %12719 = vmatprep.subr.mxu1 %v5670_v33 }
 0xc50   : > { %12720 = vmatpush3.msra.mxu1 %v5670_v33  ;;  %v6724_v33 = vld [vmem:[#allocation6 + $0x2c8] sm:$0xff] }
 0xc51   : > { %12721 = vmatprep.subr.mxu1 %v5669_v60 }
 0xc52   : > { %12722 = vmatpush3.msra.mxu1 %v5669_v60  ;;  %v6723_v60 = vld [vmem:[#allocation6 + $0x2c0] sm:$0xff] }
 0xc53   : > { %v12710_v39 = vpop.f32.mrf.mxu0  ;;  %12723 = vmatprep.subr.mxu1 %v5668_v48 }
 0xc54   : > { %12724 = vmatpush3.msra.mxu1 %v5668_v48 }
 0xc55   : > { %v5657_v28 = vpop.f32.mrf.mxu0  ;;  %12725 = vmatprep.subr.mxu1 %v5667_v38 }
 0xc56   : > { %12726 = vmatpush3.msra.mxu1 %v5667_v38  ;;  %12727 = vmatprep.mubr.msk.f32.mxu1 %vm4628_vm2, %v5657_v28  ;;  %v6906_v38 = vld [vmem:[#allocation6 + $0x338] sm:$0xff]  ;;  %v6904_v28 = vld [vmem:[#allocation6 + $0x328] sm:$0xff] }
 0xc57   : > { %12728 = vmatmul.mubr.msk.f32.vlgmr.msra.gmra.mxu1 %vm4628_vm2, %v12710_v39  ;;  %12749 = vmatprep.subr.mxu1 %v5850_v35 }
 0xc58   : > { %12750 = vmatpush3.msra.mxu1 %v5850_v35  ;;  %v6905_v35 = vld [vmem:[#allocation6 + $0x330] sm:$0xff] }
 0xc59   : > { %12751 = vmatprep.subr.mxu1 %v5849_v52 }
 0xc5a   : > { %12752 = vmatpush3.msra.mxu1 %v5849_v52  ;;  %v6903_v52 = vld [vmem:[#allocation6 + $0x320] sm:$0xff] }
 0xc5b   : > { %12753 = vmatprep.subr.mxu1 %v5848_v34 }
 0xc5c   : > { %12754 = vmatpush3.msra.mxu1 %v5848_v34  ;;  %v6902_v34 = vld [vmem:[#allocation6 + $0x318] sm:$0xff] }
 0xc5d   : > { %12755 = vmatprep.subr.mxu1 %v5847_v49 }
 0xc5e   : > { %12756 = vmatpush3.msra.mxu1 %v5847_v49  ;;  %v6901_v49 = vld [vmem:[#allocation6 + $0x310] sm:$0xff] }
 0xc5f   : > { %12757 = vmatprep.subr.mxu1 %v5846_v57 }
 0xc60   : > { %12758 = vmatpush3.msra.mxu1 %v5846_v57  ;;  %v6900_v57 = vld [vmem:[#allocation6 + $0x308] sm:$0xff] }
 0xc61   : > { %12759 = vmatprep.subr.mxu1 %v5845_v43 }
 0xc62   : > { %12760 = vmatpush3.msra.mxu1 %v5845_v43  ;;  %v6899_v43 = vld [vmem:[#allocation6 + $0x300] sm:$0xff] }
 0xc63   : > { %v12748_v18 = vpop.f32.mrf.mxu0  ;;  %12761 = vmatprep.subr.mxu1 %v5844_v44 }
 0xc64   : > { %12762 = vmatpush3.msra.mxu1 %v5844_v44 }
 0xc65   : > { %v5833_v9 = vpop.f32.mrf.mxu0  ;;  %12763 = vmatprep.subr.mxu1 %v5843_v2 }
 0xc66   : > { %12764 = vmatpush3.msra.mxu1 %v5843_v2  ;;  %12765 = vmatprep.mubr.msk.f32.mxu1 %vm4628_vm2, %v5833_v9  ;;  %v7082_v2 = vld [vmem:[#allocation6 + $0x378] sm:$0xff]  ;;  %v7080_v9 = vld [vmem:[#allocation6 + $0x368] sm:$0xff] }
 0xc67   : > { %12766 = vmatmul.mubr.msk.f32.vlgmr.msra.gmra.mxu1 %vm4628_vm2, %v12748_v18  ;;  %12787 = vmatprep.subr.mxu1 %v6026_v41 }
 0xc68   : > { %12788 = vmatpush3.msra.mxu1 %v6026_v41  ;;  %v7081_v41 = vld [vmem:[#allocation6 + $0x370] sm:$0xff] }
 0xc69   : > { %12789 = vmatprep.subr.mxu1 %v6025_v46 }
 0xc6a   : > { %12790 = vmatpush3.msra.mxu1 %v6025_v46  ;;  %v7079_v46 = vld [vmem:[#allocation6 + $0x360] sm:$0xff] }
 0xc6b   : > { %12791 = vmatprep.subr.mxu1 %v6024_v5 }
 0xc6c   : > { %12792 = vmatpush3.msra.mxu1 %v6024_v5  ;;  %v7078_v5 = vld [vmem:[#allocation6 + $0x358] sm:$0xff] }
 0xc6d   : > { %12793 = vmatprep.subr.mxu1 %v6023_v12 }
 0xc6e   : > { %12794 = vmatpush3.msra.mxu1 %v6023_v12  ;;  %v7077_v12 = vld [vmem:[#allocation6 + $0x350] sm:$0xff] }
 0xc6f   : > { %12795 = vmatprep.subr.mxu1 %v6022_v31 }
 0xc70   : > { %12796 = vmatpush3.msra.mxu1 %v6022_v31  ;;  %v7076_v31 = vld [vmem:[#allocation6 + $0x348] sm:$0xff] }
 0xc71   : > { %12797 = vmatprep.subr.mxu1 %v6021_v59 }
 0xc72   : > { %12798 = vmatpush3.msra.mxu1 %v6021_v59  ;;  %v7075_v59 = vld [vmem:[#allocation6 + $0x340] sm:$0xff] }
 0xc73   : > { %v12786_v40 = vpop.f32.mrf.mxu0  ;;  %12799 = vmatprep.subr.mxu1 %v6020_v11 }
 0xc74   : > { %12800 = vmatpush3.msra.mxu1 %v6020_v11 }
 0xc75   : > { %v6009_v6 = vpop.f32.mrf.mxu0  ;;  %12801 = vmatprep.subr.mxu1 %v6019_v37 }
 0xc76   : > { %12802 = vmatpush3.msra.mxu1 %v6019_v37  ;;  %12803 = vmatprep.mubr.msk.f32.mxu1 %vm4628_vm2, %v6009_v6  ;;  %v7258_v37 = vld [vmem:[#allocation6 + $0x3b8] sm:$0xff]  ;;  %v7256_v6 = vld [vmem:[#allocation6 + $0x3a8] sm:$0xff] }
 0xc77   : > { %12804 = vmatmul.mubr.msk.f32.vlgmr.msra.gmra.mxu1 %vm4628_vm2, %v12786_v40  ;;  %12825 = vmatprep.subr.mxu1 %v6202_v62 }
 0xc78   : > { %12826 = vmatpush3.msra.mxu1 %v6202_v62  ;;  %v7257_v62 = vld [vmem:[#allocation6 + $0x3b0] sm:$0xff] }
 0xc79   : > { %12827 = vmatprep.subr.mxu1 %v6201_v22 }
 0xc7a   : > { %12828 = vmatpush3.msra.mxu1 %v6201_v22  ;;  %v7255_v22 = vld [vmem:[#allocation6 + $0x3a0] sm:$0xff] }
 0xc7b   : > { %12829 = vmatprep.subr.mxu1 %v6200_v23 }
 0xc7c   : > { %12830 = vmatpush3.msra.mxu1 %v6200_v23  ;;  %v7254_v23 = vld [vmem:[#allocation6 + $0x398] sm:$0xff] }
 0xc7d   : > { %12831 = vmatprep.subr.mxu1 %v6199_v36 }
 0xc7e   : > { %12832 = vmatpush3.msra.mxu1 %v6199_v36  ;;  %v7253_v36 = vld [vmem:[#allocation6 + $0x390] sm:$0xff] }
 0xc7f   : > { %12833 = vmatprep.subr.mxu1 %v6198_v45 }
 0xc80   : > { %12834 = vmatpush3.msra.mxu1 %v6198_v45  ;;  %v7252_v45 = vld [vmem:[#allocation6 + $0x388] sm:$0xff] }
 0xc81   : > { %12835 = vmatprep.subr.mxu1 %v6197_v56 }
 0xc82   : > { %12836 = vmatpush3.msra.mxu1 %v6197_v56  ;;  %v7251_v56 = vld [vmem:[#allocation6 + $0x380] sm:$0xff] }
 0xc83   : > { %v12824_v24 = vpop.f32.mrf.mxu0  ;;  %12837 = vmatprep.subr.mxu1 %v6196_v63 }
 0xc84   : > { %12838 = vmatpush3.msra.mxu1 %v6196_v63 }
 0xc85   : > { %v6185_v25 = vpop.f32.mrf.mxu0  ;;  %12839 = vmatprep.subr.mxu1 %v6195_v1 }
 0xc86   : > { %12840 = vmatpush3.msra.mxu1 %v6195_v1  ;;  %12841 = vmatprep.mubr.msk.f32.mxu1 %vm4628_vm2, %v6185_v25  ;;  %v7434_v1 = vld [vmem:[#allocation6 + $0x3f8] sm:$0xff]  ;;  %v7432_v25 = vld [vmem:[#allocation6 + $0x3e8] sm:$0xff] }
 0xc87   : > { %12842 = vmatmul.mubr.msk.f32.vlgmr.msra.gmra.mxu1 %vm4628_vm2, %v12824_v24  ;;  %12863 = vmatprep.subr.mxu1 %v6378_v54 }
 0xc88   : > { %12864 = vmatpush3.msra.mxu1 %v6378_v54  ;;  %v7433_v54 = vld [vmem:[#allocation6 + $0x3f0] sm:$0xff] }
 0xc89   : > { %12865 = vmatprep.subr.mxu1 %v6377_v55 }
 0xc8a   : > { %12866 = vmatpush3.msra.mxu1 %v6377_v55  ;;  %v7431_v55 = vld [vmem:[#allocation6 + $0x3e0] sm:$0xff] }
 0xc8b   : > { %12867 = vmatprep.subr.mxu1 %v6376_v58 }
 0xc8c   : > { %12868 = vmatpush3.msra.mxu1 %v6376_v58  ;;  %v7430_v58 = vld [vmem:[#allocation6 + $0x3d8] sm:$0xff] }
 0xc8d   : > { %12869 = vmatprep.subr.mxu1 %v6375_v61 }
 0xc8e   : > { %12870 = vmatpush3.msra.mxu1 %v6375_v61  ;;  %v7429_v61 = vld [vmem:[#allocation6 + $0x3d0] sm:$0xff] }
 0xc8f   : > { %12871 = vmatprep.subr.mxu1 %v6374_v4 }
 0xc90   : > { %12872 = vmatpush3.msra.mxu1 %v6374_v4  ;;  %v7428_v4 = vld [vmem:[#allocation6 + $0x3c8] sm:$0xff] }
 0xc91   : > { %12873 = vmatprep.subr.mxu1 %v6373_v7 }
 0xc92   : > { %12874 = vmatpush3.msra.mxu1 %v6373_v7  ;;  %v7427_v7 = vld [vmem:[#allocation6 + $0x3c0] sm:$0xff] }
 0xc93   : > { %v12862_v29 = vpop.f32.mrf.mxu0  ;;  %12875 = vmatprep.subr.mxu1 %v6372_v14 }
 0xc94   : > { %12876 = vmatpush3.msra.mxu1 %v6372_v14 }
 0xc95   : > { %v6361_v42 = vpop.f32.mrf.mxu0  ;;  %12877 = vmatprep.subr.mxu1 %v6371_v10 }
 0xc96   : > { %12878 = vmatpush3.msra.mxu1 %v6371_v10  ;;  %12879 = vmatprep.mubr.msk.f32.mxu1 %vm4628_vm2, %v6361_v42 }
 0xc97   : > { %12880 = vmatmul.mubr.msk.f32.vlgmr.msra.gmra.mxu1 %vm4628_vm2, %v12862_v29  ;;  %12901 = vmatprep.subr.mxu1 %v6554_v32  ;;  %v15346_v29 = vpop.f32.mrf.mxu1 }
 0xc98   : > { %12902 = vmatpush3.msra.mxu1 %v6554_v32 }
 0xc99   : > { %12903 = vmatprep.subr.mxu1 %v6553_v13  ;;  %v15348_v32 = vpop.f32.mrf.mxu1 }
 0xc9a   : > { %12904 = vmatpush3.msra.mxu1 %v6553_v13 }
 0xc9b   : > { %12905 = vmatprep.subr.mxu1 %v6552_v27 }
 0xc9c   : > { %12906 = vmatpush3.msra.mxu1 %v6552_v27 }
 0xc9d   : > { %12907 = vmatprep.subr.mxu1 %v6551_v16 }
 0xc9e   : > { %12908 = vmatpush3.msra.mxu1 %v6551_v16 }
 0xc9f   : > { %12909 = vmatprep.subr.mxu1 %v6550_v3 }
 0xca0   : > { %12910 = vmatpush3.msra.mxu1 %v6550_v3  ;;  %v13564_v3 = vmov 0.0  }
 0xca1   : > { %12911 = vmatprep.subr.mxu1 %v6549_v17  ;;  %7824 = vmatprep.mubr.f32.mxu0 %v13564_v3 }
 0xca2   : > { %12912 = vmatpush3.msra.mxu1 %v6549_v17 }
 0xca3   : > { %v12900_v47 = vpop.f32.mrf.mxu0  ;;  %12913 = vmatprep.subr.mxu1 %v6548_v26 }
 0xca4   : > { %12914 = vmatpush3.msra.mxu1 %v6548_v26 }
 0xca5   : > { %v6537_v20 = vpop.f32.mrf.mxu0  ;;  %12915 = vmatprep.subr.mxu1 %v6547_v8 }
 0xca6   : > { %12916 = vmatpush3.msra.mxu1 %v6547_v8  ;;  %12917 = vmatprep.mubr.msk.f32.mxu1 %vm4628_vm2, %v6537_v20  ;;  %v7757_v20 = vld [vmem:[#allocation9 + $0x1e8] sm:$0xff] }
 0xca7   : > { %12918 = vmatmul.mubr.msk.f32.vlgmr.msra.gmra.mxu1 %vm4628_vm2, %v12900_v47  ;;  %12939 = vmatprep.subr.mxu1 %v6730_v15  ;;  %v7759_v47 = vld [vmem:[#allocation9 + $0x1f8] sm:$0xff] }
 0xca8   : > { %12940 = vmatpush3.msra.mxu1 %v6730_v15  ;;  %v7758_v15 = vld [vmem:[#allocation9 + $0x1f0] sm:$0xff]  ;;  %7760 = vmatprep.subr.mxu0 %v7759_v47 }
 0xca9   : > { %12941 = vmatprep.subr.mxu1 %v6729_v50  ;;  %7761 = vmatpush1.msra.mxu0 %v7758_v15 }
 0xcaa   : > { %12942 = vmatpush3.msra.mxu1 %v6729_v50  ;;  %v7756_v50 = vld [vmem:[#allocation9 + $0x1e0] sm:$0xff]  ;;  %7762 = vmatprep.subr.mxu0 %v7757_v20 }
 0xcab   : > { %12943 = vmatprep.subr.mxu1 %v6728_v30  ;;  %7763 = vmatpush1.msra.mxu0 %v7756_v50 }
 0xcac   : > { %12944 = vmatpush3.msra.mxu1 %v6728_v30  ;;  %v7755_v30 = vld [vmem:[#allocation9 + $0x1d8] sm:$0xff] }
 0xcad   : > { %12945 = vmatprep.subr.mxu1 %v6727_v21  ;;  %7764 = vmatprep.subr.mxu0 %v7755_v30 }
 0xcae   : > { %12946 = vmatpush3.msra.mxu1 %v6727_v21  ;;  %v7754_v21 = vld [vmem:[#allocation9 + $0x1d0] sm:$0xff] }
 0xcaf   : > { %12947 = vmatprep.subr.mxu1 %v6726_v19  ;;  %7765 = vmatpush1.msra.mxu0 %v7754_v21 }
 0xcb0   : > { %12948 = vmatpush3.msra.mxu1 %v6726_v19 }
 0xcb1   : > { %12949 = vmatprep.subr.mxu1 %v6725_v53 }
 0xcb2   : > { %12950 = vmatpush3.msra.mxu1 %v6725_v53  ;;  %v7753_v53 = vld [vmem:[#allocation9 + $0x1c8] sm:$0xff] }
 0xcb3   : > { %v12938_v48 = vpop.f32.mrf.mxu0  ;;  %12951 = vmatprep.subr.mxu1 %v6724_v33  ;;  %7766 = vmatprep.subr.mxu0 %v7753_v53 }
 0xcb4   : > { %12952 = vmatpush3.msra.mxu1 %v6724_v33  ;;  %v7752_v33 = vld [vmem:[#allocation9 + $0x1c0] sm:$0xff] }
 0xcb5   : > { %v6713_v39 = vpop.f32.mrf.mxu0  ;;  %12953 = vmatprep.subr.mxu1 %v6723_v60  ;;  %7767 = vmatpush1.msra.mxu0 %v7752_v33 }
 0xcb6   : > { %12954 = vmatpush3.msra.mxu1 %v6723_v60  ;;  %12955 = vmatprep.mubr.msk.f32.mxu1 %vm4628_vm2, %v6713_v39  ;;  %v7749_v39 = vld [vmem:[#allocation9 + $0x1a8] sm:$0xff] }
 0xcb7   : > { %12956 = vmatmul.mubr.msk.f32.vlgmr.msra.gmra.mxu1 %vm4628_vm2, %v12938_v48  ;;  %12977 = vmatprep.subr.mxu1 %v6906_v38  ;;  %v7751_v48 = vld [vmem:[#allocation9 + $0x1b8] sm:$0xff] }
 0xcb8   : > { %12978 = vmatpush3.msra.mxu1 %v6906_v38  ;;  %v7750_v38 = vld [vmem:[#allocation9 + $0x1b0] sm:$0xff]  ;;  %7768 = vmatprep.subr.mxu0 %v7751_v48 }
 0xcb9   : > { %12979 = vmatprep.subr.mxu1 %v6905_v35  ;;  %7769 = vmatpush1.msra.mxu0 %v7750_v38 }
 0xcba   : > { %12980 = vmatpush3.msra.mxu1 %v6905_v35  ;;  %v7748_v35 = vld [vmem:[#allocation9 + $0x1a0] sm:$0xff]  ;;  %7770 = vmatprep.subr.mxu0 %v7749_v39 }
 0xcbb   : > { %12981 = vmatprep.subr.mxu1 %v6904_v28  ;;  %7771 = vmatpush1.msra.mxu0 %v7748_v35 }
 0xcbc   : > { %12982 = vmatpush3.msra.mxu1 %v6904_v28 }
 0xcbd   : > { %12983 = vmatprep.subr.mxu1 %v6903_v52 }
 0xcbe   : > { %12984 = vmatpush3.msra.mxu1 %v6903_v52  ;;  %v7747_v52 = vld [vmem:[#allocation9 + $0x198] sm:$0xff] }
 0xcbf   : > { %12985 = vmatprep.subr.mxu1 %v6902_v34  ;;  %7772 = vmatprep.subr.mxu0 %v7747_v52 }
 0xcc0   : > { %12986 = vmatpush3.msra.mxu1 %v6902_v34  ;;  %v7746_v34 = vld [vmem:[#allocation9 + $0x190] sm:$0xff] }
 0xcc1   : > { %12987 = vmatprep.subr.mxu1 %v6901_v49  ;;  %7773 = vmatpush1.msra.mxu0 %v7746_v34 }
 0xcc2   : > { %12988 = vmatpush3.msra.mxu1 %v6901_v49 }
 0xcc3   : > { %v12976_v44 = vpop.f32.mrf.mxu0  ;;  %12989 = vmatprep.subr.mxu1 %v6900_v57 }
 0xcc4   : > { %12990 = vmatpush3.msra.mxu1 %v6900_v57  ;;  %v7745_v57 = vld [vmem:[#allocation9 + $0x188] sm:$0xff] }
 0xcc5   : > { %v6889_v18 = vpop.f32.mrf.mxu0  ;;  %12991 = vmatprep.subr.mxu1 %v6899_v43  ;;  %7774 = vmatprep.subr.mxu0 %v7745_v57 }
 0xcc6   : > { %12992 = vmatpush3.msra.mxu1 %v6899_v43  ;;  %12993 = vmatprep.mubr.msk.f32.mxu1 %vm4628_vm2, %v6889_v18  ;;  %v7744_v43 = vld [vmem:[#allocation9 + $0x180] sm:$0xff] }
 0xcc7   : > { %12994 = vmatmul.mubr.msk.f32.vlgmr.msra.gmra.mxu1 %vm4628_vm2, %v12976_v44  ;;  %13015 = vmatprep.subr.mxu1 %v7082_v2  ;;  %v7743_v44 = vld [vmem:[#allocation9 + $0x178] sm:$0xff] }
 0xcc8   : > { %13016 = vmatpush3.msra.mxu1 %v7082_v2  ;;  %v7742_v2 = vld [vmem:[#allocation9 + $0x170] sm:$0xff]  ;;  %7775 = vmatpush1.msra.mxu0 %v7744_v43 }
 0xcc9   : > { %13017 = vmatprep.subr.mxu1 %v7081_v41  ;;  %7776 = vmatprep.subr.mxu0 %v7743_v44 }
 0xcca   : > { %13018 = vmatpush3.msra.mxu1 %v7081_v41  ;;  %v7741_v41 = vld [vmem:[#allocation9 + $0x168] sm:$0xff]  ;;  %7777 = vmatpush1.msra.mxu0 %v7742_v2 }
 0xccb   : > { %13019 = vmatprep.subr.mxu1 %v7080_v9  ;;  %7778 = vmatprep.subr.mxu0 %v7741_v41 }
 0xccc   : > { %13020 = vmatpush3.msra.mxu1 %v7080_v9  ;;  %v7740_v9 = vld [vmem:[#allocation9 + $0x160] sm:$0xff] }
 0xccd   : > { %13021 = vmatprep.subr.mxu1 %v7079_v46  ;;  %7779 = vmatpush1.msra.mxu0 %v7740_v9 }
 0xcce   : > { %13022 = vmatpush3.msra.mxu1 %v7079_v46 }
 0xccf   : > { %13023 = vmatprep.subr.mxu1 %v7078_v5 }
 0xcd0   : > { %13024 = vmatpush3.msra.mxu1 %v7078_v5  ;;  %v7739_v5 = vld [vmem:[#allocation9 + $0x158] sm:$0xff] }
 0xcd1   : > { %13025 = vmatprep.subr.mxu1 %v7077_v12  ;;  %7780 = vmatprep.subr.mxu0 %v7739_v5 }
 0xcd2   : > { %13026 = vmatpush3.msra.mxu1 %v7077_v12  ;;  %v7738_v12 = vld [vmem:[#allocation9 + $0x150] sm:$0xff] }
 0xcd3   : > { %v13014_v11 = vpop.f32.mrf.mxu0  ;;  %13027 = vmatprep.subr.mxu1 %v7076_v31  ;;  %7781 = vmatpush1.msra.mxu0 %v7738_v12 }
 0xcd4   : > { %13028 = vmatpush3.msra.mxu1 %v7076_v31  ;;  %v7737_v31 = vld [vmem:[#allocation9 + $0x148] sm:$0xff] }
 0xcd5   : > { %v7065_v40 = vpop.f32.mrf.mxu0  ;;  %13029 = vmatprep.subr.mxu1 %v7075_v59  ;;  %7782 = vmatprep.subr.mxu0 %v7737_v31 }
 0xcd6   : > { %13030 = vmatpush3.msra.mxu1 %v7075_v59  ;;  %13031 = vmatprep.mubr.msk.f32.mxu1 %vm4628_vm2, %v7065_v40  ;;  %v7736_v59 = vld [vmem:[#allocation9 + $0x140] sm:$0xff]  ;;  %v7734_v40 = vld [vmem:[#allocation9 + $0x130] sm:$0xff] }
 0xcd7   : > { %13032 = vmatmul.mubr.msk.f32.vlgmr.msra.gmra.mxu1 %vm4628_vm2, %v13014_v11  ;;  %13053 = vmatprep.subr.mxu1 %v7258_v37 }
 0xcd8   : > { %13054 = vmatpush3.msra.mxu1 %v7258_v37  ;;  %v7735_v37 = vld [vmem:[#allocation9 + $0x138] sm:$0xff]  ;;  %7783 = vmatpush1.msra.mxu0 %v7736_v59 }
 0xcd9   : > { %13055 = vmatprep.subr.mxu1 %v7257_v62  ;;  %7784 = vmatprep.subr.mxu0 %v7735_v37 }
 0xcda   : > { %13056 = vmatpush3.msra.mxu1 %v7257_v62  ;;  %7785 = vmatpush1.msra.mxu0 %v7734_v40 }
 0xcdb   : > { %13057 = vmatprep.subr.mxu1 %v7256_v6 }
 0xcdc   : > { %13058 = vmatpush3.msra.mxu1 %v7256_v6  ;;  %v7733_v6 = vld [vmem:[#allocation9 + $0x128] sm:$0xff] }
 0xcdd   : > { %13059 = vmatprep.subr.mxu1 %v7255_v22  ;;  %7786 = vmatprep.subr.mxu0 %v7733_v6 }
 0xcde   : > { %13060 = vmatpush3.msra.mxu1 %v7255_v22  ;;  %v7732_v22 = vld [vmem:[#allocation9 + $0x120] sm:$0xff] }
 0xcdf   : > { %13061 = vmatprep.subr.mxu1 %v7254_v23  ;;  %7787 = vmatpush1.msra.mxu0 %v7732_v22 }
 0xce0   : > { %13062 = vmatpush3.msra.mxu1 %v7254_v23 }
 0xce1   : > { %13063 = vmatprep.subr.mxu1 %v7253_v36 }
 0xce2   : > { %13064 = vmatpush3.msra.mxu1 %v7253_v36 }
 0xce3   : > { %v13052_v63 = vpop.f32.mrf.mxu0  ;;  %13065 = vmatprep.subr.mxu1 %v7252_v45 }
 0xce4   : > { %13066 = vmatpush3.msra.mxu1 %v7252_v45 }
 0xce5   : > { %v7241_v24 = vpop.f32.mrf.mxu0  ;;  %13067 = vmatprep.subr.mxu1 %v7251_v56 }
 0xce6   : > { %13068 = vmatpush3.msra.mxu1 %v7251_v56  ;;  %13069 = vmatprep.mubr.msk.f32.mxu1 %vm4628_vm2, %v7241_v24  ;;  %v5051_v56 = vadd.f32 %v15346_v29, %v15289_v0 }
 0xce7   : > { %13070 = vmatmul.mubr.msk.f32.vlgmr.msra.gmra.mxu1 %vm4628_vm2, %v13052_v63  ;;  %13091 = vmatprep.subr.mxu1 %v7434_v1  ;;  %v15350_v42 = vpop.f32.mrf.mxu1  ;;  %v5046_v63 = vadd.f32 %v15348_v32, %v15294_v51 }
 0xce8   : > { %13092 = vmatpush3.msra.mxu1 %v7434_v1  ;;  %v5229_v24 = vadd.f32 %v15350_v42, %v5051_v56 }
 0xce9   : > { %13093 = vmatprep.subr.mxu1 %v7433_v54  ;;  %v15352_v13 = vpop.f32.mrf.mxu1 }
 0xcea   : > { %13094 = vmatpush3.msra.mxu1 %v7433_v54  ;;  %v5228_v54 = vadd.f32 %v15352_v13, %v5046_v63 }
 0xceb   : > { %13095 = vmatprep.subr.mxu1 %v7432_v25 }
 0xcec   : > { %13096 = vmatpush3.msra.mxu1 %v7432_v25 }
 0xced   : > { %13097 = vmatprep.subr.mxu1 %v7431_v55 }
 0xcee   : > { %13098 = vmatpush3.msra.mxu1 %v7431_v55 }
 0xcef   : > { %13099 = vmatprep.subr.mxu1 %v7430_v58 }
 0xcf0   : > { %13100 = vmatpush3.msra.mxu1 %v7430_v58 }
 0xcf1   : > { %13101 = vmatprep.subr.mxu1 %v7429_v61 }
 0xcf2   : > { %13102 = vmatpush3.msra.mxu1 %v7429_v61 }
 0xcf3   : > { %v13090_v14 = vpop.f32.mrf.mxu0  ;;  %13103 = vmatprep.subr.mxu1 %v7428_v4 }
 0xcf4   : > { %13104 = vmatpush3.msra.mxu1 %v7428_v4 }
 0xcf5   : > { %v7417_v10 = vpop.f32.mrf.mxu0  ;;  %13105 = vmatprep.subr.mxu1 %v7427_v7 }
 0xcf6   : > { %13106 = vmatpush3.msra.mxu1 %v7427_v7  ;;  %13107 = vmatprep.mubr.msk.f32.mxu1 %vm4628_vm2, %v7417_v10 }
 0xcf7   : > { %13108 = vmatmul.mubr.msk.f32.vlgmr.msra.gmra.mxu1 %vm4628_vm2, %v13090_v14  ;;  %v15354_v27 = vpop.f32.mrf.mxu1  ;;  %13110 = vmatprep.subr.mxu1 %v13564_v3 }
 0xcf8   : > { %13114 = vmatprep.mubr.msk.f32.mxu1 %vm13565_vm3, %v13564_v3  ;;  %v5405_v25 = vadd.f32 %v15354_v27, %v5229_v24  ;;  %v7545_v24 = vld [vmem:[#allocation7] sm:$0xf] }
 0xcf9   : > { %v15356_v16 = vpop.f32.mrf.mxu1 }
 0xcfa   : > { %v5404_v55 = vadd.f32 %v15356_v16, %v5228_v54  ;;  %v7653_v54 = vld [vmem:[#allocation7 + $0x4] sm:$0xf] }
 0xd07   : > { %v15360_v17 = vpop.f32.mrf.mxu1 }
 0xd08   : > { %v5581_v61 = vadd.f32 %v15360_v17, %v5405_v25  ;;  %v7651_v25 = vld [vmem:[#allocation9 + $0xf8] sm:$0xff] }
 0xd09   : > { %v15364_v26 = vpop.f32.mrf.mxu1 }
 0xd0a   : > { %v5580_v4 = vadd.f32 %v15364_v26, %v5404_v55  ;;  %v7650_v55 = vld [vmem:[#allocation9 + $0xf0] sm:$0xff] }
 0xd17   : > { %v15366_v8 = vpop.f32.mrf.mxu1 }
 0xd18   : > { %v5757_v0 = vadd.f32 %v15366_v8, %v5581_v61  ;;  %v7648_v61 = vld [vmem:[#allocation9 + $0xe0] sm:$0xff] }
 0xd19   : > { %v15368_v19 = vpop.f32.mrf.mxu1 }
 0xd1a   : > { %v5756_v14 = vadd.f32 %v15368_v19, %v5580_v4  ;;  %v7647_v4 = vld [vmem:[#allocation9 + $0xd8] sm:$0xff] }
 0xd27   : > { %v15370_v60 = vpop.f32.mrf.mxu1 }
 0xd28   : > { %v5933_v51 = vadd.f32 %v15370_v60, %v5757_v0  ;;  %v7645_v0 = vld [vmem:[#allocation9 + $0xc8] sm:$0xff] }
 0xd29   : > { %v5923_v28 = vpop.f32.mrf.mxu1 }
 0xd2a   : > { %v5932_v10 = vadd.f32 %v5923_v28, %v5756_v14  ;;  %v7644_v14 = vld [vmem:[#allocation9 + $0xc0] sm:$0xff] }
 0xd37   : > { %v12805_v49 = vpop.f32.mrf.mxu1 }
 0xd38   : > { %v6109_v32 = vadd.f32 %v12805_v49, %v5933_v51  ;;  %v7643_v51 = vld [vmem:[#allocation9 + $0xb8] sm:$0xff] }
 0xd39   : > { %v6099_v18 = vpop.f32.mrf.mxu1 }
 0xd3a   : > { %v6108_v42 = vadd.f32 %v6099_v18, %v5932_v10  ;;  %v7642_v10 = vld [vmem:[#allocation9 + $0xb0] sm:$0xff] }
 0xd47   : > { %v12843_v46 = vpop.f32.mrf.mxu1 }
 0xd48   : > { %v6285_v27 = vadd.f32 %v12843_v46, %v6109_v32  ;;  %v7640_v32 = vld [vmem:[#allocation9 + $0xa0] sm:$0xff] }
 0xd49   : > { %v6275_v11 = vpop.f32.mrf.mxu1 }
 0xd4a   : > { %v6284_v47 = vadd.f32 %v6275_v11, %v6108_v42  ;;  %v7639_v42 = vld [vmem:[#allocation9 + $0x98] sm:$0xff] }
 0xd57   : > { %v12881_v62 = vpop.f32.mrf.mxu1 }
 0xd58   : > { %v6461_v16 = vadd.f32 %v12881_v62, %v6285_v27  ;;  %v7637_v27 = vld [vmem:[#allocation9 + $0x88] sm:$0xff] }
 0xd59   : > { %v6451_v23 = vpop.f32.mrf.mxu1 }
 0xd5a   : > { %v6460_v15 = vadd.f32 %v6451_v23, %v6284_v47  ;;  %v7636_v47 = vld [vmem:[#allocation9 + $0x80] sm:$0xff] }
 0xd67   : > { %v12919_v36 = vpop.f32.mrf.mxu1 }
 0xd68   : > { %v6637_v17 = vadd.f32 %v12919_v36, %v6461_v16  ;;  %v7635_v16 = vld [vmem:[#allocation9 + $0x78] sm:$0xff] }
 0xd69   : > { %v6627_v45 = vpop.f32.mrf.mxu1 }
 0xd6a   : > { %v6636_v50 = vadd.f32 %v6627_v45, %v6460_v15  ;;  %v7634_v15 = vld [vmem:[#allocation9 + $0x70] sm:$0xff] }
 0xd77   : > { %v12957_v1 = vpop.f32.mrf.mxu1 }
 0xd78   : > { %v6813_v30 = vadd.f32 %v12957_v1, %v6637_v17  ;;  %v7632_v17 = vld [vmem:[#allocation9 + $0x60] sm:$0xff] }
 0xd79   : > { %v6803_v58 = vpop.f32.mrf.mxu1 }
 0xd7a   : > { %v6812_v21 = vadd.f32 %v6803_v58, %v6636_v50  ;;  %v7649_v58 = vld [vmem:[#allocation9 + $0xe8] sm:$0xff]  ;;  %v7631_v50 = vld [vmem:[#allocation9 + $0x58] sm:$0xff] }
 0xd87   : > { %v12995_v7 = vpop.f32.mrf.mxu1 }
 0xd88   : > { %v6989_v8 = vadd.f32 %v12995_v7, %v6813_v30  ;;  %v7646_v7 = vld [vmem:[#allocation9 + $0xd0] sm:$0xff]  ;;  %v7629_v30 = vld [vmem:[#allocation9 + $0x48] sm:$0xff] }
 0xd89   : > { %v6979_v29 = vpop.f32.mrf.mxu1 }
 0xd8a   : > { %v6988_v53 = vadd.f32 %v6979_v29, %v6812_v21  ;;  %v7641_v29 = vld [vmem:[#allocation9 + $0xa8] sm:$0xff]  ;;  %v7628_v21 = vld [vmem:[#allocation9 + $0x40] sm:$0xff] }
 0xd97   : > { %v13033_v13 = vpop.f32.mrf.mxu1 }
 0xd98   : > { %v7165_v33 = vadd.f32 %v13033_v13, %v6989_v8  ;;  %v7638_v13 = vld [vmem:[#allocation9 + $0x90] sm:$0xff]  ;;  %v7627_v8 = vld [vmem:[#allocation9 + $0x38] sm:$0xff] }
 0xd99   : > { %v7155_v20 = vpop.f32.mrf.mxu1 }
 0xd9a   : > { %v7164_v60 = vadd.f32 %v7155_v20, %v6988_v53  ;;  %v7633_v20 = vld [vmem:[#allocation9 + $0x68] sm:$0xff]  ;;  %v7626_v53 = vld [vmem:[#allocation9 + $0x30] sm:$0xff] }
 0xda7   : > { %v13071_v26 = vpop.f32.mrf.mxu1 }
 0xda8   : > { %v7341_v38 = vadd.f32 %v13071_v26, %v7165_v33  ;;  %v7630_v26 = vld [vmem:[#allocation9 + $0x50] sm:$0xff]  ;;  %v7624_v33 = vld [vmem:[#allocation9 + $0x20] sm:$0xff] }
 0xda9   : > { %v7331_v19 = vpop.f32.mrf.mxu1 }
 0xdaa   : > { %v7340_v39 = vadd.f32 %v7331_v19, %v7164_v60  ;;  %v7625_v19 = vld [vmem:[#allocation9 + $0x28] sm:$0xff]  ;;  %v7623_v60 = vld [vmem:[#allocation9 + $0x18] sm:$0xff] }
 0xdb7   : > { %v13109_v48 = vpop.f32.mrf.mxu1 }
 0xdb8   : > { %v7517_v28 = vadd.f32 %v13109_v48, %v7341_v38  ;;  %v7622_v48 = vld [vmem:[#allocation9 + $0x10] sm:$0xff]  ;;  %v7731_v38 = vld [vmem:[#allocation9 + $0x118] sm:$0xff] }
 0xdb9   : > { %v7507_v35 = vpop.f32.mrf.mxu1  ;;  %7788 = vmatprep.subr.mxu0 %v7731_v38  ;;  %v8169_v38 = vld [vmem:[#allocation9 + $0x350] sm:$0xff] }
 0xdba   : > { %v7516_v52 = vadd.f32 %v7507_v35, %v7340_v39  ;;  %v7621_v39 = vld [vmem:[#allocation9 + $0x8] sm:$0xff]  ;;  %v7730_v35 = vld [vmem:[#allocation9 + $0x110] sm:$0xff] }
 0xdbb   : > { %7789 = vmatpush1.msra.mxu0 %v7730_v35  ;;  %v8167_v35 = vld [vmem:[#allocation9 + $0x340] sm:$0xff] }
 0xdbc   : > { %v7518_v34 = vadd.f32 %v7517_v28, %v7516_v52 }
 0xdbe   : > { %v7519_v49 = vrot.slane %v7518_v34, 4 }
 0xdc0   : > { %v7520_v57 = vadd.f32 %v7519_v49, %v7518_v34  ;;  %v7728_v34 = vld [vmem:[#allocation9 + $0x100] sm:$0xff]  ;;  %v8009_v49 = vld [vmem:[#allocation9 + $0x2f8] sm:$0xff] }
 0xdc2   : > { %v7521_v43 = vrot.slane %v7520_v57, 2 }
 0xdc4   : > { %v7522_v44 = vadd.f32 %v7521_v43, %v7520_v57  ;;  %v8008_v57 = vld [vmem:[#allocation9 + $0x2f0] sm:$0xff] }
 0xdc6   : > { %v7523_v2 = vrot.slane %v7522_v44, 1 }
 0xdc8   : > { %v7524_v18 = vadd.f32 %v7523_v2, %v7522_v44  ;;  %v8007_v44 = vld [vmem:[#allocation9 + $0x2e8] sm:$0xff]  ;;  %v8006_v2 = vld [vmem:[#allocation9 + $0x2e0] sm:$0xff] }
 0xdca   : > { %v7526_v41 = vmul.f32 0.0625, %v7524_v18 }
 0xdcc   : > { %v7527_v9 = vsub.f32 %v7516_v52, %v7526_v41  ;;  %v7528_v46 = vsub.f32 %v7517_v28, %v7526_v41  ;;  %v7620_v28 = vld [vmem:[#allocation9] sm:$0xff]  ;;  %v7729_v52 = vld [vmem:[#allocation9 + $0x108] sm:$0xff]  ;;  %v8005_v41 = vld [vmem:[#allocation9 + $0x2d8] sm:$0xff] }
 0xdcd   : > { %7790 = vmatprep.subr.mxu0 %v7729_v52  ;;  %v8166_v52 = vld [vmem:[#allocation9 + $0x338] sm:$0xff] }
 0xdce   : > { %v7529_v5 = vmul.f32 %v7527_v9, %v7527_v9  ;;  %v7530_v12 = vmul.f32 %v7528_v46, %v7528_v46  ;;  %7791 = vmatpush1.msra.mxu0 %v7728_v34  ;;  %v7980_v34 = vld [vmem:[#allocation9 + $0x210] sm:$0xff] }
 0xdcf   : > { %13124 = vmatprep.subr.mxu0 %v13564_v3 }
 0xdd0   : > { %v7531_v31 = vadd.f32 %v7530_v12, %v7529_v5  ;;  %v8003_v5 = vld [vmem:[#allocation9 + $0x2c8] sm:$0xff] }
 0xdd1   : > { %v7903_v12 = vld [vmem:[#allocation7 + $0x8] sm:$0xf] }
 0xdd2   : > { %v7532_v59 = vrot.slane %v7531_v31, 4 }
 0xdd4   : > { %v7533_v11 = vadd.f32 %v7532_v59, %v7531_v31  ;;  %v8002_v59 = vld [vmem:[#allocation9 + $0x2c0] sm:$0xff] }
 0xdd6   : > { %v7534_v37 = vrot.slane %v7533_v11, 2 }
 0xdd8   : > { %v7535_v40 = vadd.f32 %v7534_v37, %v7533_v11  ;;  %v8001_v11 = vld [vmem:[#allocation9 + $0x2b8] sm:$0xff]  ;;  %v8084_v37 = vld [vmem:[#allocation7 + $0xc] sm:$0xf] }
 0xdda   : > { %v7536_v62 = vrot.slane %v7535_v40, 1 }
 0xddc   : > { %v7537_v6 = vadd.f32 %v7536_v62, %v7535_v40  ;;  %v8190_v40 = vld [vmem:[#allocation9 + $0x3f8] sm:$0xff]  ;;  %v8189_v62 = vld [vmem:[#allocation9 + $0x3f0] sm:$0xff] }
 0xdde   : > { %v7538_v22 = vmul.f32 0.0625, %v7537_v6  ;;  %v8000_v6 = vld [vmem:[#allocation9 + $0x2b0] sm:$0xff] }
 0xde0   : > { %v7539_v23 = vadd.f32 1e-05, %v7538_v22  ;;  %v8188_v22 = vld [vmem:[#allocation9 + $0x3e8] sm:$0xff] }
 0xde2   : > { %13302 = vrsqrt.f32 %v7539_v23  ;;  %v7999_v23 = vld [vmem:[#allocation9 + $0x2a8] sm:$0xff] }
 0xdef   : > { %v13303_v36 = vpop.eup %13302 }
 0xdf0   : > { %v7541_v45 = vmul.f32 %v13303_v36, %v7527_v9  ;;  %v7542_v56 = vmul.f32 %v13303_v36, %v7528_v46  ;;  %v8004_v46 = vld [vmem:[#allocation9 + $0x2d0] sm:$0xff]  ;;  %v8187_v36 = vld [vmem:[#allocation9 + $0x3e0] sm:$0xff] }
 0xdf2   : > { %v15385_v63 = vmax.f32 %v7542_v56, 0.0  ;;  %v15387_v1 = vmax.f32 %v7541_v45, 0.0  ;;  %v7998_v45 = vld [vmem:[#allocation9 + $0x2a0] sm:$0xff]  ;;  %v8186_v56 = vld [vmem:[#allocation9 + $0x3d8] sm:$0xff] }
 0xdf4   : > { %13111 = vmatpush3.msra.mxu1 %v15385_v63 }
 0xdf5   : > { %13112 = vmatprep.subr.mxu1 %v13564_v3 }
 0xdf6   : > { %13113 = vmatpush3.msra.mxu1 %v15387_v1 }
 0xdf7   : > { %13115 = vmatmul.mubr.msk.f32.vlgmr.msra.gmra.mxu1 %vm7546_vm4, %v7545_v24  ;;  %13117 = vmatprep.subr.mxu1 %v13564_v3  ;;  %v7997_v24 = vld [vmem:[#allocation9 + $0x298] sm:$0xff] }
 0xdf8   : > { %13118 = vmatpush3.msra.mxu1 %v15385_v63  ;;  %13121 = vmatprep.mubr.msk.f32.mxu1 %vm13565_vm3, %v13564_v3 }
 0xdf9   : > { %13119 = vmatprep.subr.mxu1 %v13564_v3 }
 0xdfa   : > { %13120 = vmatpush3.msra.mxu1 %v15387_v1 }
 0xdfb   : > { %13122 = vmatmul.mubr.msk.f32.vlgmr.msra.gmra.mxu1 %vm7546_vm4, %v7653_v54  ;;  %7831 = vmatprep.subr.mxu1 %v7651_v25  ;;  %v8185_v54 = vld [vmem:[#allocation9 + $0x3d0] sm:$0xff] }
 0xdfc   : > { %7832 = vmatpush1.msra.mxu1 %v7650_v55  ;;  %7895 = vmatprep.mubr.f32.mxu1 %v13564_v3  ;;  %v7996_v25 = vld [vmem:[#allocation9 + $0x290] sm:$0xff]  ;;  %v8184_v55 = vld [vmem:[#allocation9 + $0x3c8] sm:$0xff] }
 0xdfd   : > { %7833 = vmatprep.subr.mxu1 %v7649_v58  ;;  %v7995_v58 = vld [vmem:[#allocation9 + $0x288] sm:$0xff] }
 0xdfe   : > { %7834 = vmatpush1.msra.mxu1 %v7648_v61  ;;  %v8183_v61 = vld [vmem:[#allocation9 + $0x3c0] sm:$0xff] }
 0xdff   : > { %7835 = vmatprep.subr.mxu1 %v7647_v4  ;;  %v7994_v4 = vld [vmem:[#allocation9 + $0x280] sm:$0xff] }
 0xe00   : > { %7836 = vmatpush1.msra.mxu1 %v7646_v7  ;;  %v8182_v7 = vld [vmem:[#allocation9 + $0x3b8] sm:$0xff] }
 0xe01   : > { %7837 = vmatprep.subr.mxu1 %v7645_v0  ;;  %v7993_v0 = vld [vmem:[#allocation9 + $0x278] sm:$0xff] }
 0xe02   : > { %7838 = vmatpush1.msra.mxu1 %v7644_v14  ;;  %v8181_v14 = vld [vmem:[#allocation9 + $0x3b0] sm:$0xff] }
 0xe03   : > { %7839 = vmatprep.subr.mxu1 %v7643_v51  ;;  %v7992_v51 = vld [vmem:[#allocation9 + $0x270] sm:$0xff] }
 0xe04   : > { %7840 = vmatpush1.msra.mxu1 %v7642_v10  ;;  %v8180_v10 = vld [vmem:[#allocation9 + $0x3a8] sm:$0xff] }
 0xe05   : > { %7841 = vmatprep.subr.mxu1 %v7641_v29  ;;  %v7991_v29 = vld [vmem:[#allocation9 + $0x268] sm:$0xff] }
 0xe06   : > { %7842 = vmatpush1.msra.mxu1 %v7640_v32  ;;  %v8179_v32 = vld [vmem:[#allocation9 + $0x3a0] sm:$0xff] }
 0xe07   : > { %7843 = vmatprep.subr.mxu1 %v7639_v42  ;;  %v7990_v42 = vld [vmem:[#allocation9 + $0x260] sm:$0xff] }
 0xe08   : > { %7844 = vmatpush1.msra.mxu1 %v7638_v13  ;;  %v8178_v13 = vld [vmem:[#allocation9 + $0x398] sm:$0xff] }
 0xe09   : > { %7845 = vmatprep.subr.mxu1 %v7637_v27  ;;  %v7989_v27 = vld [vmem:[#allocation9 + $0x258] sm:$0xff] }
 0xe0a   : > { %7846 = vmatpush1.msra.mxu1 %v7636_v47  ;;  %v8177_v47 = vld [vmem:[#allocation9 + $0x390] sm:$0xff] }
 0xe0b   : > { %7847 = vmatprep.subr.mxu1 %v7635_v16  ;;  %v7988_v16 = vld [vmem:[#allocation9 + $0x250] sm:$0xff] }
 0xe0c   : > { %7848 = vmatpush1.msra.mxu1 %v7634_v15  ;;  %v8176_v15 = vld [vmem:[#allocation9 + $0x388] sm:$0xff] }
 0xe0d   : > { %7849 = vmatprep.subr.mxu1 %v7633_v20  ;;  %v7987_v20 = vld [vmem:[#allocation9 + $0x248] sm:$0xff] }
 0xe0e   : > { %7850 = vmatpush1.msra.mxu1 %v7632_v17  ;;  %v8175_v17 = vld [vmem:[#allocation9 + $0x380] sm:$0xff] }
 0xe0f   : > { %7851 = vmatprep.subr.mxu1 %v7631_v50  ;;  %v7986_v50 = vld [vmem:[#allocation9 + $0x240] sm:$0xff] }
 0xe10   : > { %7852 = vmatpush1.msra.mxu1 %v7630_v26  ;;  %v8174_v26 = vld [vmem:[#allocation9 + $0x378] sm:$0xff] }
 0xe11   : > { %7853 = vmatprep.subr.mxu1 %v7629_v30  ;;  %v7985_v30 = vld [vmem:[#allocation9 + $0x238] sm:$0xff] }
 0xe12   : > { %7854 = vmatpush1.msra.mxu1 %v7628_v21  ;;  %v8173_v21 = vld [vmem:[#allocation9 + $0x370] sm:$0xff] }
 0xe13   : > { %7855 = vmatprep.subr.mxu1 %v7627_v8  ;;  %v7984_v8 = vld [vmem:[#allocation9 + $0x230] sm:$0xff] }
 0xe14   : > { %7856 = vmatpush1.msra.mxu1 %v7626_v53  ;;  %v8172_v53 = vld [vmem:[#allocation9 + $0x368] sm:$0xff] }
 0xe15   : > { %7857 = vmatprep.subr.mxu1 %v7625_v19  ;;  %v7983_v19 = vld [vmem:[#allocation9 + $0x228] sm:$0xff] }
 0xe16   : > { %7858 = vmatpush1.msra.mxu1 %v7624_v33  ;;  %v8171_v33 = vld [vmem:[#allocation9 + $0x360] sm:$0xff] }
 0xe17   : > { %7859 = vmatprep.subr.mxu1 %v7623_v60  ;;  %v7982_v60 = vld [vmem:[#allocation9 + $0x220] sm:$0xff] }
 0xe18   : > { %7860 = vmatpush1.msra.mxu1 %v7622_v48  ;;  %v8170_v48 = vld [vmem:[#allocation9 + $0x358] sm:$0xff] }
 0xe19   : > { %7861 = vmatprep.subr.mxu1 %v7621_v39  ;;  %v8168_v39 = vld [vmem:[#allocation9 + $0x348] sm:$0xff] }
 0xe1a   : > { %7862 = vmatpush1.msra.mxu1 %v7620_v28  ;;  %v7981_v28 = vld [vmem:[#allocation9 + $0x218] sm:$0xff] }
 0xe1b   : > { %8010 = vmatprep.subr.mxu1 %v8009_v49  ;;  %v8165_v49 = vld [vmem:[#allocation9 + $0x330] sm:$0xff] }
 0xeb7   : > { %v7616_v43 = vpop.f32.mrf.mxu1 }
 0xeb8   : > { %7896 = vmatmul.mubr.f32.vlgmr.msra.gmra.mxu1 %v7616_v43  ;;  %v8164_v43 = vld [vmem:[#allocation9 + $0x328] sm:$0xff] }
 0xeb9   : > { %v13116_v18 = vpop.f32.mrf.mxu1  ;;  %8011 = vmatpush1.msra.mxu1 %v8008_v57  ;;  %8074 = vmatprep.mubr.f32.mxu1 %v13564_v3  ;;  %v7979_v57 = vld [vmem:[#allocation9 + $0x208] sm:$0xff] }
 0xeba   : > { %8012 = vmatprep.subr.mxu1 %v8007_v44  ;;  %v7978_v44 = vld [vmem:[#allocation9 + $0x200] sm:$0xff]  ;;  %v8162_v18 = vld [vmem:[#allocation9 + $0x318] sm:$0xff] }
 0xebb   : > { %v7723_v9 = vpop.f32.mrf.mxu1  ;;  %8013 = vmatpush1.msra.mxu1 %v8006_v2  ;;  %v8163_v2 = vld [vmem:[#allocation9 + $0x320] sm:$0xff] }
 0xebc   : > { %7825 = vmatmul.mubr.f32.vlgmr.msra.gmra.mxu0 %v7723_v9  ;;  %8014 = vmatprep.subr.mxu1 %v8005_v41  ;;  %v8161_v41 = vld [vmem:[#allocation9 + $0x310] sm:$0xff]  ;;  %v8160_v9 = vld [vmem:[#allocation9 + $0x308] sm:$0xff] }
 0xebd   : > { %13125 = vmatpush3.msra.mxu0 %v15385_v63  ;;  %13128 = vmatprep.mubr.msk.f32.mxu0 %vm13565_vm3, %v13564_v3  ;;  %v13123_v31 = vpop.f32.mrf.mxu1 }
 0xebe   : > { %13126 = vmatprep.subr.mxu0 %v13564_v3  ;;  %8015 = vmatpush1.msra.mxu1 %v8004_v46  ;;  %v8159_v46 = vld [vmem:[#allocation9 + $0x300] sm:$0xff] }
 0xebf   : > { %13127 = vmatpush3.msra.mxu0 %v15387_v1  ;;  %8016 = vmatprep.subr.mxu1 %v8003_v5 }
 0xec0   : > { %13131 = vmatprep.subr.mxu0 %v13564_v3  ;;  %13129 = vmatmul.mubr.msk.f32.vlgmr.msra.gmra.mxu0 %vm7546_vm4, %v7903_v12 }
 0xec1   : > { %13132 = vmatpush3.msra.mxu0 %v15385_v63  ;;  %13135 = vmatprep.mubr.msk.f32.mxu0 %vm13565_vm3, %v13564_v3 }
 0xec2   : > { %13133 = vmatprep.subr.mxu0 %v13564_v3  ;;  %8017 = vmatpush1.msra.mxu1 %v8002_v59 }
 0xec3   : > { %13134 = vmatpush3.msra.mxu0 %v15387_v1  ;;  %8018 = vmatprep.subr.mxu1 %v8001_v11 }
 0xec4   : > { %13136 = vmatmul.mubr.msk.f32.vlgmr.msra.gmra.mxu0 %vm7546_vm4, %v8084_v37  ;;  %8191 = vmatprep.subr.mxu0 %v8190_v40  ;;  %v8265_v40 = vld [vmem:[#allocation7 + $0x10] sm:$0xf] }
 0xec5   : > { %8192 = vmatpush1.msra.mxu0 %v8189_v62  ;;  %8019 = vmatpush1.msra.mxu1 %v8000_v6  ;;  %v8371_v6 = vld [vmem:[#allocation9 + $0x4f8] sm:$0xff] }
 0xec6   : > { %8193 = vmatprep.subr.mxu0 %v8188_v22  ;;  %8020 = vmatprep.subr.mxu1 %v7999_v23  ;;  %v8370_v22 = vld [vmem:[#allocation9 + $0x4f0] sm:$0xff] }
 0xec7   : > { %8194 = vmatpush1.msra.mxu0 %v8187_v36  ;;  %8021 = vmatpush1.msra.mxu1 %v7998_v45  ;;  %v8446_v23 = vld [vmem:[#allocation7 + $0x14] sm:$0xf]  ;;  %v8369_v45 = vld [vmem:[#allocation9 + $0x4e8] sm:$0xff] }
 0xec8   : > { %8195 = vmatprep.subr.mxu0 %v8186_v56  ;;  %8022 = vmatprep.subr.mxu1 %v7997_v24  ;;  %v8368_v56 = vld [vmem:[#allocation9 + $0x4e0] sm:$0xff]  ;;  %v8552_v24 = vld [vmem:[#allocation9 + $0x5f8] sm:$0xff] }
 0xec9   : > { %8196 = vmatpush1.msra.mxu0 %v8185_v54  ;;  %8023 = vmatpush1.msra.mxu1 %v7996_v25  ;;  %v8367_v54 = vld [vmem:[#allocation9 + $0x4d8] sm:$0xff]  ;;  %v8551_v25 = vld [vmem:[#allocation9 + $0x5f0] sm:$0xff] }
 0xeca   : > { %8197 = vmatprep.subr.mxu0 %v8184_v55  ;;  %8024 = vmatprep.subr.mxu1 %v7995_v58  ;;  %v8366_v55 = vld [vmem:[#allocation9 + $0x4d0] sm:$0xff]  ;;  %v8550_v58 = vld [vmem:[#allocation9 + $0x5e8] sm:$0xff] }
 0xecb   : > { %8198 = vmatpush1.msra.mxu0 %v8183_v61  ;;  %8025 = vmatpush1.msra.mxu1 %v7994_v4  ;;  %v8365_v61 = vld [vmem:[#allocation9 + $0x4c8] sm:$0xff]  ;;  %v8549_v4 = vld [vmem:[#allocation9 + $0x5e0] sm:$0xff] }
 0xecc   : > { %8199 = vmatprep.subr.mxu0 %v8182_v7  ;;  %8026 = vmatprep.subr.mxu1 %v7993_v0  ;;  %v8364_v7 = vld [vmem:[#allocation9 + $0x4c0] sm:$0xff]  ;;  %v8548_v0 = vld [vmem:[#allocation9 + $0x5d8] sm:$0xff] }
 0xecd   : > { %8200 = vmatpush1.msra.mxu0 %v8181_v14  ;;  %8027 = vmatpush1.msra.mxu1 %v7992_v51  ;;  %v8363_v14 = vld [vmem:[#allocation9 + $0x4b8] sm:$0xff]  ;;  %v8547_v51 = vld [vmem:[#allocation9 + $0x5d0] sm:$0xff] }
 0xece   : > { %8201 = vmatprep.subr.mxu0 %v8180_v10  ;;  %8028 = vmatprep.subr.mxu1 %v7991_v29  ;;  %v8362_v10 = vld [vmem:[#allocation9 + $0x4b0] sm:$0xff]  ;;  %v8546_v29 = vld [vmem:[#allocation9 + $0x5c8] sm:$0xff] }
 0xecf   : > { %8202 = vmatpush1.msra.mxu0 %v8179_v32  ;;  %8029 = vmatpush1.msra.mxu1 %v7990_v42  ;;  %v8361_v32 = vld [vmem:[#allocation9 + $0x4a8] sm:$0xff]  ;;  %v8545_v42 = vld [vmem:[#allocation9 + $0x5c0] sm:$0xff] }
 0xed0   : > { %8203 = vmatprep.subr.mxu0 %v8178_v13  ;;  %8030 = vmatprep.subr.mxu1 %v7989_v27  ;;  %v8360_v13 = vld [vmem:[#allocation9 + $0x4a0] sm:$0xff]  ;;  %v8544_v27 = vld [vmem:[#allocation9 + $0x5b8] sm:$0xff] }
 0xed1   : > { %8204 = vmatpush1.msra.mxu0 %v8177_v47  ;;  %8031 = vmatpush1.msra.mxu1 %v7988_v16  ;;  %v8359_v47 = vld [vmem:[#allocation9 + $0x498] sm:$0xff]  ;;  %v8543_v16 = vld [vmem:[#allocation9 + $0x5b0] sm:$0xff] }
 0xed2   : > { %8205 = vmatprep.subr.mxu0 %v8176_v15  ;;  %8032 = vmatprep.subr.mxu1 %v7987_v20  ;;  %v8358_v15 = vld [vmem:[#allocation9 + $0x490] sm:$0xff]  ;;  %v8542_v20 = vld [vmem:[#allocation9 + $0x5a8] sm:$0xff] }
 0xed3   : > { %8206 = vmatpush1.msra.mxu0 %v8175_v17  ;;  %8033 = vmatpush1.msra.mxu1 %v7986_v50  ;;  %v8357_v17 = vld [vmem:[#allocation9 + $0x488] sm:$0xff]  ;;  %v8541_v50 = vld [vmem:[#allocation9 + $0x5a0] sm:$0xff] }
 0xed4   : > { %8207 = vmatprep.subr.mxu0 %v8174_v26  ;;  %8034 = vmatprep.subr.mxu1 %v7985_v30  ;;  %v8356_v26 = vld [vmem:[#allocation9 + $0x480] sm:$0xff]  ;;  %v8540_v30 = vld [vmem:[#allocation9 + $0x598] sm:$0xff] }
 0xed5   : > { %8208 = vmatpush1.msra.mxu0 %v8173_v21  ;;  %8035 = vmatpush1.msra.mxu1 %v7984_v8  ;;  %v8355_v21 = vld [vmem:[#allocation9 + $0x478] sm:$0xff]  ;;  %v8539_v8 = vld [vmem:[#allocation9 + $0x590] sm:$0xff] }
 0xed6   : > { %8209 = vmatprep.subr.mxu0 %v8172_v53  ;;  %8036 = vmatprep.subr.mxu1 %v7983_v19  ;;  %v8354_v53 = vld [vmem:[#allocation9 + $0x470] sm:$0xff]  ;;  %v8538_v19 = vld [vmem:[#allocation9 + $0x588] sm:$0xff] }
 0xed7   : > { %8210 = vmatpush1.msra.mxu0 %v8171_v33  ;;  %8037 = vmatpush1.msra.mxu1 %v7982_v60  ;;  %v8353_v33 = vld [vmem:[#allocation9 + $0x468] sm:$0xff]  ;;  %v8537_v60 = vld [vmem:[#allocation9 + $0x580] sm:$0xff] }
 0xed8   : > { %8211 = vmatprep.subr.mxu0 %v8170_v48  ;;  %8255 = vmatprep.mubr.f32.mxu0 %v13564_v3  ;;  %v8352_v48 = vld [vmem:[#allocation9 + $0x460] sm:$0xff] }
 0xed9   : > { %8212 = vmatpush1.msra.mxu0 %v8169_v38  ;;  %8038 = vmatprep.subr.mxu1 %v7981_v28  ;;  %v8536_v38 = vld [vmem:[#allocation9 + $0x578] sm:$0xff]  ;;  %v8350_v28 = vld [vmem:[#allocation9 + $0x450] sm:$0xff] }
 0xeda   : > { %8213 = vmatprep.subr.mxu0 %v8168_v39  ;;  %8039 = vmatpush1.msra.mxu1 %v7980_v34  ;;  %v8351_v39 = vld [vmem:[#allocation9 + $0x458] sm:$0xff]  ;;  %v8349_v34 = vld [vmem:[#allocation9 + $0x448] sm:$0xff] }
 0xedb   : > { %8214 = vmatpush1.msra.mxu0 %v8167_v35  ;;  %8040 = vmatprep.subr.mxu1 %v7979_v57  ;;  %v8535_v35 = vld [vmem:[#allocation9 + $0x570] sm:$0xff]  ;;  %v8348_v57 = vld [vmem:[#allocation9 + $0x440] sm:$0xff] }
 0xedc   : > { %8215 = vmatprep.subr.mxu0 %v8166_v52  ;;  %8041 = vmatpush1.msra.mxu1 %v7978_v44  ;;  %v8534_v52 = vld [vmem:[#allocation9 + $0x568] sm:$0xff]  ;;  %v8347_v44 = vld [vmem:[#allocation9 + $0x438] sm:$0xff] }
 0xedd   : > { %8216 = vmatpush1.msra.mxu0 %v8165_v49  ;;  %13138 = vmatprep.subr.mxu1 %v13564_v3  ;;  %v8533_v49 = vld [vmem:[#allocation9 + $0x560] sm:$0xff] }
 0xede   : > { %8217 = vmatprep.subr.mxu0 %v8164_v43  ;;  %v8532_v43 = vld [vmem:[#allocation9 + $0x558] sm:$0xff] }
 0xedf   : > { %8218 = vmatpush1.msra.mxu0 %v8163_v2  ;;  %v8531_v2 = vld [vmem:[#allocation9 + $0x550] sm:$0xff] }
 0xee0   : > { %8219 = vmatprep.subr.mxu0 %v8162_v18  ;;  %v8346_v18 = vld [vmem:[#allocation9 + $0x430] sm:$0xff] }
 0xee1   : > { %8220 = vmatpush1.msra.mxu0 %v8161_v41  ;;  %v8530_v41 = vld [vmem:[#allocation9 + $0x548] sm:$0xff] }
 0xee2   : > { %8221 = vmatprep.subr.mxu0 %v8160_v9  ;;  %v8345_v9 = vld [vmem:[#allocation9 + $0x428] sm:$0xff] }
 0xee3   : > { %8222 = vmatpush1.msra.mxu0 %v8159_v46  ;;  %v8529_v46 = vld [vmem:[#allocation9 + $0x540] sm:$0xff] }
 0xee4   : > { %13145 = vmatprep.subr.mxu0 %v13564_v3 }
 0xf78   : > { %v7897_v12 = vpop.f32.mrf.mxu1 }
 0xf7c   : > { %v7826_v5 = vpop.f32.mrf.mxu0 }
 0xf7d   : > { %v15419_v31 = vadd.f32 %v7897_v12, %v7826_v5  ;;  %v8344_v5 = vld [vmem:[#allocation9 + $0x420] sm:$0xff]  ;;  %v8343_v12 = vld [vmem:[#allocation9 + $0x418] sm:$0xff] }
 0xf7e   : > { %v15421_v59 = vpop.f32.mrf.mxu0 }
 0xf80   : > { %v7973_v11 = vpop.f32.mrf.mxu0 }
 0xf81   : > { %8075 = vmatmul.mubr.f32.vlgmr.msra.gmra.mxu1 %v7973_v11  ;;  %v8528_v11 = vld [vmem:[#allocation9 + $0x538] sm:$0xff] }
 0xf82   : > { %13139 = vmatpush3.msra.mxu1 %v15385_v63  ;;  %v13130_v37 = vpop.f32.mrf.mxu0  ;;  %13142 = vmatprep.mubr.msk.f32.mxu1 %vm13565_vm3, %v13564_v3 }
 0xf83   : > { %13140 = vmatprep.subr.mxu1 %v13564_v3  ;;  %v8342_v37 = vld [vmem:[#allocation9 + $0x410] sm:$0xff] }
 0xf84   : > { %13141 = vmatpush3.msra.mxu1 %v15387_v1  ;;  %v8154_v62 = vpop.f32.mrf.mxu0 }
 0xf85   : > { %8256 = vmatmul.mubr.f32.vlgmr.msra.gmra.mxu0 %v8154_v62  ;;  %13143 = vmatmul.mubr.msk.f32.vlgmr.msra.gmra.mxu1 %vm7546_vm4, %v8265_v40  ;;  %v8527_v40 = vld [vmem:[#allocation9 + $0x530] sm:$0xff]  ;;  %v8341_v62 = vld [vmem:[#allocation9 + $0x408] sm:$0xff] }
 0xf86   : > { %13146 = vmatpush3.msra.mxu0 %v15385_v63  ;;  %13149 = vmatprep.mubr.msk.f32.mxu0 %vm13565_vm3, %v13564_v3  ;;  %v13137_v36 = vpop.f32.mrf.mxu0 }
 0xf87   : > { %13147 = vmatprep.subr.mxu0 %v13564_v3  ;;  %8372 = vmatprep.subr.mxu1 %v8371_v6  ;;  %v8526_v6 = vld [vmem:[#allocation9 + $0x528] sm:$0xff]  ;;  %v8524_v36 = vld [vmem:[#allocation9 + $0x518] sm:$0xff] }
 0xf88   : > { %13148 = vmatpush3.msra.mxu0 %v15387_v1  ;;  %8373 = vmatpush1.msra.mxu1 %v8370_v22  ;;  %v8340_v22 = vld [vmem:[#allocation9 + $0x400] sm:$0xff] }
 0xf89   : > { %13150 = vmatmul.mubr.msk.f32.vlgmr.msra.gmra.mxu0 %vm7546_vm4, %v8446_v23  ;;  %8374 = vmatprep.subr.mxu1 %v8369_v45  ;;  %v8525_v23 = vld [vmem:[#allocation9 + $0x520] sm:$0xff]  ;;  %v8523_v45 = vld [vmem:[#allocation9 + $0x510] sm:$0xff] }
 0xf8a   : > { %8375 = vmatpush1.msra.mxu1 %v8368_v56  ;;  %8553 = vmatprep.subr.mxu0 %v8552_v24  ;;  %v8522_v56 = vld [vmem:[#allocation9 + $0x508] sm:$0xff]  ;;  %v8521_v24 = vld [vmem:[#allocation9 + $0x500] sm:$0xff] }
 0xf8b   : > { %8376 = vmatprep.subr.mxu1 %v8367_v54  ;;  %8554 = vmatpush1.msra.mxu0 %v8551_v25  ;;  %v7899_v54 = vpop.f32.mrf.mxu1 }
 0xf8c   : > { %8377 = vmatpush1.msra.mxu1 %v8366_v55  ;;  %8555 = vmatprep.subr.mxu0 %v8550_v58  ;;  %v7900_v55 = vadd.f32 %v7899_v54, %v15421_v59  ;;  %v8733_v59 = vld [vmem:[#allocation9 + $0x6f8] sm:$0xff] }
 0xf8d   : > { %8378 = vmatprep.subr.mxu1 %v8365_v61  ;;  %8556 = vmatpush1.msra.mxu0 %v8549_v4  ;;  %v8709_v54 = vld [vmem:[#allocation9 + $0x638] sm:$0xff] }
 0xf8e   : > { %8379 = vmatpush1.msra.mxu1 %v8364_v7  ;;  %8557 = vmatprep.subr.mxu0 %v8548_v0 }
 0xf8f   : > { %8380 = vmatprep.subr.mxu1 %v8363_v14  ;;  %8558 = vmatpush1.msra.mxu0 %v8547_v51 }
 0xf90   : > { %8381 = vmatpush1.msra.mxu1 %v8362_v10  ;;  %8559 = vmatprep.subr.mxu0 %v8546_v29  ;;  %v8627_v10 = vld [vmem:[#allocation7 + $0x18] sm:$0xf] }
 0xf91   : > { %8382 = vmatprep.subr.mxu1 %v8361_v32  ;;  %8560 = vmatpush1.msra.mxu0 %v8545_v42  ;;  %v8732_v42 = vld [vmem:[#allocation9 + $0x6f0] sm:$0xff] }
 0xf92   : > { %8383 = vmatpush1.msra.mxu1 %v8360_v13  ;;  %8561 = vmatprep.subr.mxu0 %v8544_v27  ;;  %v8808_v13 = vld [vmem:[#allocation7 + $0x1c] sm:$0xf] }
 0xf93   : > { %8384 = vmatprep.subr.mxu1 %v8359_v47  ;;  %8562 = vmatpush1.msra.mxu0 %v8543_v16  ;;  %v8731_v47 = vld [vmem:[#allocation9 + $0x6e8] sm:$0xff]  ;;  %v8730_v16 = vld [vmem:[#allocation9 + $0x6e0] sm:$0xff] }
 0xf94   : > { %8385 = vmatpush1.msra.mxu1 %v8358_v15  ;;  %8563 = vmatprep.subr.mxu0 %v8542_v20  ;;  %v8914_v15 = vld [vmem:[#allocation9 + $0x7f8] sm:$0xff] }
 0xf95   : > { %8386 = vmatprep.subr.mxu1 %v8357_v17  ;;  %8564 = vmatpush1.msra.mxu0 %v8541_v50  ;;  %v8729_v20 = vld [vmem:[#allocation9 + $0x6d8] sm:$0xff]  ;;  %v8913_v17 = vld [vmem:[#allocation9 + $0x7f0] sm:$0xff] }
 0xf96   : > { %8387 = vmatpush1.msra.mxu1 %v8356_v26  ;;  %8565 = vmatprep.subr.mxu0 %v8540_v30  ;;  %v8728_v50 = vld [vmem:[#allocation9 + $0x6d0] sm:$0xff]  ;;  %v8912_v26 = vld [vmem:[#allocation9 + $0x7e8] sm:$0xff] }
 0xf97   : > { %8388 = vmatprep.subr.mxu1 %v8355_v21  ;;  %8566 = vmatpush1.msra.mxu0 %v8539_v8  ;;  %v8727_v30 = vld [vmem:[#allocation9 + $0x6c8] sm:$0xff]  ;;  %v8911_v21 = vld [vmem:[#allocation9 + $0x7e0] sm:$0xff] }
 0xf98   : > { %8389 = vmatpush1.msra.mxu1 %v8354_v53  ;;  %8567 = vmatprep.subr.mxu0 %v8538_v19  ;;  %v8726_v8 = vld [vmem:[#allocation9 + $0x6c0] sm:$0xff]  ;;  %v8910_v53 = vld [vmem:[#allocation9 + $0x7d8] sm:$0xff] }
 0xf99   : > { %8390 = vmatprep.subr.mxu1 %v8353_v33  ;;  %8568 = vmatpush1.msra.mxu0 %v8537_v60  ;;  %v8725_v19 = vld [vmem:[#allocation9 + $0x6b8] sm:$0xff]  ;;  %v8909_v33 = vld [vmem:[#allocation9 + $0x7d0] sm:$0xff] }
 0xf9a   : > { %8391 = vmatpush1.msra.mxu1 %v8352_v48  ;;  %8569 = vmatprep.subr.mxu0 %v8536_v38  ;;  %v8724_v60 = vld [vmem:[#allocation9 + $0x6b0] sm:$0xff]  ;;  %v8908_v48 = vld [vmem:[#allocation9 + $0x7c8] sm:$0xff] }
 0xf9b   : > { %8392 = vmatprep.subr.mxu1 %v8351_v39  ;;  %8570 = vmatpush1.msra.mxu0 %v8535_v35  ;;  %v8723_v38 = vld [vmem:[#allocation9 + $0x6a8] sm:$0xff]  ;;  %v8907_v39 = vld [vmem:[#allocation9 + $0x7c0] sm:$0xff] }
 0xf9c   : > { %8393 = vmatpush1.msra.mxu1 %v8350_v28  ;;  %8571 = vmatprep.subr.mxu0 %v8534_v52  ;;  %v8722_v35 = vld [vmem:[#allocation9 + $0x6a0] sm:$0xff]  ;;  %v8906_v28 = vld [vmem:[#allocation9 + $0x7b8] sm:$0xff] }
 0xf9d   : > { %8394 = vmatprep.subr.mxu1 %v8349_v34  ;;  %8572 = vmatpush1.msra.mxu0 %v8533_v49  ;;  %v8721_v52 = vld [vmem:[#allocation9 + $0x698] sm:$0xff]  ;;  %v8905_v34 = vld [vmem:[#allocation9 + $0x7b0] sm:$0xff] }
 0xf9e   : > { %8395 = vmatpush1.msra.mxu1 %v8348_v57  ;;  %8573 = vmatprep.subr.mxu0 %v8532_v43  ;;  %v8720_v49 = vld [vmem:[#allocation9 + $0x690] sm:$0xff]  ;;  %v8904_v57 = vld [vmem:[#allocation9 + $0x7a8] sm:$0xff] }
 0xf9f   : > { %8396 = vmatprep.subr.mxu1 %v8347_v44  ;;  %8574 = vmatpush1.msra.mxu0 %v8531_v2  ;;  %v8719_v43 = vld [vmem:[#allocation9 + $0x688] sm:$0xff]  ;;  %v8903_v44 = vld [vmem:[#allocation9 + $0x7a0] sm:$0xff] }
 0xfa0   : > { %8397 = vmatpush1.msra.mxu1 %v8346_v18  ;;  %8575 = vmatprep.subr.mxu0 %v8530_v41  ;;  %v8718_v2 = vld [vmem:[#allocation9 + $0x680] sm:$0xff]  ;;  %v8902_v18 = vld [vmem:[#allocation9 + $0x798] sm:$0xff] }
 0xfa1   : > { %8398 = vmatprep.subr.mxu1 %v8345_v9  ;;  %8576 = vmatpush1.msra.mxu0 %v8529_v46  ;;  %v8717_v41 = vld [vmem:[#allocation9 + $0x678] sm:$0xff]  ;;  %v8901_v9 = vld [vmem:[#allocation9 + $0x790] sm:$0xff] }
 0xfa2   : > { %8399 = vmatpush1.msra.mxu1 %v8344_v5  ;;  %8436 = vmatprep.mubr.f32.mxu1 %v13564_v3  ;;  %v8716_v46 = vld [vmem:[#allocation9 + $0x670] sm:$0xff]  ;;  %v8900_v5 = vld [vmem:[#allocation9 + $0x788] sm:$0xff] }
 0xfa3   : > { %8617 = vmatprep.mubr.f32.mxu0 %v13564_v3  ;;  %8400 = vmatprep.subr.mxu1 %v8343_v12  ;;  %v8715_v12 = vld [vmem:[#allocation9 + $0x668] sm:$0xff] }
 0xfa4   : > { %8577 = vmatprep.subr.mxu0 %v8528_v11  ;;  %8401 = vmatpush1.msra.mxu1 %v8342_v37  ;;  %v8899_v11 = vld [vmem:[#allocation9 + $0x780] sm:$0xff] }
 0xfa5   : > { %8578 = vmatpush1.msra.mxu0 %v8527_v40  ;;  %8402 = vmatprep.subr.mxu1 %v8341_v62  ;;  %v8714_v37 = vld [vmem:[#allocation9 + $0x660] sm:$0xff]  ;;  %v8898_v40 = vld [vmem:[#allocation9 + $0x778] sm:$0xff] }
 0xfa6   : > { %8579 = vmatprep.subr.mxu0 %v8526_v6  ;;  %8403 = vmatpush1.msra.mxu1 %v8340_v22  ;;  %v8713_v62 = vld [vmem:[#allocation9 + $0x658] sm:$0xff]  ;;  %v8897_v6 = vld [vmem:[#allocation9 + $0x770] sm:$0xff] }
 0xfa7   : > { %8580 = vmatpush1.msra.mxu0 %v8525_v23  ;;  %13152 = vmatprep.subr.mxu1 %v13564_v3  ;;  %v8712_v22 = vld [vmem:[#allocation9 + $0x650] sm:$0xff]  ;;  %v8896_v23 = vld [vmem:[#allocation9 + $0x768] sm:$0xff] }
 0xfa8   : > { %8581 = vmatprep.subr.mxu0 %v8524_v36  ;;  %v8711_v36 = vld [vmem:[#allocation9 + $0x648] sm:$0xff] }
 0xfa9   : > { %8582 = vmatpush1.msra.mxu0 %v8523_v45  ;;  %v8895_v45 = vld [vmem:[#allocation9 + $0x760] sm:$0xff] }
 0xfaa   : > { %8583 = vmatprep.subr.mxu0 %v8522_v56  ;;  %v8710_v56 = vld [vmem:[#allocation9 + $0x640] sm:$0xff] }
 0xfab   : > { %8584 = vmatpush1.msra.mxu0 %v8521_v24  ;;  %v8894_v24 = vld [vmem:[#allocation9 + $0x758] sm:$0xff] }
 0xfac   : > { %13159 = vmatprep.subr.mxu0 %v13564_v3 }
0x1041   : > { %v8076_v25 = vpop.f32.mrf.mxu1 }
0x1042   : > { %v8081_v58 = vadd.f32 %v8076_v25, %v15419_v31  ;;  %v8893_v25 = vld [vmem:[#allocation9 + $0x750] sm:$0xff] }
0x1043   : > { %v8078_v61 = vpop.f32.mrf.mxu1 }
0x1044   : > { %v8082_v4 = vadd.f32 %v8078_v61, %v7900_v55  ;;  %v8708_v55 = vld [vmem:[#allocation9 + $0x630] sm:$0xff]  ;;  %v8707_v61 = vld [vmem:[#allocation9 + $0x628] sm:$0xff] }
0x1045   : > { %v8257_v7 = vpop.f32.mrf.mxu0  ;;  %v8335_v0 = vpop.f32.mrf.mxu1 }
0x1046   : > { %v15441_v14 = vadd.f32 %v8257_v7, %v8081_v58  ;;  %8437 = vmatmul.mubr.f32.vlgmr.msra.gmra.mxu1 %v8335_v0  ;;  %v8892_v58 = vld [vmem:[#allocation9 + $0x748] sm:$0xff]  ;;  %v8706_v7 = vld [vmem:[#allocation9 + $0x620] sm:$0xff]  ;;  %v8705_v0 = vld [vmem:[#allocation9 + $0x618] sm:$0xff] }
0x1047   : > { %13153 = vmatpush3.msra.mxu1 %v15385_v63  ;;  %v8259_v51 = vpop.f32.mrf.mxu0  ;;  %13156 = vmatprep.mubr.msk.f32.mxu1 %vm13565_vm3, %v13564_v3  ;;  %v13144_v29 = vpop.f32.mrf.mxu1 }
0x1048   : > { %v15446_v32 = vadd.f32 %v8259_v51, %v8082_v4  ;;  %13154 = vmatprep.subr.mxu1 %v13564_v3  ;;  %v8891_v4 = vld [vmem:[#allocation9 + $0x740] sm:$0xff]  ;;  %v8890_v51 = vld [vmem:[#allocation9 + $0x738] sm:$0xff]  ;;  %v8889_v29 = vld [vmem:[#allocation9 + $0x730] sm:$0xff] }
0x1049   : > { %13155 = vmatpush3.msra.mxu1 %v15387_v1  ;;  %v8516_v31 = vpop.f32.mrf.mxu0 }
0x104a   : > { %8618 = vmatmul.mubr.f32.vlgmr.msra.gmra.mxu0 %v8516_v31  ;;  %13157 = vmatmul.mubr.msk.f32.vlgmr.msra.gmra.mxu1 %vm7546_vm4, %v8627_v10  ;;  %v8704_v10 = vld [vmem:[#allocation9 + $0x610] sm:$0xff]  ;;  %v8703_v31 = vld [vmem:[#allocation9 + $0x608] sm:$0xff] }
0x104b   : > { %13160 = vmatpush3.msra.mxu0 %v15385_v63  ;;  %13163 = vmatprep.mubr.msk.f32.mxu0 %vm13565_vm3, %v13564_v3  ;;  %v13151_v27 = vpop.f32.mrf.mxu0 }
0x104c   : > { %13161 = vmatprep.subr.mxu0 %v13564_v3  ;;  %8734 = vmatprep.subr.mxu1 %v8733_v59  ;;  %v8888_v59 = vld [vmem:[#allocation9 + $0x728] sm:$0xff]  ;;  %v8886_v27 = vld [vmem:[#allocation9 + $0x718] sm:$0xff] }
0x104d   : > { %13162 = vmatpush3.msra.mxu0 %v15387_v1  ;;  %8735 = vmatpush1.msra.mxu1 %v8732_v42  ;;  %v8702_v42 = vld [vmem:[#allocation9 + $0x600] sm:$0xff] }
0x104e   : > { %13164 = vmatmul.mubr.msk.f32.vlgmr.msra.gmra.mxu0 %vm7546_vm4, %v8808_v13  ;;  %8736 = vmatprep.subr.mxu1 %v8731_v47  ;;  %v8887_v13 = vld [vmem:[#allocation9 + $0x720] sm:$0xff]  ;;  %v8885_v47 = vld [vmem:[#allocation9 + $0x710] sm:$0xff] }
0x104f   : > { %8737 = vmatpush1.msra.mxu1 %v8730_v16  ;;  %8915 = vmatprep.subr.mxu0 %v8914_v15  ;;  %v8884_v16 = vld [vmem:[#allocation9 + $0x708] sm:$0xff]  ;;  %v8883_v15 = vld [vmem:[#allocation9 + $0x700] sm:$0xff] }
0x1050   : > { %8738 = vmatprep.subr.mxu1 %v8729_v20  ;;  %8916 = vmatpush1.msra.mxu0 %v8913_v17 }
0x1051   : > { %8739 = vmatpush1.msra.mxu1 %v8728_v50  ;;  %8917 = vmatprep.subr.mxu0 %v8912_v26 }
0x1052   : > { %8740 = vmatprep.subr.mxu1 %v8727_v30  ;;  %8918 = vmatpush1.msra.mxu0 %v8911_v21 }
0x1053   : > { %8741 = vmatpush1.msra.mxu1 %v8726_v8  ;;  %8919 = vmatprep.subr.mxu0 %v8910_v53 }
0x1054   : > { %8742 = vmatprep.subr.mxu1 %v8725_v19  ;;  %8920 = vmatpush1.msra.mxu0 %v8909_v33  ;;  %v8989_v19 = vld [vmem:[#allocation7 + $0x20] sm:$0xf] }
0x1055   : > { %8743 = vmatpush1.msra.mxu1 %v8724_v60  ;;  %8921 = vmatprep.subr.mxu0 %v8908_v48  ;;  %v9094_v48 = vld [vmem:[#allocation9 + $0x8f0] sm:$0xff] }
0x1056   : > { %8744 = vmatprep.subr.mxu1 %v8723_v38  ;;  %8922 = vmatpush1.msra.mxu0 %v8907_v39  ;;  %v9170_v38 = vld [vmem:[#allocation7 + $0x24] sm:$0xf] }
0x1057   : > { %8745 = vmatpush1.msra.mxu1 %v8722_v35  ;;  %8923 = vmatprep.subr.mxu0 %v8906_v28  ;;  %v9093_v35 = vld [vmem:[#allocation9 + $0x8e8] sm:$0xff]  ;;  %v9092_v28 = vld [vmem:[#allocation9 + $0x8e0] sm:$0xff] }
0x1058   : > { %8746 = vmatprep.subr.mxu1 %v8721_v52  ;;  %8924 = vmatpush1.msra.mxu0 %v8905_v34  ;;  %v9276_v52 = vld [vmem:[#allocation9 + $0x9f8] sm:$0xff] }
0x1059   : > { %8747 = vmatpush1.msra.mxu1 %v8720_v49  ;;  %8925 = vmatprep.subr.mxu0 %v8904_v57  ;;  %v9091_v34 = vld [vmem:[#allocation9 + $0x8d8] sm:$0xff]  ;;  %v9275_v49 = vld [vmem:[#allocation9 + $0x9f0] sm:$0xff] }
0x105a   : > { %8748 = vmatprep.subr.mxu1 %v8719_v43  ;;  %8926 = vmatpush1.msra.mxu0 %v8903_v44  ;;  %v9090_v57 = vld [vmem:[#allocation9 + $0x8d0] sm:$0xff]  ;;  %v9274_v43 = vld [vmem:[#allocation9 + $0x9e8] sm:$0xff] }
0x105b   : > { %8749 = vmatpush1.msra.mxu1 %v8718_v2  ;;  %8927 = vmatprep.subr.mxu0 %v8902_v18  ;;  %v9089_v44 = vld [vmem:[#allocation9 + $0x8c8] sm:$0xff]  ;;  %v9273_v2 = vld [vmem:[#allocation9 + $0x9e0] sm:$0xff] }
0x105c   : > { %8750 = vmatprep.subr.mxu1 %v8717_v41  ;;  %8928 = vmatpush1.msra.mxu0 %v8901_v9  ;;  %v9088_v18 = vld [vmem:[#allocation9 + $0x8c0] sm:$0xff]  ;;  %v9272_v41 = vld [vmem:[#allocation9 + $0x9d8] sm:$0xff] }
0x105d   : > { %8751 = vmatpush1.msra.mxu1 %v8716_v46  ;;  %8929 = vmatprep.subr.mxu0 %v8900_v5  ;;  %v9087_v9 = vld [vmem:[#allocation9 + $0x8b8] sm:$0xff]  ;;  %v9271_v46 = vld [vmem:[#allocation9 + $0x9d0] sm:$0xff] }
0x105e   : > { %8752 = vmatprep.subr.mxu1 %v8715_v12  ;;  %8930 = vmatpush1.msra.mxu0 %v8899_v11  ;;  %v9086_v5 = vld [vmem:[#allocation9 + $0x8b0] sm:$0xff]  ;;  %v9270_v12 = vld [vmem:[#allocation9 + $0x9c8] sm:$0xff] }
0x105f   : > { %8753 = vmatpush1.msra.mxu1 %v8714_v37  ;;  %8931 = vmatprep.subr.mxu0 %v8898_v40  ;;  %v9085_v11 = vld [vmem:[#allocation9 + $0x8a8] sm:$0xff]  ;;  %v9269_v37 = vld [vmem:[#allocation9 + $0x9c0] sm:$0xff] }
0x1060   : > { %8754 = vmatprep.subr.mxu1 %v8713_v62  ;;  %8932 = vmatpush1.msra.mxu0 %v8897_v6  ;;  %v9084_v40 = vld [vmem:[#allocation9 + $0x8a0] sm:$0xff]  ;;  %v9268_v62 = vld [vmem:[#allocation9 + $0x9b8] sm:$0xff] }
0x1061   : > { %8755 = vmatpush1.msra.mxu1 %v8712_v22  ;;  %8933 = vmatprep.subr.mxu0 %v8896_v23  ;;  %v9083_v6 = vld [vmem:[#allocation9 + $0x898] sm:$0xff]  ;;  %v9267_v22 = vld [vmem:[#allocation9 + $0x9b0] sm:$0xff] }
0x1062   : > { %8756 = vmatprep.subr.mxu1 %v8711_v36  ;;  %8934 = vmatpush1.msra.mxu0 %v8895_v45  ;;  %v9082_v23 = vld [vmem:[#allocation9 + $0x890] sm:$0xff]  ;;  %v9266_v36 = vld [vmem:[#allocation9 + $0x9a8] sm:$0xff] }
0x1063   : > { %8757 = vmatpush1.msra.mxu1 %v8710_v56  ;;  %8935 = vmatprep.subr.mxu0 %v8894_v24  ;;  %v9081_v45 = vld [vmem:[#allocation9 + $0x888] sm:$0xff]  ;;  %v9265_v56 = vld [vmem:[#allocation9 + $0x9a0] sm:$0xff] }
0x1064   : > { %8758 = vmatprep.subr.mxu1 %v8709_v54  ;;  %8936 = vmatpush1.msra.mxu0 %v8893_v25  ;;  %v9080_v24 = vld [vmem:[#allocation9 + $0x880] sm:$0xff]  ;;  %v9264_v54 = vld [vmem:[#allocation9 + $0x998] sm:$0xff] }
0x1065   : > { %8759 = vmatpush1.msra.mxu1 %v8708_v55  ;;  %8937 = vmatprep.subr.mxu0 %v8892_v58  ;;  %v9079_v25 = vld [vmem:[#allocation9 + $0x878] sm:$0xff]  ;;  %v9263_v55 = vld [vmem:[#allocation9 + $0x990] sm:$0xff] }
0x1066   : > { %8760 = vmatprep.subr.mxu1 %v8707_v61  ;;  %8938 = vmatpush1.msra.mxu0 %v8891_v4  ;;  %v9078_v58 = vld [vmem:[#allocation9 + $0x870] sm:$0xff]  ;;  %v9262_v61 = vld [vmem:[#allocation9 + $0x988] sm:$0xff] }
0x1067   : > { %8761 = vmatpush1.msra.mxu1 %v8706_v7  ;;  %8798 = vmatprep.mubr.f32.mxu1 %v13564_v3  ;;  %v9077_v4 = vld [vmem:[#allocation9 + $0x868] sm:$0xff]  ;;  %v9261_v7 = vld [vmem:[#allocation9 + $0x980] sm:$0xff] }
0x1068   : > { %8979 = vmatprep.mubr.f32.mxu0 %v13564_v3  ;;  %8762 = vmatprep.subr.mxu1 %v8705_v0  ;;  %v9076_v0 = vld [vmem:[#allocation9 + $0x860] sm:$0xff] }
0x1069   : > { %8939 = vmatprep.subr.mxu0 %v8890_v51  ;;  %8763 = vmatpush1.msra.mxu1 %v8704_v10  ;;  %v9260_v51 = vld [vmem:[#allocation9 + $0x978] sm:$0xff] }
0x106a   : > { %8940 = vmatpush1.msra.mxu0 %v8889_v29  ;;  %8764 = vmatprep.subr.mxu1 %v8703_v31  ;;  %v9075_v10 = vld [vmem:[#allocation9 + $0x858] sm:$0xff]  ;;  %v9259_v29 = vld [vmem:[#allocation9 + $0x970] sm:$0xff] }
0x106b   : > { %8941 = vmatprep.subr.mxu0 %v8888_v59  ;;  %8765 = vmatpush1.msra.mxu1 %v8702_v42  ;;  %v9074_v31 = vld [vmem:[#allocation9 + $0x850] sm:$0xff]  ;;  %v9258_v59 = vld [vmem:[#allocation9 + $0x968] sm:$0xff] }
0x106c   : > { %8942 = vmatpush1.msra.mxu0 %v8887_v13  ;;  %13166 = vmatprep.subr.mxu1 %v13564_v3  ;;  %v9073_v42 = vld [vmem:[#allocation9 + $0x848] sm:$0xff]  ;;  %v9257_v13 = vld [vmem:[#allocation9 + $0x960] sm:$0xff] }
0x106d   : > { %8943 = vmatprep.subr.mxu0 %v8886_v27  ;;  %v9072_v27 = vld [vmem:[#allocation9 + $0x840] sm:$0xff] }
0x106e   : > { %8944 = vmatpush1.msra.mxu0 %v8885_v47  ;;  %v9256_v47 = vld [vmem:[#allocation9 + $0x958] sm:$0xff] }
0x106f   : > { %8945 = vmatprep.subr.mxu0 %v8884_v16  ;;  %v9071_v16 = vld [vmem:[#allocation9 + $0x838] sm:$0xff] }
0x1070   : > { %8946 = vmatpush1.msra.mxu0 %v8883_v15  ;;  %v9255_v15 = vld [vmem:[#allocation9 + $0x950] sm:$0xff] }
0x1071   : > { %13173 = vmatprep.subr.mxu0 %v13564_v3 }
0x1106   : > { %v8438_v20 = vpop.f32.mrf.mxu1 }
0x1107   : > { %v8443_v17 = vadd.f32 %v8438_v20, %v15441_v14  ;;  %v9070_v20 = vld [vmem:[#allocation9 + $0x830] sm:$0xff] }
0x1108   : > { %v8440_v50 = vpop.f32.mrf.mxu1 }
0x1109   : > { %v8444_v26 = vadd.f32 %v8440_v50, %v15446_v32  ;;  %v9095_v32 = vld [vmem:[#allocation9 + $0x8f8] sm:$0xff]  ;;  %v9069_v50 = vld [vmem:[#allocation9 + $0x828] sm:$0xff] }
0x110a   : > { %v8619_v30 = vpop.f32.mrf.mxu0  ;;  %v8697_v21 = vpop.f32.mrf.mxu1 }
0x110b   : > { %v15463_v8 = vadd.f32 %v8619_v30, %v8443_v17  ;;  %8799 = vmatmul.mubr.f32.vlgmr.msra.gmra.mxu1 %v8697_v21  ;;  %v9254_v17 = vld [vmem:[#allocation9 + $0x948] sm:$0xff]  ;;  %v9068_v30 = vld [vmem:[#allocation9 + $0x820] sm:$0xff]  ;;  %v9067_v21 = vld [vmem:[#allocation9 + $0x818] sm:$0xff] }
0x110c   : > { %13167 = vmatpush3.msra.mxu1 %v15385_v63  ;;  %v8621_v53 = vpop.f32.mrf.mxu0  ;;  %13170 = vmatprep.mubr.msk.f32.mxu1 %vm13565_vm3, %v13564_v3  ;;  %v13158_v33 = vpop.f32.mrf.mxu1 }
0x110d   : > { %v15468_v60 = vadd.f32 %v8621_v53, %v8444_v26  ;;  %13168 = vmatprep.subr.mxu1 %v13564_v3  ;;  %v9253_v26 = vld [vmem:[#allocation9 + $0x940] sm:$0xff]  ;;  %v9252_v53 = vld [vmem:[#allocation9 + $0x938] sm:$0xff]  ;;  %v9251_v33 = vld [vmem:[#allocation9 + $0x930] sm:$0xff] }
0x110e   : > { %13169 = vmatpush3.msra.mxu1 %v15387_v1  ;;  %v8878_v14 = vpop.f32.mrf.mxu0 }
0x110f   : > { %8980 = vmatmul.mubr.f32.vlgmr.msra.gmra.mxu0 %v8878_v14  ;;  %13171 = vmatmul.mubr.msk.f32.vlgmr.msra.gmra.mxu1 %vm7546_vm4, %v8989_v19  ;;  %v9066_v19 = vld [vmem:[#allocation9 + $0x810] sm:$0xff]  ;;  %v9065_v14 = vld [vmem:[#allocation9 + $0x808] sm:$0xff] }
0x1110   : > { %13174 = vmatpush3.msra.mxu0 %v15385_v63  ;;  %13177 = vmatprep.mubr.msk.f32.mxu0 %vm13565_vm3, %v13564_v3  ;;  %v13165_v39 = vpop.f32.mrf.mxu0 }
0x1111   : > { %13175 = vmatprep.subr.mxu0 %v13564_v3  ;;  %9096 = vmatprep.subr.mxu1 %v9095_v32  ;;  %v9250_v32 = vld [vmem:[#allocation9 + $0x928] sm:$0xff]  ;;  %v9248_v39 = vld [vmem:[#allocation9 + $0x918] sm:$0xff] }
0x1112   : > { %13176 = vmatpush3.msra.mxu0 %v15387_v1  ;;  %9097 = vmatpush1.msra.mxu1 %v9094_v48  ;;  %v9064_v48 = vld [vmem:[#allocation9 + $0x800] sm:$0xff] }
0x1113   : > { %13178 = vmatmul.mubr.msk.f32.vlgmr.msra.gmra.mxu0 %vm7546_vm4, %v9170_v38  ;;  %9098 = vmatprep.subr.mxu1 %v9093_v35  ;;  %v9249_v38 = vld [vmem:[#allocation9 + $0x920] sm:$0xff]  ;;  %v9247_v35 = vld [vmem:[#allocation9 + $0x910] sm:$0xff] }
0x1114   : > { %9099 = vmatpush1.msra.mxu1 %v9092_v28  ;;  %9277 = vmatprep.subr.mxu0 %v9276_v52  ;;  %v9246_v28 = vld [vmem:[#allocation9 + $0x908] sm:$0xff]  ;;  %v9245_v52 = vld [vmem:[#allocation9 + $0x900] sm:$0xff] }
0x1115   : > { %9100 = vmatprep.subr.mxu1 %v9091_v34  ;;  %9278 = vmatpush1.msra.mxu0 %v9275_v49 }
0x1116   : > { %9101 = vmatpush1.msra.mxu1 %v9090_v57  ;;  %9279 = vmatprep.subr.mxu0 %v9274_v43 }
0x1117   : > { %9102 = vmatprep.subr.mxu1 %v9089_v44  ;;  %9280 = vmatpush1.msra.mxu0 %v9273_v2 }
0x1118   : > { %9103 = vmatpush1.msra.mxu1 %v9088_v18  ;;  %9281 = vmatprep.subr.mxu0 %v9272_v41 }
0x1119   : > { %9104 = vmatprep.subr.mxu1 %v9087_v9  ;;  %9282 = vmatpush1.msra.mxu0 %v9271_v46  ;;  %v9351_v9 = vld [vmem:[#allocation7 + $0x28] sm:$0xf] }
0x111a   : > { %9105 = vmatpush1.msra.mxu1 %v9086_v5  ;;  %9283 = vmatprep.subr.mxu0 %v9270_v12  ;;  %v9456_v12 = vld [vmem:[#allocation9 + $0xaf0] sm:$0xff] }
0x111b   : > { %9106 = vmatprep.subr.mxu1 %v9085_v11  ;;  %9284 = vmatpush1.msra.mxu0 %v9269_v37  ;;  %v9532_v11 = vld [vmem:[#allocation7 + $0x2c] sm:$0xf] }
0x111c   : > { %9107 = vmatpush1.msra.mxu1 %v9084_v40  ;;  %9285 = vmatprep.subr.mxu0 %v9268_v62  ;;  %v9455_v40 = vld [vmem:[#allocation9 + $0xae8] sm:$0xff]  ;;  %v9454_v62 = vld [vmem:[#allocation9 + $0xae0] sm:$0xff] }
0x111d   : > { %9108 = vmatprep.subr.mxu1 %v9083_v6  ;;  %9286 = vmatpush1.msra.mxu0 %v9267_v22  ;;  %v9638_v6 = vld [vmem:[#allocation9 + $0xbf8] sm:$0xff] }
0x111e   : > { %9109 = vmatpush1.msra.mxu1 %v9082_v23  ;;  %9287 = vmatprep.subr.mxu0 %v9266_v36  ;;  %v9453_v22 = vld [vmem:[#allocation9 + $0xad8] sm:$0xff]  ;;  %v9637_v23 = vld [vmem:[#allocation9 + $0xbf0] sm:$0xff] }
0x111f   : > { %9110 = vmatprep.subr.mxu1 %v9081_v45  ;;  %9288 = vmatpush1.msra.mxu0 %v9265_v56  ;;  %v9452_v36 = vld [vmem:[#allocation9 + $0xad0] sm:$0xff]  ;;  %v9636_v45 = vld [vmem:[#allocation9 + $0xbe8] sm:$0xff] }
0x1120   : > { %9111 = vmatpush1.msra.mxu1 %v9080_v24  ;;  %9289 = vmatprep.subr.mxu0 %v9264_v54  ;;  %v9451_v56 = vld [vmem:[#allocation9 + $0xac8] sm:$0xff]  ;;  %v9635_v24 = vld [vmem:[#allocation9 + $0xbe0] sm:$0xff] }
0x1121   : > { %9112 = vmatprep.subr.mxu1 %v9079_v25  ;;  %9290 = vmatpush1.msra.mxu0 %v9263_v55  ;;  %v9450_v54 = vld [vmem:[#allocation9 + $0xac0] sm:$0xff]  ;;  %v9634_v25 = vld [vmem:[#allocation9 + $0xbd8] sm:$0xff] }
0x1122   : > { %9113 = vmatpush1.msra.mxu1 %v9078_v58  ;;  %9291 = vmatprep.subr.mxu0 %v9262_v61  ;;  %v9449_v55 = vld [vmem:[#allocation9 + $0xab8] sm:$0xff]  ;;  %v9633_v58 = vld [vmem:[#allocation9 + $0xbd0] sm:$0xff] }
0x1123   : > { %9114 = vmatprep.subr.mxu1 %v9077_v4  ;;  %9292 = vmatpush1.msra.mxu0 %v9261_v7  ;;  %v9448_v61 = vld [vmem:[#allocation9 + $0xab0] sm:$0xff]  ;;  %v9632_v4 = vld [vmem:[#allocation9 + $0xbc8] sm:$0xff] }
0x1124   : > { %9115 = vmatpush1.msra.mxu1 %v9076_v0  ;;  %9293 = vmatprep.subr.mxu0 %v9260_v51  ;;  %v9447_v7 = vld [vmem:[#allocation9 + $0xaa8] sm:$0xff]  ;;  %v9631_v0 = vld [vmem:[#allocation9 + $0xbc0] sm:$0xff] }
0x1125   : > { %9116 = vmatprep.subr.mxu1 %v9075_v10  ;;  %9294 = vmatpush1.msra.mxu0 %v9259_v29  ;;  %v9446_v51 = vld [vmem:[#allocation9 + $0xaa0] sm:$0xff]  ;;  %v9630_v10 = vld [vmem:[#allocation9 + $0xbb8] sm:$0xff] }
0x1126   : > { %9117 = vmatpush1.msra.mxu1 %v9074_v31  ;;  %9295 = vmatprep.subr.mxu0 %v9258_v59  ;;  %v9445_v29 = vld [vmem:[#allocation9 + $0xa98] sm:$0xff]  ;;  %v9629_v31 = vld [vmem:[#allocation9 + $0xbb0] sm:$0xff] }
0x1127   : > { %9118 = vmatprep.subr.mxu1 %v9073_v42  ;;  %9296 = vmatpush1.msra.mxu0 %v9257_v13  ;;  %v9444_v59 = vld [vmem:[#allocation9 + $0xa90] sm:$0xff]  ;;  %v9628_v42 = vld [vmem:[#allocation9 + $0xba8] sm:$0xff] }
0x1128   : > { %9119 = vmatpush1.msra.mxu1 %v9072_v27  ;;  %9297 = vmatprep.subr.mxu0 %v9256_v47  ;;  %v9443_v13 = vld [vmem:[#allocation9 + $0xa88] sm:$0xff]  ;;  %v9627_v27 = vld [vmem:[#allocation9 + $0xba0] sm:$0xff] }
0x1129   : > { %9120 = vmatprep.subr.mxu1 %v9071_v16  ;;  %9298 = vmatpush1.msra.mxu0 %v9255_v15  ;;  %v9442_v47 = vld [vmem:[#allocation9 + $0xa80] sm:$0xff]  ;;  %v9626_v16 = vld [vmem:[#allocation9 + $0xb98] sm:$0xff] }
0x112a   : > { %9121 = vmatpush1.msra.mxu1 %v9070_v20  ;;  %9299 = vmatprep.subr.mxu0 %v9254_v17  ;;  %v9441_v15 = vld [vmem:[#allocation9 + $0xa78] sm:$0xff]  ;;  %v9625_v20 = vld [vmem:[#allocation9 + $0xb90] sm:$0xff] }
0x112b   : > { %9122 = vmatprep.subr.mxu1 %v9069_v50  ;;  %9300 = vmatpush1.msra.mxu0 %v9253_v26  ;;  %v9440_v17 = vld [vmem:[#allocation9 + $0xa70] sm:$0xff]  ;;  %v9624_v50 = vld [vmem:[#allocation9 + $0xb88] sm:$0xff] }
0x112c   : > { %9123 = vmatpush1.msra.mxu1 %v9068_v30  ;;  %9160 = vmatprep.mubr.f32.mxu1 %v13564_v3  ;;  %v9439_v26 = vld [vmem:[#allocation9 + $0xa68] sm:$0xff]  ;;  %v9623_v30 = vld [vmem:[#allocation9 + $0xb80] sm:$0xff] }
0x112d   : > { %9341 = vmatprep.mubr.f32.mxu0 %v13564_v3  ;;  %9124 = vmatprep.subr.mxu1 %v9067_v21  ;;  %v9438_v21 = vld [vmem:[#allocation9 + $0xa60] sm:$0xff] }
0x112e   : > { %9301 = vmatprep.subr.mxu0 %v9252_v53  ;;  %9125 = vmatpush1.msra.mxu1 %v9066_v19  ;;  %v9622_v53 = vld [vmem:[#allocation9 + $0xb78] sm:$0xff] }
0x112f   : > { %9302 = vmatpush1.msra.mxu0 %v9251_v33  ;;  %9126 = vmatprep.subr.mxu1 %v9065_v14  ;;  %v9437_v19 = vld [vmem:[#allocation9 + $0xa58] sm:$0xff]  ;;  %v9621_v33 = vld [vmem:[#allocation9 + $0xb70] sm:$0xff] }
0x1130   : > { %9303 = vmatprep.subr.mxu0 %v9250_v32  ;;  %9127 = vmatpush1.msra.mxu1 %v9064_v48  ;;  %v9436_v14 = vld [vmem:[#allocation9 + $0xa50] sm:$0xff]  ;;  %v9620_v32 = vld [vmem:[#allocation9 + $0xb68] sm:$0xff] }
0x1131   : > { %9304 = vmatpush1.msra.mxu0 %v9249_v38  ;;  %13180 = vmatprep.subr.mxu1 %v13564_v3  ;;  %v9435_v48 = vld [vmem:[#allocation9 + $0xa48] sm:$0xff]  ;;  %v9619_v38 = vld [vmem:[#allocation9 + $0xb60] sm:$0xff] }
0x1132   : > { %9305 = vmatprep.subr.mxu0 %v9248_v39  ;;  %v9434_v39 = vld [vmem:[#allocation9 + $0xa40] sm:$0xff] }
0x1133   : > { %9306 = vmatpush1.msra.mxu0 %v9247_v35  ;;  %v9618_v35 = vld [vmem:[#allocation9 + $0xb58] sm:$0xff] }
0x1134   : > { %9307 = vmatprep.subr.mxu0 %v9246_v28  ;;  %v9433_v28 = vld [vmem:[#allocation9 + $0xa38] sm:$0xff] }
0x1135   : > { %9308 = vmatpush1.msra.mxu0 %v9245_v52  ;;  %v9617_v52 = vld [vmem:[#allocation9 + $0xb50] sm:$0xff] }
0x1136   : > { %13187 = vmatprep.subr.mxu0 %v13564_v3 }
0x11cb   : > { %v8800_v34 = vpop.f32.mrf.mxu1 }
0x11cc   : > { %v8805_v49 = vadd.f32 %v8800_v34, %v15463_v8  ;;  %v9432_v34 = vld [vmem:[#allocation9 + $0xa30] sm:$0xff] }
0x11cd   : > { %v8802_v57 = vpop.f32.mrf.mxu1 }
0x11ce   : > { %v8806_v43 = vadd.f32 %v8802_v57, %v15468_v60  ;;  %v9457_v60 = vld [vmem:[#allocation9 + $0xaf8] sm:$0xff]  ;;  %v9431_v57 = vld [vmem:[#allocation9 + $0xa28] sm:$0xff] }
0x11cf   : > { %v8981_v44 = vpop.f32.mrf.mxu0  ;;  %v9059_v2 = vpop.f32.mrf.mxu1 }
0x11d0   : > { %v15485_v18 = vadd.f32 %v8981_v44, %v8805_v49  ;;  %9161 = vmatmul.mubr.f32.vlgmr.msra.gmra.mxu1 %v9059_v2  ;;  %v9616_v49 = vld [vmem:[#allocation9 + $0xb48] sm:$0xff]  ;;  %v9430_v44 = vld [vmem:[#allocation9 + $0xa20] sm:$0xff]  ;;  %v9429_v2 = vld [vmem:[#allocation9 + $0xa18] sm:$0xff] }
0x11d1   : > { %13181 = vmatpush3.msra.mxu1 %v15385_v63  ;;  %v8983_v41 = vpop.f32.mrf.mxu0  ;;  %13184 = vmatprep.mubr.msk.f32.mxu1 %vm13565_vm3, %v13564_v3  ;;  %v13172_v46 = vpop.f32.mrf.mxu1 }
0x11d2   : > { %v15490_v5 = vadd.f32 %v8983_v41, %v8806_v43  ;;  %13182 = vmatprep.subr.mxu1 %v13564_v3  ;;  %v9615_v43 = vld [vmem:[#allocation9 + $0xb40] sm:$0xff]  ;;  %v9614_v41 = vld [vmem:[#allocation9 + $0xb38] sm:$0xff]  ;;  %v9613_v46 = vld [vmem:[#allocation9 + $0xb30] sm:$0xff] }
0x11d3   : > { %13183 = vmatpush3.msra.mxu1 %v15387_v1  ;;  %v9240_v8 = vpop.f32.mrf.mxu0 }
0x11d4   : > { %9342 = vmatmul.mubr.f32.vlgmr.msra.gmra.mxu0 %v9240_v8  ;;  %13185 = vmatmul.mubr.msk.f32.vlgmr.msra.gmra.mxu1 %vm7546_vm4, %v9351_v9  ;;  %v9428_v9 = vld [vmem:[#allocation9 + $0xa10] sm:$0xff]  ;;  %v9427_v8 = vld [vmem:[#allocation9 + $0xa08] sm:$0xff] }
0x11d5   : > { %13188 = vmatpush3.msra.mxu0 %v15385_v63  ;;  %13191 = vmatprep.mubr.msk.f32.mxu0 %vm13565_vm3, %v13564_v3  ;;  %v13179_v37 = vpop.f32.mrf.mxu0 }
0x11d6   : > { %13189 = vmatprep.subr.mxu0 %v13564_v3  ;;  %9458 = vmatprep.subr.mxu1 %v9457_v60  ;;  %v9612_v60 = vld [vmem:[#allocation9 + $0xb28] sm:$0xff]  ;;  %v9610_v37 = vld [vmem:[#allocation9 + $0xb18] sm:$0xff] }
0x11d7   : > { %13190 = vmatpush3.msra.mxu0 %v15387_v1  ;;  %9459 = vmatpush1.msra.mxu1 %v9456_v12  ;;  %v9426_v12 = vld [vmem:[#allocation9 + $0xa00] sm:$0xff] }
0x11d8   : > { %13192 = vmatmul.mubr.msk.f32.vlgmr.msra.gmra.mxu0 %vm7546_vm4, %v9532_v11  ;;  %9460 = vmatprep.subr.mxu1 %v9455_v40  ;;  %v9611_v11 = vld [vmem:[#allocation9 + $0xb20] sm:$0xff]  ;;  %v9609_v40 = vld [vmem:[#allocation9 + $0xb10] sm:$0xff] }
0x11d9   : > { %9461 = vmatpush1.msra.mxu1 %v9454_v62  ;;  %9639 = vmatprep.subr.mxu0 %v9638_v6  ;;  %v9608_v62 = vld [vmem:[#allocation9 + $0xb08] sm:$0xff]  ;;  %v9607_v6 = vld [vmem:[#allocation9 + $0xb00] sm:$0xff] }
0x11da   : > { %9462 = vmatprep.subr.mxu1 %v9453_v22  ;;  %9640 = vmatpush1.msra.mxu0 %v9637_v23 }
0x11db   : > { %9463 = vmatpush1.msra.mxu1 %v9452_v36  ;;  %9641 = vmatprep.subr.mxu0 %v9636_v45 }
0x11dc   : > { %9464 = vmatprep.subr.mxu1 %v9451_v56  ;;  %9642 = vmatpush1.msra.mxu0 %v9635_v24 }
0x11dd   : > { %9465 = vmatpush1.msra.mxu1 %v9450_v54  ;;  %9643 = vmatprep.subr.mxu0 %v9634_v25 }
0x11de   : > { %9466 = vmatprep.subr.mxu1 %v9449_v55  ;;  %9644 = vmatpush1.msra.mxu0 %v9633_v58  ;;  %v9713_v55 = vld [vmem:[#allocation7 + $0x30] sm:$0xf] }
0x11df   : > { %9467 = vmatpush1.msra.mxu1 %v9448_v61  ;;  %9645 = vmatprep.subr.mxu0 %v9632_v4  ;;  %v9818_v4 = vld [vmem:[#allocation9 + $0xcf0] sm:$0xff] }
0x11e0   : > { %9468 = vmatprep.subr.mxu1 %v9447_v7  ;;  %9646 = vmatpush1.msra.mxu0 %v9631_v0  ;;  %v9894_v7 = vld [vmem:[#allocation7 + $0x34] sm:$0xf] }
0x11e1   : > { %9469 = vmatpush1.msra.mxu1 %v9446_v51  ;;  %9647 = vmatprep.subr.mxu0 %v9630_v10  ;;  %v9817_v51 = vld [vmem:[#allocation9 + $0xce8] sm:$0xff]  ;;  %v9816_v10 = vld [vmem:[#allocation9 + $0xce0] sm:$0xff] }
0x11e2   : > { %9470 = vmatprep.subr.mxu1 %v9445_v29  ;;  %9648 = vmatpush1.msra.mxu0 %v9629_v31  ;;  %v10000_v29 = vld [vmem:[#allocation9 + $0xdf8] sm:$0xff] }
0x11e3   : > { %9471 = vmatpush1.msra.mxu1 %v9444_v59  ;;  %9649 = vmatprep.subr.mxu0 %v9628_v42  ;;  %v9815_v31 = vld [vmem:[#allocation9 + $0xcd8] sm:$0xff]  ;;  %v9999_v59 = vld [vmem:[#allocation9 + $0xdf0] sm:$0xff] }
0x11e4   : > { %9472 = vmatprep.subr.mxu1 %v9443_v13  ;;  %9650 = vmatpush1.msra.mxu0 %v9627_v27  ;;  %v9814_v42 = vld [vmem:[#allocation9 + $0xcd0] sm:$0xff]  ;;  %v9998_v13 = vld [vmem:[#allocation9 + $0xde8] sm:$0xff] }
0x11e5   : > { %9473 = vmatpush1.msra.mxu1 %v9442_v47  ;;  %9651 = vmatprep.subr.mxu0 %v9626_v16  ;;  %v9813_v27 = vld [vmem:[#allocation9 + $0xcc8] sm:$0xff]  ;;  %v9997_v47 = vld [vmem:[#allocation9 + $0xde0] sm:$0xff] }
0x11e6   : > { %9474 = vmatprep.subr.mxu1 %v9441_v15  ;;  %9652 = vmatpush1.msra.mxu0 %v9625_v20  ;;  %v9812_v16 = vld [vmem:[#allocation9 + $0xcc0] sm:$0xff]  ;;  %v9996_v15 = vld [vmem:[#allocation9 + $0xdd8] sm:$0xff] }
0x11e7   : > { %9475 = vmatpush1.msra.mxu1 %v9440_v17  ;;  %9653 = vmatprep.subr.mxu0 %v9624_v50  ;;  %v9811_v20 = vld [vmem:[#allocation9 + $0xcb8] sm:$0xff]  ;;  %v9995_v17 = vld [vmem:[#allocation9 + $0xdd0] sm:$0xff] }
0x11e8   : > { %9476 = vmatprep.subr.mxu1 %v9439_v26  ;;  %9654 = vmatpush1.msra.mxu0 %v9623_v30  ;;  %v9810_v50 = vld [vmem:[#allocation9 + $0xcb0] sm:$0xff]  ;;  %v9994_v26 = vld [vmem:[#allocation9 + $0xdc8] sm:$0xff] }
0x11e9   : > { %9477 = vmatpush1.msra.mxu1 %v9438_v21  ;;  %9655 = vmatprep.subr.mxu0 %v9622_v53  ;;  %v9809_v30 = vld [vmem:[#allocation9 + $0xca8] sm:$0xff]  ;;  %v9993_v21 = vld [vmem:[#allocation9 + $0xdc0] sm:$0xff] }
0x11ea   : > { %9478 = vmatprep.subr.mxu1 %v9437_v19  ;;  %9656 = vmatpush1.msra.mxu0 %v9621_v33  ;;  %v9808_v53 = vld [vmem:[#allocation9 + $0xca0] sm:$0xff]  ;;  %v9992_v19 = vld [vmem:[#allocation9 + $0xdb8] sm:$0xff] }
0x11eb   : > { %9479 = vmatpush1.msra.mxu1 %v9436_v14  ;;  %9657 = vmatprep.subr.mxu0 %v9620_v32  ;;  %v9807_v33 = vld [vmem:[#allocation9 + $0xc98] sm:$0xff]  ;;  %v9991_v14 = vld [vmem:[#allocation9 + $0xdb0] sm:$0xff] }
0x11ec   : > { %9480 = vmatprep.subr.mxu1 %v9435_v48  ;;  %9658 = vmatpush1.msra.mxu0 %v9619_v38  ;;  %v9806_v32 = vld [vmem:[#allocation9 + $0xc90] sm:$0xff]  ;;  %v9990_v48 = vld [vmem:[#allocation9 + $0xda8] sm:$0xff] }
0x11ed   : > { %9481 = vmatpush1.msra.mxu1 %v9434_v39  ;;  %9659 = vmatprep.subr.mxu0 %v9618_v35  ;;  %v9805_v38 = vld [vmem:[#allocation9 + $0xc88] sm:$0xff]  ;;  %v9989_v39 = vld [vmem:[#allocation9 + $0xda0] sm:$0xff] }
0x11ee   : > { %9482 = vmatprep.subr.mxu1 %v9433_v28  ;;  %9660 = vmatpush1.msra.mxu0 %v9617_v52  ;;  %v9804_v35 = vld [vmem:[#allocation9 + $0xc80] sm:$0xff]  ;;  %v9988_v28 = vld [vmem:[#allocation9 + $0xd98] sm:$0xff] }
0x11ef   : > { %9483 = vmatpush1.msra.mxu1 %v9432_v34  ;;  %9661 = vmatprep.subr.mxu0 %v9616_v49  ;;  %v9803_v52 = vld [vmem:[#allocation9 + $0xc78] sm:$0xff]  ;;  %v9987_v34 = vld [vmem:[#allocation9 + $0xd90] sm:$0xff] }
0x11f0   : > { %9484 = vmatprep.subr.mxu1 %v9431_v57  ;;  %9662 = vmatpush1.msra.mxu0 %v9615_v43  ;;  %v9802_v49 = vld [vmem:[#allocation9 + $0xc70] sm:$0xff]  ;;  %v9986_v57 = vld [vmem:[#allocation9 + $0xd88] sm:$0xff] }
0x11f1   : > { %9485 = vmatpush1.msra.mxu1 %v9430_v44  ;;  %9522 = vmatprep.mubr.f32.mxu1 %v13564_v3  ;;  %v9801_v43 = vld [vmem:[#allocation9 + $0xc68] sm:$0xff]  ;;  %v9985_v44 = vld [vmem:[#allocation9 + $0xd80] sm:$0xff] }
0x11f2   : > { %9703 = vmatprep.mubr.f32.mxu0 %v13564_v3  ;;  %9486 = vmatprep.subr.mxu1 %v9429_v2  ;;  %v9800_v2 = vld [vmem:[#allocation9 + $0xc60] sm:$0xff] }
0x11f3   : > { %9663 = vmatprep.subr.mxu0 %v9614_v41  ;;  %9487 = vmatpush1.msra.mxu1 %v9428_v9  ;;  %v9984_v41 = vld [vmem:[#allocation9 + $0xd78] sm:$0xff] }
0x11f4   : > { %9664 = vmatpush1.msra.mxu0 %v9613_v46  ;;  %9488 = vmatprep.subr.mxu1 %v9427_v8  ;;  %v9799_v9 = vld [vmem:[#allocation9 + $0xc58] sm:$0xff]  ;;  %v9983_v46 = vld [vmem:[#allocation9 + $0xd70] sm:$0xff] }
0x11f5   : > { %9665 = vmatprep.subr.mxu0 %v9612_v60  ;;  %9489 = vmatpush1.msra.mxu1 %v9426_v12  ;;  %v9798_v8 = vld [vmem:[#allocation9 + $0xc50] sm:$0xff]  ;;  %v9982_v60 = vld [vmem:[#allocation9 + $0xd68] sm:$0xff] }
0x11f6   : > { %9666 = vmatpush1.msra.mxu0 %v9611_v11  ;;  %13194 = vmatprep.subr.mxu1 %v13564_v3  ;;  %v9797_v12 = vld [vmem:[#allocation9 + $0xc48] sm:$0xff]  ;;  %v9981_v11 = vld [vmem:[#allocation9 + $0xd60] sm:$0xff] }
0x11f7   : > { %9667 = vmatprep.subr.mxu0 %v9610_v37  ;;  %v9796_v37 = vld [vmem:[#allocation9 + $0xc40] sm:$0xff] }
0x11f8   : > { %9668 = vmatpush1.msra.mxu0 %v9609_v40  ;;  %v9980_v40 = vld [vmem:[#allocation9 + $0xd58] sm:$0xff] }
0x11f9   : > { %9669 = vmatprep.subr.mxu0 %v9608_v62  ;;  %v9795_v62 = vld [vmem:[#allocation9 + $0xc38] sm:$0xff] }
0x11fa   : > { %9670 = vmatpush1.msra.mxu0 %v9607_v6  ;;  %v9979_v6 = vld [vmem:[#allocation9 + $0xd50] sm:$0xff] }
0x11fb   : > { %13201 = vmatprep.subr.mxu0 %v13564_v3 }
0x1290   : > { %v9162_v22 = vpop.f32.mrf.mxu1 }
0x1291   : > { %v9167_v23 = vadd.f32 %v9162_v22, %v15485_v18  ;;  %v9794_v22 = vld [vmem:[#allocation9 + $0xc30] sm:$0xff] }
0x1292   : > { %v9164_v36 = vpop.f32.mrf.mxu1 }
0x1293   : > { %v9168_v45 = vadd.f32 %v9164_v36, %v15490_v5  ;;  %v9819_v5 = vld [vmem:[#allocation9 + $0xcf8] sm:$0xff]  ;;  %v9793_v36 = vld [vmem:[#allocation9 + $0xc28] sm:$0xff] }
0x1294   : > { %v9343_v56 = vpop.f32.mrf.mxu0  ;;  %v9421_v24 = vpop.f32.mrf.mxu1 }
0x1295   : > { %v15507_v54 = vadd.f32 %v9343_v56, %v9167_v23  ;;  %9523 = vmatmul.mubr.f32.vlgmr.msra.gmra.mxu1 %v9421_v24  ;;  %v9978_v23 = vld [vmem:[#allocation9 + $0xd48] sm:$0xff]  ;;  %v9792_v56 = vld [vmem:[#allocation9 + $0xc20] sm:$0xff]  ;;  %v9791_v24 = vld [vmem:[#allocation9 + $0xc18] sm:$0xff] }
0x1296   : > { %13195 = vmatpush3.msra.mxu1 %v15385_v63  ;;  %v9345_v25 = vpop.f32.mrf.mxu0  ;;  %13198 = vmatprep.mubr.msk.f32.mxu1 %vm13565_vm3, %v13564_v3  ;;  %v13186_v58 = vpop.f32.mrf.mxu1 }
0x1297   : > { %v15512_v61 = vadd.f32 %v9345_v25, %v9168_v45  ;;  %13196 = vmatprep.subr.mxu1 %v13564_v3  ;;  %v9977_v45 = vld [vmem:[#allocation9 + $0xd40] sm:$0xff]  ;;  %v9976_v25 = vld [vmem:[#allocation9 + $0xd38] sm:$0xff]  ;;  %v9975_v58 = vld [vmem:[#allocation9 + $0xd30] sm:$0xff] }
0x1298   : > { %13197 = vmatpush3.msra.mxu1 %v15387_v1  ;;  %v9602_v18 = vpop.f32.mrf.mxu0 }
0x1299   : > { %9704 = vmatmul.mubr.f32.vlgmr.msra.gmra.mxu0 %v9602_v18  ;;  %13199 = vmatmul.mubr.msk.f32.vlgmr.msra.gmra.mxu1 %vm7546_vm4, %v9713_v55  ;;  %v9790_v55 = vld [vmem:[#allocation9 + $0xc10] sm:$0xff]  ;;  %v9789_v18 = vld [vmem:[#allocation9 + $0xc08] sm:$0xff] }
0x129a   : > { %13202 = vmatpush3.msra.mxu0 %v15385_v63  ;;  %13205 = vmatprep.mubr.msk.f32.mxu0 %vm13565_vm3, %v13564_v3  ;;  %v13193_v0 = vpop.f32.mrf.mxu0 }
0x129b   : > { %13203 = vmatprep.subr.mxu0 %v13564_v3  ;;  %9820 = vmatprep.subr.mxu1 %v9819_v5  ;;  %v9974_v5 = vld [vmem:[#allocation9 + $0xd28] sm:$0xff]  ;;  %v9972_v0 = vld [vmem:[#allocation9 + $0xd18] sm:$0xff] }
0x129c   : > { %13204 = vmatpush3.msra.mxu0 %v15387_v1  ;;  %9821 = vmatpush1.msra.mxu1 %v9818_v4  ;;  %v9788_v4 = vld [vmem:[#allocation9 + $0xc00] sm:$0xff] }
0x129d   : > { %13206 = vmatmul.mubr.msk.f32.vlgmr.msra.gmra.mxu0 %vm7546_vm4, %v9894_v7  ;;  %9822 = vmatprep.subr.mxu1 %v9817_v51  ;;  %v9973_v7 = vld [vmem:[#allocation9 + $0xd20] sm:$0xff]  ;;  %v9971_v51 = vld [vmem:[#allocation9 + $0xd10] sm:$0xff] }
0x129e   : > { %9823 = vmatpush1.msra.mxu1 %v9816_v10  ;;  %10001 = vmatprep.subr.mxu0 %v10000_v29  ;;  %v9970_v10 = vld [vmem:[#allocation9 + $0xd08] sm:$0xff]  ;;  %v9969_v29 = vld [vmem:[#allocation9 + $0xd00] sm:$0xff] }
0x129f   : > { %9824 = vmatprep.subr.mxu1 %v9815_v31  ;;  %10002 = vmatpush1.msra.mxu0 %v9999_v59 }
0x12a0   : > { %9825 = vmatpush1.msra.mxu1 %v9814_v42  ;;  %10003 = vmatprep.subr.mxu0 %v9998_v13 }
0x12a1   : > { %9826 = vmatprep.subr.mxu1 %v9813_v27  ;;  %10004 = vmatpush1.msra.mxu0 %v9997_v47 }
0x12a2   : > { %9827 = vmatpush1.msra.mxu1 %v9812_v16  ;;  %10005 = vmatprep.subr.mxu0 %v9996_v15 }
0x12a3   : > { %9828 = vmatprep.subr.mxu1 %v9811_v20  ;;  %10006 = vmatpush1.msra.mxu0 %v9995_v17  ;;  %v10075_v20 = vld [vmem:[#allocation7 + $0x38] sm:$0xf] }
0x12a4   : > { %9829 = vmatpush1.msra.mxu1 %v9810_v50  ;;  %10007 = vmatprep.subr.mxu0 %v9994_v26  ;;  %v10180_v26 = vld [vmem:[#allocation9 + $0xef0] sm:$0xff] }
0x12a5   : > { %9830 = vmatprep.subr.mxu1 %v9809_v30  ;;  %10008 = vmatpush1.msra.mxu0 %v9993_v21  ;;  %v10256_v30 = vld [vmem:[#allocation7 + $0x3c] sm:$0xf] }
0x12a6   : > { %9831 = vmatpush1.msra.mxu1 %v9808_v53  ;;  %10009 = vmatprep.subr.mxu0 %v9992_v19  ;;  %v10179_v53 = vld [vmem:[#allocation9 + $0xee8] sm:$0xff]  ;;  %v10178_v19 = vld [vmem:[#allocation9 + $0xee0] sm:$0xff] }
0x12a7   : > { %9832 = vmatprep.subr.mxu1 %v9807_v33  ;;  %10010 = vmatpush1.msra.mxu0 %v9991_v14  ;;  %v10362_v33 = vld [vmem:[#allocation9 + $0xff8] sm:$0xff] }
0x12a8   : > { %9833 = vmatpush1.msra.mxu1 %v9806_v32  ;;  %10011 = vmatprep.subr.mxu0 %v9990_v48  ;;  %v10177_v14 = vld [vmem:[#allocation9 + $0xed8] sm:$0xff]  ;;  %v10361_v32 = vld [vmem:[#allocation9 + $0xff0] sm:$0xff]  ;;  %v10360_v48 = vld [vmem:[#allocation9 + $0xfe8] sm:$0xff] }
0x12a9   : > { %9834 = vmatprep.subr.mxu1 %v9805_v38  ;;  %10012 = vmatpush1.msra.mxu0 %v9989_v39  ;;  %v10175_v38 = vld [vmem:[#allocation9 + $0xec8] sm:$0xff]  ;;  %v10359_v39 = vld [vmem:[#allocation9 + $0xfe0] sm:$0xff] }
0x12aa   : > { %9835 = vmatpush1.msra.mxu1 %v9804_v35  ;;  %10013 = vmatprep.subr.mxu0 %v9988_v28  ;;  %v10174_v35 = vld [vmem:[#allocation9 + $0xec0] sm:$0xff]  ;;  %v10358_v28 = vld [vmem:[#allocation9 + $0xfd8] sm:$0xff] }
0x12ab   : > { %9836 = vmatprep.subr.mxu1 %v9803_v52  ;;  %10014 = vmatpush1.msra.mxu0 %v9987_v34  ;;  %v10173_v52 = vld [vmem:[#allocation9 + $0xeb8] sm:$0xff]  ;;  %v10172_v34 = vld [vmem:[#allocation9 + $0xeb0] sm:$0xff] }
0x12ac   : > { %9837 = vmatpush1.msra.mxu1 %v9802_v49  ;;  %10015 = vmatprep.subr.mxu0 %v9986_v57  ;;  %v10356_v49 = vld [vmem:[#allocation9 + $0xfc8] sm:$0xff] }
0x12ad   : > { %9838 = vmatprep.subr.mxu1 %v9801_v43  ;;  %10016 = vmatpush1.msra.mxu0 %v9985_v44  ;;  %v10171_v57 = vld [vmem:[#allocation9 + $0xea8] sm:$0xff]  ;;  %v10355_v43 = vld [vmem:[#allocation9 + $0xfc0] sm:$0xff] }
0x12ae   : > { %9839 = vmatpush1.msra.mxu1 %v9800_v2  ;;  %10017 = vmatprep.subr.mxu0 %v9984_v41  ;;  %v10170_v44 = vld [vmem:[#allocation9 + $0xea0] sm:$0xff]  ;;  %v10354_v2 = vld [vmem:[#allocation9 + $0xfb8] sm:$0xff] }
0x12af   : > { %9840 = vmatprep.subr.mxu1 %v9799_v9  ;;  %10018 = vmatpush1.msra.mxu0 %v9983_v46  ;;  %v10169_v41 = vld [vmem:[#allocation9 + $0xe98] sm:$0xff]  ;;  %v10353_v9 = vld [vmem:[#allocation9 + $0xfb0] sm:$0xff] }
0x12b0   : > { %9841 = vmatpush1.msra.mxu1 %v9798_v8  ;;  %10019 = vmatprep.subr.mxu0 %v9982_v60  ;;  %v10168_v46 = vld [vmem:[#allocation9 + $0xe90] sm:$0xff]  ;;  %v10352_v8 = vld [vmem:[#allocation9 + $0xfa8] sm:$0xff] }
0x12b1   : > { %9842 = vmatprep.subr.mxu1 %v9797_v12  ;;  %10020 = vmatpush1.msra.mxu0 %v9981_v11  ;;  %v10167_v60 = vld [vmem:[#allocation9 + $0xe88] sm:$0xff]  ;;  %v10351_v12 = vld [vmem:[#allocation9 + $0xfa0] sm:$0xff] }
0x12b2   : > { %9843 = vmatpush1.msra.mxu1 %v9796_v37  ;;  %10021 = vmatprep.subr.mxu0 %v9980_v40  ;;  %v10166_v11 = vld [vmem:[#allocation9 + $0xe80] sm:$0xff]  ;;  %v10350_v37 = vld [vmem:[#allocation9 + $0xf98] sm:$0xff] }
0x12b3   : > { %9844 = vmatprep.subr.mxu1 %v9795_v62  ;;  %10022 = vmatpush1.msra.mxu0 %v9979_v6  ;;  %v10165_v40 = vld [vmem:[#allocation9 + $0xe78] sm:$0xff]  ;;  %v10349_v62 = vld [vmem:[#allocation9 + $0xf90] sm:$0xff] }
0x12b4   : > { %9845 = vmatpush1.msra.mxu1 %v9794_v22  ;;  %10023 = vmatprep.subr.mxu0 %v9978_v23  ;;  %v10164_v6 = vld [vmem:[#allocation9 + $0xe70] sm:$0xff]  ;;  %v10348_v22 = vld [vmem:[#allocation9 + $0xf88] sm:$0xff] }
0x12b5   : > { %9846 = vmatprep.subr.mxu1 %v9793_v36  ;;  %10024 = vmatpush1.msra.mxu0 %v9977_v45  ;;  %v10163_v23 = vld [vmem:[#allocation9 + $0xe68] sm:$0xff]  ;;  %v10347_v36 = vld [vmem:[#allocation9 + $0xf80] sm:$0xff] }
0x12b6   : > { %9847 = vmatpush1.msra.mxu1 %v9792_v56  ;;  %9884 = vmatprep.mubr.f32.mxu1 %v13564_v3  ;;  %v10162_v45 = vld [vmem:[#allocation9 + $0xe60] sm:$0xff]  ;;  %v10346_v56 = vld [vmem:[#allocation9 + $0xf78] sm:$0xff] }
0x12b7   : > { %10065 = vmatprep.mubr.f32.mxu0 %v13564_v3  ;;  %9848 = vmatprep.subr.mxu1 %v9791_v24  ;;  %v10161_v24 = vld [vmem:[#allocation9 + $0xe58] sm:$0xff] }
0x12b8   : > { %10025 = vmatprep.subr.mxu0 %v9976_v25  ;;  %9849 = vmatpush1.msra.mxu1 %v9790_v55  ;;  %v10345_v25 = vld [vmem:[#allocation9 + $0xf70] sm:$0xff] }
0x12b9   : > { %10026 = vmatpush1.msra.mxu0 %v9975_v58  ;;  %9850 = vmatprep.subr.mxu1 %v9789_v18  ;;  %v10160_v55 = vld [vmem:[#allocation9 + $0xe50] sm:$0xff]  ;;  %v10344_v58 = vld [vmem:[#allocation9 + $0xf68] sm:$0xff] }
0x12ba   : > { %10027 = vmatprep.subr.mxu0 %v9974_v5  ;;  %9851 = vmatpush1.msra.mxu1 %v9788_v4  ;;  %v10159_v18 = vld [vmem:[#allocation9 + $0xe48] sm:$0xff]  ;;  %v10343_v5 = vld [vmem:[#allocation9 + $0xf60] sm:$0xff] }
0x12bb   : > { %10028 = vmatpush1.msra.mxu0 %v9973_v7  ;;  %13208 = vmatprep.subr.mxu1 %v13564_v3  ;;  %v10158_v4 = vld [vmem:[#allocation9 + $0xe40] sm:$0xff]  ;;  %v10342_v7 = vld [vmem:[#allocation9 + $0xf58] sm:$0xff] }
0x12bc   : > { %10029 = vmatprep.subr.mxu0 %v9972_v0  ;;  %v10157_v0 = vld [vmem:[#allocation9 + $0xe38] sm:$0xff] }
0x12bd   : > { %10030 = vmatpush1.msra.mxu0 %v9971_v51  ;;  %v10341_v51 = vld [vmem:[#allocation9 + $0xf50] sm:$0xff] }
0x12be   : > { %10031 = vmatprep.subr.mxu0 %v9970_v10  ;;  %v10156_v10 = vld [vmem:[#allocation9 + $0xe30] sm:$0xff] }
0x12bf   : > { %10032 = vmatpush1.msra.mxu0 %v9969_v29  ;;  %v10340_v29 = vld [vmem:[#allocation9 + $0xf48] sm:$0xff] }
0x12c0   : > { %13215 = vmatprep.subr.mxu0 %v13564_v3 }
0x1355   : > { %v9524_v31 = vpop.f32.mrf.mxu1 }
0x1356   : > { %v9529_v59 = vadd.f32 %v9524_v31, %v15507_v54  ;;  %v10155_v31 = vld [vmem:[#allocation9 + $0xe28] sm:$0xff] }
0x1357   : > { %v9526_v42 = vpop.f32.mrf.mxu1 }
0x1358   : > { %v9530_v13 = vadd.f32 %v9526_v42, %v15512_v61  ;;  %v10181_v61 = vld [vmem:[#allocation9 + $0xef8] sm:$0xff]  ;;  %v10339_v42 = vld [vmem:[#allocation9 + $0xf40] sm:$0xff] }
0x1359   : > { %v9705_v27 = vpop.f32.mrf.mxu0  ;;  %v9783_v47 = vpop.f32.mrf.mxu1 }
0x135a   : > { %v15529_v16 = vadd.f32 %v9705_v27, %v9529_v59  ;;  %9885 = vmatmul.mubr.f32.vlgmr.msra.gmra.mxu1 %v9783_v47  ;;  %v10154_v59 = vld [vmem:[#allocation9 + $0xe20] sm:$0xff]  ;;  %v10338_v27 = vld [vmem:[#allocation9 + $0xf38] sm:$0xff]  ;;  %v10152_v47 = vld [vmem:[#allocation9 + $0xe10] sm:$0xff] }
0x135b   : > { %13209 = vmatpush3.msra.mxu1 %v15385_v63  ;;  %v9707_v15 = vpop.f32.mrf.mxu0  ;;  %13212 = vmatprep.mubr.msk.f32.mxu1 %vm13565_vm3, %v13564_v3  ;;  %v13200_v17 = vpop.f32.mrf.mxu1 }
0x135c   : > { %v15534_v50 = vadd.f32 %v9707_v15, %v9530_v13  ;;  %13210 = vmatprep.subr.mxu1 %v13564_v3  ;;  %v10153_v13 = vld [vmem:[#allocation9 + $0xe18] sm:$0xff]  ;;  %v10337_v15 = vld [vmem:[#allocation9 + $0xf30] sm:$0xff]  ;;  %v10336_v17 = vld [vmem:[#allocation9 + $0xf28] sm:$0xff] }
0x135d   : > { %13211 = vmatpush3.msra.mxu1 %v15387_v1  ;;  %v9964_v54 = vpop.f32.mrf.mxu0 }
0x135e   : > { %10066 = vmatmul.mubr.f32.vlgmr.msra.gmra.mxu0 %v9964_v54  ;;  %13213 = vmatmul.mubr.msk.f32.vlgmr.msra.gmra.mxu1 %vm7546_vm4, %v10075_v20  ;;  %v10151_v20 = vld [vmem:[#allocation9 + $0xe08] sm:$0xff]  ;;  %v10150_v54 = vld [vmem:[#allocation9 + $0xe00] sm:$0xff] }
0x135f   : > { %13216 = vmatpush3.msra.mxu0 %v15385_v63  ;;  %13219 = vmatprep.mubr.msk.f32.mxu0 %vm13565_vm3, %v13564_v3  ;;  %v13207_v21 = vpop.f32.mrf.mxu0  ;;  %v10176_v63 = vld [vmem:[#allocation9 + $0xed0] sm:$0xff] }
0x1360   : > { %13217 = vmatprep.subr.mxu0 %v13564_v3  ;;  %10182 = vmatprep.subr.mxu1 %v10181_v61  ;;  %v10335_v61 = vld [vmem:[#allocation9 + $0xf20] sm:$0xff] }
0x1361   : > { %13218 = vmatpush3.msra.mxu0 %v15387_v1  ;;  %10183 = vmatpush1.msra.mxu1 %v10180_v26  ;;  %v10357_v1 = vld [vmem:[#allocation9 + $0xfd0] sm:$0xff]  ;;  %v10331_v21 = vld [vmem:[#allocation9 + $0xf00] sm:$0xff] }
0x1362   : > { %13220 = vmatmul.mubr.msk.f32.vlgmr.msra.gmra.mxu0 %vm7546_vm4, %v10256_v30  ;;  %10184 = vmatprep.subr.mxu1 %v10179_v53  ;;  %v10333_v26 = vld [vmem:[#allocation9 + $0xf10] sm:$0xff]  ;;  %v10332_v30 = vld [vmem:[#allocation9 + $0xf08] sm:$0xff] }
0x1363   : > { %10185 = vmatpush1.msra.mxu1 %v10178_v19  ;;  %10363 = vmatprep.subr.mxu0 %v10362_v33 }
0x1364   : > { %10186 = vmatprep.subr.mxu1 %v10177_v14  ;;  %10364 = vmatpush1.msra.mxu0 %v10361_v32 }
0x1365   : > { %10187 = vmatpush1.msra.mxu1 %v10176_v63  ;;  %10365 = vmatprep.subr.mxu0 %v10360_v48 }
0x1366   : > { %10188 = vmatprep.subr.mxu1 %v10175_v38  ;;  %10366 = vmatpush1.msra.mxu0 %v10359_v39 }
0x1367   : > { %10189 = vmatpush1.msra.mxu1 %v10174_v35  ;;  %10367 = vmatprep.subr.mxu0 %v10358_v28 }
0x1368   : > { %10190 = vmatprep.subr.mxu1 %v10173_v52  ;;  %10368 = vmatpush1.msra.mxu0 %v10357_v1 }
0x1369   : > { %10191 = vmatpush1.msra.mxu1 %v10172_v34  ;;  %10369 = vmatprep.subr.mxu0 %v10356_v49 }
0x136a   : > { %10192 = vmatprep.subr.mxu1 %v10171_v57  ;;  %10370 = vmatpush1.msra.mxu0 %v10355_v43 }
0x136b   : > { %10193 = vmatpush1.msra.mxu1 %v10170_v44  ;;  %10371 = vmatprep.subr.mxu0 %v10354_v2 }
0x136c   : > { %10194 = vmatprep.subr.mxu1 %v10169_v41  ;;  %10372 = vmatpush1.msra.mxu0 %v10353_v9 }
0x136d   : > { %10195 = vmatpush1.msra.mxu1 %v10168_v46  ;;  %10373 = vmatprep.subr.mxu0 %v10352_v8 }
0x136e   : > { %10196 = vmatprep.subr.mxu1 %v10167_v60  ;;  %10374 = vmatpush1.msra.mxu0 %v10351_v12 }
0x136f   : > { %10197 = vmatpush1.msra.mxu1 %v10166_v11  ;;  %10375 = vmatprep.subr.mxu0 %v10350_v37 }
0x1370   : > { %10198 = vmatprep.subr.mxu1 %v10165_v40  ;;  %10376 = vmatpush1.msra.mxu0 %v10349_v62 }
0x1371   : > { %10199 = vmatpush1.msra.mxu1 %v10164_v6  ;;  %10377 = vmatprep.subr.mxu0 %v10348_v22 }
0x1372   : > { %10200 = vmatprep.subr.mxu1 %v10163_v23  ;;  %10378 = vmatpush1.msra.mxu0 %v10347_v36 }
0x1373   : > { %10201 = vmatpush1.msra.mxu1 %v10162_v45  ;;  %10379 = vmatprep.subr.mxu0 %v10346_v56 }
0x1374   : > { %10202 = vmatprep.subr.mxu1 %v10161_v24  ;;  %10380 = vmatpush1.msra.mxu0 %v10345_v25 }
0x1375   : > { %10203 = vmatpush1.msra.mxu1 %v10160_v55  ;;  %10381 = vmatprep.subr.mxu0 %v10344_v58 }
0x1376   : > { %10204 = vmatprep.subr.mxu1 %v10159_v18  ;;  %10382 = vmatpush1.msra.mxu0 %v10343_v5 }
0x1377   : > { %10205 = vmatpush1.msra.mxu1 %v10158_v4  ;;  %10383 = vmatprep.subr.mxu0 %v10342_v7 }
0x1378   : > { %10206 = vmatprep.subr.mxu1 %v10157_v0  ;;  %10384 = vmatpush1.msra.mxu0 %v10341_v51 }
0x1379   : > { %10207 = vmatpush1.msra.mxu1 %v10156_v10  ;;  %10385 = vmatprep.subr.mxu0 %v10340_v29 }
0x137a   : > { %10208 = vmatprep.subr.mxu1 %v10155_v31  ;;  %10246 = vmatprep.mubr.f32.mxu1 %v13564_v3 }
0x137b   : > { %10427 = vmatprep.mubr.f32.mxu0 %v13564_v3  ;;  %10209 = vmatpush1.msra.mxu1 %v10154_v59  ;;  %v10334_v3 = vld [vmem:[#allocation9 + $0xf18] sm:$0xff] }
0x137c   : > { %10386 = vmatpush1.msra.mxu0 %v10339_v42  ;;  %10210 = vmatprep.subr.mxu1 %v10153_v13 }
0x137d   : > { %10387 = vmatprep.subr.mxu0 %v10338_v27  ;;  %10211 = vmatpush1.msra.mxu1 %v10152_v47 }
0x137e   : > { %10388 = vmatpush1.msra.mxu0 %v10337_v15  ;;  %10212 = vmatprep.subr.mxu1 %v10151_v20 }
0x137f   : > { %10389 = vmatprep.subr.mxu0 %v10336_v17  ;;  %10213 = vmatpush1.msra.mxu1 %v10150_v54 }
0x1380   : > { %10390 = vmatpush1.msra.mxu0 %v10335_v61  ;;  %v10482_v61 = vld [vmem:[#allocation10] sm:$0xff] }
0x1381   : > { %10391 = vmatprep.subr.mxu0 %v10334_v3 }
0x1382   : > { %10392 = vmatpush1.msra.mxu0 %v10333_v26 }
0x1383   : > { %10393 = vmatprep.subr.mxu0 %v10332_v30 }
0x1384   : > { %10394 = vmatpush1.msra.mxu0 %v10331_v21 }
0x141a   : > { %v9886_v53 = vpop.f32.mrf.mxu1 }
0x141b   : > { %v9891_v19 = vadd.f32 %v9886_v53, %v15529_v16  ;;  %v10484_v53 = vcombine.high %v10482_v61, %v10482_v61 }
0x141c   : > { %v9888_v33 = vpop.f32.mrf.mxu1 }
0x141d   : > { %v9892_v14 = vadd.f32 %v9888_v33, %v15534_v50 }
0x141e   : > { %v10067_v32 = vpop.f32.mrf.mxu0  ;;  %v10145_v63 = vpop.f32.mrf.mxu1 }
0x141f   : > { %v10072_v48 = vadd.f32 %v10067_v32, %v9891_v19  ;;  %10247 = vmatmul.mubr.f32.vlgmr.msra.gmra.mxu1 %v10145_v63 }
0x1420   : > { %v10069_v38 = vpop.f32.mrf.mxu0  ;;  %v13214_v39 = vpop.f32.mrf.mxu1 }
0x1421   : > { %v10073_v35 = vadd.f32 %v10069_v38, %v9892_v14 }
0x1422   : > { %v10326_v28 = vpop.f32.mrf.mxu0 }
0x1423   : > { %10428 = vmatmul.mubr.f32.vlgmr.msra.gmra.mxu0 %v10326_v28 }
0x1424   : > { %v13221_v52 = vpop.f32.mrf.mxu0 }
0x14df   : > { %v10248_v1 = vpop.f32.mrf.mxu1 }
0x14e0   : > { %v10253_v49 = vadd.f32 %v10248_v1, %v10072_v48 }
0x14e1   : > { %v10250_v34 = vpop.f32.mrf.mxu1 }
0x14e2   : > { %v10254_v43 = vadd.f32 %v10250_v34, %v10073_v35 }
0x14e3   : > { %v10429_v57 = vpop.f32.mrf.mxu0 }
0x14e4   : > { %v10434_v16 = vadd.f32 %v10429_v57, %v10253_v49 }
0x14e5   : > { %v10431_v44 = vpop.f32.mrf.mxu0 }
0x14e6   : > { %v10437_v50 = vsel %vm10436_vm5, %v10434_v16, 0.0  ;;  %v10435_v2 = vadd.f32 %v10431_v44, %v10254_v43 }
0x14e7   : > { %v10438_v41 = vrot.slane %v10437_v50, 4 }
0x14e8   : > { %v10444_v9 = vsel %vm10436_vm5, %v10435_v2, 0.0 }
0x14e9   : > { %v10439_v46 = vadd.f32 %v10438_v41, %v10437_v50  ;;  %v10445_v8 = vrot.slane %v10444_v9, 4 }
0x14eb   : > { %v10440_v60 = vrot.slane %v10439_v46, 2  ;;  %v10446_v12 = vadd.f32 %v10445_v8, %v10444_v9 }
0x14ed   : > { %v10441_v11 = vadd.f32 %v10440_v60, %v10439_v46  ;;  %v10447_v37 = vrot.slane %v10446_v12, 2 }
0x14ef   : > { %v10442_v40 = vrot.slane %v10441_v11, 1  ;;  %v10448_v62 = vadd.f32 %v10447_v37, %v10446_v12 }
0x14f1   : > { %v10443_v6 = vadd.f32 %v10442_v40, %v10441_v11  ;;  %v10449_v22 = vrot.slane %v10448_v62, 1 }
0x14f3   : > { %v10452_v23 = vmul.f32 0.25, %v10443_v6  ;;  %v10450_v36 = vadd.f32 %v10449_v22, %v10448_v62 }
0x14f5   : > { %v10454_v45 = vsub.f32 %v10434_v16, %v10452_v23  ;;  %v10453_v56 = vmul.f32 0.25, %v10450_v36 }
0x14f7   : > { %v10456_v24 = vmul.f32 %v10454_v45, %v10454_v45  ;;  %v10455_v25 = vsub.f32 %v10435_v2, %v10453_v56 }
0x14f9   : > { %v10458_v55 = vsel %vm10436_vm5, %v10456_v24, 0.0  ;;  %v10457_v58 = vmul.f32 %v10455_v25, %v10455_v25 }
0x14fa   : > { %v10459_v18 = vrot.slane %v10458_v55, 4 }
0x14fb   : > { %v10465_v5 = vsel %vm10436_vm5, %v10457_v58, 0.0 }
0x14fc   : > { %v10460_v4 = vadd.f32 %v10459_v18, %v10458_v55  ;;  %v10466_v7 = vrot.slane %v10465_v5, 4 }
0x14fe   : > { %v10461_v0 = vrot.slane %v10460_v4, 2  ;;  %v10467_v51 = vadd.f32 %v10466_v7, %v10465_v5 }
0x1500   : > { %v10462_v10 = vadd.f32 %v10461_v0, %v10460_v4  ;;  %v10468_v29 = vrot.slane %v10467_v51, 2 }
0x1502   : > { %v10463_v31 = vrot.slane %v10462_v10, 1  ;;  %v10469_v59 = vadd.f32 %v10468_v29, %v10467_v51 }
0x1504   : > { %v10464_v42 = vadd.f32 %v10463_v31, %v10462_v10  ;;  %v10470_v13 = vrot.slane %v10469_v59, 1 }
0x1506   : > { %v10472_v27 = vmul.f32 0.25, %v10464_v42  ;;  %v10471_v47 = vadd.f32 %v10470_v13, %v10469_v59 }
0x1508   : > { %v10474_v15 = vadd.f32 1e-05, %v10472_v27  ;;  %v10473_v20 = vmul.f32 0.25, %v10471_v47 }
0x150a   : > { %13304 = vrsqrt.f32 %v10474_v15  ;;  %v10475_v17 = vadd.f32 1e-05, %v10473_v20 }
0x150c   : > { %13306 = vrsqrt.f32 %v10475_v17 }
0x1517   : > { %v13305_v54 = vpop.eup %13304 }
0x1518   : > { %v10478_v3 = vmul.f32 %v13305_v54, %v10454_v45 }
0x1519   : > { %v13307_v26 = vpop.eup %13306 }
0x151a   : > { %v10479_v30 = vmul.f32 %v13307_v26, %v10455_v25  ;;  %v10480_v21 = vmax.f32 %v10478_v3, 0.0 }
0x151c   : > { %v10481_v19 = vmax.f32 %v10479_v30, 0.0  ;;  %v10486_v33 = vmul.f32 %v10482_v61, %v10480_v21 }
0x151e   : > { %v10487_v14 = vmul.f32 %v10484_v53, %v10481_v19  ;;  %v10488_v32 = vsel %vm10436_vm5, %v10486_v33, 0.0 }
0x1520   : > { %v10489_v63 = vsel %vm10436_vm5, %v10487_v14, 0.0 }
0x1521   : > { %v10490_v48 = vadd.f32 %v10489_v63, %v10488_v32 }
0x1523   : > { %10491 = vadd.xlane.f32.xlu0 %v10490_v48 }
0x15ac   : > { %v10492_v38 = vpop.xlane.xlu0 %10491 }
0x15ad   : > { %v10493_v39 = vsel %vm10436_vm5, %v10492_v38, 0.0 }
0x15ae   : > { %v10494_v35 = vrot.slane %v10493_v39, 4 }
0x15b0   : > { %v10495_v28 = vadd.f32 %v10494_v35, %v10493_v39 }
0x15b2   : > { %v10496_v52 = vrot.slane %v10495_v28, 2 }
0x15b4   : > { %v10497_v1 = vadd.f32 %v10496_v52, %v10495_v28 }
0x15b6   : > { %v10498_v34 = vrot.slane %v10497_v1, 1 }
0x15b8   : > { %v10499_v49 = vadd.f32 %v10498_v34, %v10497_v1 }
0x15ba   : > { %10501 = vst.msk [vmem:[%s387_s10] sm:$0x1] %vm10500_vm6, %v10499_v49 }
0x15bb PF: > { %s22_s27 = sadd.s32 1, %s13550_s27  }
0x15bc   : > { %p19_p2 = scmp.ge.s32.totalorder %s22_s27, 4  }
0x15be   :  { %21 = sbr.rel (!%p19_p2) target bundleno = 4 (0x4), region = 197 }
0x15c3   :  { %10519 = vsyncpa [#allocation3], 1 }
0x15c4   :  { %10521 = vsyncpa [#allocation3 + $0x1], 1 }
0x15c5   :  { %10522 = vsyncpa [#allocation5], 1 }
0x15c6   :  { %10523 = vsyncpa [#allocation8], 1 }
0x15c7   :  { %10524 = vsyncpa [#allocation11], 1 }

</bundles_post_ra>
